<compile_context>
chip_gen: v7x
topology: tpu7x:2x2x1
jax: 0.10.0
libtpu: 0.0.40
codegen_flags: <defaults>
</compile_context>

<pallas_src>
import functools
import math

import jax
import jax.numpy as jnp
from jax.experimental import pallas as pl
from jax.experimental.pallas import tpu as pltpu

ABIT_INTER = 2
_QLEVELS = float(2 ** ABIT_INTER - 1)
_INV_SQRT2 = 1.0 / math.sqrt(2.0)
_BN_EPS = 1e-5
_LANE = 128          # lane padding unit / scratch halo width


# ----------------------------- in-kernel math ------------------------------ #
def _erf(x):
    # Abramowitz & Stegun 7.1.26; reciprocal + exp on the EUP slot.
    a1, a2, a3, a4, a5 = (0.254829592, -0.284496736, 1.421413741,
                          -1.453152027, 1.061405429)
    p = 0.3275911
    s = jnp.where(x >= 0.0, 1.0, -1.0)
    z = jnp.abs(x)
    t = pl.reciprocal(1.0 + p * z, approx=True)
    poly = t * (a1 + t * (a2 + t * (a3 + t * (a4 + t * a5))))
    return s * (1.0 - poly * jnp.exp(-z * z))


def _gelu(y):
    return 0.5 * y * (1.0 + _erf(y * _INV_SQRT2))


def _quant(y):
    # DoReFa-style 2-bit activation quantizer (activation_quantize_fn2).
    y = jnp.clip(y, 0.0, 1.0)
    return jnp.floor(y * _QLEVELS + 0.5) * (1.0 / _QLEVELS)


# ------------------------------ Pallas kernel ------------------------------ #
def _fused_forward_kernel(pat_ref, mask_ref,
                          w1c_ref, b1c_ref, w2c_ref, b2c_ref,
                          w1f_ref, b1f_ref, w2f_ref, b2f_ref,
                          o_ref, cat_scr, *, wp):
    """Whole multihead block on one lane-dense tile.

    pat  : (336, ML)        bf16  im2col patches of x for the 3 heads
                                  (lanes = n*Hp*Wp + hp*Wp + wp, halo layout)
    mask : (1, ML)          f32   1.0 at real output lanes, 0.0 at halo/tail
    w1c  : (96, 336)        bf16  block-diag head conv1, bn1 scale folded
    b1c  : (96, 1)          f32
    w2c  : (16, 96)         bf16  block-diag head conv2 (1x1), bn2 folded,
                                  output channels padded 12 -> 16
    b2c  : (16, 1)          f32
    w1f  : (9, 96, 16)      bf16  fusion conv1 split per 3x3 offset, bn1 folded
    b1f  : (96, 1)          f32
    w2f  : (8, 96)          bf16  fusion conv2 (1x1), bn2 folded
    b2f  : (8, 1)           f32
    out  : (8, ML)          f32
    scr  : (16, ML+2*128)   f32   lane-halo-padded cat map scratch
    """
    ml = o_ref.shape[1]
    off = (cat_scr.shape[1] - ml) // 2

    # ---------- stage 1: the three Block_resnet heads (block-diagonal) ------
    mid = jnp.dot(w1c_ref[...], pat_ref[...], preferred_element_type=jnp.float32)
    mid = _gelu(mid + b1c_ref[...])                          # gelu(bn1(conv1(x)))
    cat = jnp.dot(w2c_ref[...], mid.astype(jnp.bfloat16),
                  preferred_element_type=jnp.float32)
    cat = _quant(cat + b2c_ref[...]) * mask_ref[...]         # act(bn2(conv2)), halo zeroed

    # ---------- stage 2: fusion head (Block_convf, last=True) ---------------
    # In-kernel 3x3/pad=1 im2col: the cat map lives in a zero-padded VMEM
    # scratch; each of the 9 kernel offsets is a static lane-shifted read.
    cat_scr[...] = jnp.zeros_like(cat_scr)
    cat_scr[:, off:off + ml] = cat

    acc = None
    for o in range(9):
        di, dj = o // 3, o % 3
        s = (di - 1) * wp + (dj - 1)                         # lane shift of this tap
        shifted = cat_scr[:, off + s:off + s + ml].astype(jnp.bfloat16)
        d = jnp.dot(w1f_ref[o], shifted, preferred_element_type=jnp.float32)
        acc = d if acc is None else acc + d
    midf = _gelu(acc + b1f_ref[...])                         # gelu(bn1(conv1(cat)))
    outf = jnp.dot(w2f_ref[...], midf.astype(jnp.bfloat16),
                   preferred_element_type=jnp.float32)
    o_ref[...] = _gelu(outf + b2f_ref[...]).astype(o_ref.dtype)   # gelu(bn2(conv2))


def fused_forward_call(pat, mask, params, *, wp):
    c_out = params["W2f"].shape[0]
    c_cat = params["W2c"].shape[0]
    ml = pat.shape[1]
    kernel = functools.partial(_fused_forward_kernel, wp=wp)
    return pl.pallas_call(
        kernel,
        out_shape=jax.ShapeDtypeStruct((c_out, ml), jnp.float32),
        scratch_shapes=[pltpu.VMEM((c_cat, ml + 2 * _LANE), jnp.float32)],
    )(pat, mask,
      params["W1c"], params["b1c"], params["W2c"], params["b2c"],
      params["W1f"], params["b1f"], params["W2f"], params["b2f"])


# ------------------------------- JAX glue ---------------------------------- #
def im2col_cm(x_cnhw, k, padding, stride=1):
    """x: (C, N, H, W) channel-major -> (C*k*k, N, Ho, Wo) patch tensor.

    Feature rows ordered (c, kh, kw), matching _grouped_dense_T columns."""
    C, N, H, W = x_cnhw.shape
    xp = jnp.pad(x_cnhw, ((0, 0), (0, 0), (padding, padding), (padding, padding)))
    Ho = (H + 2 * padding - k) // stride + 1
    Wo = (W + 2 * padding - k) // stride + 1
    slabs = []
    for di in range(k):
        for dj in range(k):
            slabs.append(xp[:, :, di:di + stride * Ho:stride, dj:dj + stride * Wo:stride])
    pat = jnp.stack(slabs, axis=1).reshape(C * k * k, N, Ho, Wo)
    return pat, Ho, Wo


def _bn_fold(key, c):
    k1, k2, k3, k4 = jax.random.split(key, 4)
    gamma = 0.5 + jax.random.uniform(k1, (c,), jnp.float32)
    beta = 0.1 * jax.random.normal(k2, (c,), jnp.float32)
    rmean = 0.1 * jax.random.normal(k3, (c,), jnp.float32)
    rvar = 0.5 + jax.random.uniform(k4, (c,), jnp.float32)
    scale = gamma / jnp.sqrt(rvar + _BN_EPS)
    bias = beta - rmean * scale
    return scale, bias


def _grouped_dense_T(w, groups):
    """torch weight (C_out, C_in//groups, kh, kw) -> dense (C_out, C_in*kh*kw)
    block matrix with exact grouped-conv semantics; columns ordered (c, kh, kw)."""
    c_out, cin_g, kh, kw = w.shape
    cout_g = c_out // groups
    dense = jnp.zeros((c_out, cin_g * groups * kh * kw), jnp.float32)
    for g in range(groups):
        blk = w[g * cout_g:(g + 1) * cout_g].reshape(cout_g, cin_g * kh * kw)
        dense = dense.at[g * cout_g:(g + 1) * cout_g,
                         g * cin_g * kh * kw:(g + 1) * cin_g * kh * kw].set(blk)
    return dense


def _init_block(key, in_planes, out_planes, k, groupsici, t=8):
    """Synthetic Block_resnet_BN params, BN scales pre-folded into the weights."""
    mid = t * in_planes
    k1, k2, k3, k4 = jax.random.split(key, 4)
    w1 = 0.1 * jax.random.normal(k1, (mid, in_planes // groupsici, k, k), jnp.float32)
    w2 = 0.1 * jax.random.normal(k2, (out_planes, mid // groupsici, 1, 1), jnp.float32)
    s1, b1 = _bn_fold(k3, mid)
    s2, b2 = _bn_fold(k4, out_planes)
    W1 = _grouped_dense_T(w1, groupsici) * s1[:, None]   # fold bn1 scale (exact)
    W2 = _grouped_dense_T(w2, groupsici) * s2[:, None]   # fold bn2 scale (exact)
    return dict(W1=W1, b1=b1, W2=W2, b2=b2)


def _block_diag(mats):
    rows = sum(m.shape[0] for m in mats)
    cols = sum(m.shape[1] for m in mats)
    out = jnp.zeros((rows, cols), jnp.float32)
    r = c = 0
    for m in mats:
        out = out.at[r:r + m.shape[0], c:c + m.shape[1]].set(m)
        r += m.shape[0]
        c += m.shape[1]
    return out


def build_params(key, in_planes, out_planes):
    cpt = 3
    kb1, kb2, kb3, kbf = jax.random.split(key, 4)

    # The three heads: k=8/4/2, padding=3/1/0, groupsici = in/1, in/2, in/4.
    blk1 = _init_block(kb1, in_planes, in_planes, 8, in_planes // 1)
    blk2 = _init_block(kb2, in_planes, in_planes, 4, in_planes // 2)
    blk3 = _init_block(kb3, in_planes, in_planes, 2, in_planes // 4)

    # One block-diagonal double matmul -> the concatenated (out1,out2,out3) map.
    W1c = _block_diag([blk1["W1"], blk2["W1"], blk3["W1"]]).astype(jnp.bfloat16)
    b1c = jnp.concatenate([blk1["b1"], blk2["b1"], blk3["b1"]])
    W2c = _block_diag([blk1["W2"], blk2["W2"], blk3["W2"]])
    b2c = jnp.concatenate([blk1["b2"], blk2["b2"], blk3["b2"]])

    # Pad cat channels 12 -> 16 so every tile on the intermediate is exact.
    c_cat = cpt * in_planes
    c_cat_p = ((c_cat + 15) // 16) * 16
    W2c = jnp.pad(W2c, ((0, c_cat_p - c_cat), (0, 0))).astype(jnp.bfloat16)
    b2c = jnp.pad(b2c, (0, c_cat_p - c_cat))

    # Fusion head (Block_convf, last=True): k=3, padding=1, groups = cpt*in/6.
    cin_f = cpt * in_planes
    blkf = _init_block(kbf, cin_f, out_planes, 3, cin_f // 6)
    # The view/transpose/view channel interleave of the reference becomes a
    # static permutation of the fusion conv1 input-channel column blocks.
    kk = 9
    perm = []
    for q in range(cin_f):                                   # concat-order channel
        p_int = (q // in_planes) + cpt * (q % in_planes)     # interleaved position
        perm.extend(range(p_int * kk, (p_int + 1) * kk))
    W1f = blkf["W1"][:, jnp.asarray(perm)]                   # (96, 108), cols (q, di, dj)
    mid_f = W1f.shape[0]
    # Split into the 9 per-offset (mid_f, c_cat) blocks (K=16 after padding);
    # the in-kernel 3x3 im2col then only needs 9 lane-shifted reads.
    W1f = jnp.transpose(W1f.reshape(mid_f, cin_f, kk), (2, 0, 1))   # (9, 96, 12)
    W1f = jnp.pad(W1f, ((0, 0), (0, 0), (0, c_cat_p - cin_f))).astype(jnp.bfloat16)
    W2f = blkf["W2"].astype(jnp.bfloat16)

    return dict(W1c=W1c, b1c=b1c.reshape(-1, 1),
                W2c=W2c, b2c=b2c.reshape(-1, 1),
                W1f=W1f, b1f=blkf["b1"].reshape(-1, 1),
                W2f=W2f, b2f=blkf["b2"].reshape(-1, 1))


def multihead_forward(x_nchw, params):
    N = x_nchw.shape[0]
    x_cm = jnp.transpose(x_nchw, (1, 0, 2, 3)).astype(jnp.bfloat16)   # (C, N, H, W)

    # im2col for the three heads (all land on the same (N, 15, 15) grid).
    p1, Ho, Wo = im2col_cm(x_cm, 8, 3)
    p2, Ho2, Wo2 = im2col_cm(x_cm, 4, 1)
    p3, Ho3, Wo3 = im2col_cm(x_cm, 2, 0)
    assert (Ho, Wo) == (Ho2, Wo2) == (Ho3, Wo3)

    # Lane layout with a 1-pixel halo per image: lane = n*Hp*Wp + hp*Wp + wp.
    # This makes the fusion head's 3x3/pad=1 im2col a set of pure static lane
    # shifts inside the kernel (no cross-image contamination, zeros at pads).
    Hp, Wp = Ho + 2, Wo + 2
    pat = jnp.concatenate([p1, p2, p3], axis=0)                       # (336, N, Ho, Wo)
    pat = jnp.pad(pat, ((0, 0), (0, 0), (1, 1), (1, 1)))              # (336, N, Hp, Wp)
    Mt = N * Hp * Wp
    ML = ((Mt + _LANE - 1) // _LANE) * _LANE
    pat = jnp.pad(pat.reshape(-1, Mt), ((0, 0), (0, ML - Mt)))        # (336, ML) bf16

    # Lane-validity mask (1.0 at real output positions, 0.0 at halo / tail).
    row_ok = (jnp.arange(Hp) >= 1) & (jnp.arange(Hp) <= Ho)
    col_ok = (jnp.arange(Wp) >= 1) & (jnp.arange(Wp) <= Wo)
    m_img = (row_ok[:, None] & col_ok[None, :]).astype(jnp.float32).reshape(-1)
    mask = jnp.pad(jnp.tile(m_img, (N,)), (0, ML - Mt)).reshape(1, ML)

    # Single fused kernel: 3 heads + interleave + fusion head, all in VMEM.
    out_p = fused_forward_call(pat, mask, params, wp=Wp)              # (c_out, ML) f32

    c_out = out_p.shape[0]
    out = out_p[:, :Mt].reshape(c_out, N, Hp, Wp)[:, :, 1:1 + Ho, 1:1 + Wo]
    return jnp.transpose(out, (1, 0, 2, 3))                           # (N, c_out, Ho, Wo)


# --------------------------------- main ------------------------------------ #
if __name__ == "__main__":
    key = jax.random.PRNGKey(0)
    kx, kp = jax.random.split(key)

    in_planes, out_planes = 4, 8
    x = jax.random.normal(kx, (2, in_planes, 16, 16), jnp.float32)
    params = build_params(kp, in_planes, out_planes)

    fwd = jax.jit(multihead_forward)
    out = fwd(x, params)
    jax.block_until_ready(out)

    assert out.shape == (2, out_planes, 15, 15), out.shape
    assert bool(jnp.all(jnp.isfinite(out)))
    print("KERNEL_OK")
</pallas_src>

<mosaic_0001>
module attributes {stable_mosaic.version = 11 : i64} {
  func.func @_fused_forward_kernel(%arg0: memref<336x640xbf16, #tpu.memory_space<vmem>>, %arg1: memref<1x640xf32, #tpu.memory_space<vmem>>, %arg2: memref<96x336xbf16, #tpu.memory_space<vmem>>, %arg3: memref<96x1xf32, #tpu.memory_space<vmem>>, %arg4: memref<16x96xbf16, #tpu.memory_space<vmem>>, %arg5: memref<16x1xf32, #tpu.memory_space<vmem>>, %arg6: memref<9x96x16xbf16, #tpu.memory_space<vmem>>, %arg7: memref<96x1xf32, #tpu.memory_space<vmem>>, %arg8: memref<8x96xbf16, #tpu.memory_space<vmem>>, %arg9: memref<8x1xf32, #tpu.memory_space<vmem>>, %arg10: memref<8x640xf32, #tpu.memory_space<vmem>>, %arg11: memref<16x896xf32, #tpu.memory_space<vmem>>) attributes {dimension_semantics = [], scalar_prefetch = 0 : i64, scratch_operands = 1 : i64, tpu.core_type = #tpu.core_type<tc>} {
    %c0 = arith.constant 0 : index
    %c0_0 = arith.constant 0 : index
    %0 = vector.load %arg2[%c0, %c0_0] : memref<96x336xbf16, #tpu.memory_space<vmem>>, vector<96x336xbf16>
    %c0_1 = arith.constant 0 : index
    %c0_2 = arith.constant 0 : index
    %1 = vector.load %arg0[%c0_1, %c0_2] : memref<336x640xbf16, #tpu.memory_space<vmem>>, vector<336x640xbf16>
    %cst = arith.constant dense<0.000000e+00> : vector<96x640xf32>
    %2 = tpu.matmul %0, %1, %cst {dimension_numbers = #tpu.dot_dimension_numbers<[1], [0], [0], [1], [0, 0, 1, 1], [], []>} : vector<96x336xbf16>, vector<336x640xbf16>, vector<96x640xf32> -> vector<96x640xf32>
    %c0_3 = arith.constant 0 : index
    %c0_4 = arith.constant 0 : index
    %3 = vector.load %arg3[%c0_3, %c0_4] : memref<96x1xf32, #tpu.memory_space<vmem>>, vector<96x1xf32>
    %4 = vector.broadcast %3 : vector<96x1xf32> to vector<96x640xf32>
    %5 = arith.addf %2, %4 : vector<96x640xf32>
    %cst_5 = arith.constant 5.000000e-01 : f32
    %6 = vector.broadcast %cst_5 : f32 to vector<96x640xf32>
    %7 = arith.mulf %6, %5 : vector<96x640xf32>
    %cst_6 = arith.constant 0.707106769 : f32
    %8 = vector.broadcast %cst_6 : f32 to vector<96x640xf32>
    %9 = arith.mulf %5, %8 : vector<96x640xf32>
    %cst_7 = arith.constant 0.000000e+00 : f32
    %10 = vector.broadcast %cst_7 : f32 to vector<96x640xf32>
    %11 = arith.cmpf oge, %9, %10 : vector<96x640xf32>
    %cst_8 = arith.constant 1.000000e+00 : f32
    %cst_9 = arith.constant -1.000000e+00 : f32
    %12 = vector.broadcast %cst_8 : f32 to vector<96x640xf32>
    %13 = vector.broadcast %cst_9 : f32 to vector<96x640xf32>
    %14 = arith.select %11, %12, %13 : vector<96x640xi1>, vector<96x640xf32>
    %15 = math.absf %9 : vector<96x640xf32>
    %cst_10 = arith.constant 0.327591091 : f32
    %16 = vector.broadcast %cst_10 : f32 to vector<96x640xf32>
    %17 = arith.mulf %16, %15 : vector<96x640xf32>
    %cst_11 = arith.constant 1.000000e+00 : f32
    %18 = vector.broadcast %cst_11 : f32 to vector<96x640xf32>
    %19 = arith.addf %18, %17 : vector<96x640xf32>
    %20 = tpu.reciprocal %19 {approx = true} : vector<96x640xf32> -> vector<96x640xf32>
    %cst_12 = arith.constant 1.06140542 : f32
    %21 = vector.broadcast %cst_12 : f32 to vector<96x640xf32>
    %22 = arith.mulf %20, %21 : vector<96x640xf32>
    %cst_13 = arith.constant -1.45315206 : f32
    %23 = vector.broadcast %cst_13 : f32 to vector<96x640xf32>
    %24 = arith.addf %23, %22 : vector<96x640xf32>
    %25 = arith.mulf %20, %24 : vector<96x640xf32>
    %cst_14 = arith.constant 1.42141378 : f32
    %26 = vector.broadcast %cst_14 : f32 to vector<96x640xf32>
    %27 = arith.addf %26, %25 : vector<96x640xf32>
    %28 = arith.mulf %20, %27 : vector<96x640xf32>
    %cst_15 = arith.constant -0.284496725 : f32
    %29 = vector.broadcast %cst_15 : f32 to vector<96x640xf32>
    %30 = arith.addf %29, %28 : vector<96x640xf32>
    %31 = arith.mulf %20, %30 : vector<96x640xf32>
    %cst_16 = arith.constant 0.254829586 : f32
    %32 = vector.broadcast %cst_16 : f32 to vector<96x640xf32>
    %33 = arith.addf %32, %31 : vector<96x640xf32>
    %34 = arith.mulf %20, %33 : vector<96x640xf32>
    %cst_17 = arith.constant 0.000000e+00 : f32
    %35 = vector.broadcast %cst_17 : f32 to vector<96x640xf32>
    %36 = arith.subf %35, %15 : vector<96x640xf32>
    %37 = arith.mulf %36, %15 : vector<96x640xf32>
    %38 = math.exp %37 : vector<96x640xf32>
    %39 = arith.mulf %34, %38 : vector<96x640xf32>
    %cst_18 = arith.constant 1.000000e+00 : f32
    %40 = vector.broadcast %cst_18 : f32 to vector<96x640xf32>
    %41 = arith.subf %40, %39 : vector<96x640xf32>
    %42 = arith.mulf %14, %41 : vector<96x640xf32>
    %cst_19 = arith.constant 1.000000e+00 : f32
    %43 = vector.broadcast %cst_19 : f32 to vector<96x640xf32>
    %44 = arith.addf %43, %42 : vector<96x640xf32>
    %45 = arith.mulf %7, %44 : vector<96x640xf32>
    %c0_20 = arith.constant 0 : index
    %c0_21 = arith.constant 0 : index
    %46 = vector.load %arg4[%c0_20, %c0_21] : memref<16x96xbf16, #tpu.memory_space<vmem>>, vector<16x96xbf16>
    %47 = arith.truncf %45 : vector<96x640xf32> to vector<96x640xbf16>
    %cst_22 = arith.constant dense<0.000000e+00> : vector<16x640xf32>
    %48 = tpu.matmul %46, %47, %cst_22 {dimension_numbers = #tpu.dot_dimension_numbers<[1], [0], [0], [1], [0, 0, 1, 1], [], []>} : vector<16x96xbf16>, vector<96x640xbf16>, vector<16x640xf32> -> vector<16x640xf32>
    %c0_23 = arith.constant 0 : index
    %c0_24 = arith.constant 0 : index
    %49 = vector.load %arg5[%c0_23, %c0_24] : memref<16x1xf32, #tpu.memory_space<vmem>>, vector<16x1xf32>
    %50 = vector.broadcast %49 : vector<16x1xf32> to vector<16x640xf32>
    %51 = arith.addf %48, %50 : vector<16x640xf32>
    %cst_25 = arith.constant 0.000000e+00 : f32
    %cst_26 = arith.constant 1.000000e+00 : f32
    %52 = vector.broadcast %cst_25 : f32 to vector<16x640xf32>
    %53 = arith.maximumf %52, %51 : vector<16x640xf32>
    %54 = vector.broadcast %cst_26 : f32 to vector<16x640xf32>
    %55 = arith.minimumf %54, %53 : vector<16x640xf32>
    %cst_27 = arith.constant 3.000000e+00 : f32
    %56 = vector.broadcast %cst_27 : f32 to vector<16x640xf32>
    %57 = arith.mulf %55, %56 : vector<16x640xf32>
    %cst_28 = arith.constant 5.000000e-01 : f32
    %58 = vector.broadcast %cst_28 : f32 to vector<16x640xf32>
    %59 = arith.addf %57, %58 : vector<16x640xf32>
    %60 = math.floor %59 : vector<16x640xf32>
    %cst_29 = arith.constant 0.333333343 : f32
    %61 = vector.broadcast %cst_29 : f32 to vector<16x640xf32>
    %62 = arith.mulf %60, %61 : vector<16x640xf32>
    %c0_30 = arith.constant 0 : index
    %c0_31 = arith.constant 0 : index
    %63 = vector.load %arg1[%c0_30, %c0_31] : memref<1x640xf32, #tpu.memory_space<vmem>>, vector<1x640xf32>
    %64 = vector.broadcast %63 : vector<1x640xf32> to vector<16x640xf32>
    %65 = arith.mulf %62, %64 : vector<16x640xf32>
    %cst_32 = arith.constant 0.000000e+00 : f32
    %66 = vector.broadcast %cst_32 : f32 to vector<16x896xf32>
    %c0_33 = arith.constant 0 : index
    %c0_34 = arith.constant 0 : index
    %67 = vector.load %arg11[%c0_33, %c0_34] : memref<16x896xf32, #tpu.memory_space<vmem>>, vector<16x896xf32>
    tpu.vector_store %arg11[%c0_33, %c0_34], %66 {strides = array<i32>} : memref<16x896xf32, #tpu.memory_space<vmem>>, vector<16x896xf32>,
    %c0_35 = arith.constant 0 : index
    %c128 = arith.constant 128 : index
    %68 = vector.load %arg11[%c0_35, %c128] : memref<16x896xf32, #tpu.memory_space<vmem>>, vector<16x640xf32>
    tpu.vector_store %arg11[%c0_35, %c128], %65 {strides = array<i32>} : memref<16x896xf32, #tpu.memory_space<vmem>>, vector<16x640xf32>,
    %c0_36 = arith.constant 0 : index
    %c110 = arith.constant 110 : index
    %69 = vector.load %arg11[%c0_36, %c110] : memref<16x896xf32, #tpu.memory_space<vmem>>, vector<16x640xf32>
    %70 = arith.truncf %69 : vector<16x640xf32> to vector<16x640xbf16>
    %c0_37 = arith.constant 0 : index
    %c0_38 = arith.constant 0 : index
    %c0_39 = arith.constant 0 : index
    %71 = vector.load %arg6[%c0_37, %c0_38, %c0_39] : memref<9x96x16xbf16, #tpu.memory_space<vmem>>, vector<1x96x16xbf16>
    %72 = vector.shape_cast %71 : vector<1x96x16xbf16> to vector<96x16xbf16>
    %cst_40 = arith.constant dense<0.000000e+00> : vector<96x640xf32>
    %73 = tpu.matmul %72, %70, %cst_40 {dimension_numbers = #tpu.dot_dimension_numbers<[1], [0], [0], [1], [0, 0, 1, 1], [], []>} : vector<96x16xbf16>, vector<16x640xbf16>, vector<96x640xf32> -> vector<96x640xf32>
    %c0_41 = arith.constant 0 : index
    %c111 = arith.constant 111 : index
    %74 = vector.load %arg11[%c0_41, %c111] : memref<16x896xf32, #tpu.memory_space<vmem>>, vector<16x640xf32>
    %75 = arith.truncf %74 : vector<16x640xf32> to vector<16x640xbf16>
    %c1 = arith.constant 1 : index
    %c0_42 = arith.constant 0 : index
    %c0_43 = arith.constant 0 : index
    %76 = vector.load %arg6[%c1, %c0_42, %c0_43] : memref<9x96x16xbf16, #tpu.memory_space<vmem>>, vector<1x96x16xbf16>
    %77 = vector.shape_cast %76 : vector<1x96x16xbf16> to vector<96x16xbf16>
    %cst_44 = arith.constant dense<0.000000e+00> : vector<96x640xf32>
    %78 = tpu.matmul %77, %75, %cst_44 {dimension_numbers = #tpu.dot_dimension_numbers<[1], [0], [0], [1], [0, 0, 1, 1], [], []>} : vector<96x16xbf16>, vector<16x640xbf16>, vector<96x640xf32> -> vector<96x640xf32>
    %79 = arith.addf %73, %78 : vector<96x640xf32>
    %c0_45 = arith.constant 0 : index
    %c112 = arith.constant 112 : index
    %80 = vector.load %arg11[%c0_45, %c112] : memref<16x896xf32, #tpu.memory_space<vmem>>, vector<16x640xf32>
    %81 = arith.truncf %80 : vector<16x640xf32> to vector<16x640xbf16>
    %c2 = arith.constant 2 : index
    %c0_46 = arith.constant 0 : index
    %c0_47 = arith.constant 0 : index
    %82 = vector.load %arg6[%c2, %c0_46, %c0_47] : memref<9x96x16xbf16, #tpu.memory_space<vmem>>, vector<1x96x16xbf16>
    %83 = vector.shape_cast %82 : vector<1x96x16xbf16> to vector<96x16xbf16>
    %cst_48 = arith.constant dense<0.000000e+00> : vector<96x640xf32>
    %84 = tpu.matmul %83, %81, %cst_48 {dimension_numbers = #tpu.dot_dimension_numbers<[1], [0], [0], [1], [0, 0, 1, 1], [], []>} : vector<96x16xbf16>, vector<16x640xbf16>, vector<96x640xf32> -> vector<96x640xf32>
    %85 = arith.addf %79, %84 : vector<96x640xf32>
    %c0_49 = arith.constant 0 : index
    %c127 = arith.constant 127 : index
    %86 = vector.load %arg11[%c0_49, %c127] : memref<16x896xf32, #tpu.memory_space<vmem>>, vector<16x640xf32>
    %87 = arith.truncf %86 : vector<16x640xf32> to vector<16x640xbf16>
    %c3 = arith.constant 3 : index
    %c0_50 = arith.constant 0 : index
    %c0_51 = arith.constant 0 : index
    %88 = vector.load %arg6[%c3, %c0_50, %c0_51] : memref<9x96x16xbf16, #tpu.memory_space<vmem>>, vector<1x96x16xbf16>
    %89 = vector.shape_cast %88 : vector<1x96x16xbf16> to vector<96x16xbf16>
    %cst_52 = arith.constant dense<0.000000e+00> : vector<96x640xf32>
    %90 = tpu.matmul %89, %87, %cst_52 {dimension_numbers = #tpu.dot_dimension_numbers<[1], [0], [0], [1], [0, 0, 1, 1], [], []>} : vector<96x16xbf16>, vector<16x640xbf16>, vector<96x640xf32> -> vector<96x640xf32>
    %91 = arith.addf %85, %90 : vector<96x640xf32>
    %c0_53 = arith.constant 0 : index
    %c128_54 = arith.constant 128 : index
    %92 = vector.load %arg11[%c0_53, %c128_54] : memref<16x896xf32, #tpu.memory_space<vmem>>, vector<16x640xf32>
    %93 = arith.truncf %92 : vector<16x640xf32> to vector<16x640xbf16>
    %c4 = arith.constant 4 : index
    %c0_55 = arith.constant 0 : index
    %c0_56 = arith.constant 0 : index
    %94 = vector.load %arg6[%c4, %c0_55, %c0_56] : memref<9x96x16xbf16, #tpu.memory_space<vmem>>, vector<1x96x16xbf16>
    %95 = vector.shape_cast %94 : vector<1x96x16xbf16> to vector<96x16xbf16>
    %cst_57 = arith.constant dense<0.000000e+00> : vector<96x640xf32>
    %96 = tpu.matmul %95, %93, %cst_57 {dimension_numbers = #tpu.dot_dimension_numbers<[1], [0], [0], [1], [0, 0, 1, 1], [], []>} : vector<96x16xbf16>, vector<16x640xbf16>, vector<96x640xf32> -> vector<96x640xf32>
    %97 = arith.addf %91, %96 : vector<96x640xf32>
    %c0_58 = arith.constant 0 : index
    %c129 = arith.constant 129 : index
    %98 = vector.load %arg11[%c0_58, %c129] : memref<16x896xf32, #tpu.memory_space<vmem>>, vector<16x640xf32>
    %99 = arith.truncf %98 : vector<16x640xf32> to vector<16x640xbf16>
    %c5 = arith.constant 5 : index
    %c0_59 = arith.constant 0 : index
    %c0_60 = arith.constant 0 : index
    %100 = vector.load %arg6[%c5, %c0_59, %c0_60] : memref<9x96x16xbf16, #tpu.memory_space<vmem>>, vector<1x96x16xbf16>
    %101 = vector.shape_cast %100 : vector<1x96x16xbf16> to vector<96x16xbf16>
    %cst_61 = arith.constant dense<0.000000e+00> : vector<96x640xf32>
    %102 = tpu.matmul %101, %99, %cst_61 {dimension_numbers = #tpu.dot_dimension_numbers<[1], [0], [0], [1], [0, 0, 1, 1], [], []>} : vector<96x16xbf16>, vector<16x640xbf16>, vector<96x640xf32> -> vector<96x640xf32>
    %103 = arith.addf %97, %102 : vector<96x640xf32>
    %c0_62 = arith.constant 0 : index
    %c144 = arith.constant 144 : index
    %104 = vector.load %arg11[%c0_62, %c144] : memref<16x896xf32, #tpu.memory_space<vmem>>, vector<16x640xf32>
    %105 = arith.truncf %104 : vector<16x640xf32> to vector<16x640xbf16>
    %c6 = arith.constant 6 : index
    %c0_63 = arith.constant 0 : index
    %c0_64 = arith.constant 0 : index
    %106 = vector.load %arg6[%c6, %c0_63, %c0_64] : memref<9x96x16xbf16, #tpu.memory_space<vmem>>, vector<1x96x16xbf16>
    %107 = vector.shape_cast %106 : vector<1x96x16xbf16> to vector<96x16xbf16>
    %cst_65 = arith.constant dense<0.000000e+00> : vector<96x640xf32>
    %108 = tpu.matmul %107, %105, %cst_65 {dimension_numbers = #tpu.dot_dimension_numbers<[1], [0], [0], [1], [0, 0, 1, 1], [], []>} : vector<96x16xbf16>, vector<16x640xbf16>, vector<96x640xf32> -> vector<96x640xf32>
    %109 = arith.addf %103, %108 : vector<96x640xf32>
    %c0_66 = arith.constant 0 : index
    %c145 = arith.constant 145 : index
    %110 = vector.load %arg11[%c0_66, %c145] : memref<16x896xf32, #tpu.memory_space<vmem>>, vector<16x640xf32>
    %111 = arith.truncf %110 : vector<16x640xf32> to vector<16x640xbf16>
    %c7 = arith.constant 7 : index
    %c0_67 = arith.constant 0 : index
    %c0_68 = arith.constant 0 : index
    %112 = vector.load %arg6[%c7, %c0_67, %c0_68] : memref<9x96x16xbf16, #tpu.memory_space<vmem>>, vector<1x96x16xbf16>
    %113 = vector.shape_cast %112 : vector<1x96x16xbf16> to vector<96x16xbf16>
    %cst_69 = arith.constant dense<0.000000e+00> : vector<96x640xf32>
    %114 = tpu.matmul %113, %111, %cst_69 {dimension_numbers = #tpu.dot_dimension_numbers<[1], [0], [0], [1], [0, 0, 1, 1], [], []>} : vector<96x16xbf16>, vector<16x640xbf16>, vector<96x640xf32> -> vector<96x640xf32>
    %115 = arith.addf %109, %114 : vector<96x640xf32>
    %c0_70 = arith.constant 0 : index
    %c146 = arith.constant 146 : index
    %116 = vector.load %arg11[%c0_70, %c146] : memref<16x896xf32, #tpu.memory_space<vmem>>, vector<16x640xf32>
    %117 = arith.truncf %116 : vector<16x640xf32> to vector<16x640xbf16>
    %c8 = arith.constant 8 : index
    %c0_71 = arith.constant 0 : index
    %c0_72 = arith.constant 0 : index
    %118 = vector.load %arg6[%c8, %c0_71, %c0_72] : memref<9x96x16xbf16, #tpu.memory_space<vmem>>, vector<1x96x16xbf16>
    %119 = vector.shape_cast %118 : vector<1x96x16xbf16> to vector<96x16xbf16>
    %cst_73 = arith.constant dense<0.000000e+00> : vector<96x640xf32>
    %120 = tpu.matmul %119, %117, %cst_73 {dimension_numbers = #tpu.dot_dimension_numbers<[1], [0], [0], [1], [0, 0, 1, 1], [], []>} : vector<96x16xbf16>, vector<16x640xbf16>, vector<96x640xf32> -> vector<96x640xf32>
    %121 = arith.addf %115, %120 : vector<96x640xf32>
    %c0_74 = arith.constant 0 : index
    %c0_75 = arith.constant 0 : index
    %122 = vector.load %arg7[%c0_74, %c0_75] : memref<96x1xf32, #tpu.memory_space<vmem>>, vector<96x1xf32>
    %123 = vector.broadcast %122 : vector<96x1xf32> to vector<96x640xf32>
    %124 = arith.addf %121, %123 : vector<96x640xf32>
    %cst_76 = arith.constant 5.000000e-01 : f32
    %125 = vector.broadcast %cst_76 : f32 to vector<96x640xf32>
    %126 = arith.mulf %125, %124 : vector<96x640xf32>
    %cst_77 = arith.constant 0.707106769 : f32
    %127 = vector.broadcast %cst_77 : f32 to vector<96x640xf32>
    %128 = arith.mulf %124, %127 : vector<96x640xf32>
    %cst_78 = arith.constant 0.000000e+00 : f32
    %129 = vector.broadcast %cst_78 : f32 to vector<96x640xf32>
    %130 = arith.cmpf oge, %128, %129 : vector<96x640xf32>
    %cst_79 = arith.constant 1.000000e+00 : f32
    %cst_80 = arith.constant -1.000000e+00 : f32
    %131 = vector.broadcast %cst_79 : f32 to vector<96x640xf32>
    %132 = vector.broadcast %cst_80 : f32 to vector<96x640xf32>
    %133 = arith.select %130, %131, %132 : vector<96x640xi1>, vector<96x640xf32>
    %134 = math.absf %128 : vector<96x640xf32>
    %cst_81 = arith.constant 0.327591091 : f32
    %135 = vector.broadcast %cst_81 : f32 to vector<96x640xf32>
    %136 = arith.mulf %135, %134 : vector<96x640xf32>
    %cst_82 = arith.constant 1.000000e+00 : f32
    %137 = vector.broadcast %cst_82 : f32 to vector<96x640xf32>
    %138 = arith.addf %137, %136 : vector<96x640xf32>
    %139 = tpu.reciprocal %138 {approx = true} : vector<96x640xf32> -> vector<96x640xf32>
    %cst_83 = arith.constant 1.06140542 : f32
    %140 = vector.broadcast %cst_83 : f32 to vector<96x640xf32>
    %141 = arith.mulf %139, %140 : vector<96x640xf32>
    %cst_84 = arith.constant -1.45315206 : f32
    %142 = vector.broadcast %cst_84 : f32 to vector<96x640xf32>
    %143 = arith.addf %142, %141 : vector<96x640xf32>
    %144 = arith.mulf %139, %143 : vector<96x640xf32>
    %cst_85 = arith.constant 1.42141378 : f32
    %145 = vector.broadcast %cst_85 : f32 to vector<96x640xf32>
    %146 = arith.addf %145, %144 : vector<96x640xf32>
    %147 = arith.mulf %139, %146 : vector<96x640xf32>
    %cst_86 = arith.constant -0.284496725 : f32
    %148 = vector.broadcast %cst_86 : f32 to vector<96x640xf32>
    %149 = arith.addf %148, %147 : vector<96x640xf32>
    %150 = arith.mulf %139, %149 : vector<96x640xf32>
    %cst_87 = arith.constant 0.254829586 : f32
    %151 = vector.broadcast %cst_87 : f32 to vector<96x640xf32>
    %152 = arith.addf %151, %150 : vector<96x640xf32>
    %153 = arith.mulf %139, %152 : vector<96x640xf32>
    %cst_88 = arith.constant 0.000000e+00 : f32
    %154 = vector.broadcast %cst_88 : f32 to vector<96x640xf32>
    %155 = arith.subf %154, %134 : vector<96x640xf32>
    %156 = arith.mulf %155, %134 : vector<96x640xf32>
    %157 = math.exp %156 : vector<96x640xf32>
    %158 = arith.mulf %153, %157 : vector<96x640xf32>
    %cst_89 = arith.constant 1.000000e+00 : f32
    %159 = vector.broadcast %cst_89 : f32 to vector<96x640xf32>
    %160 = arith.subf %159, %158 : vector<96x640xf32>
    %161 = arith.mulf %133, %160 : vector<96x640xf32>
    %cst_90 = arith.constant 1.000000e+00 : f32
    %162 = vector.broadcast %cst_90 : f32 to vector<96x640xf32>
    %163 = arith.addf %162, %161 : vector<96x640xf32>
    %164 = arith.mulf %126, %163 : vector<96x640xf32>
    %c0_91 = arith.constant 0 : index
    %c0_92 = arith.constant 0 : index
    %165 = vector.load %arg8[%c0_91, %c0_92] : memref<8x96xbf16, #tpu.memory_space<vmem>>, vector<8x96xbf16>
    %166 = arith.truncf %164 : vector<96x640xf32> to vector<96x640xbf16>
    %cst_93 = arith.constant dense<0.000000e+00> : vector<8x640xf32>
    %167 = tpu.matmul %165, %166, %cst_93 {dimension_numbers = #tpu.dot_dimension_numbers<[1], [0], [0], [1], [0, 0, 1, 1], [], []>} : vector<8x96xbf16>, vector<96x640xbf16>, vector<8x640xf32> -> vector<8x640xf32>
    %c0_94 = arith.constant 0 : index
    %c0_95 = arith.constant 0 : index
    %168 = vector.load %arg9[%c0_94, %c0_95] : memref<8x1xf32, #tpu.memory_space<vmem>>, vector<8x1xf32>
    %169 = vector.broadcast %168 : vector<8x1xf32> to vector<8x640xf32>
    %170 = arith.addf %167, %169 : vector<8x640xf32>
    %cst_96 = arith.constant 5.000000e-01 : f32
    %171 = vector.broadcast %cst_96 : f32 to vector<8x640xf32>
    %172 = arith.mulf %171, %170 : vector<8x640xf32>
    %cst_97 = arith.constant 0.707106769 : f32
    %173 = vector.broadcast %cst_97 : f32 to vector<8x640xf32>
    %174 = arith.mulf %170, %173 : vector<8x640xf32>
    %cst_98 = arith.constant 0.000000e+00 : f32
    %175 = vector.broadcast %cst_98 : f32 to vector<8x640xf32>
    %176 = arith.cmpf oge, %174, %175 : vector<8x640xf32>
    %cst_99 = arith.constant 1.000000e+00 : f32
    %cst_100 = arith.constant -1.000000e+00 : f32
    %177 = vector.broadcast %cst_99 : f32 to vector<8x640xf32>
    %178 = vector.broadcast %cst_100 : f32 to vector<8x640xf32>
    %179 = arith.select %176, %177, %178 : vector<8x640xi1>, vector<8x640xf32>
    %180 = math.absf %174 : vector<8x640xf32>
    %cst_101 = arith.constant 0.327591091 : f32
    %181 = vector.broadcast %cst_101 : f32 to vector<8x640xf32>
    %182 = arith.mulf %181, %180 : vector<8x640xf32>
    %cst_102 = arith.constant 1.000000e+00 : f32
    %183 = vector.broadcast %cst_102 : f32 to vector<8x640xf32>
    %184 = arith.addf %183, %182 : vector<8x640xf32>
    %185 = tpu.reciprocal %184 {approx = true} : vector<8x640xf32> -> vector<8x640xf32>
    %cst_103 = arith.constant 1.06140542 : f32
    %186 = vector.broadcast %cst_103 : f32 to vector<8x640xf32>
    %187 = arith.mulf %185, %186 : vector<8x640xf32>
    %cst_104 = arith.constant -1.45315206 : f32
    %188 = vector.broadcast %cst_104 : f32 to vector<8x640xf32>
    %189 = arith.addf %188, %187 : vector<8x640xf32>
    %190 = arith.mulf %185, %189 : vector<8x640xf32>
    %cst_105 = arith.constant 1.42141378 : f32
    %191 = vector.broadcast %cst_105 : f32 to vector<8x640xf32>
    %192 = arith.addf %191, %190 : vector<8x640xf32>
    %193 = arith.mulf %185, %192 : vector<8x640xf32>
    %cst_106 = arith.constant -0.284496725 : f32
    %194 = vector.broadcast %cst_106 : f32 to vector<8x640xf32>
    %195 = arith.addf %194, %193 : vector<8x640xf32>
    %196 = arith.mulf %185, %195 : vector<8x640xf32>
    %cst_107 = arith.constant 0.254829586 : f32
    %197 = vector.broadcast %cst_107 : f32 to vector<8x640xf32>
    %198 = arith.addf %197, %196 : vector<8x640xf32>
    %199 = arith.mulf %185, %198 : vector<8x640xf32>
    %cst_108 = arith.constant 0.000000e+00 : f32
    %200 = vector.broadcast %cst_108 : f32 to vector<8x640xf32>
    %201 = arith.subf %200, %180 : vector<8x640xf32>
    %202 = arith.mulf %201, %180 : vector<8x640xf32>
    %203 = math.exp %202 : vector<8x640xf32>
    %204 = arith.mulf %199, %203 : vector<8x640xf32>
    %cst_109 = arith.constant 1.000000e+00 : f32
    %205 = vector.broadcast %cst_109 : f32 to vector<8x640xf32>
    %206 = arith.subf %205, %204 : vector<8x640xf32>
    %207 = arith.mulf %179, %206 : vector<8x640xf32>
    %cst_110 = arith.constant 1.000000e+00 : f32
    %208 = vector.broadcast %cst_110 : f32 to vector<8x640xf32>
    %209 = arith.addf %208, %207 : vector<8x640xf32>
    %210 = arith.mulf %172, %209 : vector<8x640xf32>
    %c0_111 = arith.constant 0 : index
    %c0_112 = arith.constant 0 : index
    %211 = vector.load %arg10[%c0_111, %c0_112] : memref<8x640xf32, #tpu.memory_space<vmem>>, vector<8x640xf32>
    tpu.vector_store %arg10[%c0_111, %c0_112], %210 {strides = array<i32>} : memref<8x640xf32, #tpu.memory_space<vmem>>, vector<8x640xf32>,
    return
  }
}

</mosaic_0001>

<bundles_post_ra>
// kernel: tile.6
= control target key start
LH: loop header
LB: loop body
LE: loop exit
PB: predicated region body
PF: predicated region fallthrough
CT: control target
= control target key end

     0   :  { %s46_s0 = inlined_call_operand.vmem [shape: f32[289], index: 0, kind: input, shape index: {}]   ;;  %s47_s1 = inlined_call_operand.vmem [shape: f32[2,289], index: 1, kind: output, shape index: {}]  }
   0x1   :  { %v4_v0 = vld [vmem:[%s46_s0] ss:$0 sm:$0xff]  ;;  %v14_v1 = vld [vmem:[%s46_s0 + $0x1] ss:$0 sm:$0xff]  ;;  %v16_v2 = vld [vmem:[%s46_s0 + $0x2] ss:$0 sm:$0xff] }
   0x2   :  { %5 = vst [vmem:[%s47_s1] sm:$0x3] %v4_v0  ;;  %15 = vst [vmem:[%s47_s1 + $0x2] sm:$0x3] %v14_v1 }
   0x3   :  { %17 = vst [vmem:[%s47_s1 + $0x4] sm:$0x3] %v16_v2 }

// kernel: tile.7
= control target key start
LH: loop header
LB: loop body
LE: loop exit
PB: predicated region body
PF: predicated region fallthrough
CT: control target
= control target key end

     0   :  { %vm28_vm0 = vcmask 777216   ;;  %s20_s12 = smov 3  ;;  %s39_s13 = smov 3  ;;  %vm17_vm1 = vcmask 269312   ;;  %vm35_vm2 = vcmask 539912   ;;  %vm43_vm3 = vcmask 1047816   ;;  %s89_s0 = inlined_call_operand.vmem [shape: f32[2,289], index: 0, kind: input, shape index: {}]   ;;  %s90_s1 = inlined_call_operand.vmem [shape: f32[578], index: 1, kind: output, shape index: {}]  }
   0x1   :  { %v47_v0 = vld [vmem:[%s89_s0 + $0x4] sm:$0x3]  ;;  %v48_v1 = vld [vmem:[%s89_s0 + $0x2] sm:$0x3]  ;;  %v13_v2 = vld [vmem:[%s89_s0] sm:$0x3] }
   0x2   :  { %8 = vst [vmem:[#allocation0 + $0x10] sm:$0x3] %v47_v0  ;;  %12 = vst [vmem:[#allocation0 + $0x8] sm:$0x3] %v48_v1  ;;  %s24_s0 = smov 3  ;;  %s54_s14 = smov 33  }
   0x3   :  { %14 = vst [vmem:[#allocation0] sm:$0x3] %v13_v2 }
   0x9   :  { %v27_v4 = vld [vmem:[#allocation0 + $0x11] sm:$0x1]   ;;  %v16_v7 = vld [vmem:[#allocation0 + $0x10] sm:$0x1]  }
   0xa   :  { %v25_v3 = vld [vmem:[#allocation0 + $0x1] ss:$8 sm:%s24_s0]   ;;  %v21_v6 = vld [vmem:[#allocation0] ss:$8 sm:%s20_s12]   ;;  %49 = vst.msk [vmem:[%s90_s1 + $0x2] sm:$0x1] %vm17_vm1, %v16_v7  }
   0xb   :  { %v29_v5 = vsel %vm28_vm0, %v27_v4, %v25_v3  ;;  %22 = vst [vmem:[%s90_s1] sm:$0x3] %v21_v6   ;;  %v40_v8 = vld [vmem:[#allocation0 + $0x1] ss:$8 sm:%s39_s13]  }
   0xc   :  { %30 = vrot.lane.b32.xlu0 %v29_v5, %s54_s14 }
  0x10   :  { %41 = vrot.lane.b32.xlu0 %v40_v8, %s54_s14 }
  0x7e   :  { %v31_v9 = vpop.permute.xlu0 %30  }
  0x7f   :  { %50 = vst.msk [vmem:[%s90_s1 + $0x3] sm:$0x3] %vm17_vm1, %v31_v9  }
  0x80   :  { %51 = vst.msk [vmem:[%s90_s1 + $0x4] sm:$0x1] %vm35_vm2, %v31_v9  }
  0x82   :  { %v42_v10 = vpop.permute.xlu0 %41  }
  0x83   :  { %52 = vst.msk [vmem:[%s90_s1 + $0x2] sm:$0x3] %vm43_vm3, %v42_v10  }

// kernel: multihead_forward.1
= control target key start
LH: loop header
LB: loop body
LE: loop exit
PB: predicated region body
PF: predicated region fallthrough
CT: control target
= control target key end

     0   :  { %v16761_v1 = vmov 0   ;;  %vm894_vm0 = vcmask 654336   ;;  %s11009_s29 = smov 18   ;;  %s11011_s15 = smov 1   ;;  %s16750_s0 = inlined_call_operand.vmem [shape: bf16[336,640], index: 0, kind: input, shape index: {}]   ;;  %s16751_s2 = inlined_call_operand.vmem [shape: bf16[96,336], index: 2, kind: input, shape index: {}]   ;;  %s16752_s3 = inlined_call_operand.vmem [shape: f32[96,1], index: 3, kind: input, shape index: {}]   ;;  %s16753_s5 = inlined_call_operand.vmem [shape: f32[16,1], index: 5, kind: input, shape index: {}]   ;;  %s16754_s4 = inlined_call_operand.vmem [shape: bf16[16,96], index: 4, kind: input, shape index: {}]   ;;  %s16755_s1 = inlined_call_operand.vmem [shape: f32[1,640], index: 1, kind: input, shape index: {}]   ;;  %s16756_s6 = inlined_call_operand.vmem [shape: bf16[9,96,16], index: 6, kind: input, shape index: {}]   ;;  %s16757_s7 = inlined_call_operand.vmem [shape: f32[96,1], index: 7, kind: input, shape index: {}]   ;;  %s16758_s9 = inlined_call_operand.vmem [shape: f32[8,1], index: 9, kind: input, shape index: {}]   ;;  %s16759_s8 = inlined_call_operand.vmem [shape: bf16[8,96], index: 8, kind: input, shape index: {}]   ;;  %s16760_s10 = inlined_call_operand.vmem [shape: f32[8,640], index: 10, kind: output, shape index: {}]  }
   0x1   :  { %v10276_v0 = vld [vmem:[%s16750_s0 + $0x4] ss:$20 sps:$4 sm:$0xff]   ;;  %1038 = vmatprep.mubr.bf16.mxu0 %v16761_v1  ;;  %10274 = vset.pattern.permute.xlu0 %v16761_v1  ;;  %v10278_v2 = vld [vmem:[%s16750_s0] ss:$20 sps:$4 sm:$0xff]   ;;  %v10281_v4 = vld [vmem:[%s16750_s0 + $0x28] ss:$20 sps:$4 sm:$0xff]  }
   0x2   :  { %10275 = vset.pattern.permute.xlu1 %v16761_v1  ;;  %913 = vmatprep.subr.bf16.mxu1 %v10276_v0  ;;  %v10279_v3 = vld [vmem:[%s16750_s0 + $0x2c] ss:$20 sps:$4 sm:$0xff]   ;;  %v10282_v5 = vld [vmem:[%s16750_s0 + $0x54] ss:$20 sps:$4 sm:$0xff]   ;;  %v10284_v6 = vld [vmem:[%s16750_s0 + $0x50] ss:$20 sps:$4 sm:$0xff]  }
   0x3   :  { %914 = vmatpush1.bf16.msra.mxu1 %v10278_v2  ;;  %v10285_v7 = vld [vmem:[%s16750_s0 + $0x7c] ss:$20 sps:$4 sm:$0xff]   ;;  %v10287_v8 = vld [vmem:[%s16750_s0 + $0x78] ss:$20 sps:$4 sm:$0xff]   ;;  %v10290_v10 = vld [vmem:[%s16750_s0 + $0xa0] ss:$20 sps:$4 sm:$0xff]  }
   0x4   :  { %915 = vmatprep.subr.bf16.mxu1 %v10279_v3  ;;  %v10288_v9 = vld [vmem:[%s16750_s0 + $0xa4] ss:$20 sps:$4 sm:$0xff]   ;;  %v10291_v11 = vld [vmem:[%s16750_s0 + $0xcc] ss:$20 sps:$4 sm:$0xff]   ;;  %v10293_v14 = vld [vmem:[%s16750_s0 + $0xc8] ss:$20 sps:$4 sm:$0xff]  }
   0x5   :  { %v10312_v12 = vld [vmem:[%s16750_s0 + $0x284] ss:$20 sps:$4 sm:$0xff]   ;;  %v10314_v13 = vld [vmem:[%s16750_s0 + $0x280] ss:$20 sps:$4 sm:$0xff]   ;;  %v10320_v16 = vld [vmem:[%s16750_s0 + $0x2a8] ss:$20 sps:$4 sm:$0xff]  }
   0x6   :  { %1006 = vmatprep.subr.bf16.mxu0 %v10312_v12  ;;  %v10318_v15 = vld [vmem:[%s16750_s0 + $0x2ac] ss:$20 sps:$4 sm:$0xff]   ;;  %v10294_v17 = vld [vmem:[%s16750_s0 + $0xf4] ss:$20 sps:$4 sm:$0xff]   ;;  %v10296_v18 = vld [vmem:[%s16750_s0 + $0xf0] ss:$20 sps:$4 sm:$0xff]  }
   0x7   :  { %916 = vmatpush1.bf16.msra.mxu1 %v10281_v4  ;;  %1007 = vmatpush1.bf16.msra.mxu0 %v10314_v13  ;;  %v10324_v19 = vld [vmem:[%s16750_s0 + $0x2d4] ss:$20 sps:$4 sm:$0xff]   ;;  %v10297_v20 = vld [vmem:[%s16750_s0 + $0x11c] ss:$20 sps:$4 sm:$0xff]   ;;  %v10299_v23 = vld [vmem:[%s16750_s0 + $0x118] ss:$20 sps:$4 sm:$0xff]  }
   0x8   :  { %917 = vmatprep.subr.bf16.mxu1 %v10282_v5  ;;  %1008 = vmatprep.subr.bf16.mxu0 %v10318_v15  ;;  %v10326_v21 = vld [vmem:[%s16750_s0 + $0x2d0] ss:$20 sps:$4 sm:$0xff]   ;;  %v10332_v25 = vld [vmem:[%s16750_s0 + $0x2f8] ss:$20 sps:$4 sm:$0xff]   ;;  %v10302_v28 = vld [vmem:[%s16750_s0 + $0x140] ss:$20 sps:$4 sm:$0xff]  }
   0x9   :  { %v10330_v22 = vld [vmem:[%s16750_s0 + $0x2fc] ss:$20 sps:$4 sm:$0xff]   ;;  %v10300_v24 = vld [vmem:[%s16750_s0 + $0x144] ss:$20 sps:$4 sm:$0xff]   ;;  %v10340_v29 = vld [vmem:[%s16750_s0 + $0x320] ss:$20 sps:$4 sm:$0xff]  }
   0xa   :  { %v10336_v26 = vld [vmem:[%s16750_s0 + $0x324] ss:$20 sps:$4 sm:$0xff]   ;;  %v10303_v30 = vld [vmem:[%s16750_s0 + $0x16c] ss:$20 sps:$4 sm:$0xff]   ;;  %v11170_v31 = vld [vmem:[%s16751_s2 + $0x8] ss:$12 sps:$4 sm:$0xff]  }
   0xb   :  { %918 = vmatpush1.bf16.msra.mxu1 %v10284_v6  ;;  %1009 = vmatpush1.bf16.msra.mxu0 %v10320_v16  ;;  %v11155_v27 = vld [vmem:[%s16751_s2 + $0x4] ss:$12 sps:$4 sm:$0xff]   ;;  %v10305_v32 = vld [vmem:[%s16750_s0 + $0x168] ss:$20 sps:$4 sm:$0xff]   ;;  %v11190_v36 = vld [vmem:[%s16751_s2 + $0x20] ss:$12 sps:$4 sm:$0xff]  }
   0xc   :  { %919 = vmatprep.subr.bf16.mxu1 %v10285_v7  ;;  %1010 = vmatprep.subr.bf16.mxu0 %v10324_v19  ;;  %v10306_v33 = vld [vmem:[%s16750_s0 + $0x194] ss:$20 sps:$4 sm:$0xff]   ;;  %v10308_v34 = vld [vmem:[%s16750_s0 + $0x190] ss:$20 sps:$4 sm:$0xff]   ;;  %v10311_v37 = vld [vmem:[%s16750_s0 + $0x1b8] ss:$20 sps:$4 sm:$0xff]  }
   0xd   :  { %945 = vmatprep.mubr.bf16.mxu1 %v11155_v27  ;;  %v10309_v35 = vld [vmem:[%s16750_s0 + $0x1bc] ss:$20 sps:$4 sm:$0xff]   ;;  %v10315_v38 = vld [vmem:[%s16750_s0 + $0x1e4] ss:$20 sps:$4 sm:$0xff]   ;;  %v10317_v39 = vld [vmem:[%s16750_s0 + $0x1e0] ss:$20 sps:$4 sm:$0xff]  }
   0xe   :  { %v10321_v40 = vld [vmem:[%s16750_s0 + $0x20c] ss:$20 sps:$4 sm:$0xff]   ;;  %v11210_v41 = vld [vmem:[%s16751_s2 + $0x38] ss:$12 sps:$4 sm:$0xff]   ;;  %v10323_v42 = vld [vmem:[%s16750_s0 + $0x208] ss:$20 sps:$4 sm:$0xff]  }
   0xf   :  { %920 = vmatpush1.bf16.msra.mxu1 %v10287_v8  ;;  %1011 = vmatpush1.bf16.msra.mxu0 %v10326_v21  ;;  %v10327_v43 = vld [vmem:[%s16750_s0 + $0x234] ss:$20 sps:$4 sm:$0xff]   ;;  %v10329_v44 = vld [vmem:[%s16750_s0 + $0x230] ss:$20 sps:$4 sm:$0xff]   ;;  %v10335_v47 = vld [vmem:[%s16750_s0 + $0x258] ss:$20 sps:$4 sm:$0xff]  }
  0x10   :  { %921 = vmatprep.subr.bf16.mxu1 %v10288_v9  ;;  %1012 = vmatprep.subr.bf16.mxu0 %v10330_v22  ;;  %v10333_v45 = vld [vmem:[%s16750_s0 + $0x25c] ss:$20 sps:$4 sm:$0xff]   ;;  %v11238_v48 = vld [vmem:[%s16751_s2] ss:$12 sps:$4 sm:$0xff]   ;;  %v10348_v54 = vld [vmem:[%s16750_s0 + $0x34] ss:$20 sps:$4 sm:$0xff]  }
  0x11   :  { %v11230_v46 = vld [vmem:[%s16751_s2 + $0x50] ss:$12 sps:$4 sm:$0xff]   ;;  %v10344_v49 = vld [vmem:[%s16750_s0 + $0xc] ss:$20 sps:$4 sm:$0xff]   ;;  %v11269_v56 = vld [vmem:[%s16751_s2 + $0x68] ss:$12 sps:$4 sm:$0xff]  }
  0x12   :  { %v10342_v50 = vld [vmem:[%s16750_s0 + $0x8] ss:$20 sps:$4 sm:$0xff]   ;;  %v10408_v52 = vld [vmem:[%s16750_s0 + $0x150] ss:$20 sps:$4 sm:$0xff]   ;;  %v10413_v58 = vld [vmem:[%s16750_s0 + $0x178] ss:$20 sps:$4 sm:$0xff]  }
  0x13   :  { %922 = vmatpush1.bf16.msra.mxu1 %v10290_v10  ;;  %1013 = vmatpush1.bf16.msra.mxu0 %v10332_v25  ;;  %v11249_v51 = vld [vmem:[%s16751_s2 + $0x1c] ss:$12 sps:$4 sm:$0xff]   ;;  %v10409_v53 = vld [vmem:[%s16750_s0 + $0x10] ss:$20 sps:$4 sm:$0xff]   ;;  %v10414_v59 = vld [vmem:[%s16750_s0 + $0x38] ss:$20 sps:$4 sm:$0xff]  }
  0x14   :  { %923 = vmatprep.subr.bf16.mxu1 %v10291_v11  ;;  %1014 = vmatprep.subr.bf16.mxu0 %v10336_v26  ;;  %v10346_v55 = vld [vmem:[%s16750_s0 + $0x30] ss:$20 sps:$4 sm:$0xff]   ;;  %v10415_v61 = vld [vmem:[%s16750_s0 + $0x1a0] ss:$20 sps:$4 sm:$0xff]   ;;  %v10352_v62 = vld [vmem:[%s16750_s0 + $0x58] ss:$20 sps:$4 sm:$0xff]  }
  0x15   :  { %v10354_v57 = vld [vmem:[%s16750_s0 + $0x5c] ss:$20 sps:$4 sm:$0xff]   ;;  %v11285_v60 = vld [vmem:[%s16751_s2 + $0x18] ss:$12 sps:$4 sm:$0xff]   ;;  %v10416_v63 = vld [vmem:[%s16750_s0 + $0x60] ss:$20 sps:$4 sm:$0xff]  }
  0x16   :  { %v10358_v0 = vld [vmem:[%s16750_s0 + $0x84] ss:$20 sps:$4 sm:$0xff]   ;;  %v10417_v2 = vld [vmem:[%s16750_s0 + $0x1c8] ss:$20 sps:$4 sm:$0xff]   ;;  %v11307_v3 = vld [vmem:[%s16751_s2 + $0x34] ss:$12 sps:$4 sm:$0xff]  }
  0x17   :  { %924 = vmatpush1.bf16.msra.mxu1 %v10293_v14  ;;  %1015 = vmatpush1.bf16.msra.mxu0 %v10340_v29  ;;  %v11313_v4 = vld [vmem:[%s16751_s2 + $0x80] ss:$12 sps:$4 sm:$0xff]   ;;  %v10418_v5 = vld [vmem:[%s16750_s0 + $0x88] ss:$20 sps:$4 sm:$0xff]   ;;  %v10419_v6 = vld [vmem:[%s16750_s0 + $0x1f0] ss:$20 sps:$4 sm:$0xff]  }
  0x18   :  { %925 = vmatprep.subr.bf16.mxu1 %v10294_v17  ;;  %9365 = vmatprep.subr.bf16.mxu0 %v10408_v52  ;;  %v10356_v7 = vld [vmem:[%s16750_s0 + $0x80] ss:$20 sps:$4 sm:$0xff]   ;;  %v11329_v8 = vld [vmem:[%s16751_s2 + $0x30] ss:$12 sps:$4 sm:$0xff]   ;;  %v10421_v13 = vld [vmem:[%s16750_s0 + $0x218] ss:$20 sps:$4 sm:$0xff]  }
  0x19   :  { %v10364_v9 = vld [vmem:[%s16750_s0 + $0xac] ss:$20 sps:$4 sm:$0xff]   ;;  %v10362_v11 = vld [vmem:[%s16750_s0 + $0xa8] ss:$20 sps:$4 sm:$0xff]   ;;  %v10420_v12 = vld [vmem:[%s16750_s0 + $0xb0] ss:$20 sps:$4 sm:$0xff]  }
  0x1a   :  { %9028 = vmatmul.mubr.msk.bf16.vlgmr.msra.gmra.mrb[0].mxu0 %vm894_vm0, %v11170_v31  ;;  %v186_v10 = vld [vmem:[%s16752_s3] sm:$0xff]  ;;  %v187_v14 = vld [vmem:[%s16752_s3 + $0x8] sm:$0xff]  ;;  %v189_v25 = vld [vmem:[%s16752_s3 + $0x18] sm:$0xff]  ;;  %s11012_s16 = smov 127   ;;  %s11013_s17 = smov 112  }
  0x1b   :  { %926 = vmatpush1.bf16.msra.mxu1 %v10296_v18  ;;  %1048 = vmatprep.mubr.bf16.mxu0 %v16761_v1  ;;  %v11354_v15 = vld [vmem:[%s16751_s2 + $0x4c] ss:$12 sps:$4 sm:$0xff]   ;;  %v10368_v16 = vld [vmem:[%s16750_s0 + $0xd4] ss:$20 sps:$4 sm:$0xff]   ;;  %v190_v21 = vld [vmem:[%s16752_s3 + $0x20] sm:$0xff]  ;;  %s11014_s18 = smov 111  }
  0x1c   :  { %927 = vmatprep.subr.bf16.mxu1 %v10297_v20  ;;  %9366 = vmatpush3.bf16.msra.mxu0 %v10409_v53  ;;  %v10422_v17 = vld [vmem:[%s16750_s0 + $0xd8] ss:$20 sps:$4 sm:$0xff]   ;;  %v188_v18 = vld [vmem:[%s16752_s3 + $0x10] sm:$0xff]  ;;  %s11015_s19 = smov 110  }
  0x1d   :  { %9367 = vmatprep.subr.bf16.mxu0 %v10413_v58  ;;  %200 = vperm.xlu0 %10274, %v186_v10   ;;  %v10423_v19 = vld [vmem:[%s16750_s0 + $0x240] ss:$20 sps:$4 sm:$0xff]   ;;  %v10366_v20 = vld [vmem:[%s16750_s0 + $0xd0] ss:$20 sps:$4 sm:$0xff]   ;;  %v10372_v26 = vld [vmem:[%s16750_s0 + $0xf8] ss:$20 sps:$4 sm:$0xff]  }
  0x1e   :  { %v11380_v22 = vld [vmem:[%s16751_s2 + $0x48] ss:$12 sps:$4 sm:$0xff]   ;;  %210 = vperm.xlu1 %10275, %v188_v18   ;;  %v11463_v52 = vld [vmem:[%s16751_s2 + $0x78] ss:$12 sps:$4 sm:$0xff]   ;;  %v10401_v58 = vld [vmem:[%s16750_s0 + $0x1ec] ss:$20 sps:$4 sm:$0xff]  }
  0x1f   :  { %928 = vmatpush1.bf16.msra.mxu1 %v10299_v23  ;;  %v10374_v23 = vld [vmem:[%s16750_s0 + $0xfc] ss:$20 sps:$4 sm:$0xff]  }
  0x20   :  { %929 = vmatprep.subr.bf16.mxu1 %v10300_v24  ;;  %9368 = vmatpush3.bf16.msra.mxu0 %v10414_v59  ;;  %v10424_v24 = vld [vmem:[%s16750_s0 + $0x100] ss:$20 sps:$4 sm:$0xff]   ;;  %v197_v53 = vld [vmem:[%s16752_s3 + $0x58] sm:$0xff]  ;;  %v10430_v10 = vld [vmem:[%s16750_s0 + $0x2b0] ss:$20 sps:$4 sm:$0xff]  }
  0x21   :  { %9369 = vmatprep.subr.bf16.mxu0 %v10415_v61  ;;  %205 = vperm.xlu0 %10274, %v187_v14   ;;  %v192_v29 = vld [vmem:[%s16752_s3 + $0x30] sm:$0xff]  ;;  %v10399_v59 = vld [vmem:[%s16750_s0 + $0x1e8] ss:$20 sps:$4 sm:$0xff]   ;;  %v10441_v14 = vld [vmem:[%s16750_s0 + $0x32c] ss:$20 sps:$4 sm:$0xff]  }
  0x22   :  { %9029 = vmatmul.mubr.msk.bf16.gmra.mrb[4].mxu0 %vm894_vm0, %v11190_v36  ;;  %215 = vperm.xlu1 %10275, %v189_v25   ;;  %v10404_v61 = vld [vmem:[%s16750_s0 + $0x214] ss:$20 sps:$4 sm:$0xff]  }
  0x23   :  { %930 = vmatpush1.bf16.msra.mxu1 %v10302_v28  ;;  %1058 = vmatprep.mubr.bf16.mxu0 %v16761_v1  ;;  %v10425_v28 = vld [vmem:[%s16750_s0 + $0x268] ss:$20 sps:$4 sm:$0xff]  }
  0x24   :  { %931 = vmatprep.subr.bf16.mxu1 %v10303_v30  ;;  %9370 = vmatpush3.bf16.msra.mxu0 %v10416_v63  ;;  %v11403_v30 = vld [vmem:[%s16751_s2 + $0x64] ss:$12 sps:$4 sm:$0xff]   ;;  %v10405_v63 = vld [vmem:[%s16750_s0 + $0x238] ss:$20 sps:$4 sm:$0xff]  }
  0x25   :  { %9371 = vmatprep.subr.bf16.mxu0 %v10417_v2  ;;  %220 = vperm.xlu0 %10274, %v190_v21   ;;  %v10410_v2 = vld [vmem:[%s16750_s0 + $0x260] ss:$20 sps:$4 sm:$0xff]  }
  0x27   :  { %932 = vmatpush1.bf16.msra.mxu1 %v10305_v32  ;;  %v10378_v32 = vld [vmem:[%s16750_s0 + $0x124] ss:$20 sps:$4 sm:$0xff]  }
  0x28   :  { %933 = vmatprep.subr.bf16.mxu1 %v10306_v33  ;;  %9372 = vmatpush3.bf16.msra.mxu0 %v10418_v5  ;;  %v10426_v33 = vld [vmem:[%s16750_s0 + $0x128] ss:$20 sps:$4 sm:$0xff]   ;;  %v10429_v5 = vld [vmem:[%s16750_s0 + $0x28c] ss:$20 sps:$4 sm:$0xff]  }
  0x29   :  { %9373 = vmatprep.subr.bf16.mxu0 %v10419_v6  ;;  %230 = vperm.xlu0 %10274, %v192_v29   ;;  %v10427_v6 = vld [vmem:[%s16750_s0 + $0x288] ss:$20 sps:$4 sm:$0xff]  }
  0x2a   :  { %9030 = vmatmul.mubr.msk.bf16.gmra.mrb[8].mxu0 %vm894_vm0, %v11210_v41 }
  0x2b   :  { %934 = vmatpush1.bf16.msra.mxu1 %v10308_v34  ;;  %1068 = vmatprep.mubr.bf16.mxu0 %v16761_v1  ;;  %v191_v34 = vld [vmem:[%s16752_s3 + $0x28] sm:$0xff] }
  0x2c   :  { %935 = vmatprep.subr.bf16.mxu1 %v10309_v35  ;;  %9374 = vmatpush3.bf16.msra.mxu0 %v10420_v12  ;;  %v194_v35 = vld [vmem:[%s16752_s3 + $0x40] sm:$0xff]  ;;  %v3040_v12 = vld [vmem:[%s16753_s5 + $0x8] sm:$0xff] }
  0x2d   :  { %9375 = vmatprep.subr.bf16.mxu0 %v10421_v13  ;;  %225 = vperm.xlu1 %10275, %v191_v34   ;;  %v10436_v13 = vld [vmem:[%s16750_s0 + $0x300] ss:$20 sps:$4 sm:$0xff]  }
  0x2e   :  { %240 = vperm.xlu0 %10274, %v194_v35  }
  0x2f   :  { %936 = vmatpush1.bf16.msra.mxu1 %v10311_v37  ;;  %v10376_v37 = vld [vmem:[%s16750_s0 + $0x120] ss:$20 sps:$4 sm:$0xff]  }
  0x30   :  { %937 = vmatprep.subr.bf16.mxu1 %v10315_v38  ;;  %9376 = vmatpush3.bf16.msra.mxu0 %v10422_v17  ;;  %v10384_v38 = vld [vmem:[%s16750_s0 + $0x14c] ss:$20 sps:$4 sm:$0xff]   ;;  %v10446_v17 = vld [vmem:[%s16750_s0 + $0x330] ss:$20 sps:$4 sm:$0xff]  }
  0x31   :  { %9377 = vmatprep.subr.bf16.mxu0 %v10423_v19 }
  0x32   :  { %9031 = vmatmul.mubr.msk.bf16.gmra.mrb[12].mxu0 %vm894_vm0, %v11230_v46 }
  0x33   :  { %938 = vmatpush1.bf16.msra.mxu1 %v10317_v39  ;;  %1078 = vmatprep.mubr.bf16.mxu0 %v16761_v1  ;;  %v11428_v39 = vld [vmem:[%s16751_s2 + $0x60] ss:$12 sps:$4 sm:$0xff]  }
  0x34   :  { %939 = vmatprep.subr.bf16.mxu1 %v10321_v40  ;;  %9378 = vmatpush3.bf16.msra.mxu0 %v10424_v24  ;;  %v193_v40 = vld [vmem:[%s16752_s3 + $0x38] sm:$0xff] }
  0x35   :  { %9379 = vmatprep.subr.bf16.mxu0 %v10425_v28  ;;  %235 = vperm.xlu1 %10275, %v193_v40  }
  0x37   :  { %940 = vmatpush1.bf16.msra.mxu1 %v10323_v42  ;;  %v10382_v42 = vld [vmem:[%s16750_s0 + $0x148] ss:$20 sps:$4 sm:$0xff]  }
  0x38   :  { %941 = vmatprep.subr.bf16.mxu1 %v10327_v43  ;;  %9380 = vmatpush3.bf16.msra.mxu0 %v10426_v33  ;;  %v11439_v43 = vld [vmem:[%s16751_s2 + $0x7c] ss:$12 sps:$4 sm:$0xff]  }
  0x3a   :  { %9032 = vmatmul.mubr.msk.bf16.gmra.mrb[16].mxu0 %vm894_vm0, %v11269_v56 }
  0x3b   :  { %942 = vmatpush1.bf16.msra.mxu1 %v10329_v44  ;;  %1088 = vmatprep.mubr.bf16.mxu0 %v16761_v1  ;;  %v196_v44 = vld [vmem:[%s16752_s3 + $0x50] sm:$0xff] }
  0x3c   :  { %943 = vmatprep.subr.bf16.mxu1 %v10333_v45  ;;  %v10388_v45 = vld [vmem:[%s16750_s0 + $0x174] ss:$20 sps:$4 sm:$0xff]   ;;  %250 = vperm.xlu0 %10274, %v196_v44  }
  0x3f   :  { %944 = vmatpush1.bf16.msra.mxu1 %v10335_v47  ;;  %v195_v47 = vld [vmem:[%s16752_s3 + $0x48] sm:$0xff]  ;;  %s11010_s3 = smov 16  }
  0x40   :  { %1099 = vmatprep.subr.bf16.mxu1 %v10344_v49  ;;  %v10386_v49 = vld [vmem:[%s16750_s0 + $0x170] ss:$20 sps:$4 sm:$0xff]   ;;  %245 = vperm.xlu1 %10275, %v195_v47  }
  0x42   :  { %946 = vmatmul.mubr.bf16.vlgmr.msra.gmra.mrb[0].mxu1 %v11238_v48  ;;  %9033 = vmatmul.mubr.msk.bf16.gmra.mrb[20].mxu0 %vm894_vm0, %v11313_v4 }
  0x43   :  { %1100 = vmatpush1.bf16.msra.mxu1 %v10342_v50  ;;  %955 = vmatprep.mubr.bf16.mxu1 %v11249_v51  ;;  %v10394_v50 = vld [vmem:[%s16750_s0 + $0x19c] ss:$20 sps:$4 sm:$0xff]  }
  0x44   :  { %1101 = vmatprep.subr.bf16.mxu1 %v10348_v54  ;;  %1317 = vmatprep.mubr.bf16.mxu0 %v11155_v27  ;;  %v10392_v54 = vld [vmem:[%s16750_s0 + $0x198] ss:$20 sps:$4 sm:$0xff]  }
  0x45   :  { %255 = vperm.xlu1 %10275, %v197_v53  }
  0x47   :  { %1102 = vmatpush1.bf16.msra.mxu1 %v10346_v55  ;;  %v10398_v55 = vld [vmem:[%s16750_s0 + $0x1c4] ss:$20 sps:$4 sm:$0xff]  }
  0x48   :  { %1103 = vmatprep.subr.bf16.mxu1 %v10354_v57  ;;  %v10396_v57 = vld [vmem:[%s16750_s0 + $0x1c0] ss:$20 sps:$4 sm:$0xff]  }
  0x49   :  { %3048 = vperm.xlu1 %10275, %v3040_v12  }
  0x4a   :  { %956 = vmatmul.mubr.bf16.gmra.mrb[4].mxu1 %v11285_v60  ;;  %1318 = vmatmul.mubr.bf16.vlgmr.msra.gmra.mrb[24].mxu0 %v11238_v48 }
  0x4b   :  { %1104 = vmatpush1.bf16.msra.mxu1 %v10352_v62  ;;  %965 = vmatprep.mubr.bf16.mxu1 %v11307_v3  ;;  %v10407_v62 = vld [vmem:[%s16750_s0 + $0x23c] ss:$20 sps:$4 sm:$0xff]  }
  0x4c   :  { %1105 = vmatprep.subr.bf16.mxu1 %v10358_v0  ;;  %1325 = vmatprep.mubr.bf16.mxu0 %v11249_v51  ;;  %v10412_v0 = vld [vmem:[%s16750_s0 + $0x264] ss:$20 sps:$4 sm:$0xff]  }
  0x4f   :  { %1106 = vmatpush1.bf16.msra.mxu1 %v10356_v7  ;;  %v10432_v7 = vld [vmem:[%s16750_s0 + $0x2b4] ss:$20 sps:$4 sm:$0xff]  }
  0x50   :  { %1107 = vmatprep.subr.bf16.mxu1 %v10364_v9  ;;  %v3039_v9 = vld [vmem:[%s16753_s5] sm:$0xff] }
  0x51   :  { %3043 = vperm.xlu0 %10274, %v3039_v9  }
  0x52   :  { %966 = vmatmul.mubr.bf16.gmra.mrb[8].mxu1 %v11329_v8  ;;  %1326 = vmatmul.mubr.bf16.gmra.mrb[28].mxu0 %v11285_v60 }
  0x53   :  { %1108 = vmatpush1.bf16.msra.mxu1 %v10362_v11  ;;  %975 = vmatprep.mubr.bf16.mxu1 %v11354_v15  ;;  %v10435_v11 = vld [vmem:[%s16750_s0 + $0x2dc] ss:$20 sps:$4 sm:$0xff]  }
  0x54   :  { %1109 = vmatprep.subr.bf16.mxu1 %v10368_v16  ;;  %1333 = vmatprep.mubr.bf16.mxu0 %v11307_v3  ;;  %v10439_v16 = vld [vmem:[%s16750_s0 + $0x328] ss:$20 sps:$4 sm:$0xff]  }
  0x57   :  { %1110 = vmatpush1.bf16.msra.mxu1 %v10366_v20 }
  0x58   :  { %1111 = vmatprep.subr.bf16.mxu1 %v10374_v23 }
  0x5a   :  { %976 = vmatmul.mubr.bf16.gmra.mrb[12].mxu1 %v11380_v22  ;;  %1334 = vmatmul.mubr.bf16.gmra.mrb[32].mxu0 %v11329_v8 }
  0x5b   :  { %1112 = vmatpush1.bf16.msra.mxu1 %v10372_v26  ;;  %985 = vmatprep.mubr.bf16.mxu1 %v11403_v30 }
  0x5c   :  { %1113 = vmatprep.subr.bf16.mxu1 %v10378_v32  ;;  %1341 = vmatprep.mubr.bf16.mxu0 %v11354_v15 }
  0x5f   :  { %1114 = vmatpush1.bf16.msra.mxu1 %v10376_v37 }
  0x60   :  { %1115 = vmatprep.subr.bf16.mxu1 %v10384_v38 }
  0x62   :  { %986 = vmatmul.mubr.bf16.gmra.mrb[16].mxu1 %v11428_v39  ;;  %1342 = vmatmul.mubr.bf16.gmra.mrb[36].mxu0 %v11380_v22 }
  0x63   :  { %1116 = vmatpush1.bf16.msra.mxu1 %v10382_v42  ;;  %995 = vmatprep.mubr.bf16.mxu1 %v11439_v43 }
  0x64   :  { %1117 = vmatprep.subr.bf16.mxu1 %v10388_v45  ;;  %1349 = vmatprep.mubr.bf16.mxu0 %v11403_v30 }
  0x67   :  { %1118 = vmatpush1.bf16.msra.mxu1 %v10386_v49 }
  0x68   :  { %1119 = vmatprep.subr.bf16.mxu1 %v10394_v50 }
  0x6a   :  { %996 = vmatmul.mubr.bf16.gmra.mrb[20].mxu1 %v11463_v52  ;;  %1350 = vmatmul.mubr.bf16.gmra.mrb[40].mxu0 %v11428_v39 }
  0x6b   :  { %1120 = vmatpush1.bf16.msra.mxu1 %v10392_v54  ;;  %1131 = vmatprep.mubr.bf16.mxu1 %v11155_v27  ;;  %v10402_v27 = vld [vmem:[%s16750_s0 + $0x210] ss:$20 sps:$4 sm:$0xff]  }
  0x6c   :  { %1121 = vmatprep.subr.bf16.mxu1 %v10398_v55  ;;  %1357 = vmatprep.mubr.bf16.mxu0 %v11439_v43 }
  0x6f   :  { %1122 = vmatpush1.bf16.msra.mxu1 %v10396_v57 }
  0x70   :  { %1123 = vmatprep.subr.bf16.mxu1 %v10401_v58 }
  0x72   :  { %1358 = vmatmul.mubr.bf16.gmra.mrb[44].mxu0 %v11463_v52 }
  0x73   :  { %1124 = vmatpush1.bf16.msra.mxu1 %v10399_v59  ;;  %3135 = vmatprep.mubr.bf16.mxu0 %v16761_v1 }
  0x74   :  { %1125 = vmatprep.subr.bf16.mxu1 %v10404_v61 }
  0x77   :  { %1126 = vmatpush1.bf16.msra.mxu1 %v10402_v27 }
  0x78   :  { %1127 = vmatprep.subr.bf16.mxu1 %v10407_v62 }
  0x7b   :  { %1128 = vmatpush1.bf16.msra.mxu1 %v10405_v63 }
  0x7c   :  { %1129 = vmatprep.subr.bf16.mxu1 %v10412_v0 }
  0x7f   :  { %1130 = vmatpush1.bf16.msra.mxu1 %v10410_v2 }
  0x80   :  { %1192 = vmatprep.subr.bf16.mxu1 %v10429_v5 }
  0x82   :  { %1132 = vmatmul.mubr.bf16.vlgmr.msra.gmra.mrb[24].mxu1 %v11238_v48  ;;  %v10433_v48 = vld [vmem:[%s16750_s0 + $0x2d8] ss:$20 sps:$4 sm:$0xff]  }
  0x83   :  { %1141 = vmatprep.mubr.bf16.mxu1 %v11249_v51  ;;  %1193 = vmatpush1.bf16.msra.mxu1 %v10427_v6  ;;  %v10438_v51 = vld [vmem:[%s16750_s0 + $0x304] ss:$20 sps:$4 sm:$0xff]  }
  0x84   :  { %1194 = vmatprep.subr.bf16.mxu1 %v10432_v7 }
  0x87   :  { %1195 = vmatpush1.bf16.msra.mxu1 %v10430_v10 }
  0x88   :  { %1196 = vmatprep.subr.bf16.mxu1 %v10435_v11 }
  0x8a   :  { %1142 = vmatmul.mubr.bf16.gmra.mrb[28].mxu1 %v11285_v60  ;;  %v10442_v60 = vld [vmem:[%s16750_s0 + $0x290] ss:$20 sps:$4 sm:$0xff]  }
  0x8b   :  { %1151 = vmatprep.mubr.bf16.mxu1 %v11307_v3  ;;  %1197 = vmatpush1.bf16.msra.mxu1 %v10433_v48  ;;  %v10443_v3 = vld [vmem:[%s16750_s0 + $0x2b8] ss:$20 sps:$4 sm:$0xff]  }
  0x8c   :  { %1198 = vmatprep.subr.bf16.mxu1 %v10438_v51 }
  0x8f   :  { %1199 = vmatpush1.bf16.msra.mxu1 %v10436_v13 }
  0x90   :  { %1200 = vmatprep.subr.bf16.mxu1 %v10441_v14 }
  0x92   :  { %1152 = vmatmul.mubr.bf16.gmra.mrb[32].mxu1 %v11329_v8  ;;  %v10444_v8 = vld [vmem:[%s16750_s0 + $0x2e0] ss:$20 sps:$4 sm:$0xff]  }
  0x93   :  { %1161 = vmatprep.mubr.bf16.mxu1 %v11354_v15  ;;  %1201 = vmatpush1.bf16.msra.mxu1 %v10439_v16  ;;  %v10445_v15 = vld [vmem:[%s16750_s0 + $0x308] ss:$20 sps:$4 sm:$0xff]  }
  0x94   :  { %9505 = vmatprep.subr.bf16.mxu1 %v10442_v60 }
  0x9a   :  { %1162 = vmatmul.mubr.bf16.gmra.mrb[36].mxu1 %v11380_v22 }
  0x9b   :  { %1171 = vmatprep.mubr.bf16.mxu1 %v11403_v30 }
  0x9c   :  { %v11622_v24 = vpop.permute.xlu0 %200 }
  0x9d   :  { %16856 = vst [vmem:[#allocation3_spill] sm:$0xff] %v11622_v24  ;;  %v11648_v57 = vpop.permute.xlu1 %210 }
  0x9e   :  { %16862 = vst [vmem:[#allocation9_spill] sm:$0xff] %v11648_v57 }
  0xa0   :  { %v11632_v32 = vpop.permute.xlu0 %205 }
  0xa1   :  { %16858 = vst [vmem:[#allocation5_spill] sm:$0xff] %v11632_v32  ;;  %v11663_v51 = vpop.permute.xlu1 %215 }
  0xa2   :  { %1172 = vmatmul.mubr.bf16.gmra.mrb[40].mxu1 %v11428_v39  ;;  %16865 = vst [vmem:[#allocation12_spill] sm:$0xff] %v11663_v51 }
  0xa3   :  { %1181 = vmatprep.mubr.bf16.mxu1 %v11439_v43 }
  0xaa   :  { %1182 = vmatmul.mubr.bf16.gmra.mrb[44].mxu1 %v11463_v52 }
  0xab   :  { %1224 = vmatprep.mubr.bf16.mxu1 %v16761_v1 }
  0xb2   :  { %9034 = vmatmul.mubr.msk.bf16.vlgmr.msra.gmra.mrb[24].mxu1 %vm894_vm0, %v11170_v31 }
  0xb3   :  { %1234 = vmatprep.mubr.bf16.mxu1 %v16761_v1  ;;  %9506 = vmatpush3.bf16.msra.mxu1 %v10442_v60 }
  0xb4   :  { %9507 = vmatprep.subr.bf16.mxu1 %v10443_v3 }
  0xb7   :  { %9508 = vmatpush3.bf16.msra.mxu1 %v10443_v3 }
  0xb8   :  { %9509 = vmatprep.subr.bf16.mxu1 %v10444_v8 }
  0xba   :  { %9035 = vmatmul.mubr.msk.bf16.gmra.mrb[28].mxu1 %vm894_vm0, %v11190_v36 }
  0xbb   :  { %1244 = vmatprep.mubr.bf16.mxu1 %v16761_v1  ;;  %9510 = vmatpush3.bf16.msra.mxu1 %v10444_v8 }
  0xbc   :  { %9511 = vmatprep.subr.bf16.mxu1 %v10445_v15 }
  0xbf   :  { %9512 = vmatpush3.bf16.msra.mxu1 %v10445_v15 }
  0xc0   :  { %9513 = vmatprep.subr.bf16.mxu1 %v10446_v17 }
  0xc2   :  { %9036 = vmatmul.mubr.msk.bf16.gmra.mrb[32].mxu1 %vm894_vm0, %v11210_v41 }
  0xc3   :  { %1254 = vmatprep.mubr.bf16.mxu1 %v16761_v1  ;;  %9514 = vmatpush3.bf16.msra.mxu1 %v10446_v17 }
  0xca   :  { %9037 = vmatmul.mubr.msk.bf16.gmra.mrb[36].mxu1 %vm894_vm0, %v11230_v46 }
  0xcb   :  { %1264 = vmatprep.mubr.bf16.mxu1 %v16761_v1 }
  0xd2   :  { %9038 = vmatmul.mubr.msk.bf16.gmra.mrb[40].mxu1 %vm894_vm0, %v11269_v56 }
  0xd3   :  { %1274 = vmatprep.mubr.bf16.mxu1 %v16761_v1 }
  0xda   :  { %9039 = vmatmul.mubr.msk.bf16.gmra.mrb[44].mxu1 %vm894_vm0, %v11313_v4 }
  0xdb   :  { %9515 = vmatprep.mubr.msk.bf16.mxu1 %vm894_vm0, %v11170_v31 }
  0xe2   :  { %9516 = vmatmul.mubr.msk.bf16.vlgmr.msra.gmra.mrb[48].mxu1 %vm894_vm0, %v11190_v36 }
  0xe3   :  { %9519 = vmatprep.mubr.msk.bf16.mxu1 %vm894_vm0, %v11210_v41 }
  0xea   :  { %9520 = vmatmul.mubr.msk.bf16.gmra.mrb[52].mxu1 %vm894_vm0, %v11230_v46 }
  0xeb   :  { %9523 = vmatprep.mubr.msk.bf16.mxu1 %vm894_vm0, %v11269_v56 }
  0xed   :  { %v1040_v18 = vpop.f32.mrb[0].mxu0 }
  0xee   :  { %v1042_v19 = vpop.f32.mrb[1].mxu0 }
  0xef   :  { %v1044_v31 = vpop.f32.mrb[2].mxu0 }
  0xf0   :  { %v1046_v20 = vpop.f32.mrb[3].mxu0 }
  0xf2   :  { %9524 = vmatmul.mubr.msk.bf16.gmra.mrb[56].mxu1 %vm894_vm0, %v11313_v4 }
  0xf3   :  { %3092 = vmatprep.mubr.bf16.mxu1 %v16761_v1 }
  0xf5   :  { %v11606_v21 = vpop.f32.mrb[4].mxu0 }
  0xf6   :  { %v11608_v36 = vpop.f32.mrb[5].mxu0 }
  0xf7   :  { %v11610_v41 = vpop.f32.mrb[6].mxu0 }
  0xf8   :  { %v11612_v22 = vpop.f32.mrb[7].mxu0 }
  0xfd   :  { %v11614_v46 = vpop.f32.mrb[8].mxu0 }
  0xfe   :  { %v11616_v56 = vpop.f32.mrb[9].mxu0 }
  0xff   :  { %v11618_v23 = vpop.f32.mrb[10].mxu0 }
 0x100   :  { %v11620_v4 = vpop.f32.mrb[11].mxu0 }
 0x105   :  { %v11624_v25 = vpop.f32.mrb[12].mxu0 }
 0x106   :  { %v11626_v26 = vpop.f32.mrb[13].mxu0 }
 0x107   :  { %v11628_v28 = vpop.f32.mrb[14].mxu0 }
 0x108   :  { %v11630_v29 = vpop.f32.mrb[15].mxu0 }
 0x109   :  { %16857 = vst [vmem:[#allocation4_spill] sm:$0xff] %v11630_v29 }
 0x10d   :  { %v11638_v44 = vpop.f32.mrb[16].mxu0 }
 0x10e   :  { %16859 = vst [vmem:[#allocation6_spill] sm:$0xff] %v11638_v44  ;;  %v11640_v49 = vpop.f32.mrb[17].mxu0 }
 0x10f   :  { %16860 = vst [vmem:[#allocation7_spill] sm:$0xff] %v11640_v49  ;;  %v11644_v53 = vpop.f32.mrb[18].mxu0 }
 0x110   :  { %16861 = vst [vmem:[#allocation8_spill] sm:$0xff] %v11644_v53  ;;  %v11657_v6 = vpop.f32.mrb[19].mxu0 }
 0x111   :  { %16863 = vst [vmem:[#allocation10_spill] sm:$0xff] %v11657_v6 }
 0x115   :  { %v947_v30 = vpop.f32.mrb[0].mxu1  ;;  %v11659_v11 = vpop.f32.mrb[20].mxu0 }
 0x116   :  { %v948_v33 = vadd.f32 %v947_v30, %v11622_v24  ;;  %v949_v34 = vpop.f32.mrb[1].mxu1  ;;  %16864 = vst [vmem:[#allocation11_spill] sm:$0xff] %v11659_v11  ;;  %v11665_v13 = vpop.f32.mrb[21].mxu0 }
 0x117   :  { %v950_v35 = vadd.f32 %v949_v34, %v11622_v24  ;;  %v951_v37 = vpop.f32.mrb[2].mxu1  ;;  %16866 = vst [vmem:[#allocation13_spill] sm:$0xff] %v11665_v13  ;;  %v11667_v16 = vpop.f32.mrb[22].mxu0  ;;  %v16870_v24 = vmov -1.0  }
 0x118   :  { %v952_v38 = vadd.f32 %v951_v37, %v11632_v32  ;;  %v1041_v39 = vadd.f32 %v1040_v18, %v948_v33  ;;  %v953_v40 = vpop.f32.mrb[3].mxu1  ;;  %16867 = vst [vmem:[#allocation14_spill] sm:$0xff] %v11667_v16  ;;  %v11669_v3 = vpop.f32.mrb[23].mxu0 }
 0x119   :  { %v954_v42 = vadd.f32 %v953_v40, %v11632_v32  ;;  %v1043_v43 = vadd.f32 %v1042_v19, %v950_v35  ;;  %16868 = vst [vmem:[#allocation15_spill] sm:$0xff] %v11669_v3 }
 0x11a   :  { %v1507_v45 = vmul.f32 0.70710677, %v1041_v39  ;;  %v1045_v47 = vadd.f32 %v1044_v31, %v952_v38  ;;  %v11680_v30 = vmul.f32 0.5, %v1041_v39 }
 0x11b   :  { %v11642_v50 = vmul.f32 0.70710677, %v1043_v43  ;;  %v1047_v52 = vadd.f32 %v1046_v20, %v954_v42  ;;  %v11691_v38 = vmul.f32 0.5, %v1043_v43 }
 0x11c   :  { %v1687_v54 = vand.u32 2147483647, %v1507_v45  ;;  %v11646_v55 = vmul.f32 0.70710677, %v1045_v47  ;;  %vm1567_vm1 = vcmp.ge.f32.partialorder %v1507_v45, 0.0 }
 0x11d   :  { %v11651_v58 = vand.u32 2147483647, %v11642_v50  ;;  %v957_v59 = vpop.f32.mrb[4].mxu1  ;;  %v11655_v2 = vmul.f32 0.70710677, %v1047_v52  ;;  %vm1568_vm2 = vcmp.ge.f32.partialorder %v11642_v50, 0.0 }
 0x11e   :  { %v1747_v61 = vmul.f32 0.3275911, %v1687_v54  ;;  %v959_v27 = vpop.f32.mrb[5].mxu1  ;;  %v1692_v63 = vand.u32 2147483647, %v11646_v55  ;;  %v958_v48 = vadd.f32 %v957_v59, %v11648_v57  ;;  %v2467_v8 = vsub.f32 0.0, %v1687_v54 }
 0x11f   :  { %v1748_v62 = vmul.f32 0.3275911, %v11651_v58  ;;  %v961_v5 = vpop.f32.mrb[6].mxu1  ;;  %v1693_v12 = vand.u32 2147483647, %v11655_v2  ;;  %v960_v15 = vadd.f32 %v959_v27, %v11648_v57  ;;  %v11715_v50 = vmul.f32 0.5, %v1045_v47 }
 0x120   :  { %v1807_v0 = vadd.f32 1.0, %v1747_v61  ;;  %v1752_v9 = vmul.f32 0.3275911, %v1692_v63  ;;  %v963_v10 = vpop.f32.mrb[7].mxu1  ;;  %v962_v17 = vadd.f32 %v961_v5, %v11663_v51  ;;  %v11676_v31 = vadd.f32 %v11606_v21, %v958_v48 }
 0x121   :  { %v1808_v7 = vadd.f32 1.0, %v1748_v62  ;;  %v1753_v60 = vmul.f32 0.3275911, %v1693_v12  ;;  %v964_v33 = vadd.f32 %v963_v10, %v11663_v51  ;;  %v11684_v34 = vadd.f32 %v11608_v36, %v960_v15 }
 0x122   :  { %10502 = vrcp.f32 %v1807_v0  ;;  %v1812_v14 = vadd.f32 1.0, %v1752_v9  ;;  %v11687_v35 = vadd.f32 %v11610_v41, %v962_v17  ;;  %v11694_v21 = vmul.f32 0.70710677, %v11676_v31 }
 0x123   :  { %10504 = vrcp.f32 %v1808_v7  ;;  %v1813_v19 = vadd.f32 1.0, %v1753_v60  ;;  %v2527_v39 = vmul.f32 %v2467_v8, %v1687_v54  ;;  %v2468_v36 = vsub.f32 0.0, %v11651_v58 }
 0x124   :  { %10506 = vrcp.f32 %v1812_v14  ;;  %v11701_v42 = vmul.f32 0.70710677, %v11684_v34  ;;  %v2472_v41 = vsub.f32 0.0, %v1692_v63  ;;  %v11704_v59 = vand.u32 2147483647, %v11694_v21 }
 0x125   :  { %v11673_v18 = vpop.f32.mrb[8].mxu1  ;;  %10508 = vrcp.f32 %v1813_v19  ;;  %v11707_v43 = vmul.f32 0.70710677, %v11687_v35  ;;  %v11710_v45 = vadd.f32 %v11612_v22, %v964_v33  ;;  %v16763_v61 = vmov -1.0  }
 0x126   :  { %v11678_v20 = vpop.f32.mrb[9].mxu1  ;;  %v11713_v54 = vsel %vm1567_vm1, 1.0, %v16763_v61  ;;  %v11717_v27 = vmul.f32 0.5, %v1047_v52  ;;  %v11720_v62 = vand.u32 2147483647, %v11701_v42  ;;  %v11725_v5 = vsel %vm1568_vm2, 1.0, %v16763_v61 }
 0x127   :  { %v11689_v37 = vpop.f32.mrb[10].mxu1  ;;  %vm1572_vm3 = vcmp.ge.f32.partialorder %v11646_v55, 0.0  ;;  %v2473_v22 = vsub.f32 0.0, %v1693_v12  ;;  %v1757_v7 = vmul.f32 0.3275911, %v11704_v59  ;;  %v2528_v52 = vmul.f32 %v2468_v36, %v11651_v58 }
 0x128   :  { %v11696_v40 = vpop.f32.mrb[11].mxu1  ;;  %v2587_v10 = vmul.f32 1.442695, %v2527_v39  ;;  %v1758_v48 = vmul.f32 0.3275911, %v11720_v62  ;;  %v2532_v60 = vmul.f32 %v2472_v41, %v1692_v63  ;;  %v11741_v19 = vsel %vm1572_vm3, 1.0, %v16763_v61 }
 0x129   :  { %v1817_v8 = vadd.f32 1.0, %v1757_v7  ;;  %v11736_v15 = vand.u32 2147483647, %v11707_v43  ;;  %vm1573_vm4 = vcmp.ge.f32.partialorder %v11655_v2, 0.0  ;;  %v2533_v1 = vmul.f32 %v2473_v22, %v1693_v12 }
 0x12a   :  { %v1818_v33 = vadd.f32 1.0, %v1758_v48  ;;  %v2589_v7 = vmul.f32 1.442695, %v2528_v52  ;;  %v2597_v57 = vmul.f32 1.442695, %v2532_v60  ;;  %v11767_v3 = vsel %vm1573_vm4, 1.0, %v16870_v24 }
 0x12b   :  { %10510 = vrcp.f32 %v1817_v8  ;;  %v1762_v63 = vmul.f32 0.3275911, %v11736_v15  ;;  %v2599_v60 = vmul.f32 1.442695, %v2533_v1  ;;  %v11786_v13 = vmul.f32 0.5, %v11676_v31 }
 0x12c   :  { %v11722_v0 = vpop.eup %10502  ;;  %10512 = vrcp.f32 %v1818_v33  ;;  %v2482_v31 = vsub.f32 0.0, %v11736_v15  ;;  %vm1577_vm5 = vcmp.ge.f32.partialorder %v11694_v21, 0.0  ;;  %vm1578_vm6 = vcmp.ge.f32.partialorder %v11701_v42, 0.0 }
 0x12d   :  { %v11729_v9 = vpop.eup %10504  ;;  %v1927_v47 = vmul.f32 1.0614054, %v11722_v0  ;;  %v11738_v55 = vpop.f32.mrb[12].mxu1  ;;  %v1822_v32 = vadd.f32 1.0, %v1762_v63  ;;  %10514 = vpow2.f32 %v2587_v10  ;;  %v2477_v10 = vsub.f32 0.0, %v11704_v59 }
 0x12e   :  { %v1928_v14 = vmul.f32 1.0614054, %v11729_v9  ;;  %v11744_v39 = vpop.f32.mrb[13].mxu1  ;;  %v11746_v58 = vpop.eup %10506  ;;  %vm1582_vm7 = vcmp.ge.f32.partialorder %v11707_v43, 0.0 }
 0x12f   :  { %v1987_v17 = vadd.f32 -1.4531521, %v1927_v47  ;;  %v1932_v47 = vmul.f32 1.0614054, %v11746_v58  ;;  %v11751_v61 = vpop.f32.mrb[14].mxu1  ;;  %v11753_v51 = vpop.eup %10508  ;;  %10516 = vrcp.f32 %v1822_v32 }
 0x130   :  { %v1988_v36 = vadd.f32 -1.4531521, %v1928_v14  ;;  %v11757_v14 = vmul.f32 0.70710677, %v11710_v45  ;;  %v11759_v12 = vpop.f32.mrb[15].mxu1  ;;  %10518 = vpow2.f32 %v2589_v7  ;;  %v11789_v7 = vmul.f32 0.5, %v11684_v34 }
 0x131   :  { %v2047_v41 = vmul.f32 %v11722_v0, %v1987_v17  ;;  %v1992_v8 = vadd.f32 -1.4531521, %v1932_v47  ;;  %v1933_v52 = vmul.f32 1.0614054, %v11753_v51  ;;  %v11762_v17 = vpop.permute.xlu0 %220  ;;  %10520 = vpow2.f32 %v2597_v57 }
 0x132   :  { %v2048_v48 = vmul.f32 %v11729_v9, %v1988_v36  ;;  %16869 = vst [vmem:[#allocation16_spill] sm:$0xff] %v11762_v17  ;;  %v968_v2 = vadd.f32 %v11673_v18, %v11762_v17  ;;  %10522 = vpow2.f32 %v2599_v60  ;;  %16874 = vst [vmem:[#allocation20_spill] sm:$0xff] %v11789_v7  ;;  %vm1583_vm8 = vcmp.ge.f32.partialorder %v11757_v14, 0.0 }
 0x133   :  { %v2107_v22 = vadd.f32 1.4214138, %v2047_v41  ;;  %v2052_v63 = vmul.f32 %v11746_v58, %v1992_v8  ;;  %v1993_v16 = vadd.f32 -1.4531521, %v1933_v52 }
 0x134   :  { %v2108_v33 = vadd.f32 1.4214138, %v2048_v48  ;;  %v11776_v48 = vand.u32 2147483647, %v11757_v14  ;;  %v11801_v34 = vadd.f32 %v11614_v46, %v968_v2 }
 0x135   :  { %v2167_v36 = vmul.f32 %v11722_v0, %v2107_v22  ;;  %v11772_v41 = vpop.f32.mrb[16].mxu1  ;;  %v2112_v22 = vadd.f32 1.4214138, %v2052_v63  ;;  %v2053_v8 = vmul.f32 %v11753_v51, %v1993_v16  ;;  %v2537_v16 = vmul.f32 %v2477_v10, %v11704_v59  ;;  %v11797_v63 = vpop.eup %10510 }
 0x136   :  { %16871 = vst [vmem:[#allocation17_spill] sm:$0xff] %v11772_v41  ;;  %v2168_v47 = vmul.f32 %v11729_v9, %v2108_v33  ;;  %v11780_v1 = vpop.f32.mrb[17].mxu1  ;;  %v1763_v33 = vmul.f32 0.3275911, %v11776_v48  ;;  %v11803_v53 = vpop.eup %10512  ;;  %v2478_v59 = vsub.f32 0.0, %v11720_v62  ;;  %v11810_v10 = vmul.f32 0.5, %v11687_v35 }
 0x137   :  { %16872 = vst [vmem:[#allocation18_spill] sm:$0xff] %v11780_v1  ;;  %v2227_v32 = vadd.f32 -0.28449672, %v2167_v36  ;;  %v11783_v52 = vpop.f32.mrb[18].mxu1  ;;  %v2172_v36 = vmul.f32 %v11746_v58, %v2112_v22  ;;  %v2113_v57 = vadd.f32 1.4214138, %v2053_v8  ;;  %v2542_v1 = vmul.f32 %v2482_v31, %v11736_v15 }
 0x138   :  { %16873 = vst [vmem:[#allocation19_spill] sm:$0xff] %v11783_v52  ;;  %v11792_v11 = vpop.f32.mrb[19].mxu1  ;;  %v2228_v60 = vadd.f32 -0.28449672, %v2168_v47  ;;  %v1823_v6 = vadd.f32 1.0, %v1763_v33  ;;  %v10515_v47 = vpop.eup %10514 }
 0x139   :  { %16875 = vst [vmem:[#allocation21_spill] sm:$0xff] %v11792_v11  ;;  %v2287_v18 = vmul.f32 %v11722_v0, %v2227_v32  ;;  %v2232_v11 = vadd.f32 -0.28449672, %v2172_v36  ;;  %v2173_v32 = vmul.f32 %v11753_v51, %v2113_v57  ;;  %v1937_v22 = vmul.f32 1.0614054, %v11797_v63  ;;  %v11816_v57 = vpop.eup %10516 }
 0x13a   :  { %v1938_v8 = vmul.f32 1.0614054, %v11803_v53  ;;  %10524 = vrcp.f32 %v1823_v6  ;;  %v2607_v49 = vmul.f32 1.442695, %v2537_v16  ;;  %v2288_v41 = vmul.f32 %v11729_v9, %v2228_v60 }
 0x13b   :  { %v2347_v52 = vadd.f32 0.2548296, %v2287_v18  ;;  %v2292_v2 = vmul.f32 %v11746_v58, %v2232_v11  ;;  %v2233_v33 = vadd.f32 -0.28449672, %v2173_v32  ;;  %v1997_v18 = vadd.f32 -1.4531521, %v1937_v22  ;;  %v10519_v32 = vpop.eup %10518 }
 0x13c   :  { %v1998_v44 = vadd.f32 -1.4531521, %v1938_v8  ;;  %v2538_v16 = vmul.f32 %v2478_v59, %v11720_v62  ;;  %v1942_v8 = vmul.f32 1.0614054, %v11816_v57  ;;  %v10521_v31 = vpop.eup %10520  ;;  %10526 = vpow2.f32 %v2607_v49 }
 0x13d   :  { %v2407_v46 = vmul.f32 %v11722_v0, %v2347_v52  ;;  %v11814_v36 = vpop.f32.mrb[20].mxu1  ;;  %v2352_v0 = vadd.f32 0.2548296, %v2292_v2  ;;  %v2057_v11 = vmul.f32 %v11797_v63, %v1997_v18  ;;  %v2293_v22 = vmul.f32 %v11753_v51, %v2233_v33  ;;  %v10523_v18 = vpop.eup %10522 }
 0x13e   :  { %16876 = vst [vmem:[#allocation22_spill] sm:$0xff] %v11814_v36  ;;  %v11820_v35 = vpop.f32.mrb[21].mxu1  ;;  %v2058_v36 = vmul.f32 %v11803_v53, %v1998_v44  ;;  %v2002_v44 = vadd.f32 -1.4531521, %v1942_v8  ;;  %v2348_v59 = vadd.f32 0.2548296, %v2288_v41 }
 0x13f   :  { %16877 = vst [vmem:[#allocation23_spill] sm:$0xff] %v11820_v35  ;;  %v2707_v6 = vmul.f32 %v10515_v47, %v2407_v46  ;;  %v11824_v52 = vpop.f32.mrb[22].mxu1  ;;  %v2412_v60 = vmul.f32 %v11746_v58, %v2352_v0  ;;  %v11836_v46 = vsel %vm1577_vm5, 1.0, %v16870_v24  ;;  %v2117_v2 = vadd.f32 1.4214138, %v2057_v11  ;;  %v11851_v11 = vpop.permute.xlu1 %225 }
 0x140   :  { %16878 = vst [vmem:[#allocation24_spill] sm:$0xff] %v11824_v52  ;;  %v11830_v15 = vpop.f32.mrb[23].mxu1  ;;  %v2118_v33 = vadd.f32 1.4214138, %v2058_v36  ;;  %v2617_v52 = vmul.f32 1.442695, %v2542_v1  ;;  %v2062_v21 = vmul.f32 %v11816_v57, %v2002_v44  ;;  %v970_v36 = vadd.f32 %v11678_v20, %v11762_v17 }
 0x141   :  { %16879 = vst [vmem:[#allocation25_spill] sm:$0xff] %v11830_v15  ;;  %v2767_v47 = vsub.f32 1.0, %v2707_v6  ;;  %v2712_v35 = vmul.f32 %v10521_v31, %v2412_v60  ;;  %v2177_v15 = vmul.f32 %v11797_v63, %v2117_v2  ;;  %v2353_v6 = vadd.f32 0.2548296, %v2293_v22  ;;  %16880 = vst [vmem:[#allocation26_spill] sm:$0xff] %v11851_v11 }
 0x142   :  { %v2178_v58 = vmul.f32 %v11803_v53, %v2118_v33  ;;  %v2609_v0 = vmul.f32 1.442695, %v2538_v16  ;;  %v11844_v49 = vmul.f32 0.70710677, %v11801_v34  ;;  %10528 = vpow2.f32 %v2617_v52 }
 0x143   :  { %v2827_v62 = vmul.f32 %v2767_v47, %v11713_v54  ;;  %v2772_v7 = vsub.f32 1.0, %v2712_v35  ;;  %v2237_v29 = vadd.f32 -0.28449672, %v2177_v15  ;;  %v2122_v54 = vadd.f32 1.4214138, %v2062_v21 }
 0x144   :  { %v11846_v1 = vpop.eup %10524  ;;  %v2483_v41 = vsub.f32 0.0, %v11776_v48  ;;  %v2408_v35 = vmul.f32 %v11729_v9, %v2348_v59  ;;  %v2413_v15 = vmul.f32 %v11753_v51, %v2353_v6  ;;  %v2238_v31 = vadd.f32 -0.28449672, %v2178_v58 }
 0x145   :  { %v2887_v22 = vadd.f32 1.0, %v2827_v62  ;;  %v2832_v16 = vmul.f32 %v2772_v7, %v11741_v19  ;;  %v2297_v8 = vmul.f32 %v11797_v63, %v2237_v29  ;;  %v2182_v47 = vmul.f32 %v11816_v57, %v2122_v54 }
 0x146   :  { %v1943_v52 = vmul.f32 1.0614054, %v11846_v1  ;;  %v972_v20 = vadd.f32 %v11689_v37, %v11851_v11  ;;  %v11862_v33 = vand.u32 2147483647, %v11844_v49  ;;  %v2543_v19 = vmul.f32 %v2483_v41, %v11776_v48  ;;  %v10527_v59 = vpop.eup %10526 }
 0x147   :  { %v2892_v60 = vadd.f32 1.0, %v2832_v16  ;;  %v2357_v2 = vadd.f32 0.2548296, %v2297_v8  ;;  %v2242_v9 = vadd.f32 -0.28449672, %v2182_v47  ;;  %v11866_v29 = vadd.f32 %v11616_v56, %v970_v36 }
 0x148   :  { %v2003_v44 = vadd.f32 -1.4531521, %v1943_v52  ;;  %v11869_v51 = vmul.f32 %v2887_v22, %v11680_v30  ;;  %v1767_v37 = vmul.f32 0.3275911, %v11862_v33  ;;  %v2708_v6 = vmul.f32 %v10519_v32, %v2408_v35 }
 0x149   :  { %v11872_v7 = vmul.f32 %v2892_v60, %v11715_v50  ;;  %v2417_v62 = vmul.f32 %v11797_v63, %v2357_v2  ;;  %v2713_v58 = vmul.f32 %v10523_v18, %v2413_v15  ;;  %v2302_v21 = vmul.f32 %v11816_v57, %v2242_v9  ;;  %v11881_v50 = vpop.f32.mrb[24].mxu0 }
 0x14a   :  { %v2063_v48 = vmul.f32 %v11846_v1, %v2003_v44  ;;  %v2298_v30 = vmul.f32 %v11803_v53, %v2238_v31  ;;  %v1827_v41 = vadd.f32 1.0, %v1767_v37  ;;  %10530 = vpow2.f32 %v2609_v0  ;;  %v11884_v32 = vpop.f32.mrb[25].mxu0 }
 0x14b   :  { %v2717_v54 = vmul.f32 %v10527_v59, %v2417_v62  ;;  %v2362_v63 = vadd.f32 0.2548296, %v2302_v21  ;;  %v11889_v22 = vsel %vm1578_vm6, 1.0, %v16870_v24  ;;  %v11892_v35 = vmul.f32 0.70710677, %v11866_v29  ;;  %v11894_v16 = vpop.f32.mrb[26].mxu0 }
 0x14c   :  { %v2123_v36 = vadd.f32 1.4214138, %v2063_v48  ;;  %10532 = vrcp.f32 %v1827_v41  ;;  %v10529_v8 = vpop.eup %10528  ;;  %v2768_v0 = vsub.f32 1.0, %v2708_v6  ;;  %v2619_v47 = vmul.f32 1.442695, %v2543_v19  ;;  %v11898_v52 = vpop.f32.mrb[27].mxu0 }
 0x14d   :  { %v2777_v18 = vsub.f32 1.0, %v2717_v54  ;;  %v2422_v15 = vmul.f32 %v11816_v57, %v2362_v63  ;;  %v2773_v60 = vsub.f32 1.0, %v2713_v58  ;;  %v2358_v2 = vadd.f32 0.2548296, %v2298_v30  ;;  %v11906_v44 = vpop.f32.mrb[28].mxu0 }
 0x14e   :  { %v2183_v31 = vmul.f32 %v11846_v1, %v2123_v36  ;;  %v11901_v42 = vand.u32 2147483647, %v11892_v35  ;;  %v11904_v9 = vadd.f32 %v11618_v23, %v972_v20  ;;  %16881 = vst [vmem:[#allocation27_spill] sm:$0xff] %v11906_v44  ;;  %v974_v57 = vadd.f32 %v11696_v40, %v11851_v11  ;;  %v11911_v19 = vpop.f32.mrb[29].mxu0 }
 0x14f   :  { %v2837_v62 = vmul.f32 %v2777_v18, %v11836_v46  ;;  %v2722_v37 = vmul.f32 %v10529_v8, %v2422_v15  ;;  %16882 = vst [vmem:[#allocation28_spill] sm:$0xff] %v11911_v19  ;;  %v1642_v6 = vsel %vm1582_vm7, 1.0, %v16870_v24  ;;  %v11917_v58 = vmul.f32 0.5, %v11710_v45  ;;  %v11921_v20 = vpop.f32.mrb[30].mxu0 }
 0x150   :  { %v2243_v59 = vadd.f32 -0.28449672, %v2183_v31  ;;  %v1768_v23 = vmul.f32 0.3275911, %v11901_v42  ;;  %16883 = vst [vmem:[#allocation29_spill] sm:$0xff] %v11921_v20  ;;  %v2828_v46 = vmul.f32 %v2768_v0, %v11725_v5  ;;  %10534 = vpow2.f32 %v2619_v47  ;;  %v11925_v48 = vpop.f32.mrb[31].mxu0 }
 0x151   :  { %v2782_v21 = vsub.f32 1.0, %v2722_v37  ;;  %16884 = vst [vmem:[#allocation30_spill] sm:$0xff] %v11925_v48  ;;  %v2833_v43 = vmul.f32 %v2773_v60, %v11767_v3  ;;  %v2418_v54 = vmul.f32 %v11803_v53, %v2358_v2  ;;  %v11930_v30 = vmul.f32 0.70710677, %v11904_v9  ;;  %v11932_v41 = vpop.f32.mrb[32].mxu0  ;;  %v11954_v2 = vpop.permute.xlu0 %230  ;;  %v16913_v20 = vld [vmem:[#allocation8_spill] sm:$0xff] }
 0x152   :  { %v2303_v40 = vmul.f32 %v11846_v1, %v2243_v59  ;;  %v1828_v45 = vadd.f32 1.0, %v1768_v23  ;;  %16885 = vst [vmem:[#allocation31_spill] sm:$0xff] %v11932_v41  ;;  %v2897_v63 = vadd.f32 1.0, %v2837_v62  ;;  %v2487_v5 = vsub.f32 0.0, %v11862_v33  ;;  %v11938_v8 = vpop.f32.mrb[33].mxu0  ;;  %16888 = vst [vmem:[#allocation34_spill] sm:$0xff] %v11954_v2 }
 0x153   :  { %v2842_v36 = vmul.f32 %v2782_v21, %v1642_v6  ;;  %v11936_v18 = vadd.f32 %v11620_v4, %v974_v57  ;;  %16886 = vst [vmem:[#allocation32_spill] sm:$0xff] %v11938_v8  ;;  %v11943_v3 = vsel %vm1583_vm8, 1.0, %v16870_v24  ;;  %v11946_v0 = vand.u32 2147483647, %v11930_v30  ;;  %v11948_v15 = vpop.f32.mrb[34].mxu0 }
 0x154   :  { %v2363_v53 = vadd.f32 0.2548296, %v2303_v40  ;;  %10536 = vrcp.f32 %v1828_v45  ;;  %16887 = vst [vmem:[#allocation33_spill] sm:$0xff] %v11948_v15  ;;  %v10531_v31 = vpop.eup %10530  ;;  %v2888_v47 = vadd.f32 1.0, %v2828_v46  ;;  %v11951_v4 = vmul.f32 0.5, %v11801_v34  ;;  %v11956_v14 = vpop.f32.mrb[35].mxu0 }
 0x155   :  { %v2902_v60 = vadd.f32 1.0, %v2842_v36  ;;  %vm1587_vm9 = vcmp.ge.f32.partialorder %v11844_v49, 0.0  ;;  %16889 = vst [vmem:[#allocation35_spill] sm:$0xff] %v11956_v14  ;;  %v2893_v37 = vadd.f32 1.0, %v2833_v43  ;;  %v2718_v59 = vmul.f32 %v10531_v31, %v2418_v54  ;;  %v11964_v23 = vpop.f32.mrb[36].mxu0  ;;  %v16906_v15 = vld [vmem:[#allocation6_spill] sm:$0xff] }
 0x156   :  { %v11958_v62 = vpop.eup %10532  ;;  %v1772_v57 = vmul.f32 0.3275911, %v11946_v0  ;;  %v11962_v6 = vmul.f32 0.70710677, %v11936_v18  ;;  %16890 = vst [vmem:[#allocation36_spill] sm:$0xff] %v11964_v23  ;;  %v11967_v34 = vmul.f32 %v2897_v63, %v11786_v13  ;;  %v2547_v40 = vmul.f32 %v2487_v5, %v11862_v33  ;;  %v11974_v45 = vpop.f32.mrb[37].mxu0 }
 0x157   :  { %v11970_v46 = vmul.f32 %v2902_v60, %v11810_v10  ;;  %v1947_v21 = vmul.f32 1.0614054, %v11958_v62  ;;  %16891 = vst [vmem:[#allocation37_spill] sm:$0xff] %v11974_v45  ;;  %v2423_v43 = vmul.f32 %v11846_v1, %v2363_v53  ;;  %v978_v31 = vadd.f32 %v11738_v55, %v11954_v2  ;;  %v11982_v13 = vpop.f32.mrb[38].mxu0  ;;  %v11998_v60 = vpop.permute.xlu1 %235 }
 0x158   :  { %v1832_v54 = vadd.f32 1.0, %v1772_v57  ;;  %v11978_v36 = vand.u32 2147483647, %v11962_v6  ;;  %16892 = vst [vmem:[#allocation38_spill] sm:$0xff] %v11982_v13  ;;  %v11985_v10 = vmul.f32 %v2888_v47, %v11691_v38  ;;  %v11992_v33 = vsel %vm1587_vm9, 1.0, %v16870_v24  ;;  %v11994_v5 = vpop.f32.mrb[39].mxu0 }
 0x159   :  { %v2007_v1 = vadd.f32 -1.4531521, %v1947_v21  ;;  %16893 = vst [vmem:[#allocation39_spill] sm:$0xff] %v11994_v5  ;;  %v2778_v53 = vsub.f32 1.0, %v2718_v59  ;;  %vm1588_vm10 = vcmp.ge.f32.partialorder %v11892_v35, 0.0  ;;  %16894 = vst [vmem:[#allocation40_spill] sm:$0xff] %v11998_v60  ;;  %v12003_v57 = vmul.f32 %v2893_v37, %v11717_v27 }
 0x15a   :  { %10538 = vrcp.f32 %v1832_v54  ;;  %v1773_v55 = vmul.f32 0.3275911, %v11978_v36  ;;  %v12000_v38 = vpop.f32.mrb[40].mxu0  ;;  %v10535_v47 = vpop.eup %10534  ;;  %v2488_v21 = vsub.f32 0.0, %v11901_v42  ;;  %v980_v59 = vadd.f32 %v11744_v39, %v11954_v2 }
 0x15b   :  { %16895 = vst [vmem:[#allocation41_spill] sm:$0xff] %v12000_v38  ;;  %v2067_v49 = vmul.f32 %v11958_v62, %v2007_v1  ;;  %v12009_v63 = vpop.f32.mrb[41].mxu0  ;;  %v2723_v54 = vmul.f32 %v10535_v47, %v2423_v43  ;;  %v2627_v56 = vmul.f32 1.442695, %v2547_v40  ;;  %v12012_v17 = vadd.f32 %v11624_v25, %v978_v31 }
 0x15c   :  { %16896 = vst [vmem:[#allocation42_spill] sm:$0xff] %v12009_v63  ;;  %v1833_v11 = vadd.f32 1.0, %v1773_v55  ;;  %v12015_v5 = vmul.f32 0.5, %v11866_v29  ;;  %v982_v27 = vadd.f32 %v11751_v61, %v11998_v60  ;;  %v12020_v37 = vadd.f32 %v11626_v26, %v980_v59 }
 0x15d   :  { %v2127_v38 = vadd.f32 1.4214138, %v2067_v49  ;;  %v2838_v39 = vmul.f32 %v2778_v53, %v11889_v22  ;;  %v12028_v40 = vsel %vm1588_vm10, 1.0, %v16870_v24  ;;  %v12031_v25 = vmul.f32 0.70710677, %v12012_v17 }
 0x15e   :  { %v12022_v1 = vpop.eup %10536  ;;  %10540 = vrcp.f32 %v1833_v11  ;;  %v2548_v26 = vmul.f32 %v2488_v21, %v11901_v42  ;;  %v2492_v43 = vsub.f32 0.0, %v11946_v0  ;;  %v2783_v31 = vsub.f32 1.0, %v2723_v54  ;;  %v12043_v11 = vpop.f32.mrb[42].mxu0 }
 0x15f   :  { %v2187_v29 = vmul.f32 %v11958_v62, %v2127_v38  ;;  %v1948_v61 = vmul.f32 1.0614054, %v12022_v1  ;;  %10542 = vpow2.f32 %v2627_v56  ;;  %v12038_v22 = vand.u32 2147483647, %v12031_v25  ;;  %16897 = vst [vmem:[#allocation43_spill] sm:$0xff] %v12043_v11  ;;  %v12050_v42 = vpop.f32.mrb[43].mxu0 }
 0x160   :  { %v12041_v35 = vmul.f32 0.70710677, %v12020_v37  ;;  %v984_v38 = vadd.f32 %v11759_v12, %v11998_v60  ;;  %v12048_v47 = vadd.f32 %v11628_v28, %v982_v27  ;;  %16898 = vst [vmem:[#allocation44_spill] sm:$0xff] %v12050_v42  ;;  %v2898_v49 = vadd.f32 1.0, %v2838_v39  ;;  %v12062_v28 = vpop.f32.mrb[44].mxu0 }
 0x161   :  { %v2247_v53 = vadd.f32 -0.28449672, %v2187_v29  ;;  %v2008_v55 = vadd.f32 -1.4531521, %v1948_v61  ;;  %v12053_v56 = vmul.f32 0.5, %v11904_v9  ;;  %vm1592_vm11 = vcmp.ge.f32.partialorder %v11930_v30, 0.0 }
 0x162   :  { %v1777_v21 = vmul.f32 0.3275911, %v12038_v22  ;;  %v12057_v59 = vand.u32 2147483647, %v12041_v35  ;;  %v2629_v61 = vmul.f32 1.442695, %v2548_v26  ;;  %v2552_v27 = vmul.f32 %v2492_v43, %v11946_v0 }
 0x163   :  { %v2307_v54 = vmul.f32 %v11958_v62, %v2247_v53  ;;  %v2068_v29 = vmul.f32 %v12022_v1, %v2008_v55  ;;  %16899 = vst [vmem:[#allocation45_spill] sm:$0xff] %v12062_v28  ;;  %v2493_v9 = vsub.f32 0.0, %v11978_v36  ;;  %v12069_v2 = vpop.f32.mrb[45].mxu0  ;;  %v2843_v53 = vmul.f32 %v2783_v31, %v11943_v3  ;;  %v16901_v55 = vld [vmem:[#allocation4_spill] sm:$0xff] }
 0x164   :  { %v12064_v12 = vpop.eup %10538  ;;  %v1837_v39 = vadd.f32 1.0, %v1777_v21  ;;  %v1778_v60 = vmul.f32 0.3275911, %v12057_v59  ;;  %16900 = vst [vmem:[#allocation46_spill] sm:$0xff] %v12069_v2  ;;  %v12074_v11 = vadd.f32 %v16901_v55, %v984_v38  ;;  %v16902_v28 = vld [vmem:[#allocation20_spill] sm:$0xff]  ;;  %v12082_v43 = vsel %vm1592_vm11, 1.0, %v16870_v24 }
 0x165   :  { %v2128_v42 = vadd.f32 1.4214138, %v2068_v29  ;;  %v1952_v26 = vmul.f32 1.0614054, %v12064_v12  ;;  %v12077_v63 = vmul.f32 %v2898_v49, %v16902_v28  ;;  %v2367_v13 = vadd.f32 0.2548296, %v2307_v54 }
 0x166   :  { %10544 = vrcp.f32 %v1837_v39  ;;  %v1838_v0 = vadd.f32 1.0, %v1778_v60  ;;  %v12085_v3 = vmul.f32 0.5, %v11936_v18  ;;  %v12088_v31 = vmul.f32 0.70710677, %v12048_v47 }
 0x167   :  { %v2012_v21 = vadd.f32 -1.4531521, %v1952_v26  ;;  %v2188_v49 = vmul.f32 %v12022_v1, %v2128_v42  ;;  %v2637_v29 = vmul.f32 1.442695, %v2552_v27  ;;  %vm1593_vm12 = vcmp.ge.f32.partialorder %v11962_v6, 0.0 }
 0x168   :  { %v12090_v38 = vpop.eup %10540  ;;  %v2553_v60 = vmul.f32 %v2493_v9, %v11978_v36  ;;  %v2903_v54 = vadd.f32 1.0, %v2843_v53  ;;  %10546 = vpow2.f32 %v2629_v61  ;;  %v2427_v39 = vmul.f32 %v11958_v62, %v2367_v13 }
 0x169   :  { %v2072_v30 = vmul.f32 %v12064_v12, %v2012_v21  ;;  %v1953_v28 = vmul.f32 1.0614054, %v12090_v38  ;;  %v10543_v18 = vpop.eup %10542  ;;  %10548 = vrcp.f32 %v1838_v0  ;;  %v12099_v26 = vand.u32 2147483647, %v12088_v31 }
 0x16a   :  { %v12102_v42 = vmul.f32 0.70710677, %v12074_v11  ;;  %v12105_v6 = vsel %vm1593_vm12, 1.0, %v16870_v24  ;;  %v2497_v61 = vsub.f32 0.0, %v12038_v22  ;;  %v2248_v9 = vadd.f32 -0.28449672, %v2188_v49 }
 0x16b   :  { %v2132_v27 = vadd.f32 1.4214138, %v2072_v30  ;;  %v2013_v36 = vadd.f32 -1.4531521, %v1953_v28  ;;  %10550 = vpow2.f32 %v2637_v29  ;;  %v2639_v53 = vmul.f32 1.442695, %v2553_v60 }
 0x16c   :  { %v1782_v55 = vmul.f32 0.3275911, %v12099_v26  ;;  %v12110_v62 = vmul.f32 %v2903_v54, %v11917_v58  ;;  %v12115_v21 = vmul.f32 0.5, %v12012_v17  ;;  %v2727_v30 = vmul.f32 %v10543_v18, %v2427_v39  ;;  %v12131_v39 = vpop.permute.xlu0 %240 }
 0x16d   :  { %v2192_v13 = vmul.f32 %v12064_v12, %v2132_v27  ;;  %v2073_v0 = vmul.f32 %v12090_v38, %v2013_v36  ;;  %vm1597_vm13 = vcmp.ge.f32.partialorder %v12031_v25, 0.0  ;;  %v12119_v49 = vand.u32 2147483647, %v12102_v42  ;;  %16903 = vst [vmem:[#allocation4_spill] sm:$0xff] %v12131_v39 }
 0x16e   :  { %v1842_v28 = vadd.f32 1.0, %v1782_v55  ;;  %v2557_v60 = vmul.f32 %v2497_v61, %v12038_v22  ;;  %vm1598_vm14 = vcmp.ge.f32.partialorder %v12041_v35, 0.0  ;;  %v2498_v58 = vsub.f32 0.0, %v12057_v59 }
 0x16f   :  { %v2252_v29 = vadd.f32 -0.28449672, %v2192_v13  ;;  %v2308_v27 = vmul.f32 %v12022_v1, %v2248_v9  ;;  %v12128_v17 = vmul.f32 0.5, %v12020_v37  ;;  %v1783_v18 = vmul.f32 0.3275911, %v12119_v49 }
 0x170   :  { %v12124_v54 = vpop.eup %10544  ;;  %10552 = vrcp.f32 %v1842_v28  ;;  %v2133_v55 = vadd.f32 1.4214138, %v2073_v0  ;;  %v12137_v22 = vsel %vm1597_vm13, 1.0, %v16870_v24  ;;  %v2787_v35 = vsub.f32 1.0, %v2727_v30  ;;  %v16904_v0 = vld [vmem:[#allocation17_spill] sm:$0xff] }
 0x171   :  { %v2312_v36 = vmul.f32 %v12064_v12, %v2252_v29  ;;  %10554 = vpow2.f32 %v2639_v53  ;;  %v1957_v61 = vmul.f32 1.0614054, %v12124_v54  ;;  %v12141_v37 = vsel %vm1598_vm14, 1.0, %v16870_v24 }
 0x172   :  { %v1843_v9 = vadd.f32 1.0, %v1783_v18  ;;  %v10547_v13 = vpop.eup %10546  ;;  %v2647_v2 = vmul.f32 1.442695, %v2557_v60  ;;  %v2558_v45 = vmul.f32 %v2498_v58, %v12057_v59  ;;  %v988_v53 = vadd.f32 %v16904_v0, %v12131_v39 }
 0x173   :  { %v2372_v28 = vadd.f32 0.2548296, %v2312_v36  ;;  %v12146_v29 = vpop.eup %10548  ;;  %v2368_v25 = vadd.f32 0.2548296, %v2308_v27  ;;  %v2017_v23 = vadd.f32 -1.4531521, %v1957_v61  ;;  %v2193_v18 = vmul.f32 %v12090_v38, %v2133_v55 }
 0x174   :  { %v12149_v30 = vmul.f32 0.5, %v12048_v47  ;;  %10556 = vrcp.f32 %v1843_v9  ;;  %v1958_v36 = vmul.f32 1.0614054, %v12146_v29  ;;  %v2502_v60 = vsub.f32 0.0, %v12099_v26  ;;  %v16905_v27 = vld [vmem:[#allocation18_spill] sm:$0xff] }
 0x175   :  { %v2432_v14 = vmul.f32 %v12064_v12, %v2372_v28  ;;  %v10551_v59 = vpop.eup %10550  ;;  %v2847_v58 = vmul.f32 %v2787_v35, %v11992_v33  ;;  %v2077_v0 = vmul.f32 %v12124_v54, %v2017_v23  ;;  %v990_v61 = vadd.f32 %v16905_v27, %v12131_v39 }
 0x176   :  { %v12160_v47 = vadd.f32 %v16906_v15, %v988_v53  ;;  %10558 = vpow2.f32 %v2647_v2  ;;  %v2018_v12 = vadd.f32 -1.4531521, %v1958_v36  ;;  %v12162_v28 = vmul.f32 1.442695, %v2558_v45  ;;  %v16907_v53 = vld [vmem:[#allocation7_spill] sm:$0xff] }
 0x177   :  { %v2732_v9 = vmul.f32 %v10551_v59, %v2432_v14  ;;  %v2428_v55 = vmul.f32 %v12022_v1, %v2368_v25  ;;  %v2137_v8 = vadd.f32 1.4214138, %v2077_v0  ;;  %v12166_v41 = vmul.f32 0.5, %v12074_v11 }
 0x178   :  { %v12169_v33 = vmul.f32 0.70710677, %v12160_v47  ;;  %v2253_v35 = vadd.f32 -0.28449672, %v2193_v18  ;;  %v2078_v27 = vmul.f32 %v12146_v29, %v2018_v12  ;;  %v2562_v15 = vmul.f32 %v2502_v60, %v12099_v26 }
 0x179   :  { %v2792_v23 = vsub.f32 1.0, %v2732_v9  ;;  %v2907_v2 = vadd.f32 1.0, %v2847_v58  ;;  %v2197_v45 = vmul.f32 %v12124_v54, %v2137_v8  ;;  %v12180_v11 = vadd.f32 %v16907_v53, %v990_v61  ;;  %v12188_v8 = vpop.permute.xlu1 %245 }
 0x17a   :  { %v12173_v14 = vpop.eup %10552  ;;  %v12177_v1 = vand.u32 2147483647, %v12169_v33  ;;  %v2138_v18 = vadd.f32 1.4214138, %v2078_v27  ;;  %v2503_v26 = vsub.f32 0.0, %v12119_v49  ;;  %v2728_v60 = vmul.f32 %v10547_v13, %v2428_v55  ;;  %16908 = vst [vmem:[#allocation20_spill] sm:$0xff] %v12188_v8 }
 0x17b   :  { %v12182_v25 = vpop.eup %10554  ;;  %v2852_v36 = vmul.f32 %v2792_v23, %v12082_v43  ;;  %v1962_v59 = vmul.f32 1.0614054, %v12173_v14  ;;  %v2257_v0 = vadd.f32 -0.28449672, %v2197_v45  ;;  %vm1602_vm15 = vcmp.ge.f32.partialorder %v12088_v31, 0.0  ;;  %v12193_v43 = vpop.f32.mrb[46].mxu0 }
 0x17c   :  { %v1787_v58 = vmul.f32 0.3275911, %v12177_v1  ;;  %v2313_v61 = vmul.f32 %v12090_v38, %v2253_v35  ;;  %v2198_v12 = vmul.f32 %v12146_v29, %v2138_v18  ;;  %16909 = vst [vmem:[#allocation17_spill] sm:$0xff] %v12193_v43  ;;  %v12198_v27 = vmul.f32 %v2907_v2, %v11951_v4  ;;  %v12201_v39 = vpop.f32.mrb[47].mxu0 }
 0x17d   :  { %v2912_v9 = vadd.f32 1.0, %v2852_v36  ;;  %v2022_v53 = vadd.f32 -1.4531521, %v1962_v59  ;;  %v2317_v13 = vmul.f32 %v12124_v54, %v2257_v0  ;;  %v2657_v55 = vmul.f32 1.442695, %v2562_v15  ;;  %16910 = vst [vmem:[#allocation18_spill] sm:$0xff] %v12201_v39 }
 0x17e   :  { %v12195_v23 = vpop.eup %10556  ;;  %v1847_v45 = vadd.f32 1.0, %v1787_v58  ;;  %vm1603_vm0 = vcmp.ge.f32.partialorder %v12102_v42, 0.0  ;;  %v2563_v18 = vmul.f32 %v2503_v26, %v12119_v49  ;;  %v16911_v59 = vld [vmem:[#allocation19_spill] sm:$0xff]  ;;  %v2788_v4 = vsub.f32 1.0, %v2728_v60 }
 0x17f   :  { %v12204_v36 = vmul.f32 %v2912_v9, %v12053_v56  ;;  %v2082_v35 = vmul.f32 %v12173_v14, %v2022_v53  ;;  %v992_v43 = vadd.f32 %v16911_v59, %v12188_v8  ;;  %v2377_v2 = vadd.f32 0.2548296, %v2317_v13 }
 0x180   :  { %v1963_v0 = vmul.f32 1.0614054, %v12195_v23  ;;  %10560 = vrcp.f32 %v1847_v45  ;;  %v10559_v15 = vpop.eup %10558  ;;  %v2373_v56 = vadd.f32 0.2548296, %v2313_v61  ;;  %v2258_v9 = vadd.f32 -0.28449672, %v2198_v12 }
 0x181   :  { %v2142_v39 = vadd.f32 1.4214138, %v2082_v35  ;;  %v2437_v53 = vmul.f32 %v12124_v54, %v2377_v2  ;;  %10562 = vpow2.f32 %v2657_v55  ;;  %v12216_v49 = vmul.f32 0.70710677, %v12180_v11  ;;  %v16912_v45 = vld [vmem:[#allocation21_spill] sm:$0xff] }
 0x182   :  { %v2023_v48 = vadd.f32 -1.4531521, %v1963_v0  ;;  %v2659_v13 = vmul.f32 1.442695, %v2563_v18  ;;  %v994_v59 = vadd.f32 %v16912_v45, %v12188_v8  ;;  %v12224_v58 = vadd.f32 %v16913_v20, %v992_v43 }
 0x183   :  { %v2202_v60 = vmul.f32 %v12173_v14, %v2142_v39  ;;  %v2848_v54 = vmul.f32 %v2788_v4, %v12028_v40  ;;  %v2737_v12 = vmul.f32 %v10559_v15, %v2437_v53  ;;  %v12231_v35 = vand.u32 2147483647, %v12216_v49 }
 0x184   :  { %v2083_v55 = vmul.f32 %v12195_v23, %v2023_v48  ;;  %v2433_v39 = vmul.f32 %v12090_v38, %v2373_v56  ;;  %10564 = vpow2.f32 %v12162_v28  ;;  %v2507_v20 = vsub.f32 0.0, %v12177_v1  ;;  %v16916_v28 = vld [vmem:[#allocation10_spill] sm:$0xff] }
 0x185   :  { %v12218_v26 = vpop.f32.mrb[24].mxu1  ;;  %v2262_v18 = vadd.f32 -0.28449672, %v2202_v60  ;;  %v2318_v0 = vmul.f32 %v12146_v29, %v2258_v9  ;;  %v1662_v48 = vsel %vm1602_vm15, 1.0, %v16870_v24  ;;  %v1788_v4 = vmul.f32 0.3275911, %v12231_v35 }
 0x186   :  { %v12226_v61 = vpop.f32.mrb[25].mxu1  ;;  %v2143_v40 = vadd.f32 1.4214138, %v2083_v55  ;;  %v2797_v15 = vsub.f32 1.0, %v2737_v12  ;;  %v12247_v38 = vmul.f32 0.70710677, %v12224_v58  ;;  %v12250_v56 = vadd.f32 %v16916_v28, %v994_v59 }
 0x187   :  { %v12233_v2 = vpop.f32.mrb[26].mxu1  ;;  %v2322_v53 = vmul.f32 %v12173_v14, %v2262_v18  ;;  %v2908_v60 = vadd.f32 1.0, %v2848_v54  ;;  %10566 = vpow2.f32 %v2659_v13  ;;  %v1848_v9 = vadd.f32 1.0, %v1788_v4 }
 0x188   :  { %16914 = vst [vmem:[#allocation6_spill] sm:$0xff] %v12233_v2  ;;  %v12238_v43 = vpop.f32.mrb[27].mxu1  ;;  %v2203_v45 = vmul.f32 %v12195_v23, %v2143_v40  ;;  %v2733_v31 = vmul.f32 %v12182_v25, %v2433_v39  ;;  %v2567_v55 = vmul.f32 %v2507_v20, %v12177_v1  ;;  %v12256_v12 = vand.u32 2147483647, %v12247_v38 }
 0x189   :  { %16915 = vst [vmem:[#allocation7_spill] sm:$0xff] %v12238_v43  ;;  %v2382_v8 = vadd.f32 0.2548296, %v2322_v53  ;;  %v2378_v43 = vadd.f32 0.2548296, %v2318_v0  ;;  %v12263_v59 = vsel %vm1603_vm0, 1.0, %v16870_v24  ;;  %10568 = vrcp.f32 %v1848_v9 }
 0x18a   :  { %v12258_v18 = vpop.eup %10560  ;;  %v2263_v54 = vadd.f32 -0.28449672, %v2203_v45  ;;  %v2857_v25 = vmul.f32 %v2797_v15, %v12137_v22  ;;  %v12270_v1 = vmul.f32 0.5, %v12160_v47  ;;  %v12276_v42 = vmul.f32 %v2908_v60, %v12015_v5 }
 0x18b   :  { %v2442_v39 = vmul.f32 %v12173_v14, %v2382_v8  ;;  %v1967_v20 = vmul.f32 1.0614054, %v12258_v18  ;;  %v10563_v0 = vpop.eup %10562  ;;  %vm1607_vm1 = vcmp.ge.f32.partialorder %v12169_v33, 0.0  ;;  %v1792_v53 = vmul.f32 0.3275911, %v12256_v12 }
 0x18c   :  { %v2323_v4 = vmul.f32 %v12195_v23, %v2263_v54  ;;  %v2793_v14 = vsub.f32 1.0, %v2733_v31  ;;  %v2667_v15 = vmul.f32 1.442695, %v2567_v55  ;;  %v2438_v45 = vmul.f32 %v12146_v29, %v2378_v43 }
 0x18d   :  { %v12265_v13 = vpop.f32.mrb[28].mxu1  ;;  %v2742_v8 = vmul.f32 %v10563_v0, %v2442_v39  ;;  %v2027_v47 = vadd.f32 -1.4531521, %v1967_v20  ;;  %v2508_v9 = vsub.f32 0.0, %v12231_v35  ;;  %v1852_v5 = vadd.f32 1.0, %v1792_v53  ;;  %v12294_v39 = vpop.permute.xlu0 %250 }
 0x18e   :  { %16917 = vst [vmem:[#allocation19_spill] sm:$0xff] %v12265_v13  ;;  %v12273_v40 = vpop.f32.mrb[29].mxu1  ;;  %v12288_v60 = vmul.f32 0.70710677, %v12250_v56  ;;  %v10565_v54 = vpop.eup %10564  ;;  %v2917_v33 = vadd.f32 1.0, %v2857_v25  ;;  %v12291_v13 = vsel %vm1607_vm1, 1.0, %v16870_v24  ;;  %v2853_v43 = vmul.f32 %v2793_v14, %v12105_v6 }
 0x18f   :  { %16918 = vst [vmem:[#allocation21_spill] sm:$0xff] %v12273_v40  ;;  %v12281_v22 = vpop.f32.mrb[30].mxu1  ;;  %v2802_v40 = vsub.f32 1.0, %v2742_v8  ;;  %v2087_v31 = vmul.f32 %v12258_v18, %v2027_v47  ;;  %16921 = vst [vmem:[#allocation47_spill] sm:$0xff] %v12294_v39  ;;  %v2383_v55 = vadd.f32 0.2548296, %v2323_v4  ;;  %10570 = vrcp.f32 %v1852_v5  ;;  %v12303_v53 = vpop.permute.xlu1 %255 }
 0x190   :  { %16919 = vst [vmem:[#allocation8_spill] sm:$0xff] %v12281_v22  ;;  %v12283_v28 = vpop.f32.mrb[31].mxu1  ;;  %v12297_v20 = vmul.f32 0.5, %v12180_v11  ;;  %v12300_v29 = vand.u32 2147483647, %v12288_v60  ;;  %10572 = vpow2.f32 %v2667_v15  ;;  %16922 = vst [vmem:[#allocation48_spill] sm:$0xff] %v12303_v53  ;;  %v2568_v47 = vmul.f32 %v2508_v9, %v12231_v35 }
 0x191   :  { %16920 = vst [vmem:[#allocation10_spill] sm:$0xff] %v12283_v28  ;;  %v2862_v0 = vmul.f32 %v2802_v40, %v1662_v48  ;;  %v2147_v25 = vadd.f32 1.4214138, %v2087_v31  ;;  %v10567_v8 = vpop.eup %10566  ;;  %v2738_v28 = vmul.f32 %v10565_v54, %v2438_v45  ;;  %v16923_v11 = vld [vmem:[#allocation22_spill] sm:$0xff]  ;;  %v12312_v19 = vmul.f32 %v2917_v33, %v12115_v21  ;;  %v16926_v9 = vld [vmem:[#allocation23_spill] sm:$0xff]  ;;  %v16927_v31 = vld [vmem:[#allocation24_spill] sm:$0xff] }
 0x192   :  { %v1793_v4 = vmul.f32 0.3275911, %v12300_v29  ;;  %v998_v22 = vadd.f32 %v16923_v11, %v12294_v39  ;;  %v2512_v40 = vsub.f32 0.0, %v12256_v12  ;;  %v2443_v35 = vmul.f32 %v12195_v23, %v2383_v55  ;;  %v16930_v23 = vld [vmem:[#allocation25_spill] sm:$0xff] }
 0x193   :  { %v2922_v6 = vadd.f32 1.0, %v2862_v0  ;;  %v2207_v48 = vmul.f32 %v12258_v18, %v2147_v25  ;;  %v12318_v15 = vpop.eup %10568  ;;  %v1000_v54 = vadd.f32 %v16926_v9, %v12294_v39  ;;  %v1002_v11 = vadd.f32 %v16927_v31, %v12303_v53 }
 0x194   :  { %v1853_v45 = vadd.f32 1.0, %v1793_v4  ;;  %v1968_v25 = vmul.f32 1.0614054, %v12318_v15  ;;  %v2913_v44 = vadd.f32 1.0, %v2853_v43  ;;  %vm1608_vm2 = vcmp.ge.f32.partialorder %v12216_v49, 0.0  ;;  %v16932_v43 = vld [vmem:[#allocation13_spill] sm:$0xff] }
 0x195   :  { %v12309_v5 = vpop.f32.mrb[32].mxu1  ;;  %v12328_v33 = vmul.f32 %v2922_v6, %v12149_v30  ;;  %v2267_v0 = vadd.f32 -0.28449672, %v2207_v48  ;;  %v1004_v55 = vadd.f32 %v16930_v23, %v12303_v53  ;;  %v2798_v9 = vsub.f32 1.0, %v2738_v28  ;;  %v16933_v53 = vld [vmem:[#allocation14_spill] sm:$0xff] }
 0x196   :  { %16924 = vst [vmem:[#allocation22_spill] sm:$0xff] %v12309_v5  ;;  %v12316_v14 = vpop.f32.mrb[33].mxu1  ;;  %10574 = vrcp.f32 %v1853_v45  ;;  %v2028_v48 = vadd.f32 -1.4531521, %v1968_v25  ;;  %v2743_v31 = vmul.f32 %v10567_v8, %v2443_v35  ;;  %v2669_v39 = vmul.f32 1.442695, %v2568_v47 }
 0x197   :  { %16925 = vst [vmem:[#allocation49_spill] sm:$0xff] %v12316_v14  ;;  %v12325_v21 = vpop.f32.mrb[34].mxu1  ;;  %v16929_v14 = vld [vmem:[#allocation11_spill] sm:$0xff]  ;;  %v2327_v6 = vmul.f32 %v12258_v18, %v2267_v0  ;;  %v2572_v23 = vmul.f32 %v2512_v40, %v12256_v12  ;;  %v12351_v28 = vadd.f32 %v16933_v53, %v1002_v11  ;;  %v12359_v8 = vmul.f32 %v2913_v44, %v12085_v3 }
 0x198   :  { %16928 = vst [vmem:[#allocation23_spill] sm:$0xff] %v12325_v21  ;;  %v12332_v5 = vadd.f32 %v16929_v14, %v998_v22  ;;  %v12337_v4 = vpop.f32.mrb[35].mxu1  ;;  %v12346_v14 = vadd.f32 %v16932_v43, %v1000_v54  ;;  %v2088_v45 = vmul.f32 %v12318_v15, %v2028_v48  ;;  %v2513_v35 = vsub.f32 0.0, %v12300_v29 }
 0x199   :  { %16931 = vst [vmem:[#allocation24_spill] sm:$0xff] %v12337_v4  ;;  %v16934_v4 = vld [vmem:[#allocation15_spill] sm:$0xff]  ;;  %v12356_v0 = vpop.eup %10570  ;;  %v2387_v47 = vadd.f32 0.2548296, %v2327_v6  ;;  %v2858_v48 = vmul.f32 %v2798_v9, %v12141_v37  ;;  %v12367_v12 = vsel %vm1608_vm2, 1.0, %v16870_v24  ;;  %v2803_v44 = vsub.f32 1.0, %v2743_v31 }
 0x19a   :  { %v12343_v22 = vmul.f32 0.70710677, %v12332_v5  ;;  %v12354_v30 = vadd.f32 %v16934_v4, %v1004_v55  ;;  %v10573_v25 = vpop.eup %10572  ;;  %v2148_v53 = vadd.f32 1.4214138, %v2088_v45  ;;  %v1972_v40 = vmul.f32 1.0614054, %v12356_v0 }
 0x19b   :  { %v12373_v3 = vmul.f32 0.5, %v12224_v58  ;;  %v12376_v4 = vmul.f32 0.70710677, %v12346_v14  ;;  %10576 = vpow2.f32 %v2669_v39  ;;  %v2677_v49 = vmul.f32 1.442695, %v2572_v23 }
 0x19c   :  { %v1737_v54 = vand.u32 2147483647, %v12343_v22  ;;  %v2208_v37 = vmul.f32 %v12318_v15, %v2148_v53  ;;  %v2032_v9 = vadd.f32 -1.4531521, %v1972_v40  ;;  %v2447_v43 = vmul.f32 %v12258_v18, %v2387_v47 }
 0x19d   :  { %v12370_v11 = vpop.f32.mrb[36].mxu1  ;;  %v2573_v45 = vmul.f32 %v2513_v35, %v12300_v29  ;;  %v1738_v31 = vand.u32 2147483647, %v12376_v4  ;;  %v2918_v21 = vadd.f32 1.0, %v2858_v48  ;;  %vm1612_vm3 = vcmp.ge.f32.partialorder %v12247_v38, 0.0 }
 0x19e   :  { %16935 = vst [vmem:[#allocation11_spill] sm:$0xff] %v12370_v11  ;;  %v1797_v55 = vmul.f32 0.3275911, %v1737_v54  ;;  %v12379_v6 = vpop.f32.mrb[37].mxu1  ;;  %v2268_v2 = vadd.f32 -0.28449672, %v2208_v37  ;;  %v2092_v53 = vmul.f32 %v12356_v0, %v2032_v9  ;;  %v2863_v40 = vmul.f32 %v2803_v44, %v12263_v59 }
 0x19f   :  { %16936 = vst [vmem:[#allocation25_spill] sm:$0xff] %v12379_v6  ;;  %v12384_v58 = vpop.f32.mrb[38].mxu1  ;;  %v1798_v18 = vmul.f32 0.3275911, %v1738_v31  ;;  %v12394_v29 = vmul.f32 0.70710677, %v12351_v28  ;;  %v2747_v37 = vmul.f32 %v10573_v25, %v2447_v43 }
 0x1a0   :  { %v1857_v11 = vadd.f32 1.0, %v1797_v55  ;;  %16937 = vst [vmem:[#allocation13_spill] sm:$0xff] %v12384_v58  ;;  %v12388_v39 = vpop.f32.mrb[39].mxu1  ;;  %v12390_v23 = vpop.eup %10574  ;;  %v2328_v47 = vmul.f32 %v12318_v15, %v2268_v2  ;;  %v2152_v35 = vadd.f32 1.4214138, %v2092_v53  ;;  %v2517_v55 = vsub.f32 0.0, %v1737_v54 }
 0x1a1   :  { %16938 = vst [vmem:[#allocation14_spill] sm:$0xff] %v12388_v39  ;;  %v1973_v48 = vmul.f32 1.0614054, %v12390_v23  ;;  %v2679_v9 = vmul.f32 1.442695, %v2573_v45  ;;  %v1858_v58 = vadd.f32 1.0, %v1798_v18  ;;  %v12407_v2 = vmul.f32 %v2918_v21, %v12128_v17 }
 0x1a2   :  { %10578 = vrcp.f32 %v1857_v11  ;;  %v2388_v39 = vadd.f32 0.2548296, %v2328_v47  ;;  %v12401_v59 = vsel %vm1612_vm3, 1.0, %v16870_v24  ;;  %v2212_v11 = vmul.f32 %v12356_v0, %v2152_v35 }
 0x1a3   :  { %10580 = vpow2.f32 %v2677_v49  ;;  %v2033_v44 = vadd.f32 -1.4531521, %v1973_v48  ;;  %v2923_v53 = vadd.f32 1.0, %v2863_v40  ;;  %v1742_v25 = vand.u32 2147483647, %v12394_v29 }
 0x1a4   :  { %10582 = vrcp.f32 %v1858_v58  ;;  %v2448_v43 = vmul.f32 %v12318_v15, %v2388_v39  ;;  %v2272_v45 = vadd.f32 -0.28449672, %v2212_v11  ;;  %v2577_v18 = vmul.f32 %v2517_v55, %v1737_v54 }
 0x1a5   :  { %v12404_v6 = vpop.f32.mrb[40].mxu1  ;;  %v2093_v38 = vmul.f32 %v12390_v23, %v2033_v44  ;;  %v2807_v47 = vsub.f32 1.0, %v2747_v37  ;;  %vm1613_vm4 = vcmp.ge.f32.partialorder %v12288_v60, 0.0  ;;  %v2518_v35 = vsub.f32 0.0, %v1738_v31 }
 0x1a6   :  { %16939 = vst [vmem:[#allocation15_spill] sm:$0xff] %v12404_v6  ;;  %v12410_v49 = vpop.f32.mrb[41].mxu1  ;;  %v1802_v48 = vmul.f32 0.3275911, %v1742_v25  ;;  %v10577_v6 = vpop.eup %10576  ;;  %v2332_v17 = vmul.f32 %v12356_v0, %v2272_v45  ;;  %10584 = vpow2.f32 %v2679_v9  ;;  %v12417_v58 = vmul.f32 0.70710677, %v12354_v30 }
 0x1a7   :  { %16940 = vst [vmem:[#allocation50_spill] sm:$0xff] %v12410_v49  ;;  %v2153_v21 = vadd.f32 1.4214138, %v2093_v38  ;;  %v2748_v40 = vmul.f32 %v10577_v6, %v2448_v43  ;;  %v3010_v15 = vpack.c.bf16 %v12003_v57, %v11985_v10  ;;  %v3015_v54 = vpack.c.bf16 %v12110_v62, %v12077_v63  ;;  %v12423_v39 = vpop.f32.mrb[42].mxu1 }
 0x1a8   :  { %v1862_v49 = vadd.f32 1.0, %v1802_v48  ;;  %v2983_v55 = vmul.f32 %v2923_v53, %v12166_v41  ;;  %v2392_v37 = vadd.f32 0.2548296, %v2332_v17  ;;  %v2687_v44 = vmul.f32 1.442695, %v2577_v18 }
 0x1a9   :  { %v2213_v11 = vmul.f32 %v12390_v23, %v2153_v21  ;;  %v2867_v45 = vmul.f32 %v2807_v47, %v12291_v13  ;;  %v2578_v6 = vmul.f32 %v2518_v35, %v1738_v31  ;;  %v12431_v43 = vand.u32 2147483647, %v12417_v58  ;;  %3060 = vmatprep.subr.bf16.mxu1 %v3010_v15 }
 0x1aa   :  { %10586 = vrcp.f32 %v1862_v49  ;;  %v2452_v10 = vmul.f32 %v12356_v0, %v2392_v37  ;;  %v2522_v41 = vsub.f32 0.0, %v1742_v25  ;;  %v16941_v62 = vpack.c.bf16 %v11872_v7, %v11869_v51 }
 0x1ab   :  { %v2273_v63 = vadd.f32 -0.28449672, %v2213_v11  ;;  %v2808_v38 = vsub.f32 1.0, %v2748_v40  ;;  %v1673_v13 = vsel %vm1613_vm4, 1.0, %v16870_v24  ;;  %v1803_v31 = vmul.f32 0.3275911, %v12431_v43 }
 0x1ac   :  { %v12427_v9 = vpop.eup %10578  ;;  %3061 = vmatpush1.bf16.msra.mxu1 %v16941_v62  ;;  %v3020_v0 = vpack.c.bf16 %v12359_v8, %v12276_v42  ;;  %10588 = vpow2.f32 %v2687_v44  ;;  %v2927_v51 = vadd.f32 1.0, %v2867_v45  ;;  %v2689_v7 = vmul.f32 1.442695, %v2578_v6  ;;  %v12452_v8 = vpop.f32.mrb[43].mxu1 }
 0x1ad   :  { %v1977_v57 = vmul.f32 1.0614054, %v12427_v9  ;;  %v10581_v53 = vpop.eup %10580  ;;  %3062 = vmatprep.subr.bf16.mxu1 %v3015_v54  ;;  %v2333_v18 = vmul.f32 %v12390_v23, %v2273_v63  ;;  %v1863_v48 = vadd.f32 1.0, %v1803_v31  ;;  %v3025_v17 = vpack.c.bf16 %v2983_v55, %v12407_v2 }
 0x1ae   :  { %v2752_v49 = vmul.f32 %v10581_v53, %v2452_v10  ;;  %v12445_v35 = vpop.eup %10582  ;;  %v2582_v15 = vmul.f32 %v2522_v41, %v1742_v25  ;;  %v16942_v42 = vpack.c.bf16 %v11970_v46, %v11967_v34  ;;  %v2868_v54 = vmul.f32 %v2808_v38, %v12367_v12  ;;  %v16943_v34 = vld [vmem:[#allocation3_spill] sm:$0xff] }
 0x1af   :  { %v2037_v47 = vadd.f32 -1.4531521, %v1977_v57  ;;  %v2393_v21 = vadd.f32 0.2548296, %v2333_v18  ;;  %v1978_v37 = vmul.f32 1.0614054, %v12445_v35  ;;  %10590 = vrcp.f32 %v1863_v48 }
 0x1b0   :  { %v2812_v60 = vsub.f32 1.0, %v2752_v49  ;;  %3063 = vmatpush1.bf16.msra.mxu1 %v16942_v42  ;;  %v12458_v2 = vadd.f32 %v11884_v32, %v11881_v50  ;;  %v10585_v55 = vpop.eup %10584  ;;  %v12464_v46 = vadd.f32 %v12218_v26, %v16943_v34  ;;  %v12467_v12 = vmul.f32 %v2927_v51, %v12270_v1 }
 0x1b1   :  { %v2097_v40 = vmul.f32 %v12427_v9, %v2037_v47  ;;  %3064 = vmatprep.subr.bf16.mxu1 %v3020_v0  ;;  %v2453_v25 = vmul.f32 %v12390_v23, %v2393_v21  ;;  %v2038_v45 = vadd.f32 -1.4531521, %v1978_v37  ;;  %v12471_v6 = vadd.f32 %v11898_v52, %v11894_v16 }
 0x1b2   :  { %v2872_v11 = vmul.f32 %v2812_v60, %v12401_v59  ;;  %v12475_v50 = vadd.f32 %v12226_v61, %v16943_v34  ;;  %v2697_v10 = vmul.f32 1.442695, %v2582_v15  ;;  %v16945_v26 = vpack.c.bf16 %v12204_v36, %v12198_v27 }
 0x1b3   :  { %v2157_v44 = vadd.f32 1.4214138, %v2097_v40  ;;  %16944 = vst [vmem:[#allocation3_spill] sm:$0xff] %v12471_v6  ;;  %v2753_v59 = vmul.f32 %v10585_v55, %v2453_v25  ;;  %v2928_v63 = vadd.f32 1.0, %v2868_v54  ;;  %v2098_v57 = vmul.f32 %v12445_v35, %v2038_v45 }
 0x1b4   :  { %v2932_v32 = vadd.f32 1.0, %v2872_v11  ;;  %3065 = vmatpush1.bf16.msra.mxu1 %v16945_v26  ;;  %v12481_v1 = vpop.eup %10586  ;;  %v2523_v16 = vsub.f32 0.0, %v12431_v43  ;;  %v12486_v52 = vmul.f32 0.70710677, %v12464_v46  ;;  %10592 = vpow2.f32 %v2689_v7 }
 0x1b5   :  { %v2217_v23 = vmul.f32 %v12427_v9, %v2157_v44  ;;  %3066 = vmatprep.subr.bf16.mxu1 %v3025_v17  ;;  %v2813_v41 = vsub.f32 1.0, %v2753_v59  ;;  %v1982_v53 = vmul.f32 1.0614054, %v12481_v1  ;;  %v2158_v38 = vadd.f32 1.4214138, %v2098_v57 }
 0x1b6   :  { %v2992_v61 = vmul.f32 %v2932_v32, %v12373_v3  ;;  %v1689_v27 = vand.u32 2147483647, %v12486_v52  ;;  %v12492_v36 = vmul.f32 0.70710677, %v12475_v50  ;;  %v10589_v31 = vpop.eup %10588  ;;  %v16946_v3 = vpack.c.bf16 %v12328_v33, %v12312_v19 }
 0x1b7   :  { %v2277_v62 = vadd.f32 -0.28449672, %v2217_v23  ;;  %v2873_v49 = vmul.f32 %v2813_v41, %v1673_v13  ;;  %v2042_v47 = vadd.f32 -1.4531521, %v1982_v53  ;;  %v1493_v51 = vmul.f32 0.5, %v12250_v56  ;;  %v12503_v13 = vpop.f32.mrb[44].mxu1 }
 0x1b8   :  { %v3029_v0 = vpack.c.bf16 %v2992_v61, %v12467_v12  ;;  %3067 = vmatpush1.bf16.msra.mxu1 %v16946_v3  ;;  %v2218_v7 = vmul.f32 %v12445_v35, %v2158_v38  ;;  %10594 = vpow2.f32 %v2697_v10  ;;  %v1749_v48 = vmul.f32 0.3275911, %v1689_v27  ;;  %v12513_v25 = vpop.f32.mrb[45].mxu1  ;;  %v16948_v61 = vld [vmem:[#allocation6_spill] sm:$0xff] }
 0x1b9   :  { %v2337_v18 = vmul.f32 %v12427_v9, %v2277_v62  ;;  %v2933_v17 = vadd.f32 1.0, %v2873_v49  ;;  %v2102_v21 = vmul.f32 %v12481_v1, %v2042_v47  ;;  %v2583_v40 = vmul.f32 %v2523_v16, %v12431_v43  ;;  %v12505_v15 = vpop.eup %10590  ;;  %v16947_v16 = vld [vmem:[#allocation5_spill] sm:$0xff]  ;;  %v16950_v49 = vld [vmem:[#allocation28_spill] sm:$0xff] }
 0x1ba   :  { %v2988_v42 = vmul.f32 %v2928_v63, %v12297_v20  ;;  %v2278_v19 = vadd.f32 -0.28449672, %v2218_v7  ;;  %v1809_v33 = vadd.f32 1.0, %v1749_v48  ;;  %v12509_v56 = vand.u32 2147483647, %v12492_v36 }
 0x1bb   :  { %v2397_v60 = vadd.f32 0.2548296, %v2337_v18  ;;  %v2993_v54 = vmul.f32 %v2933_v17, %v1493_v51  ;;  %v2162_v55 = vadd.f32 1.4214138, %v2102_v21  ;;  %v1983_v11 = vmul.f32 1.0614054, %v12505_v15 }
 0x1bc   :  { %vm1617_vm5 = vcmp.ge.f32.partialorder %v12343_v22, 0.0  ;;  %v2338_v43 = vmul.f32 %v12445_v35, %v2278_v19  ;;  %10596 = vrcp.f32 %v1809_v33  ;;  %v1750_v20 = vmul.f32 0.3275911, %v12509_v56  ;;  %v16951_v17 = vld [vmem:[#allocation29_spill] sm:$0xff] }
 0x1bd   :  { %v2457_v37 = vmul.f32 %v12427_v9, %v2397_v60  ;;  %v2222_v44 = vmul.f32 %v12481_v1, %v2162_v55  ;;  %v2043_v12 = vadd.f32 -1.4531521, %v1983_v11  ;;  %v3030_v45 = vpack.c.bf16 %v2993_v54, %v2988_v42  ;;  %v16952_v60 = vld [vmem:[#allocation30_spill] sm:$0xff]  ;;  %v16953_v42 = vld [vmem:[#allocation7_spill] sm:$0xff] }
 0x1be   :  { %v2469_v32 = vsub.f32 0.0, %v1689_v27  ;;  %v2398_v23 = vadd.f32 0.2548296, %v2338_v43  ;;  %v2699_v9 = vmul.f32 1.442695, %v2583_v40  ;;  %v1810_v10 = vadd.f32 1.0, %v1750_v20  ;;  %v10593_v62 = vpop.eup %10592 }
 0x1bf   :  { %v2757_v59 = vmul.f32 %v10589_v31, %v2457_v37  ;;  %v12520_v26 = vmul.f32 0.5, %v12332_v5  ;;  %v2282_v63 = vadd.f32 -0.28449672, %v2222_v44  ;;  %v2103_v57 = vmul.f32 %v12505_v15, %v2043_v12  ;;  %3068 = vmatprep.subr.bf16.mxu1 %v3030_v45  ;;  %v16949_v31 = vld [vmem:[#allocation27_spill] sm:$0xff] }
 0x1c0   :  { %v12525_v41 = vadd.f32 %v16948_v61, %v16947_v16  ;;  %v12528_v53 = vmul.f32 0.5, %v12346_v14  ;;  %v2458_v38 = vmul.f32 %v12445_v35, %v2398_v23  ;;  %3069 = vmatpush1.bf16.msra.mxu1 %v3029_v0  ;;  %10598 = vrcp.f32 %v1810_v10  ;;  %v12543_v35 = vpop.f32.mrb[46].mxu1  ;;  %v16954_v23 = vld [vmem:[#allocation31_spill] sm:$0xff] }
 0x1c1   :  { %v12533_v5 = vadd.f32 %v16950_v49, %v16949_v31  ;;  %v1677_v18 = vsel %vm1617_vm5, 1.0, %v16870_v24  ;;  %v2342_v47 = vmul.f32 %v12481_v1, %v2282_v63  ;;  %v2163_v3 = vadd.f32 1.4214138, %v2103_v57  ;;  %v12584_v31 = vpop.f32.mrb[47].mxu1 }
 0x1c2   :  { %v2529_v51 = vmul.f32 %v2469_v32, %v1689_v27  ;;  %v10595_v7 = vpop.eup %10594  ;;  %v2817_v48 = vsub.f32 1.0, %v2757_v59  ;;  %vm1618_vm6 = vcmp.ge.f32.partialorder %v12376_v4, 0.0  ;;  %10600 = vpow2.f32 %v2699_v9  ;;  %v16955_v9 = vld [vmem:[#allocation32_spill] sm:$0xff] }
 0x1c3   :  { %v12541_v14 = vmul.f32 0.70710677, %v12525_v41  ;;  %vm1622_vm7 = vcmp.ge.f32.partialorder %v12394_v29, 0.0  ;;  %v2402_v0 = vadd.f32 0.2548296, %v2342_v47  ;;  %v2223_v22 = vmul.f32 %v12505_v15, %v2163_v3 }
 0x1c4   :  { %v12549_v21 = vadd.f32 %v16952_v60, %v16951_v17  ;;  %v2758_v27 = vmul.f32 %v10593_v62, %v2458_v38  ;;  %v1502_v40 = vmul.f32 0.5, %v12351_v28  ;;  %v12557_v19 = vadd.f32 %v16953_v42, %v16947_v16  ;;  %v16960_v60 = vld [vmem:[#allocation35_spill] sm:$0xff] }
 0x1c5   :  { %v12553_v4 = vand.u32 2147483647, %v12541_v14  ;;  %v1678_v33 = vsel %vm1618_vm6, 1.0, %v16870_v24  ;;  %v2462_v29 = vmul.f32 %v12481_v1, %v2402_v0  ;;  %v2283_v54 = vadd.f32 -0.28449672, %v2223_v22  ;;  %v16957_v0 = vld [vmem:[#allocation9_spill] sm:$0xff] }
 0x1c6   :  { %v2591_v37 = vmul.f32 1.442695, %v2529_v51  ;;  %v12561_v55 = vpop.eup %10596  ;;  %v2877_v11 = vmul.f32 %v2817_v48, %v1677_v18  ;;  %v1682_v43 = vsel %vm1622_vm7, 1.0, %v16870_v24  ;;  %v12565_v28 = vmul.f32 0.5, %v12354_v30  ;;  %v16958_v22 = vld [vmem:[#allocation19_spill] sm:$0xff] }
 0x1c7   :  { %v1754_v20 = vmul.f32 0.3275911, %v12553_v4  ;;  %v2762_v44 = vmul.f32 %v10595_v7, %v2462_v29  ;;  %vm1623_vm8 = vcmp.ge.f32.partialorder %v12417_v58, 0.0  ;;  %v2343_v12 = vmul.f32 %v12505_v15, %v2283_v54 }
 0x1c8   :  { %v1929_v45 = vmul.f32 1.0614054, %v12561_v55  ;;  %v2818_v1 = vsub.f32 1.0, %v2758_v27  ;;  %v12572_v59 = vmul.f32 0.70710677, %v12557_v19  ;;  %v12576_v10 = vadd.f32 %v16955_v9, %v16954_v23 }
 0x1c9   :  { %v1814_v32 = vadd.f32 1.0, %v1754_v20  ;;  %v2822_v30 = vsub.f32 1.0, %v2762_v44  ;;  %v2403_v63 = vadd.f32 0.2548296, %v2343_v12  ;;  %10602 = vpow2.f32 %v2591_v37 }
 0x1ca   :  { %16956 = vst [vmem:[#allocation5_spill] sm:$0xff] %v12576_v10  ;;  %v1989_v57 = vadd.f32 -1.4531521, %v1929_v45  ;;  %v12578_v61 = vpop.eup %10598  ;;  %v2937_v58 = vadd.f32 1.0, %v2877_v11  ;;  %v1683_v62 = vsel %vm1623_vm8, 1.0, %v16870_v24  ;;  %v12582_v38 = vmul.f32 0.5, %v12464_v46 }
 0x1cb   :  { %10604 = vrcp.f32 %v1814_v32  ;;  %v2882_v49 = vmul.f32 %v2822_v30, %v1682_v43  ;;  %v2463_v18 = vmul.f32 %v12505_v15, %v2403_v63  ;;  %v1930_v3 = vmul.f32 1.0614054, %v12578_v61  ;;  %v16959_v46 = vld [vmem:[#allocation33_spill] sm:$0xff] }
 0x1cc   :  { %v2049_v47 = vmul.f32 %v12561_v55, %v1989_v57  ;;  %v10601_v51 = vpop.eup %10600  ;;  %v2878_v7 = vmul.f32 %v2818_v1, %v1678_v33  ;;  %v12590_v48 = vand.u32 2147483647, %v12572_v59  ;;  %v12594_v17 = vadd.f32 %v16958_v22, %v16957_v0 }
 0x1cd   :  { %v12598_v27 = vadd.f32 %v16960_v60, %v16959_v46  ;;  %v2942_v42 = vadd.f32 1.0, %v2882_v49  ;;  %v2763_v29 = vmul.f32 %v10601_v51, %v2463_v18  ;;  %v1990_v54 = vadd.f32 -1.4531521, %v1930_v3 }
 0x1ce   :  { %v2109_v15 = vadd.f32 1.4214138, %v2049_v47  ;;  %v2997_v37 = vmul.f32 %v2937_v58, %v12520_v26  ;;  %v2470_v11 = vsub.f32 0.0, %v12509_v56  ;;  %v1755_v33 = vmul.f32 0.3275911, %v12590_v48 }
 0x1cf   :  { %16961 = vst [vmem:[#allocation6_spill] sm:$0xff] %v12598_v27  ;;  %v12604_v43 = vmul.f32 0.70710677, %v12594_v17  ;;  %v3002_v20 = vmul.f32 %v2942_v42, %v1502_v40  ;;  %v2823_v44 = vsub.f32 1.0, %v2763_v29  ;;  %v2050_v45 = vmul.f32 %v12578_v61, %v1990_v54 }
 0x1d0   :  { %v2169_v12 = vmul.f32 %v12561_v55, %v2109_v15  ;;  %v2938_v1 = vadd.f32 1.0, %v2878_v7  ;;  %v2474_v32 = vsub.f32 0.0, %v12553_v4  ;;  %v1815_v23 = vadd.f32 1.0, %v1755_v33 }
 0x1d1   :  { %v12610_v9 = vand.u32 2147483647, %v12604_v43  ;;  %v3034_v26 = vpack.c.bf16 %v3002_v20, %v2997_v37  ;;  %v2883_v30 = vmul.f32 %v2823_v44, %v1683_v62  ;;  %v2110_v57 = vadd.f32 1.4214138, %v2050_v45  ;;  %v16963_v37 = vld [vmem:[#allocation12_spill] sm:$0xff] }
 0x1d2   :  { %v2229_v63 = vadd.f32 -0.28449672, %v2169_v12  ;;  %vm3056_vm9 = vcmask 785408   ;;  %v12613_v58 = vmul.f32 0.5, %v12475_v50  ;;  %v2530_v40 = vmul.f32 %v2470_v11, %v12509_v56  ;;  %v16962_v56 = vld [vmem:[#allocation21_spill] sm:$0xff]  ;;  %v16964_v11 = vld [vmem:[#allocation8_spill] sm:$0xff] }
 0x1d3   :  { %10606 = vrcp.f32 %v1815_v23  ;;  %v1759_v49 = vmul.f32 0.3275911, %v12610_v9  ;;  %v10603_v18 = vpop.eup %10602  ;;  %v2943_v47 = vadd.f32 1.0, %v2883_v30  ;;  %vm1569_vm10 = vcmp.ge.f32.partialorder %v12486_v52, 0.0 }
 0x1d4   :  { %v2289_v3 = vmul.f32 %v12561_v55, %v2229_v63  ;;  %v2170_v51 = vmul.f32 %v12578_v61, %v2110_v57  ;;  %vm1570_vm11 = vcmp.ge.f32.partialorder %v12492_v36, 0.0  ;;  %v2534_v50 = vmul.f32 %v2474_v32, %v12553_v4 }
 0x1d5   :  { %v12620_v62 = vpop.eup %10604  ;;  %v1819_v7 = vadd.f32 1.0, %v1759_v49  ;;  %v12626_v22 = vadd.f32 %v16962_v56, %v16957_v0  ;;  %v2998_v46 = vmul.f32 %v2938_v1, %v12528_v53  ;;  %v3003_v60 = vmul.f32 %v2943_v47, %v12565_v28  ;;  %v10447_v1 = vld [vmem:[%s16754_s4] sm:$0xff]  }
 0x1d6   :  { %v2349_v42 = vadd.f32 0.2548296, %v2289_v3  ;;  %v1934_v29 = vmul.f32 1.0614054, %v12620_v62  ;;  %v2593_v15 = vmul.f32 1.442695, %v2530_v40  ;;  %v12636_v4 = vadd.f32 %v16964_v11, %v16963_v37 }
 0x1d7   :  { %10608 = vrcp.f32 %v1819_v7  ;;  %v12632_v54 = vmul.f32 0.70710677, %v12626_v22  ;;  %v3035_v33 = vpack.c.bf16 %v3003_v60, %v2998_v46  ;;  %v2230_v20 = vadd.f32 -0.28449672, %v2170_v51  ;;  %v16966_v40 = vld [vmem:[#allocation37_spill] sm:$0xff] }
 0x1d8   :  { %vm1574_vm12 = vcmp.ge.f32.partialorder %v12541_v14, 0.0  ;;  %v1994_v44 = vadd.f32 -1.4531521, %v1934_v29  ;;  %v1629_v53 = vsel %vm1569_vm10, 1.0, %v16870_v24  ;;  %v2409_v28 = vmul.f32 %v12561_v55, %v2349_v42 }
 0x1d9   :  { %v2601_v12 = vmul.f32 1.442695, %v2534_v50  ;;  %v12644_v45 = vand.u32 2147483647, %v12632_v54  ;;  %3070 = vmatprep.subr.bf16.mxu1 %v3035_v33  ;;  %v12652_v14 = vsel %vm1570_vm11, 1.0, %v16870_v24  ;;  %v12655_v32 = vmul.f32 0.5, %v12525_v41 }
 0x1da   :  { %v2054_v52 = vmul.f32 %v12620_v62, %v1994_v44  ;;  %v2475_v55 = vsub.f32 0.0, %v12590_v48  ;;  %3071 = vmatpush1.bf16.msra.mxu1 %v3034_v26  ;;  %10610 = vpow2.f32 %v2593_v15  ;;  %v12660_v23 = vsel %vm1574_vm12, 1.0, %v16870_v24  ;;  %v16965_v41 = vld [vmem:[#allocation36_spill] sm:$0xff] }
 0x1db   :  { %v1760_v30 = vmul.f32 0.3275911, %v12644_v45  ;;  %v12664_v63 = vmul.f32 0.70710677, %v12636_v4  ;;  %v2290_v36 = vmul.f32 %v12578_v61, %v2230_v20  ;;  %vm1575_vm13 = vcmp.ge.f32.partialorder %v12572_v59, 0.0 }
 0x1dc   :  { %v2114_v57 = vadd.f32 1.4214138, %v2054_v52  ;;  %v12670_v49 = vadd.f32 %v16966_v40, %v16965_v41  ;;  %v2709_v26 = vmul.f32 %v10603_v18, %v2409_v28  ;;  %10612 = vpow2.f32 %v2601_v12  ;;  %v16969_v40 = vld [vmem:[#allocation38_spill] sm:$0xff] }
 0x1dd   :  { %v12672_v47 = vpop.eup %10606  ;;  %v1820_v3 = vadd.f32 1.0, %v1760_v30  ;;  %v12675_v51 = vand.u32 2147483647, %v12664_v63  ;;  %9047 = vmatmul.mubr.msk.bf16.vlgmr.msra.gmra.mrb[60].mxu1 %vm3056_vm9, %v10447_v1  ;;  %v2535_v56 = vmul.f32 %v2475_v55, %v12590_v48  ;;  %v2479_v46 = vsub.f32 0.0, %v12610_v9 }
 0x1de   :  { %16967 = vst [vmem:[#allocation27_spill] sm:$0xff] %v12670_v49  ;;  %v2174_v50 = vmul.f32 %v12620_v62, %v2114_v57  ;;  %v1935_v7 = vmul.f32 1.0614054, %v12672_v47  ;;  %v12683_v60 = vmul.f32 0.5, %v12557_v19  ;;  %vm1579_vm14 = vcmp.ge.f32.partialorder %v12604_v43, 0.0  ;;  %v16968_v19 = vld [vmem:[#allocation10_spill] sm:$0xff] }
 0x1df   :  { %10614 = vrcp.f32 %v1820_v3  ;;  %v1764_v18 = vmul.f32 0.3275911, %v12675_v51  ;;  %v2350_v42 = vadd.f32 0.2548296, %v2290_v36  ;;  %v2769_v33 = vsub.f32 1.0, %v2709_v26  ;;  %v16970_v26 = vld [vmem:[#allocation39_spill] sm:$0xff] }
 0x1e0   :  { %v2234_v29 = vadd.f32 -0.28449672, %v2174_v50  ;;  %v1995_v15 = vadd.f32 -1.4531521, %v1935_v7  ;;  %v12692_v48 = vsel %vm1575_vm13, 1.0, %v16870_v24  ;;  %v12696_v44 = vadd.f32 %v16968_v19, %v16963_v37  ;;  %v16972_v43 = vld [vmem:[#allocation41_spill] sm:$0xff] }
 0x1e1   :  { %v12687_v11 = vpop.eup %10608  ;;  %v1824_v20 = vadd.f32 1.0, %v1764_v18  ;;  %v2603_v1 = vmul.f32 1.442695, %v2535_v56  ;;  %v2539_v52 = vmul.f32 %v2479_v46, %v12610_v9  ;;  %v12702_v55 = vmul.f32 0.5, %v12594_v17  ;;  %v16973_v56 = vld [vmem:[#allocation42_spill] sm:$0xff] }
 0x1e2   :  { %v2294_v28 = vmul.f32 %v12620_v62, %v2234_v29  ;;  %v2055_v12 = vmul.f32 %v12672_v47, %v1995_v15  ;;  %v12707_v59 = vsel %vm1579_vm14, 1.0, %v16870_v24  ;;  %v1939_v30 = vmul.f32 1.0614054, %v12687_v11  ;;  %v16976_v19 = vld [vmem:[#allocation22_spill] sm:$0xff] }
 0x1e3   :  { %10616 = vrcp.f32 %v1824_v20  ;;  %v2410_v36 = vmul.f32 %v12578_v61, %v2350_v42  ;;  %v12713_v3 = vadd.f32 %v16970_v26, %v16969_v40  ;;  %v2829_v50 = vmul.f32 %v2769_v33, %v1629_v53  ;;  %v16975_v20 = vld [vmem:[#allocation16_spill] sm:$0xff] }
 0x1e4   :  { %v2354_v57 = vadd.f32 0.2548296, %v2294_v28  ;;  %v2115_v41 = vadd.f32 1.4214138, %v2055_v12  ;;  %v10611_v9 = vpop.eup %10610  ;;  %v1999_v17 = vadd.f32 -1.4531521, %v1939_v30  ;;  %v12720_v46 = vadd.f32 %v16973_v56, %v16972_v43 }
 0x1e5   :  { %16971 = vst [vmem:[#allocation28_spill] sm:$0xff] %v12713_v3  ;;  %v12716_v7 = vmul.f32 0.70710677, %v12696_v44  ;;  %10618 = vpow2.f32 %v2603_v1  ;;  %v2611_v61 = vmul.f32 1.442695, %v2539_v52  ;;  %v12724_v42 = vmul.f32 0.5, %v12626_v22 }
 0x1e6   :  { %16974 = vst [vmem:[#allocation29_spill] sm:$0xff] %v12720_v46  ;;  %v2414_v18 = vmul.f32 %v12620_v62, %v2354_v57  ;;  %v10613_v29 = vpop.eup %10612  ;;  %v2175_v15 = vmul.f32 %v12672_v47, %v2115_v41  ;;  %v2059_v53 = vmul.f32 %v12687_v11, %v1999_v17  ;;  %v12731_v28 = vadd.f32 %v16976_v19, %v16975_v20  ;;  %v16977_v41 = vld [vmem:[#allocation43_spill] sm:$0xff]  ;;  %v16978_v26 = vld [vmem:[#allocation44_spill] sm:$0xff] }
 0x1e7   :  { %v1705_v33 = vand.u32 2147483647, %v12716_v7  ;;  %v2710_v12 = vmul.f32 %v10611_v9, %v2410_v36  ;;  %v2480_v62 = vsub.f32 0.0, %v12644_v45  ;;  %v2484_v1 = vsub.f32 0.0, %v12675_v51 }
 0x1e8   :  { %v2714_v30 = vmul.f32 %v10613_v29, %v2414_v18  ;;  %v2889_v22 = vadd.f32 1.0, %v2829_v50  ;;  %v2119_v57 = vadd.f32 1.4214138, %v2059_v53  ;;  %v12739_v17 = vadd.f32 %v16978_v26, %v16977_v41 }
 0x1e9   :  { %v12735_v52 = vpop.eup %10614  ;;  %v1765_v40 = vmul.f32 0.3275911, %v1705_v33  ;;  %10620 = vpow2.f32 %v2611_v61  ;;  %vm1580_vm15 = vcmp.ge.f32.partialorder %v12632_v54, 0.0  ;;  %v2235_v9 = vadd.f32 -0.28449672, %v2175_v15 }
 0x1ea   :  { %16979 = vst [vmem:[#allocation30_spill] sm:$0xff] %v12739_v17  ;;  %v2774_v43 = vsub.f32 1.0, %v2714_v30  ;;  %v1940_v36 = vmul.f32 1.0614054, %v12735_v52  ;;  %v2179_v56 = vmul.f32 %v12687_v11, %v2119_v57  ;;  %v12745_v29 = vmul.f32 0.70710677, %v12731_v28 }
 0x1eb   :  { %v1825_v18 = vadd.f32 1.0, %v1765_v40  ;;  %v2540_v19 = vmul.f32 %v2480_v62, %v12644_v45  ;;  %v2544_v41 = vmul.f32 %v2484_v1, %v12675_v51  ;;  %v12753_v61 = vmul.f32 %v2889_v22, %v12582_v38  ;;  %v16981_v62 = vld [vmem:[#allocation49_spill] sm:$0xff] }
 0x1ec   :  { %v2834_v50 = vmul.f32 %v2774_v43, %v12660_v23  ;;  %v2000_v53 = vadd.f32 -1.4531521, %v1940_v36  ;;  %v2770_v26 = vsub.f32 1.0, %v2710_v12  ;;  %v2239_v15 = vadd.f32 -0.28449672, %v2179_v56 }
 0x1ed   :  { %v12750_v30 = vpop.eup %10616  ;;  %16980 = vst [vmem:[#allocation7_spill] sm:$0xff] %v12753_v61  ;;  %10622 = vrcp.f32 %v1825_v18  ;;  %v2485_v46 = vsub.f32 0.0, %v1705_v33  ;;  %v2295_v23 = vmul.f32 %v12672_v47, %v2235_v9  ;;  %v12760_v51 = vand.u32 2147483647, %v12745_v29  ;;  %v17000_v61 = vld [vmem:[#allocation13_spill] sm:$0xff] }
 0x1ee   :  { %v2894_v57 = vadd.f32 1.0, %v2834_v50  ;;  %v2060_v40 = vmul.f32 %v12735_v52, %v2000_v53  ;;  %v1944_v17 = vmul.f32 1.0614054, %v12750_v30  ;;  %v2299_v45 = vmul.f32 %v12687_v11, %v2239_v15 }
 0x1ef   :  { %v12764_v38 = vadd.f32 %v16981_v62, %v16975_v20  ;;  %v10619_v12 = vpop.eup %10618  ;;  %v2621_v36 = vmul.f32 1.442695, %v2544_v41  ;;  %v2830_v56 = vmul.f32 %v2770_v26, %v12652_v14  ;;  %vm1584_vm0 = vcmp.ge.f32.partialorder %v12664_v63, 0.0  ;;  %v16983_v41 = vld [vmem:[#allocation26_spill] sm:$0xff]  ;;  %v16984_v14 = vld [vmem:[#allocation23_spill] sm:$0xff] }
 0x1f0   :  { %v12767_v1 = vmul.f32 %v2894_v57, %v12655_v32  ;;  %v2120_v22 = vadd.f32 1.4214138, %v2060_v40  ;;  %v2004_v43 = vadd.f32 -1.4531521, %v1944_v17  ;;  %v2359_v18 = vadd.f32 0.2548296, %v2299_v45 }
 0x1f1   :  { %v1769_v9 = vmul.f32 0.3275911, %v12760_v51  ;;  %v2545_v62 = vmul.f32 %v2485_v46, %v1705_v33  ;;  %v2355_v32 = vadd.f32 0.2548296, %v2295_v23  ;;  %v12777_v17 = vmul.f32 0.70710677, %v12764_v38 }
 0x1f2   :  { %16982 = vst [vmem:[#allocation31_spill] sm:$0xff] %v12767_v1  ;;  %v2180_v53 = vmul.f32 %v12735_v52, %v2120_v22  ;;  %v2064_v15 = vmul.f32 %v12750_v30, %v2004_v43  ;;  %v12781_v26 = vadd.f32 %v16984_v14, %v16983_v41  ;;  %v2419_v45 = vmul.f32 %v12687_v11, %v2359_v18 }
 0x1f3   :  { %v1829_v57 = vadd.f32 1.0, %v1769_v9  ;;  %v10621_v40 = vpop.eup %10620  ;;  %v2613_v27 = vmul.f32 1.442695, %v2540_v19  ;;  %10624 = vpow2.f32 %v2621_v36  ;;  %v2890_v50 = vadd.f32 1.0, %v2830_v56 }
 0x1f4   :  { %v2124_v3 = vadd.f32 1.4214138, %v2064_v15  ;;  %v12787_v46 = vsel %vm1580_vm15, 1.0, %v16870_v24  ;;  %v12790_v33 = vmul.f32 0.5, %v12636_v4  ;;  %v2240_v23 = vadd.f32 -0.28449672, %v2180_v53 }
 0x1f5   :  { %10626 = vrcp.f32 %v1829_v57  ;;  %v1644_v22 = vsel %vm1584_vm0, 1.0, %v16870_v24  ;;  %vm1585_vm1 = vcmp.ge.f32.partialorder %v12716_v7, 0.0  ;;  %v2415_v43 = vmul.f32 %v12672_v47, %v2355_v32 }
 0x1f6   :  { %v2184_v11 = vmul.f32 %v12750_v30, %v2124_v3  ;;  %v2623_v54 = vmul.f32 1.442695, %v2545_v62  ;;  %v12801_v36 = vand.u32 2147483647, %v12777_v17  ;;  %v12804_v4 = vmul.f32 0.70710677, %v12781_v26 }
 0x1f7   :  { %v12797_v19 = vpop.eup %10622  ;;  %v2719_v56 = vmul.f32 %v10621_v40, %v2419_v45  ;;  %10628 = vpow2.f32 %v2613_v27  ;;  %v12808_v3 = vmul.f32 %v2890_v50, %v12613_v58  ;;  %v12811_v7 = vmul.f32 0.5, %v12696_v44  ;;  %v16986_v40 = vld [vmem:[#allocation45_spill] sm:$0xff]  ;;  %v16987_v45 = vld [vmem:[#allocation46_spill] sm:$0xff] }
 0x1f8   :  { %v2244_v18 = vadd.f32 -0.28449672, %v2184_v11  ;;  %v1945_v63 = vmul.f32 1.0614054, %v12797_v19  ;;  %v12814_v47 = vsel %vm1585_vm1, 1.0, %v16870_v24  ;;  %v2300_v53 = vmul.f32 %v12735_v52, %v2240_v23 }
 0x1f9   :  { %16985 = vst [vmem:[#allocation32_spill] sm:$0xff] %v12808_v3  ;;  %v1770_v9 = vmul.f32 0.3275911, %v12801_v36  ;;  %v2489_v27 = vsub.f32 0.0, %v12760_v51  ;;  %v2715_v32 = vmul.f32 %v10619_v12, %v2415_v43  ;;  %10630 = vpow2.f32 %v2623_v54 }
 0x1fa   :  { %v2304_v15 = vmul.f32 %v12750_v30, %v2244_v18  ;;  %v2005_v62 = vadd.f32 -1.4531521, %v1945_v63  ;;  %v1714_v58 = vand.u32 2147483647, %v12804_v4  ;;  %v2779_v50 = vsub.f32 1.0, %v2719_v56 }
 0x1fb   :  { %v1830_v57 = vadd.f32 1.0, %v1770_v9  ;;  %v12824_v11 = vadd.f32 %v16987_v45, %v16986_v40  ;;  %v12827_v23 = vmul.f32 0.5, %v12731_v28  ;;  %vm1589_vm2 = vcmp.ge.f32.partialorder %v12745_v29, 0.0  ;;  %v16989_v40 = vld [vmem:[#allocation24_spill] sm:$0xff]  ;;  %v16990_v28 = vld [vmem:[#allocation17_spill] sm:$0xff] }
 0x1fc   :  { %v2364_v44 = vadd.f32 0.2548296, %v2304_v15  ;;  %v2065_v14 = vmul.f32 %v12797_v19, %v2005_v62  ;;  %v1774_v18 = vmul.f32 0.3275911, %v1714_v58  ;;  %v2360_v43 = vadd.f32 0.2548296, %v2300_v53 }
 0x1fd   :  { %16988 = vst [vmem:[#allocation9_spill] sm:$0xff] %v12824_v11  ;;  %10632 = vrcp.f32 %v1830_v57  ;;  %v10625_v12 = vpop.eup %10624  ;;  %v2549_v56 = vmul.f32 %v2489_v27, %v12760_v51  ;;  %v2775_v15 = vsub.f32 1.0, %v2715_v32  ;;  %v12836_v45 = vadd.f32 %v16989_v40, %v16983_v41  ;;  %v16991_v11 = vld [vmem:[#allocation18_spill] sm:$0xff]  ;;  %v12842_v57 = vpop.f32.mrb[48].mxu1 }
 0x1fe   :  { %v2424_v54 = vmul.f32 %v12750_v30, %v2364_v44  ;;  %v2125_v63 = vadd.f32 1.4214138, %v2065_v14  ;;  %v1834_v62 = vadd.f32 1.0, %v1774_v18  ;;  %v12840_v10 = vadd.f32 %v16991_v11, %v16990_v28  ;;  %v16993_v40 = vld [vmem:[#allocation34_spill] sm:$0xff]  ;;  %v16994_v28 = vld [vmem:[#allocation11_spill] sm:$0xff] }
 0x1ff   :  { %v12832_v9 = vpop.eup %10626  ;;  %v2839_v53 = vmul.f32 %v2779_v50, %v12707_v59  ;;  %v12850_v27 = vsel %vm1589_vm2, 1.0, %v16870_v24  ;;  %v12853_v32 = vmul.f32 0.5, %v12764_v38  ;;  %v12856_v14 = vmul.f32 0.70710677, %v12836_v45 }
 0x200   :  { %16992 = vst [vmem:[#allocation19_spill] sm:$0xff] %v12840_v10  ;;  %v2724_v30 = vmul.f32 %v10625_v12, %v2424_v54  ;;  %v2185_v44 = vmul.f32 %v12797_v19, %v2125_v63  ;;  %v1949_v51 = vmul.f32 1.0614054, %v12832_v9  ;;  %10634 = vrcp.f32 %v1834_v62 }
 0x201   :  { %v10629_v11 = vpop.eup %10628  ;;  %v2420_v59 = vmul.f32 %v12735_v52, %v2360_v43  ;;  %v2631_v12 = vmul.f32 1.442695, %v2549_v56  ;;  %v2490_v63 = vsub.f32 0.0, %v12801_v36  ;;  %v12861_v29 = vand.u32 2147483647, %v12856_v14 }
 0x202   :  { %v2784_v50 = vsub.f32 1.0, %v2724_v30  ;;  %v2009_v18 = vadd.f32 -1.4531521, %v1949_v51  ;;  %v2245_v54 = vadd.f32 -0.28449672, %v2185_v44  ;;  %v12865_v38 = vadd.f32 %v16994_v28, %v16993_v40 }
 0x203   :  { %v2835_v62 = vmul.f32 %v2775_v15, %v12692_v48  ;;  %v2899_v10 = vadd.f32 1.0, %v2839_v53  ;;  %v12869_v52 = vpop.eup %10630  ;;  %vm1590_vm3 = vcmp.ge.f32.partialorder %v12777_v17, 0.0  ;;  %v12873_v43 = vmul.f32 0.5, %v12781_v26 }
 0x204   :  { %v2844_v41 = vmul.f32 %v2784_v50, %v1644_v22  ;;  %v2069_v20 = vmul.f32 %v12832_v9, %v2009_v18  ;;  %v2494_v56 = vsub.f32 0.0, %v1714_v58  ;;  %v1775_v30 = vmul.f32 0.3275911, %v12861_v29  ;;  %v12883_v50 = vpop.f32.mrb[49].mxu1  ;;  %v16997_v18 = vld [vmem:[#allocation25_spill] sm:$0xff] }
 0x205   :  { %v2720_v44 = vmul.f32 %v10629_v11, %v2420_v59  ;;  %10636 = vpow2.f32 %v2631_v12  ;;  %v2305_v48 = vmul.f32 %v12797_v19, %v2245_v54  ;;  %v2550_v22 = vmul.f32 %v2490_v63, %v12801_v36  ;;  %v12933_v17 = vpop.f32.mrb[50].mxu1 }
 0x206   :  { %v2904_v51 = vadd.f32 1.0, %v2844_v41  ;;  %v2129_v28 = vadd.f32 1.4214138, %v2069_v20  ;;  %v1835_v15 = vadd.f32 1.0, %v1775_v30  ;;  %v12881_v53 = vmul.f32 0.70710677, %v12865_v38 }
 0x207   :  { %v12876_v49 = vpop.eup %10632  ;;  %v12886_v26 = vmul.f32 %v2899_v10, %v12702_v55  ;;  %v2554_v59 = vmul.f32 %v2494_v56, %v1714_v58  ;;  %v12898_v12 = vadd.f32 %v16997_v18, %v16993_v40  ;;  %v2780_v54 = vsub.f32 1.0, %v2720_v44 }
 0x208   :  { %v12889_v11 = vmul.f32 %v2904_v51, %v12790_v33  ;;  %v2189_v20 = vmul.f32 %v12832_v9, %v2129_v28  ;;  %v1950_v41 = vmul.f32 1.0614054, %v12876_v49  ;;  %10638 = vrcp.f32 %v1835_v15 }
 0x209   :  { %16995 = vst [vmem:[#allocation33_spill] sm:$0xff] %v12886_v26  ;;  %v12894_v36 = vand.u32 2147483647, %v12881_v53  ;;  %v2895_v30 = vadd.f32 1.0, %v2835_v62  ;;  %v2365_v51 = vadd.f32 0.2548296, %v2305_v48  ;;  %v2840_v62 = vmul.f32 %v2780_v54, %v12787_v46 }
 0x20a   :  { %16996 = vst [vmem:[#allocation35_spill] sm:$0xff] %v12889_v11  ;;  %v2249_v55 = vadd.f32 -0.28449672, %v2189_v20  ;;  %v2010_v33 = vadd.f32 -1.4531521, %v1950_v41  ;;  %v12902_v63 = vpop.eup %10634  ;;  %vm1594_vm4 = vcmp.ge.f32.partialorder %v12804_v4, 0.0 }
 0x20b   :  { %v1779_v58 = vmul.f32 0.3275911, %v12894_v36  ;;  %v2633_v15 = vmul.f32 1.442695, %v2550_v22  ;;  %v1954_v44 = vmul.f32 1.0614054, %v12902_v63  ;;  %v2425_v40 = vmul.f32 %v12797_v19, %v2365_v51 }
 0x20c   :  { %v2309_v56 = vmul.f32 %v12832_v9, %v2249_v55  ;;  %v2070_v28 = vmul.f32 %v12876_v49, %v2010_v33  ;;  %v2641_v18 = vmul.f32 1.442695, %v2554_v59  ;;  %v2495_v10 = vsub.f32 0.0, %v12861_v29 }
 0x20d   :  { %v1839_v20 = vadd.f32 1.0, %v1779_v58  ;;  %v12911_v41 = vmul.f32 0.70710677, %v12898_v12  ;;  %v2014_v11 = vadd.f32 -1.4531521, %v1954_v44  ;;  %v12918_v22 = vsel %vm1590_vm3, 1.0, %v16870_v24 }
 0x20e   :  { %v2369_v48 = vadd.f32 0.2548296, %v2309_v56  ;;  %v2130_v26 = vadd.f32 1.4214138, %v2070_v28  ;;  %v12924_v33 = vmul.f32 %v2895_v30, %v12683_v60  ;;  %v12930_v54 = vsel %vm1594_vm4, 1.0, %v16870_v24 }
 0x20f   :  { %10640 = vrcp.f32 %v1839_v20  ;;  %v12921_v59 = vand.u32 2147483647, %v12911_v41  ;;  %v10637_v55 = vpop.eup %10636  ;;  %v2074_v19 = vmul.f32 %v12902_v63, %v2014_v11  ;;  %v12937_v58 = vmul.f32 0.5, %v12836_v45  ;;  %v16999_v20 = vld [vmem:[#allocation40_spill] sm:$0xff] }
 0x210   :  { %16998 = vst [vmem:[#allocation21_spill] sm:$0xff] %v12924_v33  ;;  %v2190_v46 = vmul.f32 %v12876_v49, %v2130_v26  ;;  %v2429_v51 = vmul.f32 %v12832_v9, %v2369_v48  ;;  %10642 = vpow2.f32 %v2633_v15  ;;  %v2900_v30 = vadd.f32 1.0, %v2840_v62 }
 0x211   :  { %v1780_v60 = vmul.f32 0.3275911, %v12921_v59  ;;  %v2134_v56 = vadd.f32 1.4214138, %v2074_v19  ;;  %10644 = vpow2.f32 %v2641_v18  ;;  %v2555_v26 = vmul.f32 %v2495_v10, %v12861_v29 }
 0x212   :  { %v12941_v4 = vpop.eup %10638  ;;  %v2725_v28 = vmul.f32 %v12869_v52, %v2425_v40  ;;  %v2250_v11 = vadd.f32 -0.28449672, %v2190_v46  ;;  %v12946_v9 = vadd.f32 %v17000_v61, %v16999_v20  ;;  %vm1595_vm5 = vcmp.ge.f32.partialorder %v12856_v14, 0.0  ;;  %v17001_v40 = vld [vmem:[#allocation14_spill] sm:$0xff] }
 0x213   :  { %v1840_v44 = vadd.f32 1.0, %v1780_v60  ;;  %v2194_v45 = vmul.f32 %v12902_v63, %v2134_v56  ;;  %v1955_v15 = vmul.f32 1.0614054, %v12941_v4  ;;  %v2499_v18 = vsub.f32 0.0, %v12894_v36 }
 0x214   :  { %v2729_v62 = vmul.f32 %v10637_v55, %v2429_v51  ;;  %v12953_v29 = vmul.f32 0.70710677, %v12946_v9  ;;  %v12957_v52 = vadd.f32 %v17001_v40, %v16999_v20  ;;  %v12960_v61 = vmul.f32 %v2900_v30, %v12724_v42  ;;  %v12987_v40 = vpop.f32.mrb[51].mxu1 }
 0x215   :  { %10646 = vrcp.f32 %v1840_v44  ;;  %v2254_v10 = vadd.f32 -0.28449672, %v2194_v45  ;;  %v2015_v48 = vadd.f32 -1.4531521, %v1955_v15  ;;  %v2643_v46 = vmul.f32 1.442695, %v2555_v26 }
 0x216   :  { %17002 = vst [vmem:[#allocation12_spill] sm:$0xff] %v12960_v61  ;;  %v2785_v19 = vsub.f32 1.0, %v2725_v28  ;;  %v2310_v60 = vmul.f32 %v12876_v49, %v2250_v11  ;;  %vm1599_vm6 = vcmp.ge.f32.partialorder %v12881_v53, 0.0  ;;  %v12965_v55 = vand.u32 2147483647, %v12953_v29  ;;  %17003 = vst [vmem:[#allocation8_spill] sm:$0xff] %v12987_v40 }
 0x217   :  { %v2314_v51 = vmul.f32 %v12902_v63, %v2254_v10  ;;  %v12971_v56 = vsel %vm1595_vm5, 1.0, %v16870_v24  ;;  %v2075_v42 = vmul.f32 %v12941_v4, %v2015_v48  ;;  %v2559_v30 = vmul.f32 %v2499_v18, %v12894_v36 }
 0x218   :  { %v2789_v28 = vsub.f32 1.0, %v2729_v62  ;;  %v12978_v11 = vmul.f32 0.5, %v12865_v38  ;;  %v1784_v53 = vmul.f32 0.3275911, %v12965_v55  ;;  %v12982_v44 = vmul.f32 0.70710677, %v12957_v52 }
 0x219   :  { %v12975_v26 = vpop.eup %10640  ;;  %v2374_v45 = vadd.f32 0.2548296, %v2314_v51  ;;  %v2135_v15 = vadd.f32 1.4214138, %v2075_v42  ;;  %10648 = vpow2.f32 %v2643_v46  ;;  %v12985_v14 = vsel %vm1599_vm6, 1.0, %v16870_v24 }
 0x21a   :  { %v10643_v36 = vpop.eup %10642  ;;  %v2845_v18 = vmul.f32 %v2785_v19, %v12814_v47  ;;  %v2370_v62 = vadd.f32 0.2548296, %v2310_v60  ;;  %v1959_v38 = vmul.f32 1.0614054, %v12975_v26  ;;  %v1844_v10 = vadd.f32 1.0, %v1784_v53 }
 0x21b   :  { %v10645_v48 = vpop.eup %10644  ;;  %v2434_v61 = vmul.f32 %v12902_v63, %v2374_v45  ;;  %v2195_v20 = vmul.f32 %v12941_v4, %v2135_v15  ;;  %v2651_v51 = vmul.f32 1.442695, %v2559_v30  ;;  %v2500_v46 = vsub.f32 0.0, %v12921_v59  ;;  %v13002_v63 = vpop.f32.mrb[52].mxu1  ;;  %v17005_v45 = vld [vmem:[#allocation4_spill] sm:$0xff]  ;;  %v17006_v15 = vld [vmem:[#allocation15_spill] sm:$0xff] }
 0x21c   :  { %v2849_v42 = vmul.f32 %v2789_v28, %v12850_v27  ;;  %v2019_v1 = vadd.f32 -1.4531521, %v1959_v38  ;;  %10650 = vrcp.f32 %v1844_v10  ;;  %v12996_v33 = vand.u32 2147483647, %v12982_v44  ;;  %17004 = vst [vmem:[#allocation36_spill] sm:$0xff] %v13002_v63 }
 0x21d   :  { %v2734_v47 = vmul.f32 %v10645_v48, %v2434_v61  ;;  %v2255_v19 = vadd.f32 -0.28449672, %v2195_v20  ;;  %v12999_v60 = vmul.f32 0.5, %v12898_v12  ;;  %vm1600_vm7 = vcmp.ge.f32.partialorder %v12911_v41, 0.0 }
 0x21e   :  { %v2430_v30 = vmul.f32 %v12876_v49, %v2370_v62  ;;  %v2079_v27 = vmul.f32 %v12975_v26, %v2019_v1  ;;  %v1785_v28 = vmul.f32 0.3275911, %v12996_v33  ;;  %v13011_v38 = vadd.f32 %v17006_v15, %v17005_v45 }
 0x21f   :  { %v13004_v53 = vpop.eup %10646  ;;  %v2905_v20 = vadd.f32 1.0, %v2845_v18  ;;  %v2794_v61 = vsub.f32 1.0, %v2734_v47  ;;  %10652 = vpow2.f32 %v2651_v51  ;;  %v2909_v10 = vadd.f32 1.0, %v2849_v42 }
 0x220   :  { %v1960_v12 = vmul.f32 1.0614054, %v13004_v53  ;;  %v2139_v48 = vadd.f32 1.4214138, %v2079_v27  ;;  %v2560_v63 = vmul.f32 %v2500_v46, %v12921_v59  ;;  %v1845_v3 = vadd.f32 1.0, %v1785_v28 }
 0x221   :  { %v2854_v49 = vmul.f32 %v2794_v61, %v12930_v54  ;;  %v2315_v1 = vmul.f32 %v12941_v4, %v2255_v19  ;;  %v2504_v40 = vsub.f32 0.0, %v12965_v55  ;;  %v2730_v6 = vmul.f32 %v10643_v36, %v2430_v30 }
 0x222   :  { %v2020_v62 = vadd.f32 -1.4531521, %v1960_v12  ;;  %v2199_v15 = vmul.f32 %v12975_v26, %v2139_v48  ;;  %10654 = vrcp.f32 %v1845_v3  ;;  %v13020_v18 = vmul.f32 0.70710677, %v13011_v38  ;;  %v17008_v3 = vld [vmem:[#allocation50_spill] sm:$0xff] }
 0x223   :  { %v10649_v51 = vpop.eup %10648  ;;  %v13023_v42 = vmul.f32 %v2905_v20, %v12811_v7  ;;  %v2914_v59 = vadd.f32 1.0, %v2854_v49  ;;  %v13028_v54 = vsel %vm1600_vm7, 1.0, %v16870_v24  ;;  %v2653_v36 = vmul.f32 1.442695, %v2560_v63  ;;  %v13042_v20 = vpop.f32.mrb[53].mxu1 }
 0x224   :  { %v2080_v46 = vmul.f32 %v13004_v53, %v2020_v62  ;;  %v2259_v47 = vadd.f32 -0.28449672, %v2199_v15  ;;  %v1729_v19 = vand.u32 2147483647, %v13020_v18  ;;  %v13034_v30 = vadd.f32 %v17008_v3, %v17005_v45 }
 0x225   :  { %17007 = vst [vmem:[#allocation37_spill] sm:$0xff] %v13023_v42  ;;  %v13037_v27 = vmul.f32 %v2909_v10, %v12827_v23  ;;  %v13040_v7 = vmul.f32 %v2914_v59, %v12873_v43  ;;  %v2375_v28 = vadd.f32 0.2548296, %v2315_v1  ;;  %v2790_v12 = vsub.f32 1.0, %v2730_v6  ;;  %v13056_v6 = vpop.f32.mrb[54].mxu1 }
 0x226   :  { %v2140_v41 = vadd.f32 1.4214138, %v2080_v46  ;;  %v13044_v61 = vpop.eup %10650  ;;  %v2319_v63 = vmul.f32 %v12975_v26, %v2259_v47  ;;  %v2564_v48 = vmul.f32 %v2504_v40, %v12965_v55  ;;  %v1789_v49 = vmul.f32 0.3275911, %v1729_v19 }
 0x227   :  { %17009 = vst [vmem:[#allocation10_spill] sm:$0xff] %v13037_v27  ;;  %17010 = vst [vmem:[#allocation38_spill] sm:$0xff] %v13040_v7  ;;  %v1964_v43 = vmul.f32 1.0614054, %v13044_v61  ;;  %v2505_v10 = vsub.f32 0.0, %v12996_v33  ;;  %10656 = vpow2.f32 %v2653_v36  ;;  %v2435_v55 = vmul.f32 %v12941_v4, %v2375_v28 }
 0x228   :  { %v2200_v23 = vmul.f32 %v13004_v53, %v2140_v41  ;;  %v2379_v1 = vadd.f32 0.2548296, %v2319_v63  ;;  %v1849_v15 = vadd.f32 1.0, %v1789_v49  ;;  %v13054_v59 = vmul.f32 0.70710677, %v13034_v30  ;;  %v17011_v63 = vld [vmem:[#allocation20_spill] sm:$0xff] }
 0x229   :  { %v10653_v46 = vpop.eup %10652  ;;  %vm1604_vm8 = vcmp.ge.f32.partialorder %v12953_v29, 0.0  ;;  %v2024_v47 = vadd.f32 -1.4531521, %v1964_v43  ;;  %v13061_v3 = vmul.f32 0.5, %v12946_v9  ;;  %v2661_v41 = vmul.f32 1.442695, %v2564_v48 }
 0x22a   :  { %v2260_v40 = vadd.f32 -0.28449672, %v2200_v23  ;;  %10658 = vrcp.f32 %v1849_v15  ;;  %v13065_v36 = vadd.f32 %v12423_v39, %v17011_v63  ;;  %v2439_v49 = vmul.f32 %v12975_v26, %v2379_v1 }
 0x22b   :  { %v2084_v27 = vmul.f32 %v13044_v61, %v2024_v47  ;;  %v13071_v4 = vmul.f32 0.5, %v12957_v52  ;;  %v2850_v9 = vmul.f32 %v2790_v12, %v12918_v22  ;;  %v13077_v28 = vsel %vm1604_vm8, 1.0, %v16870_v24 }
 0x22c   :  { %v2320_v62 = vmul.f32 %v13004_v53, %v2260_v40  ;;  %v13073_v29 = vpop.eup %10654  ;;  %v2565_v48 = vmul.f32 %v2505_v10, %v12996_v33  ;;  %v13081_v39 = vand.u32 2147483647, %v13054_v59  ;;  %v2735_v26 = vmul.f32 %v10649_v51, %v2435_v55 }
 0x22d   :  { %v2144_v23 = vadd.f32 1.4214138, %v2084_v27  ;;  %vm1605_vm10 = vcmp.ge.f32.partialorder %v12982_v44, 0.0  ;;  %v1965_v43 = vmul.f32 1.0614054, %v13073_v29  ;;  %10660 = vpow2.f32 %v2661_v41 }
 0x22e   :  { %v2509_v52 = vsub.f32 0.0, %v1729_v19  ;;  %v1790_v1 = vmul.f32 0.3275911, %v13081_v39  ;;  %v13087_v22 = vmul.f32 0.70710677, %v13065_v36  ;;  %v2739_v12 = vmul.f32 %v10653_v46, %v2439_v49 }
 0x22f   :  { %v2380_v15 = vadd.f32 0.2548296, %v2320_v62  ;;  %v2204_v33 = vmul.f32 %v13044_v61, %v2144_v23  ;;  %v2025_v10 = vadd.f32 -1.4531521, %v1965_v43  ;;  %v2910_v40 = vadd.f32 1.0, %v2850_v9  ;;  %v13113_v43 = vpop.f32.mrb[55].mxu1 }
 0x230   :  { %v13091_v51 = vsel %vm1605_vm10, 1.0, %v16870_v24  ;;  %v2663_v27 = vmul.f32 1.442695, %v2565_v48  ;;  %v1850_v44 = vadd.f32 1.0, %v1790_v1  ;;  %v2795_v55 = vsub.f32 1.0, %v2735_v26 }
 0x231   :  { %v2264_v47 = vadd.f32 -0.28449672, %v2204_v33  ;;  %v2085_v41 = vmul.f32 %v13073_v29, %v2025_v10  ;;  %v13095_v7 = vmul.f32 0.5, %v13011_v38  ;;  %v10657_v45 = vpop.eup %10656  ;;  %v2569_v42 = vmul.f32 %v2509_v52, %v1729_v19 }
 0x232   :  { %10662 = vrcp.f32 %v1850_v44  ;;  %v13098_v62 = vand.u32 2147483647, %v13087_v22  ;;  %v13102_v46 = vadd.f32 %v12452_v8, %v17011_v63  ;;  %v2799_v49 = vsub.f32 1.0, %v2739_v12 }
 0x233   :  { %v2440_v9 = vmul.f32 %v13004_v53, %v2380_v15  ;;  %v2324_v48 = vmul.f32 %v13044_v61, %v2264_v47  ;;  %v2145_v26 = vadd.f32 1.4214138, %v2085_v41  ;;  %v13109_v38 = vmul.f32 %v2910_v40, %v12853_v32  ;;  %v17013_v47 = vld [vmem:[#allocation47_spill] sm:$0xff] }
 0x234   :  { %v13106_v23 = vpop.eup %10658  ;;  %10664 = vpow2.f32 %v2663_v27  ;;  %vm1609_vm11 = vcmp.ge.f32.partialorder %v13020_v18, 0.0  ;;  %v1794_v19 = vmul.f32 0.3275911, %v13098_v62  ;;  %v2855_v8 = vmul.f32 %v2795_v55, %v12971_v56 }
 0x235   :  { %17012 = vst [vmem:[#allocation39_spill] sm:$0xff] %v13109_v38  ;;  %v2384_v52 = vadd.f32 0.2548296, %v2324_v48  ;;  %v2205_v53 = vmul.f32 %v13073_v29, %v2145_v26  ;;  %v1969_v1 = vmul.f32 1.0614054, %v13106_v23  ;;  %vm1610_vm12 = vcmp.ge.f32.partialorder %v13054_v59, 0.0 }
 0x236   :  { %v2671_v12 = vmul.f32 1.442695, %v2569_v42  ;;  %v1854_v15 = vadd.f32 1.0, %v1794_v19  ;;  %v13120_v32 = vmul.f32 0.70710677, %v13102_v46  ;;  %v2859_v33 = vmul.f32 %v2799_v49, %v12985_v14 }
 0x237   :  { %v2740_v10 = vmul.f32 %v10657_v45, %v2440_v9  ;;  %v2444_v40 = vmul.f32 %v13044_v61, %v2384_v52  ;;  %v2029_v27 = vadd.f32 -1.4531521, %v1969_v1  ;;  %v10661_v44 = vpop.eup %10660  ;;  %v2265_v56 = vadd.f32 -0.28449672, %v2205_v53  ;;  %v13138_v61 = vpop.f32.mrb[56].mxu1 }
 0x238   :  { %10666 = vrcp.f32 %v1854_v15  ;;  %v1735_v55 = vand.u32 2147483647, %v13120_v32  ;;  %v13127_v42 = vadd.f32 %v12503_v13, %v17013_v47  ;;  %v13132_v48 = vsel %vm1609_vm11, 1.0, %v16870_v24 }
 0x239   :  { %v2744_v41 = vmul.f32 %v10661_v44, %v2444_v40  ;;  %v2089_v14 = vmul.f32 %v13106_v23, %v2029_v27  ;;  %v13136_v45 = vmul.f32 0.5, %v13034_v30  ;;  %v2915_v49 = vadd.f32 1.0, %v2855_v8 }
 0x23a   :  { %v13143_v9 = vsel %vm1610_vm12, 1.0, %v16870_v24  ;;  %v2510_v13 = vsub.f32 0.0, %v13081_v39  ;;  %v1795_v26 = vmul.f32 0.3275911, %v1735_v55  ;;  %v2919_v19 = vadd.f32 1.0, %v2859_v33 }
 0x23b   :  { %v2804_v18 = vsub.f32 1.0, %v2744_v41  ;;  %v2149_v52 = vadd.f32 1.4214138, %v2089_v14  ;;  %10668 = vpow2.f32 %v2671_v12  ;;  %v2800_v1 = vsub.f32 1.0, %v2740_v10 }
 0x23c   :  { %v13146_v53 = vpop.eup %10662  ;;  %v2325_v30 = vmul.f32 %v13073_v29, %v2265_v56  ;;  %v1855_v15 = vadd.f32 1.0, %v1795_v26  ;;  %v13150_v8 = vmul.f32 0.70710677, %v13127_v42  ;;  %v13156_v33 = vmul.f32 0.5, %v13065_v36 }
 0x23d   :  { %v2864_v59 = vmul.f32 %v2804_v18, %v13077_v28  ;;  %v2209_v40 = vmul.f32 %v13106_v23, %v2149_v52  ;;  %v1970_v27 = vmul.f32 1.0614054, %v13146_v53  ;;  %v2570_v12 = vmul.f32 %v2510_v13, %v13081_v39  ;;  %v13172_v13 = vpop.f32.mrb[57].mxu1 }
 0x23e   :  { %v10665_v44 = vpop.eup %10664  ;;  %10670 = vrcp.f32 %v1855_v15  ;;  %v13160_v10 = vand.u32 2147483647, %v13150_v8  ;;  %v13164_v56 = vadd.f32 %v12513_v25, %v17013_v47  ;;  %v2514_v26 = vsub.f32 0.0, %v13098_v62 }
 0x23f   :  { %v2924_v41 = vadd.f32 1.0, %v2864_v59  ;;  %v2269_v28 = vadd.f32 -0.28449672, %v2209_v40  ;;  %v2030_v14 = vadd.f32 -1.4531521, %v1970_v27  ;;  %v13168_v18 = vmul.f32 %v2919_v19, %v12978_v11 }
 0x240   :  { %v2860_v36 = vmul.f32 %v2800_v1, %v13028_v54  ;;  %v2385_v52 = vadd.f32 0.2548296, %v2325_v30  ;;  %v1799_v39 = vmul.f32 0.3275911, %v13160_v10  ;;  %v2515_v40 = vsub.f32 0.0, %v1735_v55 }
 0x241   :  { %17014 = vst [vmem:[#allocation41_spill] sm:$0xff] %v13168_v18  ;;  %v13175_v15 = vmul.f32 %v2924_v41, %v13061_v3  ;;  %v2329_v25 = vmul.f32 %v13106_v23, %v2269_v28  ;;  %v2090_v59 = vmul.f32 %v13146_v53, %v2030_v14  ;;  %v13182_v11 = vmul.f32 %v2915_v49, %v12937_v58 }
 0x242   :  { %v13179_v27 = vpop.eup %10666  ;;  %vm1614_vm13 = vcmp.ge.f32.partialorder %v13087_v22, 0.0  ;;  %v1859_v54 = vadd.f32 1.0, %v1799_v39  ;;  %v13186_v19 = vmul.f32 0.70710677, %v13164_v56  ;;  %v2673_v30 = vmul.f32 1.442695, %v2570_v12 }
 0x243   :  { %17015 = vst [vmem:[#allocation42_spill] sm:$0xff] %v13175_v15  ;;  %17016 = vst [vmem:[#allocation22_spill] sm:$0xff] %v13182_v11  ;;  %v2150_v1 = vadd.f32 1.4214138, %v2090_v59  ;;  %v2574_v41 = vmul.f32 %v2514_v26, %v13098_v62  ;;  %v2920_v28 = vadd.f32 1.0, %v2860_v36  ;;  %v2445_v14 = vmul.f32 %v13073_v29, %v2385_v52  ;;  %v17017_v12 = vld [vmem:[#allocation48_spill] sm:$0xff] }
 0x244   :  { %v1974_v38 = vmul.f32 1.0614054, %v13179_v27  ;;  %10672 = vrcp.f32 %v1859_v54  ;;  %v2389_v49 = vadd.f32 0.2548296, %v2329_v25  ;;  %v13195_v39 = vsel %vm1614_vm13, 1.0, %v16870_v24  ;;  %v13207_v26 = vpop.f32.mrb[58].mxu1 }
 0x245   :  { %v10669_v58 = vpop.eup %10668  ;;  %v2210_v22 = vmul.f32 %v13146_v53, %v2150_v1  ;;  %v2575_v11 = vmul.f32 %v2515_v40, %v1735_v55  ;;  %v13198_v59 = vmul.f32 0.5, %v13102_v46  ;;  %v13201_v62 = vand.u32 2147483647, %v13186_v19 }
 0x246   :  { %v2034_v63 = vadd.f32 -1.4531521, %v1974_v38  ;;  %v13205_v29 = vadd.f32 %v12543_v35, %v17017_v12  ;;  %10674 = vpow2.f32 %v2673_v30  ;;  %v2681_v52 = vmul.f32 1.442695, %v2574_v41 }
 0x247   :  { %v2270_v36 = vadd.f32 -0.28449672, %v2210_v22  ;;  %vm1615_vm14 = vcmp.ge.f32.partialorder %v13120_v32, 0.0  ;;  %v13213_v38 = vmul.f32 %v2920_v28, %v12999_v60  ;;  %v2745_v46 = vmul.f32 %v10665_v44, %v2445_v14 }
 0x248   :  { %v13210_v25 = vpop.eup %10670  ;;  %v2094_v55 = vmul.f32 %v13179_v27, %v2034_v63  ;;  %v1800_v40 = vmul.f32 0.3275911, %v13201_v62  ;;  %v2449_v35 = vmul.f32 %v13106_v23, %v2389_v49  ;;  %v2683_v1 = vmul.f32 1.442695, %v2575_v11 }
 0x249   :  { %17018 = vst [vmem:[#allocation43_spill] sm:$0xff] %v13213_v38  ;;  %v1975_v54 = vmul.f32 1.0614054, %v13210_v25  ;;  %v13220_v30 = vmul.f32 0.70710677, %v13205_v29  ;;  %v2330_v32 = vmul.f32 %v13146_v53, %v2270_v36  ;;  %v13225_v60 = vadd.f32 %v12584_v31, %v17017_v12 }
 0x24a   :  { %v2154_v41 = vadd.f32 1.4214138, %v2094_v55  ;;  %v1860_v22 = vadd.f32 1.0, %v1800_v40  ;;  %10676 = vpow2.f32 %v2681_v52  ;;  %v13228_v63 = vsel %vm1615_vm14, 1.0, %v16870_v24 }
 0x24b   :  { %v2035_v44 = vadd.f32 -1.4531521, %v1975_v54  ;;  %v2519_v23 = vsub.f32 0.0, %v13160_v10  ;;  %v2805_v28 = vsub.f32 1.0, %v2745_v46  ;;  %vm1619_vm15 = vcmp.ge.f32.partialorder %v13150_v8, 0.0 }
 0x24c   :  { %v2214_v11 = vmul.f32 %v13179_v27, %v2154_v41  ;;  %10678 = vrcp.f32 %v1860_v22  ;;  %v2749_v14 = vmul.f32 %v10669_v58, %v2449_v35  ;;  %v13235_v36 = vmul.f32 0.5, %v13127_v42  ;;  %v13251_v22 = vpop.f32.mrb[59].mxu1 }
 0x24d   :  { %v2095_v49 = vmul.f32 %v13210_v25, %v2035_v44  ;;  %v1744_v31 = vand.u32 2147483647, %v13220_v30  ;;  %v2390_v55 = vadd.f32 0.2548296, %v2330_v32  ;;  %10680 = vpow2.f32 %v2683_v1 }
 0x24e   :  { %v13238_v52 = vpop.eup %10672  ;;  %v2274_v40 = vadd.f32 -0.28449672, %v2214_v11  ;;  %v13241_v46 = vmul.f32 0.70710677, %v13225_v60  ;;  %v13244_v8 = vsel %vm1619_vm15, 1.0, %v16870_v24  ;;  %v2579_v35 = vmul.f32 %v2519_v23, %v13160_v10 }
 0x24f   :  { %v2155_v54 = vadd.f32 1.4214138, %v2095_v49  ;;  %v1979_v58 = vmul.f32 1.0614054, %v13238_v52  ;;  %v2865_v42 = vmul.f32 %v2805_v28, %v13091_v51  ;;  %vm1620_vm0 = vcmp.ge.f32.partialorder %v13186_v19, 0.0 }
 0x250   :  { %v2334_v41 = vmul.f32 %v13179_v27, %v2274_v40  ;;  %v1804_v32 = vmul.f32 0.3275911, %v1744_v31  ;;  %v10675_v1 = vpop.eup %10674  ;;  %v2809_v44 = vsub.f32 1.0, %v2749_v14  ;;  %v1328_v3 = vadd.f32 %v12533_v5, %v16957_v0 }
 0x251   :  { %v2215_v11 = vmul.f32 %v13210_v25, %v2155_v54  ;;  %v2039_v49 = vadd.f32 -1.4531521, %v1979_v58  ;;  %v2450_v18 = vmul.f32 %v13146_v53, %v2390_v55  ;;  %v13258_v51 = vand.u32 2147483647, %v13241_v46 }
 0x252   :  { %v2394_v10 = vadd.f32 0.2548296, %v2334_v41  ;;  %v1864_v23 = vadd.f32 1.0, %v1804_v32  ;;  %v2691_v15 = vmul.f32 1.442695, %v2579_v35  ;;  %v13262_v38 = vadd.f32 %v12842_v57, %v1328_v3 }
 0x253   :  { %v2275_v28 = vadd.f32 -0.28449672, %v2215_v11  ;;  %v2099_v40 = vmul.f32 %v13238_v52, %v2039_v49  ;;  %v13266_v54 = vmul.f32 0.5, %v13164_v56  ;;  %v1805_v5 = vmul.f32 0.3275911, %v13258_v51 }
 0x254   :  { %v2454_v14 = vmul.f32 %v13179_v27, %v2394_v10  ;;  %10682 = vrcp.f32 %v1864_v23  ;;  %v10677_v0 = vpop.eup %10676  ;;  %v2925_v53 = vadd.f32 1.0, %v2865_v42  ;;  %v13273_v35 = vsel %vm1620_vm0, 1.0, %v16870_v24 }
 0x255   :  { %v2335_v55 = vmul.f32 %v13210_v25, %v2275_v28  ;;  %v2159_v58 = vadd.f32 1.4214138, %v2099_v40  ;;  %v2869_v27 = vmul.f32 %v2809_v44, %v13132_v48  ;;  %v2750_v3 = vmul.f32 %v10675_v1, %v2450_v18 }
 0x256   :  { %v13275_v57 = vpop.eup %10678  ;;  %v2754_v56 = vmul.f32 %v10677_v0, %v2454_v14  ;;  %v1865_v41 = vadd.f32 1.0, %v1805_v5  ;;  %10684 = vpow2.f32 %v2691_v15  ;;  %v2524_v11 = vsub.f32 0.0, %v1744_v31 }
 0x257   :  { %v2219_v32 = vmul.f32 %v13238_v52, %v2159_v58  ;;  %v1980_v42 = vmul.f32 1.0614054, %v13275_v57  ;;  %v10681_v49 = vpop.eup %10680  ;;  %v2520_v23 = vsub.f32 0.0, %v13201_v62  ;;  %v13282_v19 = vmul.f32 0.70710677, %v13262_v38 }
 0x258   :  { %v2814_v10 = vsub.f32 1.0, %v2754_v56  ;;  %10686 = vrcp.f32 %v1865_v41  ;;  %v13285_v28 = vmul.f32 %v2925_v53, %v13071_v4  ;;  %v2395_v48 = vadd.f32 0.2548296, %v2335_v55 }
 0x259   :  { %v2279_v18 = vadd.f32 -0.28449672, %v2219_v32  ;;  %v2040_v1 = vadd.f32 -1.4531521, %v1980_v42  ;;  %v2929_v44 = vadd.f32 1.0, %v2869_v27  ;;  %v2810_v40 = vsub.f32 1.0, %v2750_v3 }
 0x25a   :  { %v2874_v15 = vmul.f32 %v2814_v10, %v13195_v39  ;;  %v1701_v14 = vand.u32 2147483647, %v13282_v19  ;;  %v2584_v58 = vmul.f32 %v2524_v11, %v1744_v31  ;;  %v1320_v56 = vadd.f32 %v12458_v2, %v16943_v34 }
 0x25b   :  { %v2339_v5 = vmul.f32 %v13238_v52, %v2279_v18  ;;  %v2100_v0 = vmul.f32 %v13275_v57, %v2040_v1  ;;  %v2580_v4 = vmul.f32 %v2520_v23, %v13201_v62  ;;  %v13295_v53 = vmul.f32 0.5, %v13205_v29 }
 0x25c   :  { %v2934_v41 = vadd.f32 1.0, %v2874_v15  ;;  %v1761_v55 = vmul.f32 0.3275911, %v1701_v14  ;;  %v2455_v27 = vmul.f32 %v13210_v25, %v2395_v48  ;;  %v13299_v3 = vmul.f32 0.5, %v13225_v60 }
 0x25d   :  { %v2399_v39 = vadd.f32 0.2548296, %v2339_v5  ;;  %v13302_v32 = vadd.f32 %v12883_v50, %v1320_v56  ;;  %v13307_v2 = vmul.f32 %v2929_v44, %v13095_v7  ;;  %v2160_v62 = vadd.f32 1.4214138, %v2100_v0  ;;  %v17019_v5 = vld [vmem:[#allocation3_spill] sm:$0xff] }
 0x25e   :  { %v13304_v31 = vpop.eup %10682  ;;  %v13310_v34 = vmul.f32 %v2934_v41, %v13156_v33  ;;  %v1821_v29 = vadd.f32 1.0, %v1761_v55  ;;  %v2870_v42 = vmul.f32 %v2810_v40, %v13143_v9  ;;  %vm1624_vm1 = vcmp.ge.f32.partialorder %v13220_v30, 0.0 }
 0x25f   :  { %v1984_v25 = vmul.f32 1.0614054, %v13304_v31  ;;  %v2701_v60 = vmul.f32 1.442695, %v2584_v58  ;;  %v2693_v11 = vmul.f32 1.442695, %v2580_v4  ;;  %v1331_v7 = vadd.f32 %v12549_v21, %v16963_v37 }
 0x260   :  { %v3031_v50 = vpack.c.bf16 %v13310_v34, %v13307_v2  ;;  %10688 = vrcp.f32 %v1821_v29  ;;  %v10685_v10 = vpop.eup %10684  ;;  %v2755_v33 = vmul.f32 %v10681_v49, %v2455_v27  ;;  %v2459_v23 = vmul.f32 %v13238_v52, %v2399_v39  ;;  %v17020_v39 = vld [vmem:[#allocation8_spill] sm:$0xff] }
 0x261   :  { %v2044_v48 = vadd.f32 -1.4531521, %v1984_v25  ;;  %v2525_v9 = vsub.f32 0.0, %v13258_v51  ;;  %v2220_v30 = vmul.f32 %v13275_v57, %v2160_v62  ;;  %v13325_v1 = vsel %vm1624_vm1, 1.0, %v16870_v24 }
 0x262   :  { %v13321_v18 = vpop.eup %10686  ;;  %v13328_v44 = vmul.f32 0.70710677, %v13302_v32  ;;  %v13331_v40 = vadd.f32 %v12933_v17, %v1331_v7  ;;  %v2930_v21 = vadd.f32 1.0, %v2870_v42  ;;  %10690 = vpow2.f32 %v2701_v60 }
 0x263   :  { %v2104_v37 = vmul.f32 %v13304_v31, %v2044_v48  ;;  %vm1625_vm2 = vcmp.ge.f32.partialorder %v13241_v46, 0.0  ;;  %v1985_v52 = vmul.f32 1.0614054, %v13321_v18  ;;  %v2481_v49 = vsub.f32 0.0, %v1701_v14 }
 0x264   :  { %v13337_v15 = vand.u32 2147483647, %v13328_v44  ;;  %v1323_v0 = vadd.f32 %v17019_v5, %v16947_v16  ;;  %v2815_v58 = vsub.f32 1.0, %v2755_v33  ;;  %v2759_v56 = vmul.f32 %v10685_v10, %v2459_v23 }
 0x265   :  { %v2164_v41 = vadd.f32 1.4214138, %v2104_v37  ;;  %v2585_v17 = vmul.f32 %v2525_v9, %v13258_v51  ;;  %v2280_v4 = vadd.f32 -0.28449672, %v2220_v30  ;;  %v2045_v55 = vadd.f32 -1.4531521, %v1985_v52 }
 0x266   :  { %v1751_v27 = vmul.f32 0.3275911, %v13337_v15  ;;  %v13344_v46 = vadd.f32 %v17020_v39, %v1323_v0  ;;  %10692 = vpow2.f32 %v2693_v11  ;;  %v13348_v29 = vsel %vm1625_vm2, 1.0, %v16870_v24  ;;  %v17021_v52 = vld [vmem:[#allocation32_spill] sm:$0xff] }
 0x267   :  { %v2224_v62 = vmul.f32 %v13304_v31, %v2164_v41  ;;  %v13351_v16 = vmul.f32 0.70710677, %v13331_v40  ;;  %v2105_v42 = vmul.f32 %v13321_v18, %v2045_v55  ;;  %v13355_v51 = vmul.f32 0.5, %v13262_v38 }
 0x268   :  { %v2541_v25 = vmul.f32 %v2481_v49, %v1701_v14  ;;  %v1811_v60 = vadd.f32 1.0, %v1751_v27  ;;  %v13358_v7 = vmul.f32 %v2930_v21, %v13136_v45  ;;  %v2875_v11 = vmul.f32 %v2815_v58, %v13228_v63  ;;  %v17022_v49 = vld [vmem:[#allocation21_spill] sm:$0xff] }
 0x269   :  { %v2284_v10 = vadd.f32 -0.28449672, %v2224_v62  ;;  %v2703_v33 = vmul.f32 1.442695, %v2585_v17  ;;  %v2819_v48 = vsub.f32 1.0, %v2759_v56  ;;  %v2340_v9 = vmul.f32 %v13275_v57, %v2280_v4 }
 0x26a   :  { %v13361_v23 = vpop.eup %10688  ;;  %v2165_v30 = vadd.f32 1.4214138, %v2105_v42  ;;  %10694 = vrcp.f32 %v1811_v60  ;;  %vm1581_vm3 = vcmp.ge.f32.partialorder %v13282_v19, 0.0  ;;  %v1706_v45 = vand.u32 2147483647, %v13351_v16  ;;  %v17023_v60 = vld [vmem:[#allocation31_spill] sm:$0xff] }
 0x26b   :  { %v2344_v37 = vmul.f32 %v13304_v31, %v2284_v10  ;;  %v1941_v38 = vmul.f32 1.0614054, %v13361_v23  ;;  %v2615_v63 = vmul.f32 1.442695, %v2541_v25  ;;  %v13370_v21 = vmul.f32 0.70710677, %v13344_v46 }
 0x26c   :  { %v2225_v14 = vmul.f32 %v13321_v18, %v2165_v30  ;;  %v3012_v5 = vpack.c.bf16 %v17022_v49, %v17021_v52  ;;  %v10691_v0 = vpop.eup %10690  ;;  %10696 = vpow2.f32 %v2703_v33  ;;  %v1766_v41 = vmul.f32 0.3275911, %v1706_v45  ;;  %v17024_v10 = vld [vmem:[#allocation7_spill] sm:$0xff] }
 0x26d   :  { %v2404_v58 = vadd.f32 0.2548296, %v2344_v37  ;;  %v2001_v56 = vadd.f32 -1.4531521, %v1941_v38  ;;  %v2935_v17 = vadd.f32 1.0, %v2875_v11  ;;  %v2879_v4 = vmul.f32 %v2819_v48, %v13244_v8 }
 0x26e   :  { %v2400_v55 = vadd.f32 0.2548296, %v2340_v9  ;;  %v13376_v27 = vand.u32 2147483647, %v13370_v21  ;;  %3103 = vmatprep.subr.bf16.mxu0 %v3012_v5  ;;  %v2471_v42 = vsub.f32 0.0, %v13337_v15  ;;  %v1826_v25 = vadd.f32 1.0, %v1766_v41 }
 0x26f   :  { %v2464_v39 = vmul.f32 %v13304_v31, %v2404_v58  ;;  %v2061_v62 = vmul.f32 %v13361_v23, %v2001_v56  ;;  %v17025_v33 = vpack.c.bf16 %v17023_v60, %v17024_v10  ;;  %v2285_v30 = vadd.f32 -0.28449672, %v2225_v14  ;;  %v17027_v41 = vld [vmem:[#allocation27_spill] sm:$0xff] }
 0x270   :  { %v13387_v8 = vsel %vm1581_vm3, 1.0, %v16870_v24  ;;  %10698 = vpow2.f32 %v2615_v63  ;;  %v1756_v11 = vmul.f32 0.3275911, %v13376_v27  ;;  %v10693_v48 = vpop.eup %10692  ;;  %v13391_v37 = vmul.f32 0.5, %v13302_v32  ;;  %v17026_v32 = vld [vmem:[#allocation34_spill] sm:$0xff] }
 0x271   :  { %3104 = vmatpush1.bf16.msra.mxu0 %v17025_v33  ;;  %v2764_v31 = vmul.f32 %v10691_v0, %v2464_v39  ;;  %v2121_v9 = vadd.f32 1.4214138, %v2061_v62  ;;  %10700 = vrcp.f32 %v1826_v25  ;;  %v13394_v38 = vmul.f32 %v2935_v17, %v13198_v59  ;;  %v17028_v62 = vld [vmem:[#allocation16_spill] sm:$0xff]  ;;  %v17029_v59 = vld [vmem:[#allocation5_spill] sm:$0xff] }
 0x272   :  { %v2939_v52 = vadd.f32 1.0, %v2879_v4  ;;  %v2460_v14 = vmul.f32 %v13275_v57, %v2400_v55  ;;  %v1816_v49 = vadd.f32 1.0, %v1756_v11  ;;  %v2531_v63 = vmul.f32 %v2471_v42, %v13337_v15  ;;  %v17030_v4 = vld [vmem:[#allocation40_spill] sm:$0xff] }
 0x273   :  { %v2824_v19 = vsub.f32 1.0, %v2764_v31  ;;  %v2181_v5 = vmul.f32 %v13361_v23, %v2121_v9  ;;  %v2486_v58 = vsub.f32 0.0, %v1706_v45  ;;  %v2345_v0 = vmul.f32 %v13321_v18, %v2285_v30  ;;  %v17031_v25 = vld [vmem:[#allocation28_spill] sm:$0xff] }
 0x274   :  { %v13399_v56 = vpop.eup %10694  ;;  %v1344_v39 = vadd.f32 %v17027_v41, %v17026_v32  ;;  %v1336_v17 = vadd.f32 %v17029_v59, %v17028_v62  ;;  %v1347_v57 = vadd.f32 %v17031_v25, %v17030_v4  ;;  %10702 = vrcp.f32 %v1816_v49  ;;  %v17032_v42 = vld [vmem:[#allocation36_spill] sm:$0xff] }
 0x275   :  { %v2884_v55 = vmul.f32 %v2824_v19, %v13325_v1  ;;  %v2241_v60 = vadd.f32 -0.28449672, %v2181_v5  ;;  %v1931_v10 = vmul.f32 1.0614054, %v13399_v56  ;;  %v13411_v15 = vmul.f32 %v2939_v52, %v13235_v36 }
 0x276   :  { %vm1571_vm4 = vcmp.ge.f32.partialorder %v13328_v44, 0.0  ;;  %v13415_v33 = vadd.f32 %v17032_v42, %v1344_v39  ;;  %v13418_v30 = vadd.f32 %v13042_v20, %v1336_v17  ;;  %v10697_v11 = vpop.eup %10696  ;;  %v13422_v19 = vadd.f32 %v13056_v6, %v1347_v57 }
 0x277   :  { %v2944_v31 = vadd.f32 1.0, %v2884_v55  ;;  %v2301_v9 = vmul.f32 %v13361_v23, %v2241_v60  ;;  %v1991_v1 = vadd.f32 -1.4531521, %v1931_v10  ;;  %v2760_v49 = vmul.f32 %v10693_v48, %v2460_v14 }
 0x278   :  { %v2595_v5 = vmul.f32 1.442695, %v2531_v63  ;;  %v2546_v36 = vmul.f32 %v2486_v58, %v1706_v45  ;;  %v13425_v52 = vmul.f32 0.70710677, %v13415_v33  ;;  %v2405_v41 = vadd.f32 0.2548296, %v2345_v0 }
 0x279   :  { %v13428_v32 = vmul.f32 %v2944_v31, %v13295_v53  ;;  %v2361_v20 = vadd.f32 0.2548296, %v2301_v9  ;;  %v2051_v39 = vmul.f32 %v13399_v56, %v1991_v1  ;;  %v13432_v59 = vmul.f32 0.5, %v13331_v40 }
 0x27a   :  { %v10699_v62 = vpop.eup %10698  ;;  %v2476_v6 = vsub.f32 0.0, %v13376_v27  ;;  %v1721_v48 = vand.u32 2147483647, %v13425_v52  ;;  %v13437_v45 = vmul.f32 0.70710677, %v13418_v30  ;;  %v13447_v58 = vsel %vm1571_vm4, 1.0, %v16870_v24 }
 0x27b   :  { %v13439_v14 = vpop.eup %10700  ;;  %v3036_v53 = vpack.c.bf16 %v13428_v32, %v13411_v15  ;;  %v2421_v63 = vmul.f32 %v13361_v23, %v2361_v20  ;;  %v2111_v40 = vadd.f32 1.4214138, %v2051_v39  ;;  %v2820_v0 = vsub.f32 1.0, %v2760_v49  ;;  %v13700_v15 = vld [vmem:[%s16754_s4] sm:$0xff]  }
 0x27c   :  { %v1946_v17 = vmul.f32 1.0614054, %v13439_v14  ;;  %v13451_v4 = vmul.f32 0.5, %v13344_v46  ;;  %v1781_v25 = vmul.f32 0.3275911, %v1721_v48  ;;  %10704 = vpow2.f32 %v2595_v5 }
 0x27d   :  { %v2171_v57 = vmul.f32 %v13399_v56, %v2111_v40  ;;  %v2625_v55 = vmul.f32 1.442695, %v2546_v36  ;;  %v13455_v60 = vand.u32 2147483647, %v13437_v45  ;;  %v2465_v23 = vmul.f32 %v13321_v18, %v2405_v41 }
 0x27e   :  { %v2006_v44 = vadd.f32 -1.4531521, %v1946_v17  ;;  %v2536_v10 = vmul.f32 %v2476_v6, %v13376_v27  ;;  %v1841_v42 = vadd.f32 1.0, %v1781_v25  ;;  %v13459_v31 = vpop.eup %10702  ;;  %v2721_v9 = vmul.f32 %v10699_v62, %v2421_v63  ;;  %v17033_v25 = vld [vmem:[#allocation26_spill] sm:$0xff] }
 0x27f   :  { %v2231_v1 = vadd.f32 -0.28449672, %v2171_v57  ;;  %vm1586_vm5 = vcmp.ge.f32.partialorder %v13351_v16, 0.0  ;;  %v1771_v46 = vmul.f32 0.3275911, %v13455_v60  ;;  %v2880_v49 = vmul.f32 %v2820_v0, %v13273_v35  ;;  %v17034_v57 = vld [vmem:[#allocation6_spill] sm:$0xff] }
 0x280   :  { %v2066_v5 = vmul.f32 %v13439_v14, %v2006_v44  ;;  %v1936_v36 = vmul.f32 1.0614054, %v13459_v31  ;;  %10706 = vrcp.f32 %v1841_v42  ;;  %vm1576_vm6 = vcmp.ge.f32.partialorder %v13370_v21, 0.0  ;;  %v17036_v42 = vld [vmem:[#allocation37_spill] sm:$0xff] }
 0x281   :  { %v2291_v18 = vmul.f32 %v13399_v56, %v2231_v1  ;;  %10708 = vpow2.f32 %v2625_v55  ;;  %v1831_v27 = vadd.f32 1.0, %v1771_v46  ;;  %v2765_v41 = vmul.f32 %v10697_v11, %v2465_v23 }
 0x282   :  { %v2126_v20 = vadd.f32 1.4214138, %v2066_v5  ;;  %v1996_v39 = vadd.f32 -1.4531521, %v1936_v36  ;;  %v2605_v62 = vmul.f32 1.442695, %v2536_v10  ;;  %v1339_v55 = vadd.f32 %v17034_v57, %v17033_v25 }
 0x283   :  { %v2781_v6 = vsub.f32 1.0, %v2721_v9  ;;  %v2351_v63 = vadd.f32 0.2548296, %v2291_v18  ;;  %v2501_v40 = vsub.f32 0.0, %v1721_v48  ;;  %10710 = vrcp.f32 %v1831_v27  ;;  %v17035_v10 = vld [vmem:[#allocation12_spill] sm:$0xff] }
 0x284   :  { %v2186_v35 = vmul.f32 %v13439_v14, %v2126_v20  ;;  %v2056_v0 = vmul.f32 %v13459_v31, %v1996_v39  ;;  %v13471_v17 = vmul.f32 0.70710677, %v13422_v19  ;;  %v2940_v44 = vadd.f32 1.0, %v2880_v49 }
 0x285   :  { %v2411_v11 = vmul.f32 %v13399_v56, %v2351_v63  ;;  %v1646_v23 = vsel %vm1586_vm5, 1.0, %v16870_v24  ;;  %v3017_v9 = vpack.c.bf16 %v17036_v42, %v17035_v10  ;;  %v13484_v46 = vsel %vm1576_vm6, 1.0, %v16870_v24  ;;  %v17037_v63 = vld [vmem:[#allocation35_spill] sm:$0xff] }
 0x286   :  { %v2246_v1 = vadd.f32 -0.28449672, %v2186_v35  ;;  %v2116_v5 = vadd.f32 1.4214138, %v2056_v0  ;;  %v13487_v36 = vadd.f32 %v13113_v43, %v1339_v55  ;;  %v10705_v49 = vpop.eup %10704  ;;  %v2825_v18 = vsub.f32 1.0, %v2765_v41  ;;  %v17038_v35 = vld [vmem:[#allocation33_spill] sm:$0xff] }
 0x287   :  { %10712 = vpow2.f32 %v2605_v62  ;;  %v2561_v56 = vmul.f32 %v2501_v40, %v1721_v48  ;;  %v1726_v16 = vand.u32 2147483647, %v13471_v17  ;;  %3105 = vmatprep.subr.bf16.mxu0 %v3017_v9  ;;  %v2841_v27 = vmul.f32 %v2781_v6, %v13387_v8 }
 0x288   :  { %v2306_v20 = vmul.f32 %v13439_v14, %v2246_v1  ;;  %v2176_v39 = vmul.f32 %v13459_v31, %v2116_v5  ;;  %v13494_v21 = vmul.f32 0.70710677, %v13487_v36  ;;  %v17039_v43 = vpack.c.bf16 %v17037_v63, %v17038_v35 }
 0x289   :  { %v13500_v41 = vmul.f32 %v2940_v44, %v13266_v54  ;;  %v2711_v48 = vmul.f32 %v10705_v49, %v2411_v11  ;;  %v2491_v62 = vsub.f32 0.0, %v13455_v60  ;;  %v1786_v40 = vmul.f32 0.3275911, %v1726_v16 }
 0x28a   :  { %3106 = vmatpush1.bf16.msra.mxu0 %v17039_v43  ;;  %v13503_v0 = vpop.eup %10706  ;;  %v2366_v8 = vadd.f32 0.2548296, %v2306_v20  ;;  %v2236_v6 = vadd.f32 -0.28449672, %v2176_v39  ;;  %v13506_v25 = vmul.f32 0.5, %v13415_v33  ;;  %v13509_v57 = vmul.f32 0.5, %v13418_v30 }
 0x28b   :  { %v10709_v55 = vpop.eup %10708  ;;  %v13512_v10 = vmul.f32 %v2825_v18, %v13348_v29  ;;  %v1961_v54 = vmul.f32 1.0614054, %v13503_v0  ;;  %v2655_v44 = vmul.f32 1.442695, %v2561_v56  ;;  %v1846_v11 = vadd.f32 1.0, %v1786_v40  ;;  %v17041_v43 = vld [vmem:[#allocation4_spill] sm:$0xff] }
 0x28c   :  { %v2901_v42 = vadd.f32 1.0, %v2841_v27  ;;  %v2426_v9 = vmul.f32 %v13439_v14, %v2366_v8  ;;  %v2296_v1 = vmul.f32 %v13459_v31, %v2236_v6  ;;  %v1716_v5 = vand.u32 2147483647, %v13494_v21  ;;  %v17040_v14 = vld [vmem:[#allocation9_spill] sm:$0xff] }
 0x28d   :  { %v13518_v33 = vpop.eup %10710  ;;  %v2771_v49 = vsub.f32 1.0, %v2711_v48  ;;  %v2021_v30 = vadd.f32 -1.4531521, %v1961_v54  ;;  %v2551_v20 = vmul.f32 %v2491_v62, %v13455_v60  ;;  %10714 = vrcp.f32 %v1846_v11  ;;  %v17042_v40 = vld [vmem:[#allocation29_spill] sm:$0xff] }
 0x28e   :  { %v2726_v29 = vmul.f32 %v10709_v55, %v2426_v9  ;;  %v2356_v18 = vadd.f32 0.2548296, %v2296_v1  ;;  %v1951_v39 = vmul.f32 1.0614054, %v13518_v33  ;;  %v1776_v56 = vmul.f32 0.3275911, %v1716_v5 }
 0x28f   :  { %v2081_v27 = vmul.f32 %v13503_v0, %v2021_v30  ;;  %v2506_v63 = vsub.f32 0.0, %v1726_v16  ;;  %v1360_v35 = vadd.f32 %v17040_v14, %v17013_v47  ;;  %v1352_v8 = vadd.f32 %v17042_v40, %v17041_v43 }
 0x290   :  { %v2786_v6 = vsub.f32 1.0, %v2726_v29  ;;  %v2416_v48 = vmul.f32 %v13459_v31, %v2356_v18  ;;  %v2011_v54 = vadd.f32 -1.4531521, %v1951_v39  ;;  %v1836_v60 = vadd.f32 1.0, %v1776_v56 }
 0x291   :  { %v10713_v62 = vpop.eup %10712  ;;  %v2831_v55 = vmul.f32 %v2771_v49, %v13447_v58  ;;  %v2141_v11 = vadd.f32 1.4214138, %v2081_v27  ;;  %v13530_v9 = vadd.f32 %v13138_v61, %v1360_v35  ;;  %v13533_v1 = vadd.f32 %v13172_v13, %v1352_v8 }
 0x292   :  { %v2846_v30 = vmul.f32 %v2786_v6, %v1646_v23  ;;  %v2716_v47 = vmul.f32 %v10713_v62, %v2416_v48  ;;  %vm1601_vm7 = vcmp.ge.f32.partialorder %v13425_v52, 0.0  ;;  %v2071_v29 = vmul.f32 %v13518_v33, %v2011_v54 }
 0x293   :  { %10716 = vrcp.f32 %v1836_v60  ;;  %v2201_v31 = vmul.f32 %v13503_v0, %v2141_v11  ;;  %vm1591_vm8 = vcmp.ge.f32.partialorder %v13437_v45, 0.0  ;;  %v13540_v58 = vmul.f32 0.70710677, %v13530_v9 }
 0x294   :  { %10718 = vpow2.f32 %v2655_v44  ;;  %v13543_v61 = vmul.f32 %v2901_v42, %v13355_v51  ;;  %v2906_v13 = vadd.f32 1.0, %v2846_v30  ;;  %v2776_v49 = vsub.f32 1.0, %v2716_v47 }
 0x295   :  { %v2131_v23 = vadd.f32 1.4214138, %v2071_v29  ;;  %v2261_v18 = vadd.f32 -0.28449672, %v2201_v31  ;;  %v2635_v39 = vmul.f32 1.442695, %v2551_v20  ;;  %v2566_v56 = vmul.f32 %v2506_v63, %v1726_v16 }
 0x296   :  { %v1741_v27 = vand.u32 2147483647, %v13540_v58  ;;  %v2891_v14 = vadd.f32 1.0, %v2831_v55  ;;  %v13547_v35 = vmul.f32 %v2906_v13, %v13432_v59  ;;  %v2836_v44 = vmul.f32 %v2776_v49, %v13484_v46 }
 0x297   :  { %v2191_v43 = vmul.f32 %v13518_v33, %v2131_v23  ;;  %v13551_v40 = vpop.eup %10714  ;;  %v2321_v51 = vmul.f32 %v13503_v0, %v2261_v18  ;;  %v2496_v42 = vsub.f32 0.0, %v1716_v5  ;;  %v13555_v6 = vmul.f32 0.70710677, %v13533_v1 }
 0x298   :  { %v1801_v8 = vmul.f32 0.3275911, %v1741_v27  ;;  %v3018_v16 = vpack.c.bf16 %v13547_v35, %v13543_v61  ;;  %v2896_v20 = vadd.f32 1.0, %v2836_v44  ;;  %v1966_v59 = vmul.f32 1.0614054, %v13551_v40 }
 0x299   :  { %v2251_v63 = vadd.f32 -0.28449672, %v2191_v43  ;;  %v2381_v48 = vadd.f32 0.2548296, %v2321_v51  ;;  %10720 = vpow2.f32 %v2635_v39  ;;  %v2665_v46 = vmul.f32 1.442695, %v2566_v56 }
 0x29a   :  { %v1861_v54 = vadd.f32 1.0, %v1801_v8  ;;  %v13561_v60 = vmul.f32 %v2891_v14, %v13391_v37  ;;  %v13564_v62 = vmul.f32 %v2896_v20, %v13451_v4  ;;  %v2026_v11 = vadd.f32 -1.4531521, %v1966_v59  ;;  %v17043_v4 = vld [vmem:[#allocation19_spill] sm:$0xff]  ;;  %v17045_v59 = vld [vmem:[#allocation30_spill] sm:$0xff] }
 0x29b   :  { %v2311_v55 = vmul.f32 %v13518_v33, %v2251_v63  ;;  %v2556_v30 = vmul.f32 %v2496_v42, %v1716_v5  ;;  %v2521_v47 = vsub.f32 0.0, %v1741_v27  ;;  %v1731_v29 = vand.u32 2147483647, %v13555_v6  ;;  %v17044_v63 = vld [vmem:[#allocation20_spill] sm:$0xff] }
 0x29c   :  { %10722 = vrcp.f32 %v1861_v54  ;;  %v3013_v13 = vpack.c.bf16 %v13564_v62, %v13561_v60  ;;  %v2441_v49 = vmul.f32 %v13503_v0, %v2381_v48  ;;  %v2086_v37 = vmul.f32 %v13551_v40, %v2026_v11 }
 0x29d   :  { %v13568_v31 = vpop.eup %10716  ;;  %v1363_v23 = vadd.f32 %v17043_v4, %v17017_v12  ;;  %v2945_v39 = vadd.f32 1.0, %v13512_v10  ;;  %v1661_v5 = vsel %vm1601_vm7, 1.0, %v16870_v24  ;;  %v1791_v14 = vmul.f32 0.3275911, %v1731_v29 }
 0x29e   :  { %v10719_v18 = vpop.eup %10718  ;;  %v1956_v56 = vmul.f32 1.0614054, %v13568_v31  ;;  %v13584_v44 = vsel %vm1591_vm8, 1.0, %v16870_v24  ;;  %v2371_v0 = vadd.f32 0.2548296, %v2311_v55  ;;  %10724 = vpow2.f32 %v2665_v46 }
 0x29f   :  { %v2146_v43 = vadd.f32 1.4214138, %v2086_v37  ;;  %v13587_v51 = vadd.f32 %v13207_v26, %v1363_v23  ;;  %v2581_v10 = vmul.f32 %v2521_v47, %v1741_v27  ;;  %v1851_v42 = vadd.f32 1.0, %v1791_v14 }
 0x2a0   :  { %v2016_v12 = vadd.f32 -1.4531521, %v1956_v56  ;;  %v2741_v8 = vmul.f32 %v10719_v18, %v2441_v49  ;;  %v2645_v20 = vmul.f32 1.442695, %v2556_v30  ;;  %v1355_v48 = vadd.f32 %v17045_v59, %v17044_v63 }
 0x2a1   :  { %v2206_v52 = vmul.f32 %v13551_v40, %v2146_v43  ;;  %vm1606_vm10 = vcmp.ge.f32.partialorder %v13471_v17, 0.0  ;;  %10726 = vrcp.f32 %v1851_v42  ;;  %v13595_v54 = vmul.f32 0.70710677, %v13587_v51 }
 0x2a2   :  { %v2076_v45 = vmul.f32 %v13568_v31, %v2016_v12  ;;  %v2431_v26 = vmul.f32 %v13518_v33, %v2371_v0  ;;  %v13599_v27 = vmul.f32 0.5, %v13422_v19  ;;  %v13602_v55 = vadd.f32 %v13251_v22, %v1355_v48 }
 0x2a3   :  { %v2266_v46 = vadd.f32 -0.28449672, %v2206_v52  ;;  %v10721_v11 = vpop.eup %10720  ;;  %v13605_v30 = vmul.f32 %v2945_v39, %v13299_v3  ;;  %v2695_v47 = vmul.f32 1.442695, %v2581_v10  ;;  %v1746_v49 = vand.u32 2147483647, %v13595_v54 }
 0x2a4   :  { %v2136_v17 = vadd.f32 1.4214138, %v2076_v45  ;;  %v2801_v37 = vsub.f32 1.0, %v2741_v8  ;;  %v1666_v4 = vsel %vm1606_vm10, 1.0, %v16870_v24  ;;  %10728 = vpow2.f32 %v2645_v20  ;;  %v17046_v8 = vld [vmem:[#allocation39_spill] sm:$0xff]  ;;  %v17047_v52 = vld [vmem:[#allocation22_spill] sm:$0xff] }
 0x2a5   :  { %v2326_v33 = vmul.f32 %v13551_v40, %v2266_v46  ;;  %v13613_v23 = vmul.f32 0.5, %v13487_v36  ;;  %v2511_v18 = vsub.f32 0.0, %v1731_v29  ;;  %v1806_v3 = vmul.f32 0.3275911, %v1746_v49 }
 0x2a6   :  { %v13610_v19 = vpop.eup %10722  ;;  %v2196_v22 = vmul.f32 %v13568_v31, %v2136_v17  ;;  %v2731_v39 = vmul.f32 %v10721_v11, %v2431_v26  ;;  %vm1596_vm11 = vcmp.ge.f32.partialorder %v13494_v21, 0.0  ;;  %10730 = vpow2.f32 %v2695_v47  ;;  %v17048_v47 = vld [vmem:[#allocation38_spill] sm:$0xff] }
 0x2a7   :  { %v2386_v56 = vadd.f32 0.2548296, %v2326_v33  ;;  %v1981_v14 = vmul.f32 1.0614054, %v13610_v19  ;;  %v1866_v43 = vadd.f32 1.0, %v1806_v3  ;;  %v2861_v10 = vmul.f32 %v2801_v37, %v1661_v5  ;;  %v17049_v37 = vld [vmem:[#allocation10_spill] sm:$0xff] }
 0x2a8   :  { %v2256_v0 = vadd.f32 -0.28449672, %v2196_v22  ;;  %v13619_v12 = vmul.f32 0.70710677, %v13602_v55  ;;  %v3022_v20 = vpack.c.bf16 %v17047_v52, %v17046_v8  ;;  %v10725_v63 = vpop.eup %10724  ;;  %v1656_v59 = vsel %vm1596_vm11, 1.0, %v16870_v24  ;;  %v17051_v22 = vld [vmem:[#allocation43_spill] sm:$0xff] }
 0x2a9   :  { %v2446_v36 = vmul.f32 %v13551_v40, %v2386_v56  ;;  %v2041_v42 = vadd.f32 -1.4531521, %v1981_v14  ;;  %v2571_v48 = vmul.f32 %v2511_v18, %v1731_v29  ;;  %10732 = vrcp.f32 %v1866_v43 }
 0x2aa   :  { %v2316_v21 = vmul.f32 %v13568_v31, %v2256_v0  ;;  %v2791_v45 = vsub.f32 1.0, %v2731_v39  ;;  %v13628_v11 = vand.u32 2147483647, %v13619_v12  ;;  %3107 = vmatprep.subr.bf16.mxu0 %v3022_v20  ;;  %v2526_v17 = vsub.f32 0.0, %v1746_v49 }
 0x2ab   :  { %v2746_v26 = vmul.f32 %v10725_v63, %v2446_v36  ;;  %v2101_v46 = vmul.f32 %v13610_v19, %v2041_v42  ;;  %v13630_v40 = vpop.eup %10726  ;;  %v17050_v33 = vpack.c.bf16 %v17048_v47, %v17049_v37  ;;  %v3027_v29 = vpack.c.bf16 %v13285_v28, %v17051_v22 }
 0x2ac   :  { %v2376_v5 = vadd.f32 0.2548296, %v2316_v21  ;;  %v3032_v18 = vpack.c.bf16 %v13394_v38, %v13358_v7  ;;  %v2921_v3 = vadd.f32 1.0, %v2861_v10  ;;  %v1971_v14 = vmul.f32 1.0614054, %v13630_v40  ;;  %v17053_v21 = vld [vmem:[#allocation41_spill] sm:$0xff] }
 0x2ad   :  { %3108 = vmatpush1.bf16.msra.mxu0 %v17050_v33  ;;  %v2806_v39 = vsub.f32 1.0, %v2746_v26  ;;  %v2161_v56 = vadd.f32 1.4214138, %v2101_v46  ;;  %v1796_v43 = vmul.f32 0.3275911, %v13628_v11  ;;  %v3037_v36 = vpack.c.bf16 %v13605_v30, %v13500_v41  ;;  %v13653_v41 = vpop.permute.xlu0 %3043 }
 0x2ae   :  { %v2436_v0 = vmul.f32 %v13568_v31, %v2376_v5  ;;  %3109 = vmatprep.subr.bf16.mxu0 %v3027_v29  ;;  %v10729_v42 = vpop.eup %10728  ;;  %v2851_v8 = vmul.f32 %v2791_v45, %v13584_v44  ;;  %v2031_v7 = vadd.f32 -1.4531521, %v1971_v14  ;;  %v16803_v38 = vmov 0.0   ;;  %v17052_v31 = vld [vmem:[#allocation42_spill] sm:$0xff] }
 0x2af   :  { %v2866_v28 = vmul.f32 %v2806_v39, %v1666_v4  ;;  %v2221_v52 = vmul.f32 %v13610_v19, %v2161_v56  ;;  %9527 = vmatprep.subr.bf16.mxu1 %v16803_v38  ;;  %v2586_v20 = vmul.f32 %v2526_v17, %v1746_v49  ;;  %v1856_v63 = vadd.f32 1.0, %v1796_v43 }
 0x2b0   :  { %v2736_v10 = vmul.f32 %v10729_v42, %v2436_v0  ;;  %v17054_v26 = vpack.c.bf16 %v17052_v31, %v17053_v21  ;;  %9528 = vmatpush3.bf16.msra.mxu1 %v3013_v13  ;;  %v2091_v4 = vmul.f32 %v13630_v40, %v2031_v7  ;;  %v2675_v45 = vmul.f32 1.442695, %v2571_v48  ;;  %v3094_v49 = vpop.f32.mrb[60].mxu1  ;;  %v13657_v46 = vpop.eup %10730 }
 0x2b1   :  { %v2926_v44 = vadd.f32 1.0, %v2866_v28  ;;  %v2281_v30 = vadd.f32 -0.28449672, %v2221_v52  ;;  %9529 = vmatprep.subr.bf16.mxu1 %v16803_v38  ;;  %v13660_v5 = vmul.f32 %v2921_v3, %v13506_v25  ;;  %10734 = vrcp.f32 %v1856_v63  ;;  %v3096_v62 = vpop.f32.mrb[61].mxu1 }
 0x2b2   :  { %3110 = vmatpush1.bf16.msra.mxu0 %v17054_v26  ;;  %v2796_v17 = vsub.f32 1.0, %v2736_v10  ;;  %vm11006_vm12 = vmmov 0   ;;  %v3095_v60 = vadd.f32 %v3094_v49, %v13653_v41  ;;  %v2911_v13 = vadd.f32 1.0, %v2851_v8  ;;  %v3098_v33 = vpop.f32.mrb[62].mxu1 }
 0x2b3   :  { %3111 = vmatprep.subr.bf16.mxu0 %v3032_v18  ;;  %9539 = vmatprep.mubr.msk.bf16.mxu1 %vm11006_vm12, %v16803_v38  ;;  %v13666_v48 = vmul.f32 %v2926_v44, %v13599_v27  ;;  %v2341_v47 = vmul.f32 %v13610_v19, %v2281_v30  ;;  %v2151_v37 = vadd.f32 1.4214138, %v2091_v4  ;;  %v13669_v22 = vpop.eup %10732  ;;  %v2705_v29 = vmul.f32 1.442695, %v2586_v20  ;;  %v3100_v3 = vpop.f32.mrb[63].mxu1 }
 0x2b4   :  { %v2856_v25 = vmul.f32 %v2796_v17, %v1656_v59  ;;  %9530 = vmatpush3.bf16.msra.mxu1 %v3018_v16  ;;  %v3187_v18 = vmax.f32 %v3095_v60, 0.0  ;;  %v3097_v27 = vadd.f32 %v3096_v62, %v13653_v41  ;;  %v1986_v59 = vmul.f32 1.0614054, %v13669_v22  ;;  %v13684_v16 = vpop.permute.xlu1 %3048  ;;  %v13716_v17 = vld [vmem:[%s16755_s1] sm:$0x1f]  ;;  %s11007_s1 = smov 17  }
 0x2b5   :  { %v3028_v39 = vpack.c.bf16 %v13666_v48, %v13660_v5  ;;  %v2211_v56 = vmul.f32 %v13630_v40, %v2151_v37  ;;  %9531 = vmatprep.subr.bf16.mxu1 %v16803_v38  ;;  %v3249_v2 = vlaneseq  ;;  %v2971_v14 = vmul.f32 %v2911_v13, %v13509_v57 }
 0x2b6   :  { %3112 = vmatpush1.bf16.msra.mxu0 %v3031_v50  ;;  %v2916_v34 = vadd.f32 1.0, %v2856_v25  ;;  %v2516_v50 = vsub.f32 0.0, %v13628_v11  ;;  %v3197_v61 = vmin.f32 %v3187_v18, 1.0  ;;  %v3188_v35 = vmax.f32 %v3097_v27, 0.0 }
 0x2b7   :  { %3113 = vmatprep.subr.bf16.mxu0 %v3037_v36  ;;  %v2401_v0 = vadd.f32 0.2548296, %v2341_v47  ;;  %v2271_v43 = vadd.f32 -0.28449672, %v2211_v56  ;;  %v2046_v42 = vadd.f32 -1.4531521, %v1986_v59  ;;  %v3099_v52 = vadd.f32 %v3098_v33, %v13684_v16 }
 0x2b8   :  { %v2976_v8 = vmul.f32 %v2916_v34, %v13613_v23  ;;  %v3207_v36 = vmul.f32 3.0, %v3197_v61  ;;  %v3198_v28 = vmin.f32 %v3188_v35, 1.0  ;;  %10736 = vpow2.f32 %v2675_v45 }
 0x2b9   :  { %v2106_v7 = vmul.f32 %v13669_v22, %v2046_v42  ;;  %v13693_v10 = vshrl.u32 %v3249_v2, 7  ;;  %v3192_v31 = vmax.f32 %v3099_v52, 0.0  ;;  %v2461_v21 = vmul.f32 %v13610_v19, %v2401_v0 }
 0x2ba   :  { %3114 = vmatpush1.bf16.msra.mxu0 %v3036_v53  ;;  %v3023_v20 = vpack.c.bf16 %v2976_v8, %v2971_v14  ;;  %v3217_v57 = vadd.f32 0.5, %v3207_v36  ;;  %v3208_v63 = vmul.f32 3.0, %v3198_v28  ;;  %v2331_v23 = vmul.f32 %v13630_v40, %v2271_v43 }
 0x2bb   :  { %v2166_v26 = vadd.f32 1.4214138, %v2106_v7  ;;  %v3101_v32 = vadd.f32 %v3100_v3, %v13684_v16  ;;  %v13705_v53 = vpop.eup %10734  ;;  %10738 = vpow2.f32 %v2705_v29  ;;  %v2576_v44 = vmul.f32 %v2516_v50, %v13628_v11 }
 0x2bc   :  { %9532 = vmatpush3.bf16.msra.mxu1 %v3023_v20  ;;  %v3202_v19 = vmin.f32 %v3192_v31, 1.0  ;;  %v17055_v30 = vmov 0   ;;  %v1976_v45 = vmul.f32 1.0614054, %v13705_v53  ;;  %v3251_v49 = vsub.s32 0, %v13693_v10 }
 0x2bd   :  { %9048 = vmatmul.mubr.msk.bf16.vlgmr.msra.gmra.mrb[48].mxu0 %vm3056_vm9, %v13700_v15  ;;  %v2226_v4 = vmul.f32 %v13669_v22, %v2166_v26  ;;  %9533 = vmatprep.subr.bf16.mxu1 %v16803_v38  ;;  %v3227_v5 = vfloor.f32 %v3217_v57  ;;  %v3218_v60 = vadd.f32 0.5, %v3208_v63  ;;  %v3193_v62 = vmax.f32 %v3101_v32, 0.0 }
 0x2be   :  { %3461 = vmatprep.mubr.bf16.mxu0 %v17055_v30  ;;  %v3212_v11 = vmul.f32 3.0, %v3202_v19  ;;  %v2761_v13 = vmul.f32 %v13657_v46, %v2461_v21  ;;  %v2391_v48 = vadd.f32 0.2548296, %v2331_v23  ;;  %v2036_v37 = vadd.f32 -1.4531521, %v1976_v45 }
 0x2bf   :  { %v2286_v47 = vadd.f32 -0.28449672, %v2226_v4  ;;  %vm1621_vm13 = vcmp.ge.f32.partialorder %v13540_v58, 0.0  ;;  %v2685_v33 = vmul.f32 1.442695, %v2576_v44  ;;  %v3203_v29 = vmin.f32 %v3193_v62, 1.0 }
 0x2c0   :  { %9534 = vmatpush3.bf16.msra.mxu1 %v3028_v39  ;;  %v3222_v25 = vadd.f32 0.5, %v3212_v11  ;;  %v2096_v27 = vmul.f32 %v13705_v53, %v2036_v37  ;;  %v3252_v3 = vrot.slane %v13716_v17, %v3251_v49  ;;  %v3255_v56 = vsub.s32 1, %v13693_v10 }
 0x2c1   :  { %v2346_v18 = vmul.f32 %v13669_v22, %v2286_v47  ;;  %9535 = vmatprep.subr.bf16.mxu1 %v16803_v38  ;;  %v3237_v46 = vmul.f32 0.33333334, %v3227_v5  ;;  %v3228_v59 = vfloor.f32 %v3218_v60  ;;  %v3213_v34 = vmul.f32 3.0, %v3203_v29 }
 0x2c2   :  { %v3232_v2 = vfloor.f32 %v3222_v25  ;;  %v10737_v50 = vpop.eup %10736  ;;  %v2821_v61 = vsub.f32 1.0, %v2761_v13  ;;  %v2451_v39 = vmul.f32 %v13630_v40, %v2391_v48  ;;  %v2156_v14 = vadd.f32 1.4214138, %v2096_v27 }
 0x2c3   :  { %v2406_v35 = vadd.f32 0.2548296, %v2346_v18  ;;  %v1681_v0 = vsel %vm1621_vm13, 1.0, %v16870_v24  ;;  %10740 = vpow2.f32 %v2685_v33  ;;  %v3223_v42 = vadd.f32 0.5, %v3213_v34 }
 0x2c4   :  { %v3242_v43 = vmul.f32 0.33333334, %v3232_v2  ;;  %vm1626_vm14 = vcmp.ge.f32.partialorder %v13595_v54, 0.0  ;;  %v2216_v36 = vmul.f32 %v13705_v53, %v2156_v14  ;;  %v3256_v28 = vrot.slane %v13716_v17, %v3255_v56 }
 0x2c5   :  { %v2466_v8 = vmul.f32 %v13669_v22, %v2406_v35  ;;  %v10739_v52 = vpop.eup %10738  ;;  %v3274_v7 = vmul.f32 %v3252_v3, %v3237_v46  ;;  %v3238_v40 = vmul.f32 0.33333334, %v3228_v59  ;;  %v3233_v57 = vfloor.f32 %v3223_v42 }
 0x2c6   :  { %v3279_v20 = vmul.f32 %v3252_v3, %v3242_v43  ;;  %v2881_v63 = vmul.f32 %v2821_v61, %v1681_v0  ;;  %v2751_v31 = vmul.f32 %v10737_v50, %v2451_v39  ;;  %v2276_v21 = vadd.f32 -0.28449672, %v2216_v36 }
 0x2c7   :  { %v2766_v58 = vmul.f32 %v10739_v52, %v2466_v8  ;;  %v3243_v26 = vmul.f32 0.33333334, %v3233_v57  ;;  %vm1611_vm15 = vcmp.ge.f32.partialorder %v13555_v6, 0.0  ;;  %v1686_v44 = vsel %vm1626_vm14, 1.0, %v16870_v24 }
 0x2c8   :  { %v13733_v23 = vpack.c.bf16 %v3279_v20, %v3274_v7  ;;  %v2336_v22 = vmul.f32 %v13705_v53, %v2276_v21  ;;  %v3275_v19 = vmul.f32 %v3256_v28, %v3238_v40  ;;  %v2941_v45 = vadd.f32 1.0, %v2881_v63  ;;  %v13774_v63 = vld [vmem:[%s16756_s6 + $0x30] sm:$0xff]  }
 0x2c9   :  { %v2826_v32 = vsub.f32 1.0, %v2766_v58  ;;  %v3280_v4 = vmul.f32 %v3256_v28, %v3243_v26  ;;  %v2811_v49 = vsub.f32 1.0, %v2751_v31  ;;  %v1501_v62 = vmul.f32 0.5, %v13530_v9 }
 0x2ca   :  { %3389 = vrot.lane.b32.xlu0 %v13733_v23, %s11007_s1  ;;  %v2396_v60 = vadd.f32 0.2548296, %v2336_v22  ;;  %v1506_v13 = vmul.f32 0.5, %v13587_v51  ;;  %v1671_v37 = vsel %vm1611_vm15, 1.0, %v16870_v24  ;;  %vm1616_vm0 = vcmp.ge.f32.partialorder %v13619_v12, 0.0 }
 0x2cb   :  { %v2886_v5 = vmul.f32 %v2826_v32, %v1686_v44  ;;  %v13742_v11 = vpack.c.bf16 %v3280_v4, %v3275_v19  ;;  %v11008_v33 = vmov 0.0|0.0   ;;  %v3001_v9 = vmul.f32 %v2941_v45, %v1501_v62 }
 0x2cc   :  { %v2456_v54 = vmul.f32 %v13705_v53, %v2396_v60  ;;  %v2871_v25 = vmul.f32 %v2811_v49, %v1671_v37  ;;  %v1676_v27 = vsel %vm1616_vm0, 1.0, %v16870_v24  ;;  %v1491_v56 = vmul.f32 0.5, %v13533_v1 }
 0x2cd   :  { %v2946_v48 = vadd.f32 1.0, %v2886_v5  ;;  %v10741_v47 = vpop.eup %10740  ;;  %3391 = vrot.lane.b32.xlu1 %v13742_v11, %s11007_s1  ;;  %v1496_v12 = vmul.f32 0.5, %v13602_v55  ;;  %vm3399_vm1 = vcmask 138240   ;;  %vm3410_vm2 = vcmask 130048  }
 0x2ce   :  { %3387 = vrot.lane.b32.xlu0 %v11008_v33, %s11007_s1  ;;  %v2756_v29 = vmul.f32 %v10741_v47, %v2456_v54  ;;  %v2931_v3 = vadd.f32 1.0, %v2871_v25  ;;  %v3259_v22 = vsub.s32 2, %v13693_v10  ;;  %v3263_v44 = vsub.s32 3, %v13693_v10 }
 0x2cf   :  { %v3006_v51 = vmul.f32 %v2946_v48, %v1506_v13  ;;  %v13784_v13 = vld [vmem:[%s16756_s6 + $0x38] sm:$0xff]   ;;  %vm3738_vm3 = vcmask 146432   ;;  %vm4500_vm4 = vcmask 7168   ;;  %vm5323_vm5 = vcmask 1039360  }
 0x2d0   :  { %v2816_v53 = vsub.f32 1.0, %v2756_v29  ;;  %v2991_v59 = vmul.f32 %v2931_v3, %v1491_v56  ;;  %v3260_v54 = vrot.slane %v13716_v17, %v3259_v22  ;;  %v6921_v22 = vld [vmem:[%s16757_s7 + $0x48] sm:$0xff]  ;;  %vm5734_vm6 = vcmask 916480  }
 0x2d1   :  { %v3038_v18 = vpack.c.bf16 %v3006_v51, %v3001_v9  ;;  %v3264_v9 = vrot.slane %v13716_v17, %v3263_v44  ;;  %v6916_v44 = vld [vmem:[%s16757_s7 + $0x20] sm:$0xff]  ;;  %vm6145_vm7 = vcmask 908288   ;;  %vm6556_vm8 = vcmask 900096  }
 0x2d2   :  { %v2876_v6 = vmul.f32 %v2816_v53, %v1676_v27 }
 0x2d4   :  { %v2936_v46 = vadd.f32 1.0, %v2876_v6 }
 0x2d6   :  { %v2996_v2 = vmul.f32 %v2936_v46, %v1496_v12  ;;  %v13798_v12 = vld [vmem:[%s16756_s6 + $0x40] sm:$0xff]   ;;  %v13810_v46 = vld [vmem:[%s16756_s6 + $0x48] sm:$0xff]  }
 0x2d8   :  { %v3033_v34 = vpack.c.bf16 %v2996_v2, %v2991_v59  ;;  %v13820_v59 = vld [vmem:[%s16756_s6 + $0x50] sm:$0xff]  }
 0x2da   :  { %9536 = vmatpush3.bf16.msra.mxu1 %v3033_v34 }
 0x2db   :  { %9537 = vmatprep.subr.bf16.mxu1 %v16803_v38 }
 0x2de   :  { %9538 = vmatpush3.bf16.msra.mxu1 %v3038_v18 }
 0x2e1   :  { %9540 = vmatmul.mubr.msk.bf16.vlgmr.msra.gmra.mrb[64].mxu1 %vm3056_vm9, %v13700_v15 }
 0x2e2   :  { %3554 = vmatprep.mubr.bf16.mxu1 %v17055_v30 }
 0x33c   :  { %v3390_v50 = vpop.permute.xlu0 %3389 }
 0x33f   :  { %v13762_v61 = vpop.permute.xlu1 %3391 }
 0x340   :  { %v3401_v1 = vsel %vm3399_vm1, %v3390_v50, %v13762_v61  ;;  %v3388_v55 = vpop.permute.xlu0 %3387 }
 0x341   :  { %3429 = vmatprep.subr.bf16.mxu0 %v3401_v1  ;;  %v3400_v39 = vsel %vm3399_vm1, %v3388_v55, %v3390_v50 }
 0x342   :  { %3430 = vmatpush1.bf16.msra.mxu0 %v3400_v39 }
 0x345   :  { %9068 = vmatmul.mubr.msk.bf16.vlgmr.msra.gmra.mrb[52].mxu0 %vm3410_vm2, %v13774_v63 }
 0x346   :  { %3471 = vmatprep.mubr.bf16.mxu0 %v17055_v30 }
 0x34d   :  { %9069 = vmatmul.mubr.msk.bf16.gmra.mrb[56].mxu0 %vm3410_vm2, %v13784_v13 }
 0x34e   :  { %3481 = vmatprep.mubr.bf16.mxu0 %v17055_v30 }
 0x355   :  { %9070 = vmatmul.mubr.msk.bf16.gmra.mrb[60].mxu0 %vm3410_vm2, %v13798_v12 }
 0x356   :  { %3491 = vmatprep.mubr.bf16.mxu0 %v17055_v30 }
 0x35d   :  { %9071 = vmatmul.mubr.msk.bf16.gmra.mrb[64].mxu0 %vm3410_vm2, %v13810_v46 }
 0x35e   :  { %3501 = vmatprep.mubr.bf16.mxu0 %v17055_v30 }
 0x365   :  { %9072 = vmatmul.mubr.msk.bf16.gmra.mrb[68].mxu0 %vm3410_vm2, %v13820_v59 }
 0x366   :  { %3511 = vmatprep.mubr.bf16.mxu0 %v17055_v30 }
 0x390   :  { %v3137_v35 = vpop.f32.mrb[48].mxu0 }
 0x391   :  { %v3138_v14 = vadd.f32 %v3137_v35, %v13653_v41  ;;  %v3139_v0 = vpop.f32.mrb[49].mxu0 }
 0x392   :  { %v3140_v15 = vadd.f32 %v3139_v0, %v13653_v41  ;;  %v3141_v43 = vpop.f32.mrb[50].mxu0  ;;  %v3267_v0 = vsub.s32 4, %v13693_v10 }
 0x393   :  { %v3189_v42 = vmax.f32 %v3138_v14, 0.0  ;;  %v3142_v8 = vadd.f32 %v3141_v43, %v13684_v16  ;;  %v3143_v36 = vpop.f32.mrb[51].mxu0  ;;  %v13831_v43 = vld [vmem:[%s16756_s6 + $0x58] sm:$0xff]  }
 0x394   :  { %v3190_v28 = vmax.f32 %v3140_v15, 0.0  ;;  %v3144_v52 = vadd.f32 %v3143_v36, %v13684_v16  ;;  %9073 = vmatmul.mubr.msk.bf16.gmra.mrb[72].mxu0 %vm3410_vm2, %v13831_v43  ;;  %v3268_v10 = vrot.slane %v13716_v17, %v3267_v0  ;;  %v6913_v17 = vld [vmem:[%s16757_s7 + $0x8] sm:$0xff] }
 0x395   :  { %v3199_v7 = vmin.f32 %v3189_v42, 1.0  ;;  %v3194_v40 = vmax.f32 %v3142_v8, 0.0  ;;  %9545 = vmatprep.mubr.msk.bf16.mxu0 %vm3410_vm2, %v13774_v63 }
 0x396   :  { %v3200_v20 = vmin.f32 %v3190_v28, 1.0  ;;  %v3195_v57 = vmax.f32 %v3144_v52, 0.0 }
 0x397   :  { %v3209_v31 = vmul.f32 3.0, %v3199_v7  ;;  %v3204_v58 = vmin.f32 %v3194_v40, 1.0 }
 0x398   :  { %v3210_v21 = vmul.f32 3.0, %v3200_v20  ;;  %v3205_v26 = vmin.f32 %v3195_v57, 1.0 }
 0x399   :  { %v3219_v32 = vadd.f32 0.5, %v3209_v31  ;;  %v3214_v19 = vmul.f32 3.0, %v3204_v58  ;;  %v6915_v58 = vld [vmem:[%s16757_s7 + $0x18] sm:$0xff] }
 0x39a   :  { %v3220_v4 = vadd.f32 0.5, %v3210_v21  ;;  %v3215_v45 = vmul.f32 3.0, %v3205_v26  ;;  %v6912_v21 = vld [vmem:[%s16757_s7] sm:$0xff]  ;;  %v6919_v26 = vld [vmem:[%s16757_s7 + $0x38] sm:$0xff] }
 0x39b   :  { %v3229_v49 = vfloor.f32 %v3219_v32  ;;  %v3224_v5 = vadd.f32 0.5, %v3214_v19  ;;  %v6914_v32 = vld [vmem:[%s16757_s7 + $0x10] sm:$0xff]  ;;  %v6923_v19 = vld [vmem:[%s16757_s7 + $0x58] sm:$0xff] }
 0x39c   :  { %v3230_v60 = vfloor.f32 %v3220_v4  ;;  %v3225_v62 = vadd.f32 0.5, %v3215_v45  ;;  %v6918_v4 = vld [vmem:[%s16757_s7 + $0x30] sm:$0xff] }
 0x39d   :  { %v3239_v48 = vmul.f32 0.33333334, %v3229_v49  ;;  %v3234_v47 = vfloor.f32 %v3224_v5  ;;  %v6920_v49 = vld [vmem:[%s16757_s7 + $0x40] sm:$0xff] }
 0x39e   :  { %v3240_v37 = vmul.f32 0.33333334, %v3230_v60  ;;  %v3235_v25 = vfloor.f32 %v3225_v62  ;;  %v6922_v60 = vld [vmem:[%s16757_s7 + $0x50] sm:$0xff]  ;;  %v8635_v62 = vld [vmem:[%s16758_s9] sm:$0xff] }
 0x39f   :  { %v3244_v51 = vmul.f32 0.33333334, %v3234_v47  ;;  %v3276_v18 = vmul.f32 %v3260_v54, %v3239_v48 }
 0x3a0   :  { %v3245_v29 = vmul.f32 0.33333334, %v3235_v25  ;;  %v3277_v27 = vmul.f32 %v3264_v9, %v3240_v37 }
 0x3a1   :  { %v3281_v53 = vmul.f32 %v3260_v54, %v3244_v51 }
 0x3a2   :  { %v3282_v3 = vmul.f32 %v3264_v9, %v3245_v29 }
 0x3a3   :  { %v13791_v6 = vpack.c.bf16 %v3281_v53, %v3276_v18 }
 0x3a4   :  { %v13793_v56 = vpack.c.bf16 %v3282_v3, %v3277_v27 }
 0x3a6   :  { %3395 = vrot.lane.b32.xlu1 %v13793_v56, %s11007_s1 }
 0x3aa   :  { %3728 = vrot.lane.b32.xlu1 %v13733_v23, %s11009_s29 }
 0x3ae   :  { %3726 = vrot.lane.b32.xlu1 %v11008_v33, %s11009_s29 }
 0x3b4   :  { %v3180_v2 = vpop.f32.mrb[64].mxu1 }
 0x3b5   :  { %v3181_v34 = vadd.f32 %v3180_v2, %v13653_v41  ;;  %v9541_v50 = vpop.f32.mrb[65].mxu1 }
 0x3b6   :  { %v3183_v1 = vpop.f32.mrb[66].mxu1 }
 0x3b7   :  { %v3191_v55 = vmax.f32 %v3181_v34, 0.0  ;;  %v3184_v39 = vadd.f32 %v3183_v1, %v13684_v16  ;;  %v9542_v35 = vpop.f32.mrb[67].mxu1 }
 0x3b9   :  { %v3201_v14 = vmin.f32 %v3191_v55, 1.0  ;;  %v3196_v15 = vmax.f32 %v3184_v39, 0.0 }
 0x3bb   :  { %v3211_v41 = vmul.f32 3.0, %v3201_v14  ;;  %v3206_v42 = vmin.f32 %v3196_v15, 1.0 }
 0x3bd   :  { %v3221_v8 = vadd.f32 0.5, %v3211_v41  ;;  %v3216_v36 = vmul.f32 3.0, %v3206_v42  ;;  %v13971_v41 = vld [vmem:[%s16756_s6] sm:$0xff]  }
 0x3bf   :  { %v3231_v16 = vfloor.f32 %v3221_v8  ;;  %v3226_v28 = vadd.f32 0.5, %v3216_v36 }
 0x3c1   :  { %v3241_v52 = vmul.f32 0.33333334, %v3231_v16  ;;  %v3236_v7 = vfloor.f32 %v3226_v28 }
 0x3c3   :  { %v3246_v40 = vmul.f32 0.33333334, %v3236_v7  ;;  %v3278_v20 = vmul.f32 %v3268_v10, %v3241_v52 }
 0x3c5   :  { %v3283_v57 = vmul.f32 %v3268_v10, %v3246_v40  ;;  %v13995_v10 = vld [vmem:[%s16756_s6 + $0x8] sm:$0xff]  }
 0x3c7   :  { %v13838_v31 = vpack.c.bf16 %v3283_v57, %v3278_v20 }
 0x3c9   :  { %3736 = vrot.lane.b32.xlu1 %v13838_v31, %s11009_s29  ;;  %3397 = vrot.lane.b32.xlu0 %v13838_v31, %s11007_s1 }
 0x3cd   :  { %4081 = vrot.lane.b32.xlu1 %v13742_v11, %s11010_s3  ;;  %3730 = vrot.lane.b32.xlu0 %v13742_v11, %s11009_s29 }
 0x3d1   :  { %4085 = vrot.lane.b32.xlu1 %v13793_v56, %s11010_s3  ;;  %3734 = vrot.lane.b32.xlu0 %v13793_v56, %s11009_s29 }
 0x3d5   :  { %3393 = vrot.lane.b32.xlu1 %v13791_v6, %s11007_s1  ;;  %4079 = vrot.lane.b32.xlu0 %v13733_v23, %s11010_s3 }
 0x3d9   :  { %4492 = vrot.lane.b32.xlu1 %v13742_v11, %s11011_s15  ;;  %4077 = vrot.lane.b32.xlu0 %v11008_v33, %s11010_s3 }
 0x3dd   :  { %3732 = vrot.lane.b32.xlu1 %v13791_v6, %s11009_s29  ;;  %4087 = vrot.lane.b32.xlu0 %v13838_v31, %s11010_s3 }
 0x3e1   :  { %4498 = vrot.lane.b32.xlu1 %v13838_v31, %s11011_s15  ;;  %4490 = vrot.lane.b32.xlu0 %v13733_v23, %s11011_s15 }
 0x3e5   :  { %4494 = vrot.lane.b32.xlu1 %v13791_v6, %s11011_s15  ;;  %4488 = vrot.lane.b32.xlu0 %v11008_v33, %s11011_s15 }
 0x3e9   :  { %5315 = vrot.lane.b32.xlu1 %v13791_v6, %s11012_s16  ;;  %4496 = vrot.lane.b32.xlu0 %v13793_v56, %s11011_s15 }
 0x3ed   :  { %5319 = vrot.lane.b32.xlu1 %v13838_v31, %s11012_s16  ;;  %4083 = vrot.lane.b32.xlu0 %v13791_v6, %s11010_s3 }
 0x3f1   :  { %5724 = vrot.lane.b32.xlu1 %v13742_v11, %s11013_s17  ;;  %5313 = vrot.lane.b32.xlu0 %v13742_v11, %s11012_s16 }
 0x3f5   :  { %5722 = vrot.lane.b32.xlu1 %v13733_v23, %s11013_s17  ;;  %5311 = vrot.lane.b32.xlu0 %v13733_v23, %s11012_s16 }
 0x3f9   :  { %5730 = vrot.lane.b32.xlu1 %v13838_v31, %s11013_s17  ;;  %5321 = vrot.lane.b32.xlu0 %v11008_v33, %s11012_s16 }
 0x3fd   :  { %5728 = vrot.lane.b32.xlu1 %v13793_v56, %s11013_s17  ;;  %5726 = vrot.lane.b32.xlu0 %v13791_v6, %s11013_s17 }
 0x401   :  { %6137 = vrot.lane.b32.xlu1 %v13791_v6, %s11014_s18  ;;  %5317 = vrot.lane.b32.xlu0 %v13793_v56, %s11012_s16 }
 0x405   :  { %6139 = vrot.lane.b32.xlu1 %v13793_v56, %s11014_s18  ;;  %5732 = vrot.lane.b32.xlu0 %v11008_v33, %s11013_s17 }
 0x409   :  { %6143 = vrot.lane.b32.xlu1 %v11008_v33, %s11014_s18  ;;  %6135 = vrot.lane.b32.xlu0 %v13742_v11, %s11014_s18 }
 0x40d   :  { %6548 = vrot.lane.b32.xlu1 %v13791_v6, %s11015_s19  ;;  %6133 = vrot.lane.b32.xlu0 %v13733_v23, %s11014_s18 }
 0x411   :  { %6550 = vrot.lane.b32.xlu1 %v13793_v56, %s11015_s19  ;;  %6141 = vrot.lane.b32.xlu0 %v13838_v31, %s11014_s18 }
 0x415   :  { %6554 = vrot.lane.b32.xlu1 %v11008_v33, %s11015_s19  ;;  %6546 = vrot.lane.b32.xlu0 %v13742_v11, %s11015_s19  ;;  %v6917_v33 = vld [vmem:[%s16757_s7 + $0x28] sm:$0xff] }
 0x418   :  { %v3396_v45 = vpop.permute.xlu1 %3395 }
 0x419   :  { %6931 = vperm.xlu1 %10275, %v6913_v17   ;;  %6544 = vrot.lane.b32.xlu0 %v13733_v23, %s11015_s19 }
 0x41c   :  { %v3729_v5 = vpop.permute.xlu1 %3728 }
 0x41d   :  { %6941 = vperm.xlu1 %10275, %v6915_v58   ;;  %6552 = vrot.lane.b32.xlu0 %v13838_v31, %s11015_s19  ;;  %v10456_v58 = vld [vmem:[%s16756_s6 + $0x10] sm:$0xff]  }
 0x420   :  { %v3727_v48 = vpop.permute.xlu1 %3726 }
 0x421   :  { %6951 = vperm.xlu1 %10275, %v6917_v33   ;;  %6926 = vperm.xlu0 %10274, %v6912_v21   ;;  %v3739_v29 = vsel %vm3738_vm3, %v3727_v48, %v3729_v5 }
 0x425   :  { %6961 = vperm.xlu1 %10275, %v6919_v26   ;;  %6936 = vperm.xlu0 %10274, %v6914_v32  }
 0x429   :  { %6971 = vperm.xlu1 %10275, %v6921_v22   ;;  %6946 = vperm.xlu0 %10274, %v6916_v44  }
 0x42d   :  { %6981 = vperm.xlu1 %10275, %v6923_v19   ;;  %6956 = vperm.xlu0 %10274, %v6918_v4   ;;  %v10457_v19 = vld [vmem:[%s16756_s6 + $0x18] sm:$0xff]  }
 0x431   :  { %6966 = vperm.xlu0 %10274, %v6920_v49  }
 0x435   :  { %6976 = vperm.xlu0 %10274, %v6922_v60   ;;  %v10458_v60 = vld [vmem:[%s16756_s6 + $0x20] sm:$0xff]  }
 0x439   :  { %8638 = vperm.xlu0 %10274, %v8635_v62  }
 0x43b   :  { %v3737_v54 = vpop.permute.xlu1 %3736  ;;  %v3398_v47 = vpop.permute.xlu0 %3397 }
 0x43c   :  { %v3404_v37 = vsel %vm3399_vm1, %v3396_v45, %v3398_v47 }
 0x43d   :  { %9543 = vmatprep.subr.bf16.mxu0 %v3404_v37 }
 0x43e   :  { %9544 = vmatpush3.bf16.msra.mxu0 %v3404_v37 }
 0x43f   :  { %v13928_v9 = vpop.permute.xlu1 %4081  ;;  %v3731_v25 = vpop.permute.xlu0 %3730 }
 0x440   :  { %v3740_v51 = vsel %vm3738_vm3, %v3729_v5, %v3731_v25 }
 0x441   :  { %9546 = vmatmul.mubr.msk.bf16.vlgmr.msra.gmra.mrb[76].mxu0 %vm3410_vm2, %v13784_v13  ;;  %3767 = vmatprep.subr.bf16.mxu0 %v3740_v51  ;;  %v10459_v51 = vld [vmem:[%s16756_s6 + $0x28] sm:$0xff]  }
 0x442   :  { %3768 = vmatpush1.bf16.msra.mxu0 %v3739_v29  ;;  %9549 = vmatprep.mubr.msk.bf16.mxu0 %vm3410_vm2, %v13798_v12 }
 0x443   :  { %v13936_v18 = vpop.permute.xlu1 %4085  ;;  %v3735_v53 = vpop.permute.xlu0 %3734 }
 0x444   :  { %v3743_v27 = vsel %vm3738_vm3, %v3735_v53, %v3737_v54 }
 0x445   :  { %9557 = vmatprep.subr.bf16.mxu0 %v3743_v27 }
 0x447   :  { %v3394_v3 = vpop.permute.xlu1 %3393  ;;  %v13939_v2 = vpop.permute.xlu0 %4079 }
 0x448   :  { %v3402_v34 = vsel %vm3399_vm1, %v13762_v61, %v3394_v3  ;;  %v3403_v50 = vsel %vm3399_vm1, %v3394_v3, %v3396_v45 }
 0x449   :  { %3522 = vmatprep.subr.bf16.mxu1 %v3403_v50  ;;  %9550 = vmatmul.mubr.msk.bf16.gmra.mrb[80].mxu0 %vm3410_vm2, %v13810_v46 }
 0x44a   :  { %3523 = vmatpush1.bf16.msra.mxu1 %v3402_v34  ;;  %9553 = vmatprep.mubr.msk.bf16.mxu0 %vm3410_vm2, %v13820_v59 }
 0x44b   :  { %v13948_v1 = vpop.permute.xlu1 %4492  ;;  %v13950_v55 = vpop.permute.xlu0 %4077 }
 0x44d   :  { %9074 = vmatmul.mubr.msk.bf16.vlgmr.msra.gmra.mrb[68].mxu1 %vm3410_vm2, %v13774_v63 }
 0x44e   :  { %3564 = vmatprep.mubr.bf16.mxu1 %v17055_v30 }
 0x44f   :  { %v3733_v61 = vpop.permute.xlu1 %3732  ;;  %v13955_v39 = vpop.permute.xlu0 %4087 }
 0x450   :  { %v3741_v35 = vsel %vm3738_vm3, %v3731_v25, %v3733_v61  ;;  %v3742_v14 = vsel %vm3738_vm3, %v3733_v61, %v3735_v53 }
 0x451   :  { %9554 = vmatmul.mubr.msk.bf16.gmra.mrb[84].mxu0 %vm3410_vm2, %v13831_v43  ;;  %3860 = vmatprep.subr.bf16.mxu1 %v3742_v14 }
 0x452   :  { %3861 = vmatpush1.bf16.msra.mxu1 %v3741_v35  ;;  %3799 = vmatprep.mubr.bf16.mxu0 %v17055_v30  ;;  %v4090_v35 = vsel %vm3410_vm2, %v13950_v55, %v13939_v2 }
 0x453   :  { %v4499_v0 = vpop.permute.xlu1 %4498  ;;  %v4491_v15 = vpop.permute.xlu0 %4490 }
 0x454   :  { %v13964_v63 = vsel %vm4500_vm4, %v4491_v15, %v13948_v1 }
 0x455   :  { %9075 = vmatmul.mubr.msk.bf16.gmra.mrb[72].mxu1 %vm3410_vm2, %v13784_v13  ;;  %v4091_v13 = vsel %vm3410_vm2, %v13939_v2, %v13928_v9 }
 0x456   :  { %3574 = vmatprep.mubr.bf16.mxu1 %v17055_v30 }
 0x457   :  { %v13974_v42 = vpop.permute.xlu1 %4494  ;;  %v4489_v8 = vpop.permute.xlu0 %4488 }
 0x458   :  { %v13977_v36 = vsel %vm4500_vm4, %v4489_v8, %v4491_v15 }
 0x459   :  { %9092 = vmatmul.mubr.msk.bf16.vlgmr.msra.gmra.mrb[52].mxu0 %vm3410_vm2, %v13971_v41 }
 0x45a   :  { %9558 = vmatpush3.bf16.msra.mxu0 %v3743_v27  ;;  %3809 = vmatprep.mubr.bf16.mxu0 %v17055_v30 }
 0x45b   :  { %4118 = vmatprep.subr.bf16.mxu0 %v4091_v13  ;;  %v13985_v16 = vpop.permute.xlu1 %5315  ;;  %v4497_v28 = vpop.permute.xlu0 %4496  ;;  %v4503_v13 = vsel %vm4500_vm4, %v13948_v1, %v13974_v42  ;;  %v10463_v1 = vld [vmem:[%s16756_s6 + $0x78] sm:$0xff]  }
 0x45c   :  { %v13988_v52 = vsel %vm4500_vm4, %v4497_v28, %v4499_v0  ;;  %v4504_v29 = vsel %vm4500_vm4, %v13974_v42, %v4497_v28  ;;  %v4094_v0 = vsel %vm3410_vm2, %v13936_v18, %v13955_v39  ;;  %v10461_v39 = vld [vmem:[%s16756_s6 + $0x68] sm:$0xff]   ;;  %v10466_v28 = vld [vmem:[%s16756_s6 + $0x90] sm:$0xff]  }
 0x45d   :  { %9076 = vmatmul.mubr.msk.bf16.gmra.mrb[76].mxu1 %vm3410_vm2, %v13798_v12  ;;  %v10465_v42 = vld [vmem:[%s16756_s6 + $0x88] sm:$0xff]  }
 0x45e   :  { %3584 = vmatprep.mubr.bf16.mxu1 %v17055_v30 }
 0x45f   :  { %v13998_v7 = vpop.permute.xlu1 %5319  ;;  %v4084_v40 = vpop.permute.xlu0 %4083 }
 0x460   :  { %v4093_v20 = vsel %vm3410_vm2, %v4084_v40, %v13936_v18  ;;  %v4092_v37 = vsel %vm3410_vm2, %v13928_v9, %v4084_v40  ;;  %v10460_v18 = vld [vmem:[%s16756_s6 + $0x60] sm:$0xff]  }
 0x461   :  { %9093 = vmatmul.mubr.msk.bf16.gmra.mrb[56].mxu0 %vm3410_vm2, %v13995_v10  ;;  %4211 = vmatprep.subr.bf16.mxu1 %v4093_v20  ;;  %v14233_v40 = vld [vmem:[%s16756_s6 + $0xc0] sm:$0xff]  }
 0x462   :  { %3819 = vmatprep.mubr.bf16.mxu0 %v17055_v30 }
 0x463   :  { %v5725_v12 = vpop.permute.xlu1 %5724  ;;  %v5314_v57 = vpop.permute.xlu0 %5313 }
 0x464   :  { %v14007_v17 = vsel %vm5323_vm5, %v5314_v57, %v13985_v16 }
 0x465   :  { %9077 = vmatmul.mubr.msk.bf16.gmra.mrb[80].mxu1 %vm3410_vm2, %v13810_v46 }
 0x466   :  { %3594 = vmatprep.mubr.bf16.mxu1 %v17055_v30 }
 0x467   :  { %v5723_v33 = vpop.permute.xlu1 %5722  ;;  %v5312_v21 = vpop.permute.xlu0 %5311 }
 0x468   :  { %v14016_v26 = vsel %vm5734_vm6, %v5723_v33, %v5725_v12  ;;  %v14019_v32 = vsel %vm5323_vm5, %v5312_v21, %v5314_v57  ;;  %v10473_v57 = vld [vmem:[%s16756_s6 + $0xc8] sm:$0xff]   ;;  %v14289_v21 = vld [vmem:[%s16756_s6 + $0xf0] sm:$0xff]  }
 0x469   :  { %9094 = vmatmul.mubr.msk.bf16.gmra.mrb[60].mxu0 %vm3410_vm2, %v10456_v58  ;;  %v10477_v33 = vld [vmem:[%s16756_s6 + $0xe8] sm:$0xff]  }
 0x46a   :  { %3829 = vmatprep.mubr.bf16.mxu0 %v17055_v30 }
 0x46b   :  { %v14023_v46 = vpop.permute.xlu1 %5730  ;;  %v5322_v22 = vpop.permute.xlu0 %5321 }
 0x46c   :  { %v14027_v44 = vsel %vm5323_vm5, %v13998_v7, %v5322_v22  ;;  %v14315_v22 = vld [vmem:[%s16756_s6 + $0x100] sm:$0xff]  }
 0x46d   :  { %9078 = vmatmul.mubr.msk.bf16.gmra.mrb[84].mxu1 %vm3410_vm2, %v13820_v59 }
 0x46e   :  { %3604 = vmatprep.mubr.bf16.mxu1 %v17055_v30 }
 0x46f   :  { %v14035_v4 = vpop.permute.xlu1 %5728  ;;  %v14037_v45 = vpop.permute.xlu0 %5726 }
 0x470   :  { %v14041_v49 = vsel %vm5734_vm6, %v5725_v12, %v14037_v45  ;;  %v5738_v12 = vsel %vm5734_vm6, %v14035_v4, %v14023_v46 }
 0x471   :  { %9095 = vmatmul.mubr.msk.bf16.gmra.mrb[64].mxu0 %vm3410_vm2, %v10457_v19 }
 0x472   :  { %3839 = vmatprep.mubr.bf16.mxu0 %v17055_v30 }
 0x473   :  { %v14045_v5 = vpop.permute.xlu1 %6137  ;;  %v14047_v59 = vpop.permute.xlu0 %5317 }
 0x474   :  { %v5326_v20 = vsel %vm5323_vm5, %v13985_v16, %v14047_v59  ;;  %v10474_v16 = vld [vmem:[%s16756_s6 + $0xd0] sm:$0xff]  }
 0x475   :  { %9079 = vmatmul.mubr.msk.bf16.gmra.mrb[88].mxu1 %vm3410_vm2, %v13831_v43 }
 0x476   :  { %3892 = vmatprep.mubr.bf16.mxu1 %v17055_v30 }
 0x477   :  { %v14055_v62 = vpop.permute.xlu1 %6139  ;;  %v5733_v48 = vpop.permute.xlu0 %5732 }
 0x478   :  { %v14059_v54 = vsel %vm5734_vm6, %v14023_v46, %v5733_v48  ;;  %v14305_v46 = vld [vmem:[%s16756_s6 + $0xf8] sm:$0xff]   ;;  %v14374_v48 = vld [vmem:[%s16756_s6 + $0x128] sm:$0xff]  }
 0x479   :  { %9096 = vmatmul.mubr.msk.bf16.gmra.mrb[68].mxu0 %vm3410_vm2, %v10458_v60 }
 0x47a   :  { %3849 = vmatprep.mubr.bf16.mxu0 %v17055_v30 }
 0x47b   :  { %v6136_v47 = vpop.permute.xlu0 %6135  ;;  %v6144_v25 = vpop.permute.xlu1 %6143 }
 0x47c   :  { %v14065_v43 = vsel %vm6145_vm7, %v6136_v47, %v14045_v5 }
 0x47d   :  { %9098 = vmatmul.mubr.msk.bf16.vlgmr.msra.gmra.mrb[68].mxu1 %vm3410_vm2, %v13971_v41 }
 0x47e   :  { %4212 = vmatpush1.bf16.msra.mxu1 %v4092_v37  ;;  %3902 = vmatprep.mubr.bf16.mxu1 %v17055_v30 }
 0x47f   :  { %4622 = vmatprep.subr.bf16.mxu1 %v4504_v29  ;;  %v6134_v53 = vpop.permute.xlu0 %6133  ;;  %v14083_v9 = vpop.permute.xlu1 %6548  ;;  %v14471_v29 = vld [vmem:[%s16756_s6 + $0x168] sm:$0xff]  }
 0x480   :  { %v14078_v27 = vsel %vm6145_vm7, %v6134_v53, %v6136_v47  ;;  %v14431_v47 = vld [vmem:[%s16756_s6 + $0x150] sm:$0xff]   ;;  %v10495_v53 = vld [vmem:[%s16756_s6 + $0x178] sm:$0xff]  }
 0x481   :  { %9097 = vmatmul.mubr.msk.bf16.gmra.mrb[72].mxu0 %vm3410_vm2, %v10459_v51 }
 0x482   :  { %9559 = vmatprep.mubr.msk.bf16.mxu0 %vm3410_vm2, %v13971_v41 }
 0x483   :  { %v14085_v3 = vpop.permute.xlu0 %6141  ;;  %v14101_v14 = vpop.permute.xlu1 %6550 }
 0x484   :  { %v14089_v34 = vsel %vm6145_vm7, %v14085_v3, %v6144_v25  ;;  %v6559_v37 = vsel %vm6556_vm8, %v14083_v9, %v14101_v14  ;;  %v14445_v25 = vld [vmem:[%s16756_s6 + $0x158] sm:$0xff]  }
 0x485   :  { %9099 = vmatmul.mubr.msk.bf16.gmra.mrb[72].mxu1 %vm3410_vm2, %v13995_v10 }
 0x486   :  { %3912 = vmatprep.mubr.bf16.mxu1 %v17055_v30 }
 0x487   :  { %v6547_v50 = vpop.permute.xlu0 %6546  ;;  %v6555_v2 = vpop.permute.xlu1 %6554 }
 0x488   :  { %v14096_v61 = vsel %vm6556_vm8, %v6547_v50, %v14083_v9  ;;  %v14504_v9 = vld [vmem:[%s16756_s6 + $0x180] sm:$0xff]  }
 0x489   :  { %9560 = vmatmul.mubr.msk.bf16.vlgmr.msra.gmra.mrb[76].mxu0 %vm3410_vm2, %v13995_v10  ;;  %v10467_v10 = vld [vmem:[%s16756_s6 + $0x98] sm:$0xff]  }
 0x48a   :  { %4119 = vmatpush1.bf16.msra.mxu0 %v4090_v35  ;;  %9563 = vmatprep.mubr.msk.bf16.mxu0 %vm3410_vm2, %v10456_v58  ;;  %v10501_v35 = vld [vmem:[%s16756_s6 + $0x1a8] sm:$0xff]  }
 0x48b   :  { %9571 = vmatprep.subr.bf16.mxu0 %v4094_v0  ;;  %v6545_v15 = vpop.permute.xlu0 %6544 }
 0x48c   :  { %v14110_v41 = vsel %vm6556_vm8, %v6545_v15, %v6547_v50  ;;  %v10500_v50 = vld [vmem:[%s16756_s6 + $0x1a0] sm:$0xff]  }
 0x48d   :  { %9100 = vmatmul.mubr.msk.bf16.gmra.mrb[76].mxu1 %vm3410_vm2, %v10456_v58  ;;  %v10475_v58 = vld [vmem:[%s16756_s6 + $0xd8] sm:$0xff]  }
 0x48e   :  { %3922 = vmatprep.mubr.bf16.mxu1 %v17055_v30 }
 0x48f   :  { %v14114_v55 = vpop.permute.xlu0 %6552 }
 0x490   :  { %v14118_v8 = vsel %vm6556_vm8, %v14114_v55, %v6555_v2 }
 0x491   :  { %9564 = vmatmul.mubr.msk.bf16.gmra.mrb[80].mxu0 %vm3410_vm2, %v10457_v19 }
 0x492   :  { %9567 = vmatprep.mubr.msk.bf16.mxu0 %vm3410_vm2, %v10458_v60 }
 0x495   :  { %9101 = vmatmul.mubr.msk.bf16.gmra.mrb[80].mxu1 %vm3410_vm2, %v10457_v19  ;;  %v14325_v19 = vld [vmem:[%s16756_s6 + $0x108] sm:$0xff]  }
 0x496   :  { %3932 = vmatprep.mubr.bf16.mxu1 %v17055_v30 }
 0x499   :  { %9568 = vmatmul.mubr.msk.bf16.gmra.mrb[84].mxu0 %vm3410_vm2, %v10459_v51 }
 0x49a   :  { %4150 = vmatprep.mubr.bf16.mxu0 %v17055_v30 }
 0x49d   :  { %9102 = vmatmul.mubr.msk.bf16.gmra.mrb[84].mxu1 %vm3410_vm2, %v10458_v60  ;;  %v6560_v60 = vsel %vm6556_vm8, %v14101_v14, %v14114_v55 }
 0x49e   :  { %3942 = vmatprep.mubr.bf16.mxu1 %v17055_v30 }
 0x4a1   :  { %9128 = vmatmul.mubr.msk.bf16.vlgmr.msra.gmra.mrb[52].mxu0 %vm3410_vm2, %v10460_v18 }
 0x4a2   :  { %9572 = vmatpush3.bf16.msra.mxu0 %v4094_v0  ;;  %4160 = vmatprep.mubr.bf16.mxu0 %v17055_v30  ;;  %v14621_v0 = vpop.permute.xlu1 %6931 }
 0x4a3   :  { %4529 = vmatprep.subr.bf16.mxu0 %v13964_v63  ;;  %v10462_v63 = vld [vmem:[%s16756_s6 + $0x70] sm:$0xff]   ;;  %17057 = vst [vmem:[#allocation49_spill] sm:$0xff] %v14621_v0 }
 0x4a5   :  { %9103 = vmatmul.mubr.msk.bf16.gmra.mrb[88].mxu1 %vm3410_vm2, %v10459_v51  ;;  %v14457_v51 = vld [vmem:[%s16756_s6 + $0x160] sm:$0xff]  }
 0x4a6   :  { %4243 = vmatprep.mubr.bf16.mxu1 %v17055_v30 }
 0x4a9   :  { %9129 = vmatmul.mubr.msk.bf16.gmra.mrb[56].mxu0 %vm3410_vm2, %v10461_v39 }
 0x4aa   :  { %4170 = vmatprep.mubr.bf16.mxu0 %v17055_v30 }
 0x4ad   :  { %9134 = vmatmul.mubr.msk.bf16.vlgmr.msra.gmra.mrb[68].mxu1 %vm3410_vm2, %v10460_v18 }
 0x4ae   :  { %4623 = vmatpush1.bf16.msra.mxu1 %v4503_v13  ;;  %4253 = vmatprep.mubr.bf16.mxu1 %v17055_v30 }
 0x4af   :  { %5010 = vmatprep.subr.bf16.mxu1 %v13793_v56  ;;  %v10464_v56 = vld [vmem:[%s16756_s6 + $0x80] sm:$0xff]  }
 0x4b1   :  { %9130 = vmatmul.mubr.msk.bf16.gmra.mrb[60].mxu0 %vm3410_vm2, %v10462_v63 }
 0x4b2   :  { %4180 = vmatprep.mubr.bf16.mxu0 %v17055_v30 }
 0x4b5   :  { %9135 = vmatmul.mubr.msk.bf16.gmra.mrb[72].mxu1 %vm3410_vm2, %v10461_v39 }
 0x4b6   :  { %4263 = vmatprep.mubr.bf16.mxu1 %v17055_v30 }
 0x4b9   :  { %9131 = vmatmul.mubr.msk.bf16.gmra.mrb[64].mxu0 %vm3410_vm2, %v10463_v1 }
 0x4ba   :  { %4190 = vmatprep.mubr.bf16.mxu0 %v17055_v30 }
 0x4bd   :  { %9136 = vmatmul.mubr.msk.bf16.gmra.mrb[76].mxu1 %vm3410_vm2, %v10462_v63 }
 0x4be   :  { %4273 = vmatprep.mubr.bf16.mxu1 %v17055_v30 }
 0x4c1   :  { %9132 = vmatmul.mubr.msk.bf16.gmra.mrb[68].mxu0 %vm3410_vm2, %v10464_v56 }
 0x4c2   :  { %4200 = vmatprep.mubr.bf16.mxu0 %v17055_v30 }
 0x4c5   :  { %9137 = vmatmul.mubr.msk.bf16.gmra.mrb[80].mxu1 %vm3410_vm2, %v10463_v1 }
 0x4c6   :  { %4283 = vmatprep.mubr.bf16.mxu1 %v17055_v30 }
 0x4c9   :  { %9133 = vmatmul.mubr.msk.bf16.gmra.mrb[72].mxu0 %vm3410_vm2, %v10465_v42 }
 0x4ca   :  { %9573 = vmatprep.mubr.msk.bf16.mxu0 %vm3410_vm2, %v10460_v18 }
 0x4cd   :  { %9138 = vmatmul.mubr.msk.bf16.gmra.mrb[84].mxu1 %vm3410_vm2, %v10464_v56 }
 0x4ce   :  { %4293 = vmatprep.mubr.bf16.mxu1 %v17055_v30 }
 0x4d1   :  { %9574 = vmatmul.mubr.msk.bf16.vlgmr.msra.gmra.mrb[76].mxu0 %vm3410_vm2, %v10461_v39 }
 0x4d2   :  { %4530 = vmatpush1.bf16.msra.mxu0 %v13977_v36  ;;  %9577 = vmatprep.mubr.msk.bf16.mxu0 %vm3410_vm2, %v10462_v63  ;;  %v5327_v36 = vsel %vm5323_vm5, %v14047_v59, %v13998_v7  ;;  %v10469_v7 = vld [vmem:[%s16756_s6 + $0xa8] sm:$0xff]   ;;  %v14358_v59 = vld [vmem:[%s16756_s6 + $0x120] sm:$0xff]  }
 0x4d3   :  { %9585 = vmatprep.subr.bf16.mxu0 %v13988_v52 }
 0x4d5   :  { %9139 = vmatmul.mubr.msk.bf16.gmra.mrb[88].mxu1 %vm3410_vm2, %v10465_v42 }
 0x4d6   :  { %4654 = vmatprep.mubr.bf16.mxu1 %v17055_v30 }
 0x4d9   :  { %9578 = vmatmul.mubr.msk.bf16.gmra.mrb[80].mxu0 %vm3410_vm2, %v10463_v1 }
 0x4da   :  { %9581 = vmatprep.mubr.msk.bf16.mxu0 %vm3410_vm2, %v10464_v56 }
 0x4dd   :  { %9170 = vmatmul.mubr.msk.bf16.vlgmr.msra.gmra.mrb[68].mxu1 %vm3410_vm2, %v10466_v28 }
 0x4de   :  { %5011 = vmatpush1.bf16.msra.mxu1 %v13791_v6  ;;  %4664 = vmatprep.mubr.bf16.mxu1 %v17055_v30  ;;  %v10468_v6 = vld [vmem:[%s16756_s6 + $0xa0] sm:$0xff]  }
 0x4df   :  { %5445 = vmatprep.subr.bf16.mxu1 %v5327_v36 }
 0x4e1   :  { %9582 = vmatmul.mubr.msk.bf16.gmra.mrb[84].mxu0 %vm3410_vm2, %v10465_v42 }
 0x4e2   :  { %4561 = vmatprep.mubr.bf16.mxu0 %v17055_v30 }
 0x4e5   :  { %9171 = vmatmul.mubr.msk.bf16.gmra.mrb[72].mxu1 %vm3410_vm2, %v10467_v10 }
 0x4e6   :  { %4674 = vmatprep.mubr.bf16.mxu1 %v17055_v30 }
 0x4e9   :  { %9164 = vmatmul.mubr.msk.bf16.vlgmr.msra.gmra.mrb[52].mxu0 %vm3410_vm2, %v10466_v28 }
 0x4ea   :  { %9586 = vmatpush3.bf16.msra.mxu0 %v13988_v52  ;;  %4571 = vmatprep.mubr.bf16.mxu0 %v17055_v30  ;;  %v10471_v52 = vld [vmem:[%s16756_s6 + $0xb8] sm:$0xff]  }
 0x4eb   :  { %4917 = vmatprep.subr.bf16.mxu0 %v13742_v11  ;;  %v10470_v11 = vld [vmem:[%s16756_s6 + $0xb0] sm:$0xff]  }
 0x4ed   :  { %9172 = vmatmul.mubr.msk.bf16.gmra.mrb[76].mxu1 %vm3410_vm2, %v10468_v6 }
 0x4ee   :  { %4684 = vmatprep.mubr.bf16.mxu1 %v17055_v30 }
 0x4f1   :  { %9165 = vmatmul.mubr.msk.bf16.gmra.mrb[56].mxu0 %vm3410_vm2, %v10467_v10 }
 0x4f2   :  { %4581 = vmatprep.mubr.bf16.mxu0 %v17055_v30 }
 0x4f5   :  { %9173 = vmatmul.mubr.msk.bf16.gmra.mrb[80].mxu1 %vm3410_vm2, %v10469_v7 }
 0x4f6   :  { %4694 = vmatprep.mubr.bf16.mxu1 %v17055_v30 }
 0x4f9   :  { %9166 = vmatmul.mubr.msk.bf16.gmra.mrb[60].mxu0 %vm3410_vm2, %v10468_v6 }
 0x4fa   :  { %4591 = vmatprep.mubr.bf16.mxu0 %v17055_v30 }
 0x4fd   :  { %9174 = vmatmul.mubr.msk.bf16.gmra.mrb[84].mxu1 %vm3410_vm2, %v10470_v11 }
 0x4fe   :  { %4704 = vmatprep.mubr.bf16.mxu1 %v17055_v30 }
 0x501   :  { %9167 = vmatmul.mubr.msk.bf16.gmra.mrb[64].mxu0 %vm3410_vm2, %v10469_v7 }
 0x502   :  { %4601 = vmatprep.mubr.bf16.mxu0 %v17055_v30 }
 0x505   :  { %9175 = vmatmul.mubr.msk.bf16.gmra.mrb[88].mxu1 %vm3410_vm2, %v10471_v52 }
 0x506   :  { %5042 = vmatprep.mubr.bf16.mxu1 %v17055_v30 }
 0x509   :  { %9168 = vmatmul.mubr.msk.bf16.gmra.mrb[68].mxu0 %vm3410_vm2, %v10470_v11 }
 0x50a   :  { %4611 = vmatprep.mubr.bf16.mxu0 %v17055_v30 }
 0x50d   :  { %9206 = vmatmul.mubr.msk.bf16.vlgmr.msra.gmra.mrb[68].mxu1 %vm3410_vm2, %v14233_v40 }
 0x50e   :  { %5446 = vmatpush1.bf16.msra.mxu1 %v5326_v20  ;;  %5052 = vmatprep.mubr.bf16.mxu1 %v17055_v30 }
 0x50f   :  { %5856 = vmatprep.subr.bf16.mxu1 %v5738_v12 }
 0x511   :  { %9169 = vmatmul.mubr.msk.bf16.gmra.mrb[72].mxu0 %vm3410_vm2, %v10471_v52 }
 0x512   :  { %9587 = vmatprep.mubr.msk.bf16.mxu0 %vm3410_vm2, %v10466_v28 }
 0x515   :  { %9207 = vmatmul.mubr.msk.bf16.gmra.mrb[72].mxu1 %vm3410_vm2, %v10473_v57 }
 0x516   :  { %5062 = vmatprep.mubr.bf16.mxu1 %v17055_v30 }
 0x519   :  { %9588 = vmatmul.mubr.msk.bf16.vlgmr.msra.gmra.mrb[76].mxu0 %vm3410_vm2, %v10467_v10 }
 0x51a   :  { %4918 = vmatpush1.bf16.msra.mxu0 %v13733_v23  ;;  %9591 = vmatprep.mubr.msk.bf16.mxu0 %vm3410_vm2, %v10468_v6  ;;  %v10476_v23 = vld [vmem:[%s16756_s6 + $0xe0] sm:$0xff]  }
 0x51b   :  { %9599 = vmatprep.subr.bf16.mxu0 %v13838_v31 }
 0x51d   :  { %9208 = vmatmul.mubr.msk.bf16.gmra.mrb[76].mxu1 %vm3410_vm2, %v10474_v16 }
 0x51e   :  { %5072 = vmatprep.mubr.bf16.mxu1 %v17055_v30 }
 0x521   :  { %9592 = vmatmul.mubr.msk.bf16.gmra.mrb[80].mxu0 %vm3410_vm2, %v10469_v7 }
 0x522   :  { %9595 = vmatprep.mubr.msk.bf16.mxu0 %vm3410_vm2, %v10470_v11 }
 0x525   :  { %9209 = vmatmul.mubr.msk.bf16.gmra.mrb[80].mxu1 %vm3410_vm2, %v10475_v58 }
 0x526   :  { %5082 = vmatprep.mubr.bf16.mxu1 %v17055_v30 }
 0x529   :  { %9596 = vmatmul.mubr.msk.bf16.gmra.mrb[84].mxu0 %vm3410_vm2, %v10471_v52 }
 0x52a   :  { %4949 = vmatprep.mubr.bf16.mxu0 %v17055_v30 }
 0x52d   :  { %9210 = vmatmul.mubr.msk.bf16.gmra.mrb[84].mxu1 %vm3410_vm2, %v10476_v23 }
 0x52e   :  { %5092 = vmatprep.mubr.bf16.mxu1 %v17055_v30 }
 0x531   :  { %9200 = vmatmul.mubr.msk.bf16.vlgmr.msra.gmra.mrb[52].mxu0 %vm3410_vm2, %v14233_v40 }
 0x532   :  { %9600 = vmatpush3.bf16.msra.mxu0 %v13838_v31  ;;  %4959 = vmatprep.mubr.bf16.mxu0 %v17055_v30  ;;  %v5737_v31 = vsel %vm5734_vm6, %v14037_v45, %v14035_v4  ;;  %v14335_v4 = vld [vmem:[%s16756_s6 + $0x110] sm:$0xff]   ;;  %v14346_v45 = vld [vmem:[%s16756_s6 + $0x118] sm:$0xff]  }
 0x533   :  { %5352 = vmatprep.subr.bf16.mxu0 %v14007_v17  ;;  %v6149_v17 = vsel %vm6145_vm7, %v14055_v62, %v14085_v3  ;;  %v10499_v3 = vld [vmem:[%s16756_s6 + $0x198] sm:$0xff]  }
 0x535   :  { %9211 = vmatmul.mubr.msk.bf16.gmra.mrb[88].mxu1 %vm3410_vm2, %v10477_v33 }
 0x536   :  { %5477 = vmatprep.mubr.bf16.mxu1 %v17055_v30 }
 0x539   :  { %9201 = vmatmul.mubr.msk.bf16.gmra.mrb[56].mxu0 %vm3410_vm2, %v10473_v57 }
 0x53a   :  { %4969 = vmatprep.mubr.bf16.mxu0 %v17055_v30 }
 0x53d   :  { %9242 = vmatmul.mubr.msk.bf16.vlgmr.msra.gmra.mrb[68].mxu1 %vm3410_vm2, %v14289_v21 }
 0x53e   :  { %5857 = vmatpush1.bf16.msra.mxu1 %v5737_v31  ;;  %5487 = vmatprep.mubr.bf16.mxu1 %v17055_v30 }
 0x53f   :  { %6267 = vmatprep.subr.bf16.mxu1 %v6149_v17 }
 0x541   :  { %9202 = vmatmul.mubr.msk.bf16.gmra.mrb[60].mxu0 %vm3410_vm2, %v10474_v16 }
 0x542   :  { %4979 = vmatprep.mubr.bf16.mxu0 %v17055_v30 }
 0x545   :  { %9243 = vmatmul.mubr.msk.bf16.gmra.mrb[72].mxu1 %vm3410_vm2, %v14305_v46 }
 0x546   :  { %5497 = vmatprep.mubr.bf16.mxu1 %v17055_v30 }
 0x549   :  { %9203 = vmatmul.mubr.msk.bf16.gmra.mrb[64].mxu0 %vm3410_vm2, %v10475_v58 }
 0x54a   :  { %4989 = vmatprep.mubr.bf16.mxu0 %v17055_v30 }
 0x54d   :  { %9244 = vmatmul.mubr.msk.bf16.gmra.mrb[76].mxu1 %vm3410_vm2, %v14315_v22 }
 0x54e   :  { %5507 = vmatprep.mubr.bf16.mxu1 %v17055_v30 }
 0x551   :  { %9204 = vmatmul.mubr.msk.bf16.gmra.mrb[68].mxu0 %vm3410_vm2, %v10476_v23 }
 0x552   :  { %4999 = vmatprep.mubr.bf16.mxu0 %v17055_v30 }
 0x555   :  { %9245 = vmatmul.mubr.msk.bf16.gmra.mrb[80].mxu1 %vm3410_vm2, %v14325_v19 }
 0x556   :  { %5517 = vmatprep.mubr.bf16.mxu1 %v17055_v30 }
 0x559   :  { %9205 = vmatmul.mubr.msk.bf16.gmra.mrb[72].mxu0 %vm3410_vm2, %v10477_v33 }
 0x55a   :  { %9601 = vmatprep.mubr.msk.bf16.mxu0 %vm3410_vm2, %v14233_v40 }
 0x55d   :  { %9246 = vmatmul.mubr.msk.bf16.gmra.mrb[84].mxu1 %vm3410_vm2, %v14335_v4 }
 0x55e   :  { %5527 = vmatprep.mubr.bf16.mxu1 %v17055_v30 }
 0x561   :  { %9602 = vmatmul.mubr.msk.bf16.vlgmr.msra.gmra.mrb[76].mxu0 %vm3410_vm2, %v10473_v57 }
 0x562   :  { %5353 = vmatpush1.bf16.msra.mxu0 %v14019_v32  ;;  %9605 = vmatprep.mubr.msk.bf16.mxu0 %vm3410_vm2, %v10474_v16  ;;  %v6148_v32 = vsel %vm6145_vm7, %v14045_v5, %v14055_v62  ;;  %v14385_v5 = vld [vmem:[%s16756_s6 + $0x130] sm:$0xff]   ;;  %v14398_v62 = vld [vmem:[%s16756_s6 + $0x138] sm:$0xff]  }
 0x563   :  { %9613 = vmatprep.subr.bf16.mxu0 %v14027_v44 }
 0x565   :  { %9247 = vmatmul.mubr.msk.bf16.gmra.mrb[88].mxu1 %vm3410_vm2, %v14346_v45 }
 0x566   :  { %5888 = vmatprep.mubr.bf16.mxu1 %v17055_v30 }
 0x569   :  { %9606 = vmatmul.mubr.msk.bf16.gmra.mrb[80].mxu0 %vm3410_vm2, %v10475_v58 }
 0x56a   :  { %9609 = vmatprep.mubr.msk.bf16.mxu0 %vm3410_vm2, %v10476_v23  ;;  %v14640_v23 = vpop.permute.xlu1 %6941 }
 0x56b   :  { %17059 = vst [vmem:[#allocation45_spill] sm:$0xff] %v14640_v23 }
 0x56d   :  { %9278 = vmatmul.mubr.msk.bf16.vlgmr.msra.gmra.mrb[68].mxu1 %vm3410_vm2, %v14358_v59 }
 0x56e   :  { %6268 = vmatpush1.bf16.msra.mxu1 %v6148_v32  ;;  %5898 = vmatprep.mubr.bf16.mxu1 %v17055_v30 }
 0x56f   :  { %6678 = vmatprep.subr.bf16.mxu1 %v6560_v60 }
 0x571   :  { %9610 = vmatmul.mubr.msk.bf16.gmra.mrb[84].mxu0 %vm3410_vm2, %v10477_v33 }
 0x572   :  { %5384 = vmatprep.mubr.bf16.mxu0 %v17055_v30 }
 0x575   :  { %9279 = vmatmul.mubr.msk.bf16.gmra.mrb[72].mxu1 %vm3410_vm2, %v14374_v48 }
 0x576   :  { %5908 = vmatprep.mubr.bf16.mxu1 %v17055_v30 }
 0x579   :  { %9236 = vmatmul.mubr.msk.bf16.vlgmr.msra.gmra.mrb[52].mxu0 %vm3410_vm2, %v14289_v21 }
 0x57a   :  { %9614 = vmatpush3.bf16.msra.mxu0 %v14027_v44  ;;  %5394 = vmatprep.mubr.bf16.mxu0 %v17055_v30  ;;  %v14409_v44 = vld [vmem:[%s16756_s6 + $0x140] sm:$0xff]  }
 0x57b   :  { %5763 = vmatprep.subr.bf16.mxu0 %v14041_v49  ;;  %v14420_v49 = vld [vmem:[%s16756_s6 + $0x148] sm:$0xff]  }
 0x57d   :  { %9280 = vmatmul.mubr.msk.bf16.gmra.mrb[76].mxu1 %vm3410_vm2, %v14385_v5 }
 0x57e   :  { %5918 = vmatprep.mubr.bf16.mxu1 %v17055_v30 }
 0x581   :  { %9237 = vmatmul.mubr.msk.bf16.gmra.mrb[56].mxu0 %vm3410_vm2, %v14305_v46 }
 0x582   :  { %5404 = vmatprep.mubr.bf16.mxu0 %v17055_v30 }
 0x585   :  { %9281 = vmatmul.mubr.msk.bf16.gmra.mrb[80].mxu1 %vm3410_vm2, %v14398_v62 }
 0x586   :  { %5928 = vmatprep.mubr.bf16.mxu1 %v17055_v30 }
 0x589   :  { %9238 = vmatmul.mubr.msk.bf16.gmra.mrb[60].mxu0 %vm3410_vm2, %v14315_v22 }
 0x58a   :  { %5414 = vmatprep.mubr.bf16.mxu0 %v17055_v30 }
 0x58d   :  { %9282 = vmatmul.mubr.msk.bf16.gmra.mrb[84].mxu1 %vm3410_vm2, %v14409_v44 }
 0x58e   :  { %5938 = vmatprep.mubr.bf16.mxu1 %v17055_v30 }
 0x591   :  { %9239 = vmatmul.mubr.msk.bf16.gmra.mrb[64].mxu0 %vm3410_vm2, %v14325_v19 }
 0x592   :  { %5424 = vmatprep.mubr.bf16.mxu0 %v17055_v30 }
 0x595   :  { %9283 = vmatmul.mubr.msk.bf16.gmra.mrb[88].mxu1 %vm3410_vm2, %v14420_v49 }
 0x596   :  { %6299 = vmatprep.mubr.bf16.mxu1 %v17055_v30 }
 0x599   :  { %9240 = vmatmul.mubr.msk.bf16.gmra.mrb[68].mxu0 %vm3410_vm2, %v14335_v4 }
 0x59a   :  { %5434 = vmatprep.mubr.bf16.mxu0 %v17055_v30 }
 0x59d   :  { %9314 = vmatmul.mubr.msk.bf16.vlgmr.msra.gmra.mrb[68].mxu1 %vm3410_vm2, %v14431_v47 }
 0x59e   :  { %6679 = vmatpush1.bf16.msra.mxu1 %v6559_v37  ;;  %6309 = vmatprep.mubr.bf16.mxu1 %v17055_v30 }
 0x5a1   :  { %9241 = vmatmul.mubr.msk.bf16.gmra.mrb[72].mxu0 %vm3410_vm2, %v14346_v45 }
 0x5a2   :  { %9615 = vmatprep.mubr.msk.bf16.mxu0 %vm3410_vm2, %v14289_v21 }
 0x5a5   :  { %9315 = vmatmul.mubr.msk.bf16.gmra.mrb[72].mxu1 %vm3410_vm2, %v14445_v25 }
 0x5a6   :  { %6319 = vmatprep.mubr.bf16.mxu1 %v17055_v30 }
 0x5a9   :  { %9616 = vmatmul.mubr.msk.bf16.vlgmr.msra.gmra.mrb[76].mxu0 %vm3410_vm2, %v14305_v46 }
 0x5aa   :  { %5764 = vmatpush1.bf16.msra.mxu0 %v14016_v26  ;;  %9619 = vmatprep.mubr.msk.bf16.mxu0 %vm3410_vm2, %v14315_v22  ;;  %v14483_v26 = vld [vmem:[%s16756_s6 + $0x170] sm:$0xff]  }
 0x5ab   :  { %9627 = vmatprep.subr.bf16.mxu0 %v14059_v54 }
 0x5ad   :  { %9316 = vmatmul.mubr.msk.bf16.gmra.mrb[76].mxu1 %vm3410_vm2, %v14457_v51 }
 0x5ae   :  { %6329 = vmatprep.mubr.bf16.mxu1 %v17055_v30 }
 0x5b1   :  { %9620 = vmatmul.mubr.msk.bf16.gmra.mrb[80].mxu0 %vm3410_vm2, %v14325_v19 }
 0x5b2   :  { %9623 = vmatprep.mubr.msk.bf16.mxu0 %vm3410_vm2, %v14335_v4 }
 0x5b5   :  { %9317 = vmatmul.mubr.msk.bf16.gmra.mrb[80].mxu1 %vm3410_vm2, %v14471_v29 }
 0x5b6   :  { %6339 = vmatprep.mubr.bf16.mxu1 %v17055_v30 }
 0x5b9   :  { %9624 = vmatmul.mubr.msk.bf16.gmra.mrb[84].mxu0 %vm3410_vm2, %v14346_v45 }
 0x5ba   :  { %5795 = vmatprep.mubr.bf16.mxu0 %v17055_v30 }
 0x5bd   :  { %9318 = vmatmul.mubr.msk.bf16.gmra.mrb[84].mxu1 %vm3410_vm2, %v14483_v26 }
 0x5be   :  { %6349 = vmatprep.mubr.bf16.mxu1 %v17055_v30 }
 0x5c1   :  { %9272 = vmatmul.mubr.msk.bf16.vlgmr.msra.gmra.mrb[52].mxu0 %vm3410_vm2, %v14358_v59 }
 0x5c2   :  { %9628 = vmatpush3.bf16.msra.mxu0 %v14059_v54  ;;  %5805 = vmatprep.mubr.bf16.mxu0 %v17055_v30  ;;  %v14515_v54 = vld [vmem:[%s16756_s6 + $0x188] sm:$0xff]  }
 0x5c3   :  { %6174 = vmatprep.subr.bf16.mxu0 %v14065_v43  ;;  %v10498_v43 = vld [vmem:[%s16756_s6 + $0x190] sm:$0xff]  }
 0x5c5   :  { %9319 = vmatmul.mubr.msk.bf16.gmra.mrb[88].mxu1 %vm3410_vm2, %v10495_v53 }
 0x5c6   :  { %6710 = vmatprep.mubr.bf16.mxu1 %v17055_v30 }
 0x5c9   :  { %9273 = vmatmul.mubr.msk.bf16.gmra.mrb[56].mxu0 %vm3410_vm2, %v14374_v48 }
 0x5ca   :  { %5815 = vmatprep.mubr.bf16.mxu0 %v17055_v30 }
 0x5cd   :  { %9350 = vmatmul.mubr.msk.bf16.vlgmr.msra.gmra.mrb[68].mxu1 %vm3410_vm2, %v14504_v9 }
 0x5ce   :  { %6720 = vmatprep.mubr.bf16.mxu1 %v17055_v30 }
 0x5d1   :  { %9274 = vmatmul.mubr.msk.bf16.gmra.mrb[60].mxu0 %vm3410_vm2, %v14385_v5 }
 0x5d2   :  { %5825 = vmatprep.mubr.bf16.mxu0 %v17055_v30 }
 0x5d5   :  { %9351 = vmatmul.mubr.msk.bf16.gmra.mrb[72].mxu1 %vm3410_vm2, %v14515_v54 }
 0x5d6   :  { %6730 = vmatprep.mubr.bf16.mxu1 %v17055_v30 }
 0x5d9   :  { %9275 = vmatmul.mubr.msk.bf16.gmra.mrb[64].mxu0 %vm3410_vm2, %v14398_v62 }
 0x5da   :  { %5835 = vmatprep.mubr.bf16.mxu0 %v17055_v30 }
 0x5dd   :  { %9352 = vmatmul.mubr.msk.bf16.gmra.mrb[76].mxu1 %vm3410_vm2, %v10498_v43 }
 0x5de   :  { %6740 = vmatprep.mubr.bf16.mxu1 %v17055_v30 }
 0x5e1   :  { %9276 = vmatmul.mubr.msk.bf16.gmra.mrb[68].mxu0 %vm3410_vm2, %v14409_v44 }
 0x5e2   :  { %5845 = vmatprep.mubr.bf16.mxu0 %v17055_v30 }
 0x5e5   :  { %9353 = vmatmul.mubr.msk.bf16.gmra.mrb[80].mxu1 %vm3410_vm2, %v10499_v3 }
 0x5e6   :  { %6750 = vmatprep.mubr.bf16.mxu1 %v17055_v30 }
 0x5e9   :  { %9277 = vmatmul.mubr.msk.bf16.gmra.mrb[72].mxu0 %vm3410_vm2, %v14420_v49 }
 0x5ea   :  { %9629 = vmatprep.mubr.msk.bf16.mxu0 %vm3410_vm2, %v14358_v59 }
 0x5ed   :  { %9354 = vmatmul.mubr.msk.bf16.gmra.mrb[84].mxu1 %vm3410_vm2, %v10500_v50 }
 0x5ee   :  { %6760 = vmatprep.mubr.bf16.mxu1 %v17055_v30 }
 0x5f1   :  { %9630 = vmatmul.mubr.msk.bf16.vlgmr.msra.gmra.mrb[76].mxu0 %vm3410_vm2, %v14374_v48 }
 0x5f2   :  { %6175 = vmatpush1.bf16.msra.mxu0 %v14078_v27  ;;  %9633 = vmatprep.mubr.msk.bf16.mxu0 %vm3410_vm2, %v14385_v5  ;;  %v14618_v27 = vpop.permute.xlu0 %6926 }
 0x5f3   :  { %9641 = vmatprep.subr.bf16.mxu0 %v14089_v34  ;;  %17056 = vst [vmem:[#allocation44_spill] sm:$0xff] %v14618_v27 }
 0x5f5   :  { %9355 = vmatmul.mubr.msk.bf16.gmra.mrb[88].mxu1 %vm3410_vm2, %v10501_v35 }
 0x5f6   :  { %8676 = vmatprep.mubr.bf16.mxu1 %v17055_v30  ;;  %v14637_v16 = vpop.permute.xlu0 %6936 }
 0x5f7   :  { %17058 = vst [vmem:[#allocation23_spill] sm:$0xff] %v14637_v16 }
 0x5f9   :  { %9634 = vmatmul.mubr.msk.bf16.gmra.mrb[80].mxu0 %vm3410_vm2, %v14398_v62 }
 0x5fa   :  { %9637 = vmatprep.mubr.msk.bf16.mxu0 %vm3410_vm2, %v14409_v44 }
 0x601   :  { %9638 = vmatmul.mubr.msk.bf16.gmra.mrb[84].mxu0 %vm3410_vm2, %v14420_v49 }
 0x602   :  { %6206 = vmatprep.mubr.bf16.mxu0 %v17055_v30 }
 0x609   :  { %9308 = vmatmul.mubr.msk.bf16.vlgmr.msra.gmra.mrb[52].mxu0 %vm3410_vm2, %v14431_v47 }
 0x60a   :  { %9642 = vmatpush3.bf16.msra.mxu0 %v14089_v34  ;;  %6216 = vmatprep.mubr.bf16.mxu0 %v17055_v30 }
 0x60b   :  { %6585 = vmatprep.subr.bf16.mxu0 %v14096_v61 }
 0x611   :  { %9309 = vmatmul.mubr.msk.bf16.gmra.mrb[56].mxu0 %vm3410_vm2, %v14445_v25 }
 0x612   :  { %6226 = vmatprep.mubr.bf16.mxu0 %v17055_v30 }
 0x619   :  { %9310 = vmatmul.mubr.msk.bf16.gmra.mrb[60].mxu0 %vm3410_vm2, %v14457_v51 }
 0x61a   :  { %6236 = vmatprep.mubr.bf16.mxu0 %v17055_v30 }
 0x621   :  { %9311 = vmatmul.mubr.msk.bf16.gmra.mrb[64].mxu0 %vm3410_vm2, %v14471_v29 }
 0x622   :  { %6246 = vmatprep.mubr.bf16.mxu0 %v17055_v30 }
 0x629   :  { %9312 = vmatmul.mubr.msk.bf16.gmra.mrb[68].mxu0 %vm3410_vm2, %v14483_v26 }
 0x62a   :  { %6256 = vmatprep.mubr.bf16.mxu0 %v17055_v30 }
 0x631   :  { %9313 = vmatmul.mubr.msk.bf16.gmra.mrb[72].mxu0 %vm3410_vm2, %v10495_v53 }
 0x632   :  { %9643 = vmatprep.mubr.msk.bf16.mxu0 %vm3410_vm2, %v14431_v47 }
 0x639   :  { %9644 = vmatmul.mubr.msk.bf16.vlgmr.msra.gmra.mrb[76].mxu0 %vm3410_vm2, %v14445_v25 }
 0x63a   :  { %6586 = vmatpush1.bf16.msra.mxu0 %v14110_v41  ;;  %9647 = vmatprep.mubr.msk.bf16.mxu0 %vm3410_vm2, %v14457_v51 }
 0x63b   :  { %9655 = vmatprep.subr.bf16.mxu0 %v14118_v8 }
 0x641   :  { %9648 = vmatmul.mubr.msk.bf16.gmra.mrb[80].mxu0 %vm3410_vm2, %v14471_v29 }
 0x642   :  { %9651 = vmatprep.mubr.msk.bf16.mxu0 %vm3410_vm2, %v14483_v26 }
 0x649   :  { %9652 = vmatmul.mubr.msk.bf16.gmra.mrb[84].mxu0 %vm3410_vm2, %v10495_v53 }
 0x64a   :  { %6617 = vmatprep.mubr.bf16.mxu0 %v17055_v30 }
 0x651   :  { %9344 = vmatmul.mubr.msk.bf16.vlgmr.msra.gmra.mrb[52].mxu0 %vm3410_vm2, %v14504_v9 }
 0x652   :  { %9656 = vmatpush3.bf16.msra.mxu0 %v14118_v8  ;;  %6627 = vmatprep.mubr.bf16.mxu0 %v17055_v30 }
 0x659   :  { %9345 = vmatmul.mubr.msk.bf16.gmra.mrb[56].mxu0 %vm3410_vm2, %v14515_v54 }
 0x65a   :  { %6637 = vmatprep.mubr.bf16.mxu0 %v17055_v30 }
 0x661   :  { %9346 = vmatmul.mubr.msk.bf16.gmra.mrb[60].mxu0 %vm3410_vm2, %v10498_v43 }
 0x662   :  { %6647 = vmatprep.mubr.bf16.mxu0 %v17055_v30 }
 0x669   :  { %9347 = vmatmul.mubr.msk.bf16.gmra.mrb[64].mxu0 %vm3410_vm2, %v10499_v3 }
 0x66a   :  { %6657 = vmatprep.mubr.bf16.mxu0 %v17055_v30 }
 0x671   :  { %9348 = vmatmul.mubr.msk.bf16.gmra.mrb[68].mxu0 %vm3410_vm2, %v10500_v50 }
 0x672   :  { %6667 = vmatprep.mubr.bf16.mxu0 %v17055_v30 }
 0x679   :  { %9349 = vmatmul.mubr.msk.bf16.gmra.mrb[72].mxu0 %vm3410_vm2, %v10501_v35 }
 0x67a   :  { %9657 = vmatprep.mubr.msk.bf16.mxu0 %vm3410_vm2, %v14504_v9 }
 0x681   :  { %9658 = vmatmul.mubr.msk.bf16.vlgmr.msra.gmra.mrb[76].mxu0 %vm3410_vm2, %v14515_v54 }
 0x682   :  { %9661 = vmatprep.mubr.msk.bf16.mxu0 %vm3410_vm2, %v10498_v43 }
 0x689   :  { %9662 = vmatmul.mubr.msk.bf16.gmra.mrb[80].mxu0 %vm3410_vm2, %v10499_v3 }
 0x68a   :  { %9665 = vmatprep.mubr.msk.bf16.mxu0 %vm3410_vm2, %v10500_v50 }
 0x691   :  { %9666 = vmatmul.mubr.msk.bf16.gmra.mrb[84].mxu0 %vm3410_vm2, %v10501_v35 }
 0x6a0   :  { %v6712_v34 = vpop.f32.mrb[68].mxu1 }
 0x6a1   :  { %v6986_v61 = vadd.f32 %v14618_v27, %v6712_v34  ;;  %v6714_v14 = vpop.f32.mrb[69].mxu1 }
 0x6a2   :  { %v6987_v15 = vadd.f32 %v14618_v27, %v6714_v14  ;;  %v6716_v41 = vpop.f32.mrb[70].mxu1 }
 0x6a3   :  { %v7106_v2 = vmul.f32 0.70710677, %v6986_v61  ;;  %v6991_v55 = vadd.f32 %v14621_v0, %v6716_v41  ;;  %v6718_v8 = vpop.f32.mrb[71].mxu1  ;;  %v14669_v62 = vmul.f32 0.5, %v6986_v61 }
 0x6a4   :  { %v14625_v18 = vmul.f32 0.70710677, %v6987_v15  ;;  %v6992_v63 = vadd.f32 %v14621_v0, %v6718_v8  ;;  %v14671_v44 = vmul.f32 0.5, %v6987_v15 }
 0x6a5   :  { %v7286_v39 = vand.u32 2147483647, %v7106_v2  ;;  %v14627_v13 = vmul.f32 0.70710677, %v6991_v55  ;;  %vm7166_vm10 = vcmp.ge.f32.partialorder %v7106_v2, 0.0  ;;  %v14683_v25 = vmul.f32 0.5, %v6991_v55 }
 0x6a6   :  { %v7287_v1 = vand.u32 2147483647, %v14625_v18  ;;  %v14632_v10 = vmul.f32 0.70710677, %v6992_v63  ;;  %v14680_v37 = vsel %vm7166_vm10, 1.0, %v16870_v24  ;;  %vm7167_vm11 = vcmp.ge.f32.partialorder %v14625_v18, 0.0 }
 0x6a7   :  { %v7346_v56 = vmul.f32 0.3275911, %v7286_v39  ;;  %v7291_v28 = vand.u32 2147483647, %v14627_v13  ;;  %v8066_v19 = vsub.f32 0.0, %v7286_v39  ;;  %v14688_v53 = vmul.f32 0.5, %v6992_v63 }
 0x6a8   :  { %v7347_v42 = vmul.f32 0.3275911, %v7287_v1  ;;  %v6722_v6 = vpop.f32.mrb[72].mxu1  ;;  %v14635_v40 = vand.u32 2147483647, %v14632_v10  ;;  %v8067_v4 = vsub.f32 0.0, %v7287_v1 }
 0x6a9   :  { %v7406_v36 = vadd.f32 1.0, %v7346_v56  ;;  %v7351_v11 = vmul.f32 0.3275911, %v7291_v28  ;;  %v6724_v52 = vpop.f32.mrb[73].mxu1  ;;  %v14643_v33 = vadd.f32 %v14637_v16, %v6722_v6  ;;  %v8071_v32 = vsub.f32 0.0, %v7291_v28 }
 0x6aa   :  { %v7407_v7 = vadd.f32 1.0, %v7347_v42  ;;  %v6726_v20 = vpop.f32.mrb[74].mxu1  ;;  %v7352_v58 = vmul.f32 0.3275911, %v14635_v40  ;;  %v14646_v21 = vadd.f32 %v14637_v16, %v6724_v52  ;;  %v8126_v26 = vmul.f32 %v8066_v19, %v7286_v39 }
 0x6ab   :  { %10742 = vrcp.f32 %v7406_v36  ;;  %v7411_v12 = vadd.f32 1.0, %v7351_v11  ;;  %v6728_v57 = vpop.f32.mrb[75].mxu1  ;;  %v14649_v17 = vadd.f32 %v14640_v23, %v6726_v20  ;;  %v14652_v46 = vmul.f32 0.70710677, %v14643_v33 }
 0x6ac   :  { %10744 = vrcp.f32 %v7407_v7  ;;  %v7412_v31 = vadd.f32 1.0, %v7352_v58  ;;  %v14657_v45 = vmul.f32 0.70710677, %v14646_v21  ;;  %v8127_v50 = vmul.f32 %v8067_v4, %v7287_v1 }
 0x6ad   :  { %10746 = vrcp.f32 %v7411_v12  ;;  %v14662_v60 = vand.u32 2147483647, %v14652_v46  ;;  %v14665_v48 = vmul.f32 0.70710677, %v14649_v17  ;;  %v8131_v35 = vmul.f32 %v8071_v32, %v7291_v28 }
 0x6ae   :  { %10748 = vrcp.f32 %v7412_v31  ;;  %v14674_v49 = vand.u32 2147483647, %v14657_v45  ;;  %v14700_v41 = vadd.f32 %v14640_v23, %v6728_v57  ;;  %v14705_v55 = vsel %vm7167_vm11, 1.0, %v16870_v24 }
 0x6af   :  { %v7356_v51 = vmul.f32 0.3275911, %v14662_v60  ;;  %v14692_v54 = vand.u32 2147483647, %v14665_v48  ;;  %vm7171_vm13 = vcmp.ge.f32.partialorder %v14627_v13, 0.0  ;;  %vm7172_vm14 = vcmp.ge.f32.partialorder %v14632_v10, 0.0 }
 0x6b0   :  { %v14654_v22 = vpop.f32.mrb[76].mxu1  ;;  %v7357_v9 = vmul.f32 0.3275911, %v14674_v49  ;;  %v8188_v63 = vmul.f32 1.442695, %v8126_v26  ;;  %v8072_v20 = vsub.f32 0.0, %v14635_v40 }
 0x6b1   :  { %v14659_v59 = vpop.f32.mrb[77].mxu1  ;;  %v7416_v34 = vadd.f32 1.0, %v7356_v51  ;;  %v7361_v15 = vmul.f32 0.3275911, %v14692_v54  ;;  %v8190_v36 = vmul.f32 1.442695, %v8127_v50 }
 0x6b2   :  { %v14667_v5 = vpop.f32.mrb[78].mxu1  ;;  %v7417_v14 = vadd.f32 1.0, %v7357_v9  ;;  %v8198_v52 = vmul.f32 1.442695, %v8131_v35  ;;  %v14724_v12 = vmul.f32 0.70710677, %v14700_v41  ;;  %v8132_v50 = vmul.f32 %v8072_v20, %v14635_v40 }
 0x6b3   :  { %v14676_v47 = vpop.f32.mrb[79].mxu1  ;;  %10750 = vrcp.f32 %v7416_v34  ;;  %v7421_v56 = vadd.f32 1.0, %v7361_v15  ;;  %v14732_v10 = vsel %vm7171_vm13, 1.0, %v16870_v24  ;;  %v14735_v4 = vsel %vm7172_vm14, 1.0, %v16870_v24  ;;  %v14745_v34 = vpop.permute.xlu0 %6946 }
 0x6b4   :  { %10752 = vrcp.f32 %v7417_v14  ;;  %v8076_v32 = vsub.f32 0.0, %v14662_v60  ;;  %v8081_v35 = vsub.f32 0.0, %v14692_v54  ;;  %v14743_v13 = vand.u32 2147483647, %v14724_v12 }
 0x6b5   :  { %v14686_v29 = vpop.eup %10742  ;;  %10754 = vrcp.f32 %v7421_v56  ;;  %v14757_v56 = vadd.f32 %v14745_v34, %v14654_v22  ;;  %vm7176_vm15 = vcmp.ge.f32.partialorder %v14652_v46, 0.0  ;;  %vm7177_vm0 = vcmp.ge.f32.partialorder %v14657_v45, 0.0 }
 0x6b6   :  { %v14694_v43 = vpop.eup %10744  ;;  %v7526_v3 = vmul.f32 1.0614054, %v14686_v29  ;;  %10756 = vpow2.f32 %v8188_v63  ;;  %v14751_v63 = vmul.f32 0.5, %v14643_v33  ;;  %v7362_v40 = vmul.f32 0.3275911, %v14743_v13 }
 0x6b7   :  { %v7527_v61 = vmul.f32 1.0614054, %v14694_v43  ;;  %v14710_v39 = vpop.eup %10746  ;;  %10758 = vpow2.f32 %v8190_v36  ;;  %v8141_v22 = vmul.f32 %v8081_v35, %v14692_v54  ;;  %vm7181_vm1 = vcmp.ge.f32.partialorder %v14665_v48, 0.0 }
 0x6b8   :  { %v7586_v2 = vadd.f32 -1.4531521, %v7526_v3  ;;  %v14708_v8 = vpop.f32.mrb[80].mxu1  ;;  %v7531_v18 = vmul.f32 1.0614054, %v14710_v39  ;;  %v14719_v7 = vpop.eup %10748  ;;  %10760 = vpow2.f32 %v8198_v52  ;;  %v14764_v52 = vmul.f32 0.5, %v14646_v21 }
 0x6b9   :  { %v7587_v1 = vadd.f32 -1.4531521, %v7527_v61  ;;  %v14712_v42 = vpop.f32.mrb[81].mxu1  ;;  %v7532_v19 = vmul.f32 1.0614054, %v14719_v7  ;;  %vm7182_vm2 = vcmp.ge.f32.partialorder %v14724_v12, 0.0 }
 0x6ba   :  { %v7646_v28 = vmul.f32 %v14686_v29, %v7586_v2  ;;  %v14717_v6 = vpop.f32.mrb[82].mxu1  ;;  %v7591_v31 = vadd.f32 -1.4531521, %v7531_v18 }
 0x6bb   :  { %v7647_v11 = vmul.f32 %v14694_v43, %v7587_v1  ;;  %v14726_v57 = vpop.f32.mrb[83].mxu1  ;;  %v7592_v9 = vadd.f32 -1.4531521, %v7532_v19  ;;  %v8136_v1 = vmul.f32 %v8076_v32, %v14662_v60  ;;  %v14770_v60 = vmul.f32 1.442695, %v8132_v50 }
 0x6bc   :  { %v7706_v58 = vadd.f32 1.4214138, %v7646_v28  ;;  %v7651_v26 = vmul.f32 %v14710_v39, %v7591_v31  ;;  %v7422_v31 = vadd.f32 1.0, %v7362_v40 }
 0x6bd   :  { %v7707_v3 = vadd.f32 1.4214138, %v7647_v11  ;;  %v7652_v15 = vmul.f32 %v14719_v7, %v7592_v9  ;;  %v14759_v28 = vpop.eup %10750 }
 0x6be   :  { %v7766_v51 = vmul.f32 %v14686_v29, %v7706_v58  ;;  %v7711_v14 = vadd.f32 1.4214138, %v7651_v26  ;;  %v14768_v20 = vpop.eup %10752  ;;  %v7536_v58 = vmul.f32 1.0614054, %v14759_v28  ;;  %10762 = vrcp.f32 %v7422_v31 }
 0x6bf   :  { %v7712_v11 = vadd.f32 1.4214138, %v7652_v15  ;;  %v7537_v21 = vmul.f32 1.0614054, %v14768_v20  ;;  %v14781_v50 = vpop.eup %10754  ;;  %v8218_v31 = vmul.f32 1.442695, %v8141_v22 }
 0x6c0   :  { %v7826_v61 = vadd.f32 -0.28449672, %v7766_v51  ;;  %v14748_v2 = vpop.f32.mrb[84].mxu1  ;;  %v7771_v18 = vmul.f32 %v14710_v39, %v7711_v14  ;;  %v7767_v51 = vmul.f32 %v14694_v43, %v7707_v3  ;;  %v7596_v9 = vadd.f32 -1.4531521, %v7536_v58  ;;  %v10757_v3 = vpop.eup %10756 }
 0x6c1   :  { %v14766_v33 = vpop.f32.mrb[85].mxu1  ;;  %v14779_v14 = vmul.f32 0.70710677, %v14757_v56  ;;  %v7772_v35 = vmul.f32 %v14719_v7, %v7712_v11  ;;  %v7597_v40 = vadd.f32 -1.4531521, %v7537_v21  ;;  %v14791_v38 = vpop.eup %10758 }
 0x6c2   :  { %v7886_v36 = vmul.f32 %v14686_v29, %v7826_v61  ;;  %v14774_v19 = vpop.f32.mrb[86].mxu1  ;;  %v7831_v26 = vadd.f32 -0.28449672, %v7771_v18  ;;  %v8208_v61 = vmul.f32 1.442695, %v8136_v1  ;;  %v7656_v18 = vmul.f32 %v14759_v28, %v7596_v9  ;;  %v10761_v9 = vpop.eup %10760 }
 0x6c3   :  { %17060 = vst [vmem:[#allocation46_spill] sm:$0xff] %v14774_v19  ;;  %v8077_v1 = vsub.f32 0.0, %v14674_v49  ;;  %v7541_v58 = vmul.f32 1.0614054, %v14781_v50  ;;  %v7827_v23 = vadd.f32 -0.28449672, %v7767_v51 }
 0x6c4   :  { %v7946_v32 = vadd.f32 0.2548296, %v7886_v36  ;;  %v7891_v54 = vmul.f32 %v14710_v39, %v7831_v26  ;;  %v14786_v36 = vpop.f32.mrb[87].mxu1  ;;  %v7716_v11 = vadd.f32 1.4214138, %v7656_v18  ;;  %10764 = vpow2.f32 %v8208_v61 }
 0x6c5   :  { %17061 = vst [vmem:[#allocation24_spill] sm:$0xff] %v14786_v36  ;;  %v7601_v21 = vadd.f32 -1.4531521, %v7541_v58  ;;  %v14797_v16 = vand.u32 2147483647, %v14779_v14  ;;  %10766 = vpow2.f32 %v8218_v31  ;;  %v14827_v31 = vadd.f32 %v14745_v34, %v14659_v59 }
 0x6c6   :  { %v8006_v15 = vmul.f32 %v14686_v29, %v7946_v32  ;;  %v7951_v29 = vadd.f32 0.2548296, %v7891_v54  ;;  %v7657_v32 = vmul.f32 %v14768_v20, %v7597_v40  ;;  %v7832_v22 = vadd.f32 -0.28449672, %v7772_v35 }
 0x6c7   :  { %v7776_v51 = vmul.f32 %v14759_v28, %v7716_v11  ;;  %v7661_v54 = vmul.f32 %v14781_v50, %v7601_v21  ;;  %v7366_v61 = vmul.f32 0.3275911, %v14797_v16  ;;  %v8137_v35 = vmul.f32 %v8077_v1, %v14674_v49 }
 0x6c8   :  { %v8306_v30 = vmul.f32 %v10757_v3, %v8006_v15  ;;  %v14794_v26 = vpop.f32.mrb[88].mxu1  ;;  %v8011_v27 = vmul.f32 %v14710_v39, %v7951_v29  ;;  %v7717_v36 = vadd.f32 1.4214138, %v7657_v32  ;;  %v14804_v15 = vmul.f32 0.5, %v14649_v17 }
 0x6c9   :  { %v14800_v19 = vpop.f32.mrb[89].mxu1  ;;  %v7836_v58 = vadd.f32 -0.28449672, %v7776_v51  ;;  %v7721_v17 = vadd.f32 1.4214138, %v7661_v54  ;;  %v7426_v29 = vadd.f32 1.0, %v7366_v61  ;;  %v7887_v32 = vmul.f32 %v14694_v43, %v7827_v23 }
 0x6ca   :  { %v8366_v0 = vsub.f32 1.0, %v8306_v30  ;;  %v14808_v40 = vpop.f32.mrb[90].mxu1  ;;  %v8311_v30 = vmul.f32 %v10761_v9, %v8011_v27  ;;  %v7777_v39 = vmul.f32 %v14768_v20, %v7717_v36  ;;  %v7892_v21 = vmul.f32 %v14719_v7, %v7832_v22 }
 0x6cb   :  { %17062 = vst [vmem:[#allocation17_spill] sm:$0xff] %v14808_v40  ;;  %v14813_v18 = vpop.f32.mrb[91].mxu1  ;;  %v14818_v40 = vpop.eup %10762  ;;  %v7896_v27 = vmul.f32 %v14759_v28, %v7836_v58  ;;  %v7781_v49 = vmul.f32 %v14781_v50, %v7721_v17  ;;  %10768 = vrcp.f32 %v7426_v29  ;;  %v8210_v1 = vmul.f32 1.442695, %v8137_v35 }
 0x6cc   :  { %v8426_v3 = vmul.f32 %v8366_v0, %v14680_v37  ;;  %v8371_v11 = vsub.f32 1.0, %v8311_v30  ;;  %v7837_v0 = vadd.f32 -0.28449672, %v7777_v39  ;;  %10770 = vpow2.f32 %v14770_v60 }
 0x6cd   :  { %v7956_v9 = vadd.f32 0.2548296, %v7896_v27  ;;  %v7841_v23 = vadd.f32 -0.28449672, %v7781_v49  ;;  %v7542_v51 = vmul.f32 1.0614054, %v14818_v40  ;;  %10772 = vpow2.f32 %v8210_v1 }
 0x6ce   :  { %v8486_v37 = vadd.f32 1.0, %v8426_v3  ;;  %v8431_v36 = vmul.f32 %v8371_v11, %v14732_v10  ;;  %v7947_v22 = vadd.f32 0.2548296, %v7887_v32  ;;  %v7952_v61 = vadd.f32 0.2548296, %v7892_v21  ;;  %v10765_v30 = vpop.eup %10764 }
 0x6cf   :  { %v8016_v3 = vmul.f32 %v14759_v28, %v7956_v9  ;;  %v7897_v10 = vmul.f32 %v14768_v20, %v7837_v0  ;;  %v7901_v60 = vmul.f32 %v14781_v50, %v7841_v23  ;;  %v7602_v39 = vadd.f32 -1.4531521, %v7542_v51 }
 0x6d0   :  { %v8491_v54 = vadd.f32 1.0, %v8431_v36  ;;  %v14834_v35 = vmul.f32 %v8486_v37, %v14669_v62  ;;  %v8082_v59 = vsub.f32 0.0, %v14743_v13  ;;  %v14842_v28 = vmul.f32 0.70710677, %v14827_v31  ;;  %v10767_v37 = vpop.eup %10766  ;;  %v14850_v36 = vpop.permute.xlu1 %6951 }
 0x6d1   :  { %v8316_v17 = vmul.f32 %v10765_v30, %v8016_v3  ;;  %v7961_v29 = vadd.f32 0.2548296, %v7901_v60  ;;  %v7662_v32 = vmul.f32 %v14818_v40, %v7602_v39  ;;  %v8007_v11 = vmul.f32 %v14694_v43, %v7947_v22  ;;  %17065 = vst [vmem:[#allocation25_spill] sm:$0xff] %v14850_v36 }
 0x6d2   :  { %17063 = vst [vmem:[#allocation18_spill] sm:$0xff] %v14834_v35  ;;  %v14837_v58 = vmul.f32 %v8491_v54, %v14683_v25  ;;  %v8012_v62 = vmul.f32 %v14719_v7, %v7952_v61  ;;  %v7957_v27 = vadd.f32 0.2548296, %v7897_v10  ;;  %v7236_v1 = vsel %vm7176_vm15, 1.0, %v16870_v24 }
 0x6d3   :  { %v8376_v25 = vsub.f32 1.0, %v8316_v17  ;;  %v8021_v0 = vmul.f32 %v14781_v50, %v7961_v29  ;;  %v7722_v49 = vadd.f32 1.4214138, %v7662_v32  ;;  %v14858_v43 = vsel %vm7177_vm0, 1.0, %v16870_v24 }
 0x6d4   :  { %17064 = vst [vmem:[#allocation11_spill] sm:$0xff] %v14837_v58  ;;  %v8142_v7 = vmul.f32 %v8082_v59, %v14743_v13  ;;  %v14862_v9 = vand.u32 2147483647, %v14842_v28  ;;  %v14869_v46 = vadd.f32 %v14850_v36, %v14667_v5  ;;  %v8307_v45 = vmul.f32 %v14791_v38, %v8007_v11 }
 0x6d5   :  { %v14864_v23 = vpop.eup %10768  ;;  %v8436_v50 = vmul.f32 %v8376_v25, %v7236_v1  ;;  %v8321_v51 = vmul.f32 %v10767_v37, %v8021_v0  ;;  %v7782_v22 = vmul.f32 %v14818_v40, %v7722_v49  ;;  %v7241_v13 = vsel %vm7181_vm1, 1.0, %v16870_v24 }
 0x6d6   :  { %v10771_v54 = vpop.eup %10770  ;;  %v7546_v61 = vmul.f32 1.0614054, %v14864_v23  ;;  %v7367_v30 = vmul.f32 0.3275911, %v14862_v9  ;;  %v8017_v10 = vmul.f32 %v14768_v20, %v7957_v27  ;;  %v8086_v59 = vsub.f32 0.0, %v14797_v16 }
 0x6d7   :  { %v8312_v3 = vmul.f32 %v10771_v54, %v8012_v62  ;;  %v8381_v60 = vsub.f32 1.0, %v8321_v51  ;;  %v7842_v39 = vadd.f32 -0.28449672, %v7782_v22  ;;  %v8496_v38 = vadd.f32 1.0, %v8436_v50  ;;  %v10773_v11 = vpop.eup %10772  ;;  %v14892_v51 = vpop.permute.xlu0 %6956 }
 0x6d8   :  { %v7606_v5 = vadd.f32 -1.4531521, %v7546_v61  ;;  %v7427_v17 = vadd.f32 1.0, %v7367_v30  ;;  %v8220_v32 = vmul.f32 1.442695, %v8142_v7  ;;  %v8367_v25 = vsub.f32 1.0, %v8307_v45 }
 0x6d9   :  { %v8441_v29 = vmul.f32 %v8381_v60, %v7241_v13  ;;  %v14881_v48 = vmul.f32 0.70710677, %v14869_v46  ;;  %vm7186_vm3 = vcmp.ge.f32.partialorder %v14779_v14, 0.0  ;;  %v8372_v62 = vsub.f32 1.0, %v8312_v3 }
 0x6da   :  { %v7666_v20 = vmul.f32 %v14864_v23, %v7606_v5  ;;  %10774 = vrcp.f32 %v7427_v17  ;;  %v8317_v27 = vmul.f32 %v10773_v11, %v8017_v10  ;;  %v7902_v37 = vmul.f32 %v14818_v40, %v7842_v39 }
 0x6db   :  { %v8501_v0 = vadd.f32 1.0, %v8441_v29  ;;  %v7311_v49 = vand.u32 2147483647, %v14881_v48  ;;  %v8146_v7 = vmul.f32 %v8086_v59, %v14797_v16  ;;  %v14890_v50 = vadd.f32 %v14850_v36, %v14676_v47 }
 0x6dc   :  { %v7726_v1 = vadd.f32 1.4214138, %v7666_v20  ;;  %v14895_v22 = vmul.f32 %v8496_v38, %v14751_v63  ;;  %10776 = vpow2.f32 %v8220_v32  ;;  %v8427_v13 = vmul.f32 %v8367_v25, %v14705_v55  ;;  %v14937_v25 = vpop.permute.xlu1 %6961 }
 0x6dd   :  { %v14898_v54 = vmul.f32 %v8501_v0, %v14804_v15  ;;  %v7371_v45 = vmul.f32 0.3275911, %v7311_v49  ;;  %v14903_v16 = vmul.f32 0.70710677, %v14890_v50  ;;  %v14907_v47 = vadd.f32 %v14892_v51, %v14708_v8  ;;  %17068 = vst [vmem:[#allocation15_spill] sm:$0xff] %v14937_v25 }
 0x6de   :  { %17066 = vst [vmem:[#allocation13_spill] sm:$0xff] %v14895_v22  ;;  %v7786_v61 = vmul.f32 %v14864_v23, %v7726_v1  ;;  %v8432_v30 = vmul.f32 %v8372_v62, %v14735_v4  ;;  %v8377_v63 = vsub.f32 1.0, %v8317_v27  ;;  %v7962_v10 = vadd.f32 0.2548296, %v7902_v37 }
 0x6df   :  { %17067 = vst [vmem:[#allocation14_spill] sm:$0xff] %v14898_v54  ;;  %v7431_v3 = vadd.f32 1.0, %v7371_v45  ;;  %v8228_v60 = vmul.f32 1.442695, %v8146_v7  ;;  %v14913_v55 = vand.u32 2147483647, %v14903_v16  ;;  %v14942_v62 = vadd.f32 %v14892_v51, %v14712_v42 }
 0x6e0   :  { %v14916_v39 = vmul.f32 0.5, %v14700_v41  ;;  %v14919_v5 = vmul.f32 0.5, %v14757_v56  ;;  %v7846_v8 = vadd.f32 -0.28449672, %v7786_v61  ;;  %v8487_v59 = vadd.f32 1.0, %v8427_v13 }
 0x6e1   :  { %10778 = vrcp.f32 %v7431_v3  ;;  %v7242_v4 = vsel %vm7182_vm2, 1.0, %v16870_v24  ;;  %v7372_v17 = vmul.f32 0.3275911, %v14913_v55  ;;  %v14926_v38 = vmul.f32 0.70710677, %v14907_v47 }
 0x6e2   :  { %v8492_v29 = vadd.f32 1.0, %v8432_v30  ;;  %v8437_v32 = vmul.f32 %v8377_v63, %v14858_v43  ;;  %v14932_v41 = vsel %vm7186_vm3, 1.0, %v16870_v24  ;;  %v8087_v56 = vsub.f32 0.0, %v14862_v9 }
 0x6e3   :  { %v8022_v12 = vmul.f32 %v14818_v40, %v7962_v10  ;;  %10780 = vpow2.f32 %v8228_v60  ;;  %v7432_v20 = vadd.f32 1.0, %v7372_v17  ;;  %v7906_v43 = vmul.f32 %v14864_v23, %v7846_v8 }
 0x6e4   :  { %v14935_v11 = vpop.eup %10774  ;;  %v7316_v27 = vand.u32 2147483647, %v14926_v38  ;;  %v14949_v0 = vadd.f32 %v14937_v25, %v14717_v6  ;;  %v14952_v37 = vmul.f32 %v8487_v59, %v14671_v44  ;;  %vm7187_vm4 = vcmp.ge.f32.partialorder %v14842_v28, 0.0 }
 0x6e5   :  { %v7547_v14 = vmul.f32 1.0614054, %v14935_v11  ;;  %v8091_v40 = vsub.f32 0.0, %v7311_v49  ;;  %10782 = vrcp.f32 %v7432_v20  ;;  %v8497_v42 = vadd.f32 1.0, %v8437_v32 }
 0x6e6   :  { %17069 = vst [vmem:[#allocation50_spill] sm:$0xff] %v14952_v37  ;;  %v10777_v1 = vpop.eup %10776  ;;  %v8147_v45 = vmul.f32 %v8087_v56, %v14862_v9  ;;  %v7376_v13 = vmul.f32 0.3275911, %v7316_v27  ;;  %v14957_v61 = vmul.f32 %v8492_v29, %v14688_v53  ;;  %v14960_v6 = vmul.f32 0.5, %v14827_v31 }
 0x6e7   :  { %v7607_v7 = vadd.f32 -1.4531521, %v7547_v14  ;;  %v8322_v30 = vmul.f32 %v10777_v1, %v8022_v12  ;;  %v14963_v44 = vmul.f32 0.70710677, %v14942_v62  ;;  %v7966_v63 = vadd.f32 0.2548296, %v7906_v43 }
 0x6e8   :  { %17070 = vst [vmem:[#allocation47_spill] sm:$0xff] %v14957_v61  ;;  %vm7191_vm5 = vcmp.ge.f32.partialorder %v14881_v48, 0.0  ;;  %v7436_v3 = vadd.f32 1.0, %v7376_v13  ;;  %v14967_v10 = vmul.f32 0.70710677, %v14949_v0  ;;  %v14972_v9 = vsel %vm7187_vm4, 1.0, %v16870_v24 }
 0x6e9   :  { %v14975_v53 = vmul.f32 0.5, %v14869_v46  ;;  %v8151_v31 = vmul.f32 %v8091_v40, %v7311_v49  ;;  %v14978_v60 = vand.u32 2147483647, %v14963_v44  ;;  %v14983_v48 = vmul.f32 %v8497_v42, %v14764_v52 }
 0x6ea   :  { %v7667_v59 = vmul.f32 %v14935_v11, %v7607_v7  ;;  %v8230_v17 = vmul.f32 1.442695, %v8147_v45  ;;  %10784 = vrcp.f32 %v7436_v3  ;;  %v8382_v29 = vsub.f32 1.0, %v8322_v30 }
 0x6eb   :  { %v14980_v8 = vpop.eup %10778  ;;  %17071 = vst [vmem:[#allocation48_spill] sm:$0xff] %v14983_v48  ;;  %v14987_v28 = vsel %vm7191_vm5, 1.0, %v16870_v24  ;;  %v7377_v49 = vmul.f32 0.3275911, %v14978_v60  ;;  %v8026_v32 = vmul.f32 %v14864_v23, %v7966_v63  ;;  %v14993_v56 = vmul.f32 0.5, %v14890_v50 }
 0x6ec   :  { %v7551_v46 = vmul.f32 1.0614054, %v14980_v8  ;;  %v8092_v52 = vsub.f32 0.0, %v14913_v55  ;;  %v14997_v12 = vand.u32 2147483647, %v14967_v10  ;;  %v15001_v1 = vadd.f32 %v14937_v25, %v14726_v57 }
 0x6ed   :  { %v10781_v20 = vpop.eup %10780  ;;  %v8238_v14 = vmul.f32 1.442695, %v8151_v31  ;;  %v7437_v40 = vadd.f32 1.0, %v7377_v49  ;;  %v7727_v42 = vadd.f32 1.4214138, %v7667_v59  ;;  %vm7192_vm6 = vcmp.ge.f32.partialorder %v14903_v16, 0.0 }
 0x6ee   :  { %v7611_v43 = vadd.f32 -1.4531521, %v7551_v46  ;;  %v8096_v23 = vsub.f32 0.0, %v7316_v27  ;;  %v7381_v50 = vmul.f32 0.3275911, %v14997_v12  ;;  %v8442_v45 = vmul.f32 %v8382_v29, %v7242_v4  ;;  %v15017_v4 = vpop.permute.xlu0 %6966 }
 0x6ef   :  { %v15005_v7 = vpop.eup %10782  ;;  %v15009_v30 = vmul.f32 0.5, %v14907_v47  ;;  %10786 = vrcp.f32 %v7437_v40  ;;  %v8326_v63 = vmul.f32 %v10781_v20, %v8026_v32  ;;  %v8152_v57 = vmul.f32 %v8092_v52, %v14913_v55  ;;  %17072 = vst [vmem:[#allocation3_spill] sm:$0xff] %v15017_v4 }
 0x6f0   :  { %v7671_v13 = vmul.f32 %v14980_v8, %v7611_v43  ;;  %v7552_v3 = vmul.f32 1.0614054, %v15005_v7  ;;  %v7441_v31 = vadd.f32 1.0, %v7381_v50  ;;  %10788 = vpow2.f32 %v8238_v14 }
 0x6f1   :  { %vm7196_vm7 = vcmp.ge.f32.partialorder %v14926_v38, 0.0  ;;  %v15015_v46 = vmul.f32 0.70710677, %v15001_v1  ;;  %v7787_v29 = vmul.f32 %v14935_v11, %v7727_v42  ;;  %v8156_v49 = vmul.f32 %v8096_v23, %v7316_v27 }
 0x6f2   :  { %v7731_v59 = vadd.f32 1.4214138, %v7671_v13  ;;  %v7612_v47 = vadd.f32 -1.4531521, %v7552_v3  ;;  %10790 = vrcp.f32 %v7441_v31  ;;  %v15024_v55 = vsel %vm7192_vm6, 1.0, %v16870_v24 }
 0x6f3   :  { %v15027_v52 = vand.u32 2147483647, %v15015_v46  ;;  %v15031_v38 = vadd.f32 %v15017_v4, %v14748_v2  ;;  %v8502_v43 = vadd.f32 1.0, %v8442_v45  ;;  %v8386_v14 = vsub.f32 1.0, %v8326_v63 }
 0x6f4   :  { %v7791_v32 = vmul.f32 %v14980_v8, %v7731_v59  ;;  %v15033_v20 = vpop.eup %10784  ;;  %v8240_v27 = vmul.f32 1.442695, %v8152_v57  ;;  %v15036_v40 = vsel %vm7196_vm7, 1.0, %v16870_v24  ;;  %10792 = vpow2.f32 %v8230_v17 }
 0x6f5   :  { %v7556_v16 = vmul.f32 1.0614054, %v15033_v20  ;;  %v7382_v23 = vmul.f32 0.3275911, %v15027_v52  ;;  %v7847_v50 = vadd.f32 -0.28449672, %v7787_v29  ;;  %v7672_v13 = vmul.f32 %v15005_v7, %v7612_v47 }
 0x6f6   :  { %v7851_v42 = vadd.f32 -0.28449672, %v7791_v32  ;;  %v8248_v3 = vmul.f32 1.442695, %v8156_v49  ;;  %v15042_v2 = vmul.f32 0.5, %v14942_v62  ;;  %v15049_v17 = vmul.f32 %v8502_v43, %v14916_v39 }
 0x6f7   :  { %v7616_v63 = vadd.f32 -1.4531521, %v7556_v16  ;;  %v7442_v57 = vadd.f32 1.0, %v7382_v23  ;;  %v15046_v31 = vmul.f32 0.70710677, %v15031_v38  ;;  %v8446_v59 = vmul.f32 %v8386_v14, %v14932_v41 }
 0x6f8   :  { %v7911_v45 = vmul.f32 %v14980_v8, %v7851_v42  ;;  %17073 = vst [vmem:[#allocation8_spill] sm:$0xff] %v15049_v17  ;;  %v15053_v29 = vmul.f32 0.5, %v14949_v0  ;;  %v8101_v47 = vsub.f32 0.0, %v14997_v12  ;;  %vm7197_vm8 = vcmp.ge.f32.partialorder %v14963_v44, 0.0 }
 0x6f9   :  { %v15056_v49 = vpop.eup %10786  ;;  %v7676_v32 = vmul.f32 %v15033_v20, %v7616_v63  ;;  %10794 = vrcp.f32 %v7442_v57  ;;  %v7907_v42 = vmul.f32 %v14935_v11, %v7847_v50  ;;  %v7732_v16 = vadd.f32 1.4214138, %v7672_v13 }
 0x6fa   :  { %v7971_v62 = vadd.f32 0.2548296, %v7911_v45  ;;  %v7557_v39 = vmul.f32 1.0614054, %v15056_v49  ;;  %v8097_v41 = vsub.f32 0.0, %v14978_v60  ;;  %v10789_v43 = vpop.eup %10788  ;;  %10796 = vpow2.f32 %v8248_v3 }
 0x6fb   :  { %v7736_v14 = vadd.f32 1.4214138, %v7676_v32  ;;  %v15065_v23 = vand.u32 2147483647, %v15046_v31  ;;  %v8506_v63 = vadd.f32 1.0, %v8446_v59  ;;  %v8161_v57 = vmul.f32 %v8101_v47, %v14997_v12 }
 0x6fc   :  { %v8031_v0 = vmul.f32 %v14980_v8, %v7971_v62  ;;  %v15067_v45 = vpop.eup %10790  ;;  %v7617_v15 = vadd.f32 -1.4531521, %v7557_v39  ;;  %v15072_v50 = vadd.f32 %v15017_v4, %v14766_v33  ;;  %v7967_v62 = vadd.f32 0.2548296, %v7907_v42 }
 0x6fd   :  { %v7796_v21 = vmul.f32 %v15033_v20, %v7736_v14  ;;  %v7561_v8 = vmul.f32 1.0614054, %v15067_v45  ;;  %v7386_v3 = vmul.f32 0.3275911, %v15065_v23  ;;  %v7792_v32 = vmul.f32 %v15005_v7, %v7732_v16 }
 0x6fe   :  { %v8331_v13 = vmul.f32 %v10789_v43, %v8031_v0  ;;  %v7677_v22 = vmul.f32 %v15056_v49, %v7617_v15  ;;  %v8157_v59 = vmul.f32 %v8097_v41, %v14978_v60  ;;  %v10793_v39 = vpop.eup %10792  ;;  %10798 = vpow2.f32 %v8240_v27 }
 0x6ff   :  { %v7856_v47 = vadd.f32 -0.28449672, %v7796_v21  ;;  %v7621_v54 = vadd.f32 -1.4531521, %v7561_v8  ;;  %v7446_v33 = vadd.f32 1.0, %v7386_v3  ;;  %v15089_v21 = vsel %vm7197_vm8, 1.0, %v16870_v24  ;;  %v15100_v3 = vpop.permute.xlu1 %6971 }
 0x700   :  { %v8391_v12 = vsub.f32 1.0, %v8331_v13  ;;  %v7737_v43 = vadd.f32 1.4214138, %v7677_v22  ;;  %v8258_v0 = vmul.f32 1.442695, %v8161_v57  ;;  %vm7201_vm10 = vcmp.ge.f32.partialorder %v14967_v10, 0.0 }
 0x701   :  { %v15081_v14 = vmul.f32 0.70710677, %v15072_v50  ;;  %v7916_v42 = vmul.f32 %v15033_v20, %v7856_v47  ;;  %v7681_v16 = vmul.f32 %v15067_v45, %v7621_v54  ;;  %10800 = vrcp.f32 %v7446_v33  ;;  %17075 = vst [vmem:[#allocation21_spill] sm:$0xff] %v15100_v3 }
 0x702   :  { %v8451_v35 = vmul.f32 %v8391_v12, %v14987_v28  ;;  %v7852_v15 = vadd.f32 -0.28449672, %v7792_v32  ;;  %v8250_v60 = vmul.f32 1.442695, %v8157_v59  ;;  %v15095_v27 = vmul.f32 %v8506_v63, %v14919_v5 }
 0x703   :  { %v15092_v22 = vpop.eup %10794  ;;  %v7976_v41 = vadd.f32 0.2548296, %v7916_v42  ;;  %v7741_v57 = vadd.f32 1.4214138, %v7681_v16  ;;  %v8027_v54 = vmul.f32 %v14935_v11, %v7967_v62  ;;  %v7797_v13 = vmul.f32 %v15056_v49, %v7737_v43  ;;  %v17077_v62 = vld [vmem:[#allocation46_spill] sm:$0xff] }
 0x704   :  { %17074 = vst [vmem:[#allocation32_spill] sm:$0xff] %v15095_v27  ;;  %v8511_v28 = vadd.f32 1.0, %v8451_v35  ;;  %10802 = vpow2.f32 %v8258_v0  ;;  %v7562_v44 = vmul.f32 1.0614054, %v15092_v22  ;;  %v10797_v8 = vpop.eup %10796  ;;  %v15108_v35 = vand.u32 2147483647, %v15081_v14 }
 0x705   :  { %v8036_v59 = vmul.f32 %v15033_v20, %v7976_v41  ;;  %v7801_v5 = vmul.f32 %v15067_v45, %v7741_v57  ;;  %v7912_v11 = vmul.f32 %v15005_v7, %v7852_v15  ;;  %vm7202_vm11 = vcmp.ge.f32.partialorder %v15015_v46, 0.0 }
 0x706   :  { %v15103_v32 = vmul.f32 %v8511_v28, %v14975_v53  ;;  %v7622_v63 = vadd.f32 -1.4531521, %v7562_v44  ;;  %v15114_v12 = vadd.f32 %v15100_v3, %v17077_v62  ;;  %v7387_v20 = vmul.f32 0.3275911, %v15108_v35 }
 0x707   :  { %v8336_v47 = vmul.f32 %v10797_v8, %v8036_v59  ;;  %v7861_v33 = vadd.f32 -0.28449672, %v7801_v5  ;;  %v8327_v43 = vmul.f32 %v10793_v39, %v8027_v54  ;;  %v7857_v0 = vadd.f32 -0.28449672, %v7797_v13 }
 0x708   :  { %17076 = vst [vmem:[#allocation31_spill] sm:$0xff] %v15103_v32  ;;  %v7261_v42 = vsel %vm7201_vm10, 1.0, %v16870_v24  ;;  %v7682_v16 = vmul.f32 %v15092_v22, %v7622_v63  ;;  %10804 = vpow2.f32 %v8250_v60  ;;  %v15125_v28 = vmul.f32 0.5, %v15001_v1  ;;  %v10799_v57 = vpop.eup %10798  ;;  %v15165_v32 = vpop.permute.xlu0 %6976 }
 0x709   :  { %v7921_v15 = vmul.f32 %v15067_v45, %v7861_v33  ;;  %v7447_v41 = vadd.f32 1.0, %v7387_v20  ;;  %v7972_v44 = vadd.f32 0.2548296, %v7912_v11  ;;  %v15130_v39 = vsel %vm7202_vm11, 1.0, %v16870_v24  ;;  %17079 = vst [vmem:[#allocation7_spill] sm:$0xff] %v15165_v32 }
 0x70a   :  { %v7742_v54 = vadd.f32 1.4214138, %v7682_v16  ;;  %v8102_v10 = vsub.f32 0.0, %v15027_v52  ;;  %v8396_v8 = vsub.f32 1.0, %v8336_v47  ;;  %v15136_v59 = vmul.f32 0.70710677, %v15114_v12 }
 0x70b   :  { %v15133_v13 = vpop.eup %10800  ;;  %v7981_v60 = vadd.f32 0.2548296, %v7921_v15  ;;  %10806 = vrcp.f32 %v7447_v41  ;;  %v8387_v1 = vsub.f32 1.0, %v8327_v43  ;;  %v7917_v5 = vmul.f32 %v15056_v49, %v7857_v0 }
 0x70c   :  { %v7566_v11 = vmul.f32 1.0614054, %v15133_v13  ;;  %v8106_v46 = vsub.f32 0.0, %v15065_v23  ;;  %v7802_v62 = vmul.f32 %v15092_v22, %v7742_v54  ;;  %v15144_v33 = vmul.f32 0.5, %v15031_v38 }
 0x70d   :  { %v8041_v63 = vmul.f32 %v15067_v45, %v7981_v60  ;;  %v15147_v47 = vand.u32 2147483647, %v15136_v59  ;;  %v8032_v16 = vmul.f32 %v15005_v7, %v7972_v44  ;;  %v8162_v43 = vmul.f32 %v8102_v10, %v15027_v52 }
 0x70e   :  { %v10803_v20 = vpop.eup %10802  ;;  %v7626_v0 = vadd.f32 -1.4531521, %v7566_v11  ;;  %v15152_v15 = vmul.f32 0.5, %v15072_v50  ;;  %v8456_v41 = vmul.f32 %v8396_v8, %v15036_v40  ;;  %vm7206_vm13 = vcmp.ge.f32.partialorder %v15046_v31, 0.0  ;;  %v17078_v11 = vld [vmem:[#allocation24_spill] sm:$0xff] }
 0x70f   :  { %v8341_v45 = vmul.f32 %v10803_v20, %v8041_v63  ;;  %v7391_v38 = vmul.f32 0.3275911, %v15147_v47  ;;  %v8447_v54 = vmul.f32 %v8387_v1, %v14972_v9  ;;  %v7977_v60 = vadd.f32 0.2548296, %v7917_v5 }
 0x710   :  { %v7686_v53 = vmul.f32 %v15133_v13, %v7626_v0  ;;  %v8166_v7 = vmul.f32 %v8106_v46, %v15065_v23  ;;  %v7862_v52 = vadd.f32 -0.28449672, %v7802_v62  ;;  %v15162_v50 = vadd.f32 %v15100_v3, %v17078_v11 }
 0x711   :  { %v8401_v44 = vsub.f32 1.0, %v8341_v45  ;;  %v7451_v10 = vadd.f32 1.0, %v7391_v38  ;;  %v8332_v40 = vmul.f32 %v10799_v57, %v8032_v16  ;;  %v8260_v8 = vmul.f32 1.442695, %v8162_v43 }
 0x712   :  { %v7746_v63 = vadd.f32 1.4214138, %v7686_v53  ;;  %v8107_v20 = vsub.f32 0.0, %v15108_v35  ;;  %v10805_v27 = vpop.eup %10804  ;;  %v8516_v9 = vadd.f32 1.0, %v8456_v41  ;;  %v15168_v23 = vmul.f32 0.70710677, %v15162_v50 }
 0x713   :  { %v8461_v1 = vmul.f32 %v8401_v44, %v7261_v42  ;;  %10808 = vrcp.f32 %v7451_v10  ;;  %v8507_v5 = vadd.f32 1.0, %v8447_v54  ;;  %v8037_v46 = vmul.f32 %v15056_v49, %v7977_v60 }
 0x714   :  { %v7806_v62 = vmul.f32 %v15133_v13, %v7746_v63  ;;  %v15174_v57 = vadd.f32 %v15165_v32, %v14794_v26  ;;  %v7922_v43 = vmul.f32 %v15092_v22, %v7862_v52  ;;  %v8268_v0 = vmul.f32 1.442695, %v8166_v7 }
 0x715   :  { %v15176_v53 = vpop.eup %10806  ;;  %v8521_v16 = vadd.f32 1.0, %v8461_v1  ;;  %v15180_v42 = vand.u32 2147483647, %v15168_v23  ;;  %v8392_v41 = vsub.f32 1.0, %v8332_v40  ;;  %10810 = vpow2.f32 %v8260_v8 }
 0x716   :  { %v7866_v45 = vadd.f32 -0.28449672, %v7806_v62  ;;  %v7567_v49 = vmul.f32 1.0614054, %v15176_v53  ;;  %v15184_v38 = vmul.f32 %v8516_v9, %v15009_v30  ;;  %v8167_v54 = vmul.f32 %v8107_v20, %v15108_v35 }
 0x717   :  { %v15187_v26 = vmul.f32 %v8521_v16, %v15053_v29  ;;  %v7392_v60 = vmul.f32 0.3275911, %v15180_v42  ;;  %v8337_v44 = vmul.f32 %v10805_v27, %v8037_v46  ;;  %v8111_v52 = vsub.f32 0.0, %v15147_v47 }
 0x718   :  { %17080 = vst [vmem:[#allocation34_spill] sm:$0xff] %v15184_v38  ;;  %v7627_v7 = vadd.f32 -1.4531521, %v7567_v49  ;;  %v15193_v10 = vmul.f32 0.70710677, %v15174_v57  ;;  %v15199_v29 = vadd.f32 %v15165_v32, %v14800_v19  ;;  %v15204_v35 = vsel %vm7206_vm13, 1.0, %v16870_v24 }
 0x719   :  { %17081 = vst [vmem:[#allocation27_spill] sm:$0xff] %v15187_v26  ;;  %v7982_v40 = vadd.f32 0.2548296, %v7922_v43  ;;  %v7452_v30 = vadd.f32 1.0, %v7392_v60  ;;  %v7926_v27 = vmul.f32 %v15133_v13, %v7866_v45  ;;  %10812 = vpow2.f32 %v8268_v0 }
 0x71a   :  { %v7687_v8 = vmul.f32 %v15176_v53, %v7627_v7  ;;  %v8452_v63 = vmul.f32 %v8392_v41, %v15024_v55  ;;  %vm7207_vm14 = vcmp.ge.f32.partialorder %v15081_v14, 0.0  ;;  %v15211_v20 = vand.u32 2147483647, %v15193_v10  ;;  %v15236_v7 = vpop.permute.xlu1 %6981 }
 0x71b   :  { %10814 = vrcp.f32 %v7452_v30  ;;  %v8397_v19 = vsub.f32 1.0, %v8337_v44  ;;  %v8270_v1 = vmul.f32 1.442695, %v8167_v54  ;;  %v8171_v31 = vmul.f32 %v8111_v52, %v15147_v47  ;;  %17083 = vst [vmem:[#allocation5_spill] sm:$0xff] %v15236_v7 }
 0x71c   :  { %v7747_v9 = vadd.f32 1.4214138, %v7687_v8  ;;  %v15217_v62 = vmul.f32 %v8507_v5, %v14960_v6  ;;  %v8042_v16 = vmul.f32 %v15092_v22, %v7982_v40  ;;  %v7396_v55 = vmul.f32 0.3275911, %v15211_v20 }
 0x71d   :  { %v15214_v46 = vpop.eup %10808  ;;  %v15222_v14 = vmul.f32 0.70710677, %v15199_v29  ;;  %v7986_v43 = vadd.f32 0.2548296, %v7926_v27  ;;  %v15225_v0 = vsel %vm7207_vm14, 1.0, %v16870_v24  ;;  %v8512_v45 = vadd.f32 1.0, %v8452_v63 }
 0x71e   :  { %17082 = vst [vmem:[#allocation16_spill] sm:$0xff] %v15217_v62  ;;  %v7807_v41 = vmul.f32 %v15176_v53, %v7747_v9  ;;  %v7571_v47 = vmul.f32 1.0614054, %v15214_v46  ;;  %vm7211_vm15 = vcmp.ge.f32.partialorder %v15136_v59, 0.0  ;;  %v7456_v6 = vadd.f32 1.0, %v7396_v55 }
 0x71f   :  { %v15231_v5 = vand.u32 2147483647, %v15222_v14  ;;  %v10811_v49 = vpop.eup %10810  ;;  %v8457_v54 = vmul.f32 %v8397_v19, %v15089_v21  ;;  %10816 = vpow2.f32 %v8270_v1  ;;  %v8278_v44 = vmul.f32 1.442695, %v8171_v31  ;;  %v17084_v21 = vld [vmem:[#allocation17_spill] sm:$0xff] }
 0x720   :  { %v7631_v60 = vadd.f32 -1.4531521, %v7571_v47  ;;  %v8342_v52 = vmul.f32 %v10811_v49, %v8042_v16  ;;  %v15239_v40 = vmul.f32 0.5, %v15114_v12  ;;  %10818 = vrcp.f32 %v7456_v6 }
 0x721   :  { %v7397_v30 = vmul.f32 0.3275911, %v15231_v5  ;;  %v8046_v8 = vmul.f32 %v15133_v13, %v7986_v43  ;;  %v7867_v63 = vadd.f32 -0.28449672, %v7807_v41  ;;  %v15248_v19 = vadd.f32 %v15236_v7, %v17084_v21 }
 0x722   :  { %v7691_v9 = vmul.f32 %v15214_v46, %v7631_v60  ;;  %v15255_v12 = vsel %vm7211_vm15, 1.0, %v16870_v24  ;;  %v8112_v31 = vsub.f32 0.0, %v15180_v42  ;;  %v15260_v13 = vadd.f32 %v15236_v7, %v14813_v18 }
 0x723   :  { %v7457_v16 = vadd.f32 1.0, %v7397_v30  ;;  %v10813_v43 = vpop.eup %10812  ;;  %v8517_v41 = vadd.f32 1.0, %v8457_v54  ;;  %10820 = vpow2.f32 %v8278_v44  ;;  %v15265_v6 = vmul.f32 0.5, %v15162_v50 }
 0x724   :  { %v15233_v22 = vpop.f32.mrb[52].mxu0  ;;  %v7751_v47 = vadd.f32 1.4214138, %v7691_v9  ;;  %v8402_v59 = vsub.f32 1.0, %v8342_v52  ;;  %vm7212_vm0 = vcmp.ge.f32.partialorder %v15168_v23, 0.0  ;;  %v8346_v18 = vmul.f32 %v10813_v43, %v8046_v8 }
 0x725   :  { %v15242_v27 = vpop.f32.mrb[53].mxu0  ;;  %v15267_v49 = vpop.eup %10814  ;;  %10822 = vrcp.f32 %v7457_v16  ;;  %v15271_v60 = vmul.f32 0.70710677, %v15248_v19  ;;  %v7927_v30 = vmul.f32 %v15176_v53, %v7867_v63  ;;  %v8172_v44 = vmul.f32 %v8112_v31, %v15180_v42 }
 0x726   :  { %v15250_v1 = vpop.f32.mrb[54].mxu0  ;;  %v7811_v21 = vmul.f32 %v15214_v46, %v7751_v47  ;;  %v7572_v54 = vmul.f32 1.0614054, %v15267_v49  ;;  %v15278_v50 = vmul.f32 0.5, %v15174_v57  ;;  %v15284_v9 = vmul.f32 0.70710677, %v15260_v13 }
 0x727   :  { %v15262_v55 = vpop.f32.mrb[55].mxu0  ;;  %v15281_v52 = vand.u32 2147483647, %v15271_v60  ;;  %v15289_v8 = vmul.f32 %v8512_v45, %v14993_v56  ;;  %v8116_v47 = vsub.f32 0.0, %v15211_v20  ;;  %v8462_v57 = vmul.f32 %v8402_v59, %v15130_v39 }
 0x728   :  { %v7871_v63 = vadd.f32 -0.28449672, %v7811_v21  ;;  %v7632_v43 = vadd.f32 -1.4531521, %v7572_v54  ;;  %v15298_v42 = vsel %vm7212_vm0, 1.0, %v16870_v24  ;;  %v8406_v45 = vsub.f32 1.0, %v8346_v18 }
 0x729   :  { %17085 = vst [vmem:[#allocation40_spill] sm:$0xff] %v15289_v8  ;;  %v7401_v31 = vmul.f32 0.3275911, %v15281_v52  ;;  %v15302_v38 = vand.u32 2147483647, %v15284_v9  ;;  %v10817_v56 = vpop.eup %10816  ;;  %vm7216_vm1 = vcmp.ge.f32.partialorder %v15193_v10, 0.0  ;;  %v15311_v23 = vmul.f32 %v8517_v41, %v15042_v2 }
 0x72a   :  { %v7987_v21 = vadd.f32 0.2548296, %v7927_v30  ;;  %v7931_v54 = vmul.f32 %v15214_v46, %v7871_v63  ;;  %v15308_v39 = vpop.eup %10818  ;;  %v8280_v59 = vmul.f32 1.442695, %v8172_v44  ;;  %v7692_v18 = vmul.f32 %v15267_v49, %v7632_v43 }
 0x72b   :  { %17086 = vst [vmem:[#allocation28_spill] sm:$0xff] %v15311_v23  ;;  %v7461_v58 = vadd.f32 1.0, %v7401_v31  ;;  %v7402_v8 = vmul.f32 0.3275911, %v15302_v38  ;;  %v7576_v30 = vmul.f32 1.0614054, %v15308_v39  ;;  %v8176_v10 = vmul.f32 %v8116_v47, %v15211_v20 }
 0x72c   :  { %v15286_v16 = vpop.f32.mrb[56].mxu0  ;;  %v7991_v17 = vadd.f32 0.2548296, %v7931_v54  ;;  %v8522_v63 = vadd.f32 1.0, %v8462_v57  ;;  %v15320_v48 = vsel %vm7216_vm1, 1.0, %v16870_v24  ;;  %v8466_v44 = vmul.f32 %v8406_v45, %v15204_v35  ;;  %v17087_v20 = vld [vmem:[#allocation44_spill] sm:$0xff] }
 0x72d   :  { %v15292_v11 = vpop.f32.mrb[57].mxu0  ;;  %10824 = vrcp.f32 %v7461_v58  ;;  %v7462_v2 = vadd.f32 1.0, %v7402_v8  ;;  %v10821_v41 = vpop.eup %10820  ;;  %v8047_v31 = vmul.f32 %v15176_v53, %v7987_v21  ;;  %v7636_v54 = vadd.f32 -1.4531521, %v7576_v30 }
 0x72e   :  { %v15306_v26 = vpop.f32.mrb[58].mxu0  ;;  %v8051_v23 = vmul.f32 %v15214_v46, %v7991_v17  ;;  %10826 = vpow2.f32 %v8280_v59  ;;  %v15328_v43 = vmul.f32 0.5, %v15199_v29  ;;  %vm7217_vm2 = vcmp.ge.f32.partialorder %v15222_v14, 0.0 }
 0x72f   :  { %v15314_v62 = vpop.f32.mrb[59].mxu0  ;;  %v15325_v61 = vpop.eup %10822  ;;  %v15333_v58 = vadd.f32 %v17087_v20, %v15233_v22  ;;  %v7752_v47 = vadd.f32 1.4214138, %v7692_v18  ;;  %v7696_v53 = vmul.f32 %v15308_v39, %v7636_v54  ;;  %v8288_v17 = vmul.f32 1.442695, %v8176_v10 }
 0x730   :  { %v8351_v35 = vmul.f32 %v10821_v41, %v8051_v23  ;;  %v7577_v57 = vmul.f32 1.0614054, %v15325_v61  ;;  %v8117_v29 = vsub.f32 0.0, %v15231_v5  ;;  %10828 = vrcp.f32 %v7462_v2 }
 0x731   :  { %v15343_v45 = vmul.f32 0.70710677, %v15333_v58  ;;  %v8526_v22 = vadd.f32 1.0, %v8466_v44  ;;  %v8347_v59 = vmul.f32 %v10817_v56, %v8047_v31  ;;  %v7756_v23 = vadd.f32 1.4214138, %v7696_v53 }
 0x732   :  { %v8411_v30 = vsub.f32 1.0, %v8351_v35  ;;  %v7637_v41 = vadd.f32 -1.4531521, %v7577_v57  ;;  %v8121_v10 = vsub.f32 0.0, %v15281_v52  ;;  %v15355_v2 = vadd.f32 %v17087_v20, %v15242_v27 }
 0x733   :  { %v15351_v54 = vand.u32 2147483647, %v15343_v45  ;;  %v15358_v37 = vmul.f32 %v8522_v63, %v15125_v28  ;;  %v7812_v56 = vmul.f32 %v15267_v49, %v7752_v47  ;;  %v7816_v31 = vmul.f32 %v15308_v39, %v7756_v23 }
 0x734   :  { %v15335_v8 = vpop.f32.mrb[60].mxu0  ;;  %v8471_v44 = vmul.f32 %v8411_v30, %v15255_v12  ;;  %v15366_v35 = vsel %vm7217_vm2, 1.0, %v16870_v24  ;;  %v7697_v53 = vmul.f32 %v15325_v61, %v7637_v41  ;;  %v8177_v57 = vmul.f32 %v8117_v29, %v15231_v5 }
 0x735   :  { %v15338_v46 = vpop.f32.mrb[61].mxu0  ;;  %17088 = vst [vmem:[#allocation36_spill] sm:$0xff] %v15358_v37  ;;  %v7344_v27 = vmul.f32 0.3275911, %v15351_v54  ;;  %v15372_v28 = vmul.f32 %v8526_v22, %v15144_v33  ;;  %v7876_v12 = vadd.f32 -0.28449672, %v7816_v31  ;;  %10830 = vpow2.f32 %v8288_v17 }
 0x736   :  { %v15345_v21 = vpop.f32.mrb[62].mxu0  ;;  %v8531_v63 = vadd.f32 1.0, %v8471_v44  ;;  %v8407_v30 = vsub.f32 1.0, %v8347_v59  ;;  %v8181_v23 = vmul.f32 %v8121_v10, %v15281_v52  ;;  %v15378_v37 = vmul.f32 0.70710677, %v15355_v2 }
 0x737   :  { %v15347_v18 = vpop.f32.mrb[63].mxu0  ;;  %17089 = vst [vmem:[#allocation26_spill] sm:$0xff] %v15372_v28  ;;  %v15374_v47 = vpop.eup %10824  ;;  %v7404_v14 = vadd.f32 1.0, %v7344_v27  ;;  %v7872_v29 = vadd.f32 -0.28449672, %v7812_v56  ;;  %v7936_v33 = vmul.f32 %v15308_v39, %v7876_v12  ;;  %v15392_v10 = vmul.f32 0.5, %v15248_v19 }
 0x738   :  { %v15383_v5 = vmul.f32 %v8531_v63, %v15239_v40  ;;  %v7581_v22 = vmul.f32 1.0614054, %v15374_v47  ;;  %v15389_v44 = vpop.eup %10826  ;;  %v7757_v59 = vadd.f32 1.4214138, %v7697_v53  ;;  %v8290_v52 = vmul.f32 1.442695, %v8177_v57 }
 0x739   :  { %10832 = vrcp.f32 %v7404_v14  ;;  %v7996_v56 = vadd.f32 0.2548296, %v7936_v33  ;;  %v17092_v63 = vld [vmem:[#allocation49_spill] sm:$0xff]  ;;  %v8467_v53 = vmul.f32 %v8407_v30, %v15225_v0  ;;  %v8298_v19 = vmul.f32 1.442695, %v8181_v23 }
 0x73a   :  { %17090 = vst [vmem:[#allocation6_spill] sm:$0xff] %v15383_v5  ;;  %v7641_v27 = vadd.f32 -1.4531521, %v7581_v22  ;;  %v15400_v12 = vadd.f32 %v17092_v63, %v15250_v1  ;;  %v15404_v7 = vpop.eup %10828  ;;  %v8122_v57 = vsub.f32 0.0, %v15302_v38  ;;  %v15409_v14 = vand.u32 2147483647, %v15378_v37 }
 0x73b   :  { %v7932_v40 = vmul.f32 %v15267_v49, %v7872_v29  ;;  %v15414_v22 = vmul.f32 0.5, %v15260_v13  ;;  %v7582_v1 = vmul.f32 1.0614054, %v15404_v7  ;;  %v7817_v28 = vmul.f32 %v15325_v61, %v7757_v59 }
 0x73c   :  { %v15380_v41 = vpop.f32.mrb[64].mxu0  ;;  %v7701_v33 = vmul.f32 %v15374_v47, %v7641_v27  ;;  %10834 = vpow2.f32 %v8290_v52  ;;  %vm7221_vm3 = vcmp.ge.f32.partialorder %v15271_v60, 0.0  ;;  %v7345_v0 = vmul.f32 0.3275911, %v15409_v14 }
 0x73d   :  { %v15387_v17 = vpop.f32.mrb[65].mxu0  ;;  %v8056_v30 = vmul.f32 %v15308_v39, %v7996_v56  ;;  %v7642_v5 = vadd.f32 -1.4531521, %v7582_v1  ;;  %v15422_v29 = vmul.f32 0.70710677, %v15400_v12  ;;  %v8527_v27 = vadd.f32 1.0, %v8467_v53 }
 0x73e   :  { %v15394_v31 = vpop.f32.mrb[66].mxu0  ;;  %v7761_v23 = vadd.f32 1.4214138, %v7701_v33  ;;  %10836 = vpow2.f32 %v8298_v19  ;;  %v8182_v13 = vmul.f32 %v8122_v57, %v15302_v38  ;;  %v7405_v32 = vadd.f32 1.0, %v7345_v0 }
 0x73f   :  { %17091 = vst [vmem:[#allocation12_spill] sm:$0xff] %v15394_v31  ;;  %v15402_v20 = vpop.f32.mrb[67].mxu0  ;;  %v10831_v59 = vpop.eup %10830  ;;  %v7992_v52 = vadd.f32 0.2548296, %v7932_v40  ;;  %vm7222_vm4 = vcmp.ge.f32.partialorder %v15284_v9, 0.0  ;;  %v7702_v39 = vmul.f32 %v15404_v7, %v7642_v5  ;;  %v7281_v53 = vsel %vm7221_vm3, 1.0, %v16870_v24 }
 0x740   :  { %17093 = vst [vmem:[#allocation37_spill] sm:$0xff] %v15402_v20  ;;  %v7821_v4 = vmul.f32 %v15374_v47, %v7761_v23  ;;  %v7877_v33 = vadd.f32 -0.28449672, %v7817_v28  ;;  %v8064_v38 = vsub.f32 0.0, %v15351_v54  ;;  %10838 = vrcp.f32 %v7405_v32 }
 0x741   :  { %v8356_v57 = vmul.f32 %v10831_v59, %v8056_v30  ;;  %v7762_v1 = vadd.f32 1.4214138, %v7702_v39  ;;  %v15439_v0 = vand.u32 2147483647, %v15422_v29  ;;  %v15444_v5 = vmul.f32 %v8527_v27, %v15152_v15 }
 0x742   :  { %v7881_v40 = vadd.f32 -0.28449672, %v7821_v4  ;;  %v15447_v28 = vsel %vm7222_vm4, 1.0, %v16870_v24  ;;  %v8300_v60 = vmul.f32 1.442695, %v8182_v13  ;;  %v15451_v32 = vadd.f32 %v17092_v63, %v15262_v55 }
 0x743   :  { %v15441_v9 = vpop.eup %10832  ;;  %17097 = vst [vmem:[#allocation4_spill] sm:$0xff] %v15444_v5  ;;  %v8052_v4 = vmul.f32 %v15267_v49, %v7992_v52  ;;  %v15458_v59 = vmul.f32 0.5, %v15333_v58  ;;  %v7937_v27 = vmul.f32 %v15325_v61, %v7877_v33  ;;  %v7822_v39 = vmul.f32 %v15404_v7, %v7762_v1 }
 0x744   :  { %v15425_v3 = vpop.f32.mrb[68].mxu0  ;;  %v7941_v30 = vmul.f32 %v15374_v47, %v7881_v40  ;;  %v7524_v15 = vmul.f32 1.0614054, %v15441_v9  ;;  %vm7164_vm5 = vcmp.ge.f32.partialorder %v15343_v45, 0.0  ;;  %v7349_v55 = vmul.f32 0.3275911, %v15439_v0 }
 0x745   :  { %17094 = vst [vmem:[#allocation35_spill] sm:$0xff] %v15425_v3  ;;  %v15430_v56 = vpop.f32.mrb[69].mxu0  ;;  %v8416_v13 = vsub.f32 1.0, %v8356_v57  ;;  %v8124_v49 = vmul.f32 %v8064_v38, %v15351_v54  ;;  %10840 = vpow2.f32 %v8300_v60  ;;  %v15467_v58 = vmul.f32 0.70710677, %v15451_v32 }
 0x746   :  { %17095 = vst [vmem:[#allocation33_spill] sm:$0xff] %v15430_v56  ;;  %v15436_v19 = vpop.f32.mrb[70].mxu0  ;;  %v8001_v5 = vadd.f32 0.2548296, %v7941_v30  ;;  %v7584_v63 = vadd.f32 -1.4531521, %v7524_v15  ;;  %v10835_v52 = vpop.eup %10834 }
 0x747   :  { %17096 = vst [vmem:[#allocation9_spill] sm:$0xff] %v15436_v19  ;;  %v15453_v23 = vpop.f32.mrb[71].mxu0  ;;  %v7409_v40 = vadd.f32 1.0, %v7349_v55  ;;  %v8352_v19 = vmul.f32 %v15389_v44, %v8052_v4  ;;  %v15479_v54 = vmul.f32 0.5, %v15355_v2  ;;  %v7997_v15 = vadd.f32 0.2548296, %v7937_v27 }
 0x748   :  { %17098 = vst [vmem:[#allocation29_spill] sm:$0xff] %v15453_v23  ;;  %v17099_v23 = vld [vmem:[#allocation23_spill] sm:$0xff]  ;;  %v8061_v57 = vmul.f32 %v15374_v47, %v8001_v5  ;;  %v7644_v30 = vmul.f32 %v15441_v9, %v7584_v63  ;;  %v10837_v60 = vpop.eup %10836  ;;  %v7882_v55 = vadd.f32 -0.28449672, %v7822_v39  ;;  %v8476_v47 = vmul.f32 %v8416_v13, %v15320_v48 }
 0x749   :  { %v15471_v33 = vadd.f32 %v17099_v23, %v15286_v16  ;;  %v15486_v16 = vsel %vm7164_vm5, 1.0, %v16870_v24  ;;  %10842 = vrcp.f32 %v7409_v40  ;;  %v8184_v5 = vmul.f32 1.442695, %v8124_v49 }
 0x74a   :  { %v8361_v44 = vmul.f32 %v10837_v60, %v8061_v57  ;;  %v7704_v63 = vadd.f32 1.4214138, %v7644_v30  ;;  %v15493_v4 = vpop.eup %10838  ;;  %vm7165_vm6 = vcmp.ge.f32.partialorder %v15378_v37, 0.0  ;;  %v8065_v27 = vsub.f32 0.0, %v15409_v14 }
 0x74b   :  { %v15498_v45 = vand.u32 2147483647, %v15467_v58  ;;  %v15501_v39 = vmul.f32 0.70710677, %v15471_v33  ;;  %v8412_v40 = vsub.f32 1.0, %v8352_v19  ;;  %v8057_v49 = vmul.f32 %v15325_v61, %v7997_v15 }
 0x74c   :  { %v15473_v1 = vpop.f32.mrb[72].mxu0  ;;  %v7764_v48 = vmul.f32 %v15441_v9, %v7704_v63  ;;  %v7525_v13 = vmul.f32 1.0614054, %v15493_v4  ;;  %v7942_v57 = vmul.f32 %v15404_v7, %v7882_v55  ;;  %10844 = vpow2.f32 %v8184_v5 }
 0x74d   :  { %17100 = vst [vmem:[#allocation19_spill] sm:$0xff] %v15473_v1  ;;  %v15481_v38 = vpop.f32.mrb[73].mxu0  ;;  %v7350_v30 = vmul.f32 0.3275911, %v15498_v45  ;;  %v15509_v60 = vand.u32 2147483647, %v15501_v39  ;;  %v8125_v19 = vmul.f32 %v8065_v27, %v15409_v14  ;;  %v8472_v31 = vmul.f32 %v8412_v40, %v15298_v42 }
 0x74e   :  { %17101 = vst [vmem:[#allocation20_spill] sm:$0xff] %v15481_v38  ;;  %v15488_v1 = vpop.f32.mrb[74].mxu0  ;;  %v7824_v56 = vadd.f32 -0.28449672, %v7764_v48  ;;  %v7585_v3 = vadd.f32 -1.4531521, %v7525_v13  ;;  %v8357_v5 = vmul.f32 %v10835_v52, %v8057_v49  ;;  %v15534_v40 = vadd.f32 %v17099_v23, %v15292_v11 }
 0x74f   :  { %17102 = vst [vmem:[#allocation30_spill] sm:$0xff] %v15488_v1  ;;  %v15491_v2 = vpop.f32.mrb[75].mxu0  ;;  %v8421_v1 = vsub.f32 1.0, %v8361_v44  ;;  %v7410_v44 = vadd.f32 1.0, %v7350_v30  ;;  %v7354_v63 = vmul.f32 0.3275911, %v15509_v60  ;;  %v10841_v25 = vpop.eup %10840 }
 0x750   :  { %17103 = vst [vmem:[#allocation39_spill] sm:$0xff] %v15491_v2  ;;  %v8536_v2 = vadd.f32 1.0, %v8476_v47  ;;  %v7884_v61 = vmul.f32 %v15441_v9, %v7824_v56  ;;  %v7645_v15 = vmul.f32 %v15493_v4, %v7585_v3  ;;  %v8069_v55 = vsub.f32 0.0, %v15439_v0 }
 0x751   :  { %v8481_v38 = vmul.f32 %v8421_v1, %v7281_v53  ;;  %v8002_v47 = vadd.f32 0.2548296, %v7942_v57  ;;  %10846 = vrcp.f32 %v7410_v44  ;;  %v7414_v53 = vadd.f32 1.0, %v7354_v63 }
 0x752   :  { %v15520_v14 = vmul.f32 %v8536_v2, %v15278_v50  ;;  %v7705_v56 = vadd.f32 1.4214138, %v7645_v15  ;;  %v15530_v3 = vsel %vm7165_vm6, 1.0, %v16870_v24  ;;  %v8186_v42 = vmul.f32 1.442695, %v8125_v19  ;;  %v17106_v50 = vld [vmem:[#allocation45_spill] sm:$0xff] }
 0x753   :  { %v8541_v20 = vadd.f32 1.0, %v8481_v38  ;;  %v15525_v27 = vpop.eup %10842  ;;  %v15538_v2 = vadd.f32 %v17106_v50, %v15306_v26  ;;  %vm7169_vm7 = vcmp.ge.f32.partialorder %v15422_v29, 0.0  ;;  %v8129_v52 = vmul.f32 %v8069_v55, %v15439_v0 }
 0x754   :  { %v15517_v1 = vpop.f32.mrb[76].mxu0  ;;  %17104 = vst [vmem:[#allocation22_spill] sm:$0xff] %v15520_v14  ;;  %v8062_v37 = vmul.f32 %v15404_v7, %v8002_v47  ;;  %v15546_v48 = vmul.f32 0.5, %v15400_v12  ;;  %v7529_v11 = vmul.f32 1.0614054, %v15525_v27  ;;  %10848 = vrcp.f32 %v7414_v53 }
 0x755   :  { %v15523_v38 = vmul.f32 %v8541_v20, %v15392_v10  ;;  %v7944_v10 = vadd.f32 0.2548296, %v7884_v61  ;;  %v15549_v13 = vpop.f32.mrb[77].mxu0  ;;  %v8532_v26 = vadd.f32 1.0, %v8472_v31  ;;  %v8417_v49 = vsub.f32 1.0, %v8357_v5 }
 0x756   :  { %v7765_v57 = vmul.f32 %v15493_v4, %v7705_v56  ;;  %v15553_v30 = vmul.f32 0.70710677, %v15534_v40  ;;  %10850 = vpow2.f32 %v8186_v42  ;;  %v15556_v29 = vsel %vm7169_vm7, 1.0, %v16870_v24  ;;  %v10845_v63 = vpop.eup %10844 }
 0x757   :  { %17105 = vst [vmem:[#allocation38_spill] sm:$0xff] %v15523_v38  ;;  %v7589_v7 = vadd.f32 -1.4531521, %v7529_v11  ;;  %v15559_v12 = vmul.f32 0.70710677, %v15538_v2  ;;  %v8004_v0 = vmul.f32 %v15441_v9, %v7944_v10  ;;  %v15563_v44 = vmul.f32 0.5, %v15451_v32 }
 0x758   :  { %v8194_v19 = vmul.f32 1.442695, %v8129_v52  ;;  %v15566_v31 = vand.u32 2147483647, %v15553_v30  ;;  %v8362_v61 = vmul.f32 %v10841_v25, %v8062_v37  ;;  %v8070_v55 = vsub.f32 0.0, %v15498_v45  ;;  %v15584_v11 = vpop.f32.mrb[78].mxu0 }
 0x759   :  { %v7649_v15 = vmul.f32 %v15525_v27, %v7589_v7  ;;  %v15571_v47 = vand.u32 2147483647, %v15559_v12  ;;  %v8477_v53 = vmul.f32 %v8417_v49, %v15366_v35  ;;  %v7825_v5 = vadd.f32 -0.28449672, %v7765_v57 }
 0x75a   :  { %v8074_v9 = vsub.f32 0.0, %v15509_v60  ;;  %v7355_v32 = vmul.f32 0.3275911, %v15566_v31  ;;  %vm7170_vm8 = vcmp.ge.f32.partialorder %v15467_v58, 0.0  ;;  %v15580_v25 = vmul.f32 0.5, %v15471_v33 }
 0x75b   :  { %v15576_v56 = vpop.eup %10846  ;;  %v7709_v42 = vadd.f32 1.4214138, %v7649_v15  ;;  %v7359_v10 = vmul.f32 0.3275911, %v15571_v47  ;;  %v8304_v52 = vmul.f32 %v10845_v63, %v8004_v0  ;;  %10852 = vpow2.f32 %v8194_v19 }
 0x75c   :  { %v7530_v37 = vmul.f32 1.0614054, %v15576_v56  ;;  %v7415_v35 = vadd.f32 1.0, %v7355_v32  ;;  %v8422_v49 = vsub.f32 1.0, %v8362_v61  ;;  %v8130_v7 = vmul.f32 %v8070_v55, %v15498_v45 }
 0x75d   :  { %v7769_v57 = vmul.f32 %v15525_v27, %v7709_v42  ;;  %v7419_v15 = vadd.f32 1.0, %v7359_v10  ;;  %v7885_v20 = vmul.f32 %v15493_v4, %v7825_v5  ;;  %v8134_v33 = vmul.f32 %v8074_v9, %v15509_v60 }
 0x75e   :  { %v7590_v14 = vadd.f32 -1.4531521, %v7530_v37  ;;  %10854 = vrcp.f32 %v7415_v35  ;;  %v15590_v38 = vpop.eup %10848  ;;  %v8537_v0 = vadd.f32 1.0, %v8477_v53  ;;  %v15595_v63 = vsel %vm7170_vm8, 1.0, %v16870_v24 }
 0x75f   :  { %v7829_v19 = vadd.f32 -0.28449672, %v7769_v57  ;;  %10856 = vrcp.f32 %v7419_v15  ;;  %v8364_v61 = vsub.f32 1.0, %v8304_v52  ;;  %v7534_v55 = vmul.f32 1.0614054, %v15590_v38 }
 0x760   :  { %v7650_v45 = vmul.f32 %v15576_v56, %v7590_v14  ;;  %v15601_v5 = vadd.f32 %v17106_v50, %v15314_v62  ;;  %v10851_v60 = vpop.eup %10850  ;;  %v8196_v53 = vmul.f32 1.442695, %v8130_v7  ;;  %vm7174_vm10 = vcmp.ge.f32.partialorder %v15501_v39, 0.0 }
 0x761   :  { %v7889_v9 = vmul.f32 %v15525_v27, %v7829_v19  ;;  %v15607_v58 = vadd.f32 %v14745_v34, %v15335_v8  ;;  %v8482_v32 = vmul.f32 %v8422_v49, %v15447_v28  ;;  %v7945_v42 = vadd.f32 0.2548296, %v7885_v20  ;;  %v15624_v20 = vpop.f32.mrb[79].mxu0 }
 0x762   :  { %v7594_v14 = vadd.f32 -1.4531521, %v7534_v55  ;;  %v8204_v10 = vmul.f32 1.442695, %v8134_v33  ;;  %v15611_v52 = vmul.f32 %v8532_v26, %v15265_v6  ;;  %v7710_v37 = vadd.f32 1.4214138, %v7650_v45 }
 0x763   :  { %v7949_v62 = vadd.f32 0.2548296, %v7889_v9  ;;  %v15614_v35 = vmul.f32 0.70710677, %v15601_v5  ;;  %v15617_v57 = vmul.f32 %v8537_v0, %v15328_v43  ;;  %v8424_v7 = vmul.f32 %v8364_v61, %v15486_v16 }
 0x764   :  { %17107 = vst [vmem:[#allocation10_spill] sm:$0xff] %v15611_v52  ;;  %v7654_v8 = vmul.f32 %v15590_v38, %v7594_v14  ;;  %v15622_v28 = vmul.f32 0.70710677, %v15607_v58  ;;  %v15630_v26 = vsel %vm7174_vm10, 1.0, %v16870_v24  ;;  %v8079_v49 = vsub.f32 0.0, %v15571_v47 }
 0x765   :  { %17108 = vst [vmem:[#allocation43_spill] sm:$0xff] %v15617_v57  ;;  %v8009_v6 = vmul.f32 %v15525_v27, %v7949_v62  ;;  %v15634_v43 = vand.u32 2147483647, %v15614_v35  ;;  %v10853_v16 = vpop.eup %10852  ;;  %v8542_v15 = vadd.f32 1.0, %v8482_v32  ;;  %v8005_v33 = vmul.f32 %v15493_v4, %v7945_v42 }
 0x766   :  { %10858 = vpow2.f32 %v8196_v53  ;;  %v7714_v0 = vadd.f32 1.4214138, %v7654_v8  ;;  %v7770_v61 = vmul.f32 %v15576_v56, %v7710_v37  ;;  %v8484_v45 = vadd.f32 1.0, %v8424_v7 }
 0x767   :  { %v8309_v19 = vmul.f32 %v10853_v16, %v8009_v6  ;;  %10860 = vpow2.f32 %v8204_v10  ;;  %v7360_v27 = vmul.f32 0.3275911, %v15634_v43  ;;  %v8075_v9 = vsub.f32 0.0, %v15566_v31 }
 0x768   :  { %v15639_v39 = vpop.eup %10854  ;;  %v7774_v55 = vmul.f32 %v15590_v38, %v7714_v0  ;;  %v15644_v14 = vand.u32 2147483647, %v15622_v28  ;;  %vm7175_vm11 = vcmp.ge.f32.partialorder %v15553_v30, 0.0  ;;  %v8139_v42 = vmul.f32 %v8079_v49, %v15571_v47 }
 0x769   :  { %v15646_v32 = vpop.eup %10856  ;;  %v8369_v4 = vsub.f32 1.0, %v8309_v19  ;;  %v7535_v53 = vmul.f32 1.0614054, %v15639_v39  ;;  %v7420_v10 = vadd.f32 1.0, %v7360_v27  ;;  %v8305_v62 = vmul.f32 %v10851_v60, %v8005_v33  ;;  %v15660_v60 = vpop.f32.mrb[80].mxu0 }
 0x76a   :  { %v7834_v37 = vadd.f32 -0.28449672, %v7774_v55  ;;  %v7539_v7 = vmul.f32 1.0614054, %v15646_v32  ;;  %v15654_v8 = vadd.f32 %v14745_v34, %v15338_v46  ;;  %v7830_v16 = vadd.f32 -0.28449672, %v7770_v61 }
 0x76b   :  { %v8429_v6 = vmul.f32 %v8369_v4, %v15556_v29  ;;  %v7595_v0 = vadd.f32 -1.4531521, %v7535_v53  ;;  %10862 = vrcp.f32 %v7420_v10  ;;  %vm7179_vm13 = vcmp.ge.f32.partialorder %v15559_v12, 0.0 }
 0x76c   :  { %v7894_v19 = vmul.f32 %v15590_v38, %v7834_v37  ;;  %v7599_v57 = vadd.f32 -1.4531521, %v7539_v7  ;;  %v7364_v47 = vmul.f32 0.3275911, %v15644_v14  ;;  %v8135_v46 = vmul.f32 %v8075_v9, %v15566_v31 }
 0x76d   :  { %v8489_v49 = vadd.f32 1.0, %v8429_v6  ;;  %v7655_v33 = vmul.f32 %v15639_v39, %v7595_v0  ;;  %v8214_v27 = vmul.f32 1.442695, %v8139_v42  ;;  %v8365_v55 = vsub.f32 1.0, %v8305_v62 }
 0x76e   :  { %v7954_v29 = vadd.f32 0.2548296, %v7894_v19  ;;  %v7659_v61 = vmul.f32 %v15646_v32, %v7599_v57  ;;  %v7424_v4 = vadd.f32 1.0, %v7364_v47  ;;  %v15666_v53 = vmul.f32 %v8484_v45, %v15458_v59  ;;  %v15682_v45 = vpop.f32.mrb[81].mxu0 }
 0x76f   :  { %v15669_v10 = vmul.f32 %v8489_v49, %v15546_v48  ;;  %v7715_v37 = vadd.f32 1.4214138, %v7655_v33  ;;  %v15672_v7 = vmul.f32 0.70710677, %v15654_v8  ;;  %v7890_v0 = vmul.f32 %v15576_v56, %v7830_v16 }
 0x770   :  { %v10859_v6 = vpop.eup %10858  ;;  %v8014_v31 = vmul.f32 %v15590_v38, %v7954_v29  ;;  %v7719_v9 = vadd.f32 1.4214138, %v7659_v61  ;;  %10864 = vrcp.f32 %v7424_v4  ;;  %v8206_v59 = vmul.f32 1.442695, %v8135_v46  ;;  %v15716_v29 = vpop.f32.mrb[82].mxu0 }
 0x771   :  { %v10861_v42 = vpop.eup %10860  ;;  %10866 = vpow2.f32 %v8214_v27  ;;  %v15680_v48 = vadd.f32 %v14850_v36, %v15345_v21  ;;  %v15685_v62 = vmul.f32 %v8542_v15, %v15414_v22  ;;  %v8425_v16 = vmul.f32 %v8365_v55, %v15530_v3  ;;  %17110 = vst [vmem:[#allocation41_spill] sm:$0xff] %v15716_v29 }
 0x772   :  { %v15689_v38 = vmul.f32 0.5, %v15534_v40  ;;  %v7779_v19 = vmul.f32 %v15646_v32, %v7719_v9  ;;  %v8314_v47 = vmul.f32 %v10861_v42, %v8014_v31  ;;  %v7775_v49 = vmul.f32 %v15639_v39, %v7715_v37 }
 0x773   :  { %17109 = vst [vmem:[#allocation42_spill] sm:$0xff] %v15685_v62  ;;  %v15694_v33 = vmul.f32 0.5, %v15538_v2  ;;  %v15697_v21 = vand.u32 2147483647, %v15672_v7  ;;  %v7950_v46 = vadd.f32 0.2548296, %v7890_v0  ;;  %10868 = vpow2.f32 %v8206_v59 }
 0x774   :  { %v15702_v22 = vsel %vm7175_vm11, 1.0, %v16870_v24  ;;  %v7239_v3 = vsel %vm7179_vm13, 1.0, %v16870_v24  ;;  %v7839_v40 = vadd.f32 -0.28449672, %v7779_v19  ;;  %v15710_v2 = vmul.f32 0.5, %v15601_v5 }
 0x775   :  { %v15707_v15 = vpop.eup %10862  ;;  %v7365_v27 = vmul.f32 0.3275911, %v15697_v21  ;;  %v15714_v55 = vmul.f32 0.70710677, %v15680_v48  ;;  %v8485_v30 = vadd.f32 1.0, %v8425_v16  ;;  %v15721_v4 = vmul.f32 0.5, %v15607_v58 }
 0x776   :  { %v7899_v61 = vmul.f32 %v15646_v32, %v7839_v40  ;;  %v7540_v12 = vmul.f32 1.0614054, %v15707_v15  ;;  %v8374_v37 = vsub.f32 1.0, %v8314_v47  ;;  %v7835_v0 = vadd.f32 -0.28449672, %v7775_v49 }
 0x777   :  { %v8080_v5 = vsub.f32 0.0, %v15634_v43  ;;  %v7425_v31 = vadd.f32 1.0, %v7365_v27  ;;  %v8010_v9 = vmul.f32 %v15576_v56, %v7950_v46  ;;  %v15727_v19 = vadd.f32 %v14850_v36, %v15347_v18 }
 0x778   :  { %v7959_v42 = vadd.f32 0.2548296, %v7899_v61  ;;  %v7600_v59 = vadd.f32 -1.4531521, %v7540_v12  ;;  %vm7180_vm14 = vcmp.ge.f32.partialorder %v15614_v35, 0.0  ;;  %v15731_v16 = vmul.f32 0.5, %v15654_v8 }
 0x779   :  { %10870 = vrcp.f32 %v7425_v31  ;;  %v15734_v58 = vand.u32 2147483647, %v15714_v55  ;;  %vm7184_vm15 = vcmp.ge.f32.partialorder %v15622_v28, 0.0  ;;  %v8084_v18 = vsub.f32 0.0, %v15644_v14 }
 0x77a   :  { %v15736_v47 = vpop.eup %10864  ;;  %v8019_v49 = vmul.f32 %v15646_v32, %v7959_v42  ;;  %v7660_v56 = vmul.f32 %v15707_v15, %v7600_v59  ;;  %v8434_v40 = vmul.f32 %v8374_v37, %v15630_v26  ;;  %v7895_v8 = vmul.f32 %v15639_v39, %v7835_v0  ;;  %v15763_v0 = vpop.f32.mrb[83].mxu0 }
 0x77b   :  { %v10867_v46 = vpop.eup %10866  ;;  %v7544_v27 = vmul.f32 1.0614054, %v15736_v47  ;;  %v7369_v61 = vmul.f32 0.3275911, %v15734_v58  ;;  %v8310_v12 = vmul.f32 %v10859_v6, %v8010_v9  ;;  %v8140_v57 = vmul.f32 %v8080_v5, %v15634_v43  ;;  %17111 = vst [vmem:[#allocation46_spill] sm:$0xff] %v15763_v0 }
 0x77c   :  { %v8319_v31 = vmul.f32 %v10867_v46, %v8019_v49  ;;  %v15748_v32 = vmul.f32 0.70710677, %v15727_v19  ;;  %v7720_v42 = vadd.f32 1.4214138, %v7660_v56  ;;  %v15752_v52 = vadd.f32 %v14892_v51, %v15380_v41 }
 0x77d   :  { %v7604_v59 = vadd.f32 -1.4531521, %v7544_v27  ;;  %v7429_v62 = vadd.f32 1.0, %v7369_v61  ;;  %v15755_v26 = vmul.f32 %v8485_v30, %v15479_v54  ;;  %v15760_v6 = vsel %vm7180_vm14, 1.0, %v16870_v24  ;;  %v10869_v5 = vpop.eup %10868 }
 0x77e   :  { %v8379_v37 = vsub.f32 1.0, %v8319_v31  ;;  %v8144_v43 = vmul.f32 %v8084_v18, %v15644_v14  ;;  %v8494_v9 = vadd.f32 1.0, %v8434_v40  ;;  %v7955_v49 = vadd.f32 0.2548296, %v7895_v8 }
 0x77f   :  { %v7664_v56 = vmul.f32 %v15736_v47, %v7604_v59  ;;  %10872 = vrcp.f32 %v7429_v62  ;;  %v8216_v46 = vmul.f32 1.442695, %v8140_v57  ;;  %v15769_v54 = vsel %vm7184_vm15, 1.0, %v16870_v24 }
 0x780   :  { %v8439_v41 = vmul.f32 %v8379_v37, %v7239_v3  ;;  %v15772_v35 = vand.u32 2147483647, %v15748_v32  ;;  %v8370_v30 = vsub.f32 1.0, %v8310_v12  ;;  %v7780_v14 = vmul.f32 %v15707_v15, %v7720_v42 }
 0x781   :  { %v7724_v18 = vadd.f32 1.4214138, %v7664_v56  ;;  %v15776_v40 = vmul.f32 0.70710677, %v15752_v52  ;;  %v8224_v27 = vmul.f32 1.442695, %v8144_v43  ;;  %v15783_v28 = vmul.f32 %v8494_v9, %v15580_v25 }
 0x782   :  { %v8499_v8 = vadd.f32 1.0, %v8439_v41  ;;  %v8085_v62 = vsub.f32 0.0, %v15697_v21  ;;  %v7370_v57 = vmul.f32 0.3275911, %v15772_v35  ;;  %v8015_v61 = vmul.f32 %v15639_v39, %v7955_v49 }
 0x783   :  { %v15780_v3 = vpop.eup %10870  ;;  %17112 = vst [vmem:[#allocation24_spill] sm:$0xff] %v15783_v28  ;;  %v7784_v12 = vmul.f32 %v15736_v47, %v7724_v18  ;;  %vm7185_vm0 = vcmp.ge.f32.partialorder %v15672_v7, 0.0  ;;  %v8089_v59 = vsub.f32 0.0, %v15734_v58  ;;  %v8430_v43 = vmul.f32 %v8370_v30, %v15595_v63 }
 0x784   :  { %v15789_v31 = vmul.f32 %v8499_v8, %v15694_v33  ;;  %v7545_v42 = vmul.f32 1.0614054, %v15780_v3  ;;  %v7430_v37 = vadd.f32 1.0, %v7370_v57  ;;  %v7840_v56 = vadd.f32 -0.28449672, %v7780_v14 }
 0x785   :  { %v7844_v41 = vadd.f32 -0.28449672, %v7784_v12  ;;  %v15795_v25 = vand.u32 2147483647, %v15776_v40  ;;  %v8145_v7 = vmul.f32 %v8085_v62, %v15697_v21  ;;  %v15802_v49 = vsel %vm7185_vm0, 1.0, %v16870_v24  ;;  %v15815_v12 = vpop.f32.mrb[84].mxu0 }
 0x786   :  { %17113 = vst [vmem:[#allocation17_spill] sm:$0xff] %v15789_v31  ;;  %v7605_v9 = vadd.f32 -1.4531521, %v7545_v42  ;;  %10874 = vrcp.f32 %v7430_v37  ;;  %v8315_v30 = vmul.f32 %v10869_v5, %v8015_v61  ;;  %v8149_v18 = vmul.f32 %v8089_v59, %v15734_v58  ;;  %17114 = vst [vmem:[#allocation23_spill] sm:$0xff] %v15815_v12  ;;  %v17115_v59 = vld [vmem:[#allocation12_spill] sm:$0xff]  ;;  %v17116_v37 = vld [vmem:[#allocation15_spill] sm:$0xff] }
 0x787   :  { %v7904_v33 = vmul.f32 %v15736_v47, %v7844_v41  ;;  %10876 = vpow2.f32 %v8224_v27  ;;  %v7374_v63 = vmul.f32 0.3275911, %v15795_v25  ;;  %v15809_v8 = vadd.f32 %v14892_v51, %v15387_v17 }
 0x788   :  { %v7665_v14 = vmul.f32 %v15780_v3, %v7605_v9  ;;  %v8490_v21 = vadd.f32 1.0, %v8430_v43  ;;  %v7900_v62 = vmul.f32 %v15707_v15, %v7840_v56  ;;  %vm7189_vm1 = vcmp.ge.f32.partialorder %v15714_v55, 0.0  ;;  %v15825_v56 = vpop.f32.mrb[85].mxu0 }
 0x789   :  { %v15811_v57 = vpop.eup %10872  ;;  %v7434_v27 = vadd.f32 1.0, %v7374_v63  ;;  %10878 = vpow2.f32 %v8216_v46  ;;  %v8226_v61 = vmul.f32 1.442695, %v8145_v7  ;;  %v7964_v58 = vadd.f32 0.2548296, %v7904_v33  ;;  %17117 = vst [vmem:[#allocation45_spill] sm:$0xff] %v15825_v56 }
 0x78a   :  { %v7725_v5 = vadd.f32 1.4214138, %v7665_v14  ;;  %v7549_v42 = vmul.f32 1.0614054, %v15811_v57  ;;  %v15819_v17 = vmul.f32 0.70710677, %v15809_v8  ;;  %v15823_v43 = vadd.f32 %v17116_v37, %v17115_v59 }
 0x78b   :  { %10880 = vrcp.f32 %v7434_v27  ;;  %v8375_v41 = vsub.f32 1.0, %v8315_v30  ;;  %v15828_v9 = vmul.f32 0.5, %v15680_v48  ;;  %v8234_v63 = vmul.f32 1.442695, %v8149_v18 }
 0x78c   :  { %v7609_v46 = vadd.f32 -1.4531521, %v7549_v42  ;;  %v15831_v7 = vmul.f32 %v8490_v21, %v15563_v44  ;;  %v7960_v33 = vadd.f32 0.2548296, %v7900_v62  ;;  %v7785_v14 = vmul.f32 %v15780_v3, %v7725_v5 }
 0x78d   :  { %v15835_v27 = vand.u32 2147483647, %v15819_v17  ;;  %10882 = vpow2.f32 %v8226_v61  ;;  %v15840_v59 = vsel %vm7189_vm1, 1.0, %v16870_v24  ;;  %v8090_v30 = vsub.f32 0.0, %v15772_v35 }
 0x78e   :  { %v7669_v48 = vmul.f32 %v15811_v57, %v7609_v46  ;;  %v8024_v18 = vmul.f32 %v15736_v47, %v7964_v58  ;;  %vm7190_vm2 = vcmp.ge.f32.partialorder %v15748_v32, 0.0  ;;  %v15848_v21 = vmul.f32 0.70710677, %v15823_v43 }
 0x78f   :  { %v7375_v44 = vmul.f32 0.3275911, %v15835_v27  ;;  %v8435_v5 = vmul.f32 %v8375_v41, %v15702_v22  ;;  %10884 = vpow2.f32 %v8234_v63  ;;  %v15854_v61 = vmul.f32 0.5, %v15727_v19  ;;  %v17118_v63 = vld [vmem:[#allocation37_spill] sm:$0xff] }
 0x790   :  { %v15850_v62 = vpop.eup %10874  ;;  %v7729_v55 = vadd.f32 1.4214138, %v7669_v48  ;;  %v8020_v46 = vmul.f32 %v15707_v15, %v7960_v33  ;;  %v7845_v47 = vadd.f32 -0.28449672, %v7785_v14  ;;  %v15860_v56 = vsel %vm7190_vm2, 1.0, %v16870_v24  ;;  %v15870_v33 = vpop.f32.mrb[86].mxu0 }
 0x791   :  { %v10877_v42 = vpop.eup %10876  ;;  %v7550_v32 = vmul.f32 1.0614054, %v15850_v62  ;;  %v7435_v58 = vadd.f32 1.0, %v7375_v44  ;;  %v8150_v28 = vmul.f32 %v8090_v30, %v15772_v35  ;;  %v15864_v22 = vand.u32 2147483647, %v15848_v21  ;;  %17119 = vst [vmem:[#allocation12_spill] sm:$0xff] %v15870_v33 }
 0x792   :  { %v7789_v39 = vmul.f32 %v15811_v57, %v7729_v55  ;;  %v8324_v41 = vmul.f32 %v10877_v42, %v8024_v18  ;;  %v15868_v15 = vadd.f32 %v17116_v37, %v17118_v63  ;;  %v8495_v48 = vadd.f32 1.0, %v8435_v5 }
 0x793   :  { %v7610_v19 = vadd.f32 -1.4531521, %v7550_v32  ;;  %10886 = vrcp.f32 %v7435_v58  ;;  %v10879_v14 = vpop.eup %10878  ;;  %v8094_v55 = vsub.f32 0.0, %v15795_v25  ;;  %v7379_v31 = vmul.f32 0.3275911, %v15864_v22 }
 0x794   :  { %v7849_v44 = vadd.f32 -0.28449672, %v7789_v39  ;;  %v8320_v30 = vmul.f32 %v10879_v14, %v8020_v46  ;;  %v7905_v18 = vmul.f32 %v15780_v3, %v7845_v47  ;;  %v15879_v32 = vmul.f32 0.5, %v15752_v52 }
 0x795   :  { %v15874_v35 = vpop.eup %10880  ;;  %v7670_v42 = vmul.f32 %v15850_v62, %v7610_v19  ;;  %v8236_v63 = vmul.f32 1.442695, %v8150_v28  ;;  %v7439_v39 = vadd.f32 1.0, %v7379_v31  ;;  %v8384_v33 = vsub.f32 1.0, %v8324_v41 }
 0x796   :  { %v7909_v58 = vmul.f32 %v15811_v57, %v7849_v44  ;;  %v7554_v5 = vmul.f32 1.0614054, %v15874_v35  ;;  %vm7194_vm3 = vcmp.ge.f32.partialorder %v15776_v40, 0.0  ;;  %v15885_v36 = vmul.f32 0.70710677, %v15868_v15 }
 0x797   :  { %v7730_v12 = vadd.f32 1.4214138, %v7670_v42  ;;  %v10883_v46 = vpop.eup %10882  ;;  %v8154_v19 = vmul.f32 %v8094_v55, %v15795_v25  ;;  %10888 = vrcp.f32 %v7439_v39  ;;  %v15889_v52 = vmul.f32 %v8495_v48, %v15689_v38  ;;  %v17123_v39 = vld [vmem:[#allocation3_spill] sm:$0xff] }
 0x798   :  { %v7969_v47 = vadd.f32 0.2548296, %v7909_v58  ;;  %v7614_v14 = vadd.f32 -1.4531521, %v7554_v5  ;;  %v8380_v28 = vsub.f32 1.0, %v8320_v30  ;;  %10890 = vpow2.f32 %v8236_v63  ;;  %v15905_v30 = vpop.f32.mrb[87].mxu0 }
 0x799   :  { %17120 = vst [vmem:[#allocation15_spill] sm:$0xff] %v15889_v52  ;;  %v7965_v44 = vadd.f32 0.2548296, %v7905_v18  ;;  %v15892_v31 = vand.u32 2147483647, %v15885_v36  ;;  %v10885_v41 = vpop.eup %10884  ;;  %v15896_v42 = vsel %vm7194_vm3, 1.0, %v16870_v24  ;;  %v8444_v25 = vmul.f32 %v8384_v33, %v15769_v54 }
 0x79a   :  { %v8029_v40 = vmul.f32 %v15811_v57, %v7969_v47  ;;  %v7674_v58 = vmul.f32 %v15874_v35, %v7614_v14  ;;  %v7790_v55 = vmul.f32 %v15850_v62, %v7730_v12  ;;  %v15902_v38 = vmul.f32 0.5, %v15809_v8  ;;  %17121 = vst [vmem:[#allocation37_spill] sm:$0xff] %v15905_v30  ;;  %v17122_v63 = vld [vmem:[#allocation35_spill] sm:$0xff] }
 0x79b   :  { %v7380_v48 = vmul.f32 0.3275911, %v15892_v31  ;;  %v8244_v57 = vmul.f32 1.442695, %v8154_v19  ;;  %v15909_v47 = vadd.f32 %v17123_v39, %v17122_v63  ;;  %v8440_v54 = vmul.f32 %v8380_v28, %v15760_v6  ;;  %v17124_v63 = vld [vmem:[#allocation33_spill] sm:$0xff] }
 0x79c   :  { %v8329_v18 = vmul.f32 %v10885_v41, %v8029_v40  ;;  %v7734_v5 = vadd.f32 1.4214138, %v7674_v58  ;;  %v8025_v12 = vmul.f32 %v15780_v3, %v7965_v44  ;;  %v8095_v8 = vsub.f32 0.0, %v15835_v27 }
 0x79d   :  { %v15911_v52 = vpop.eup %10886  ;;  %v7440_v33 = vadd.f32 1.0, %v7380_v48  ;;  %v8099_v19 = vsub.f32 0.0, %v15864_v22  ;;  %v8504_v40 = vadd.f32 1.0, %v8444_v25  ;;  %v7850_v58 = vadd.f32 -0.28449672, %v7790_v55 }
 0x79e   :  { %v8389_v14 = vsub.f32 1.0, %v8329_v18  ;;  %v7794_v0 = vmul.f32 %v15874_v35, %v7734_v5  ;;  %v7555_v41 = vmul.f32 1.0614054, %v15911_v52  ;;  %v15921_v30 = vadd.f32 %v17123_v39, %v17124_v63 }
 0x79f   :  { %10892 = vrcp.f32 %v7440_v33  ;;  %v15925_v44 = vmul.f32 0.70710677, %v15909_v47  ;;  %v8325_v48 = vmul.f32 %v10883_v46, %v8025_v12  ;;  %vm7195_vm4 = vcmp.ge.f32.partialorder %v15819_v17, 0.0  ;;  %v17127_v17 = vld [vmem:[#allocation9_spill] sm:$0xff] }
 0x7a0   :  { %v8449_v6 = vmul.f32 %v8389_v14, %v15840_v59  ;;  %v7854_v3 = vadd.f32 -0.28449672, %v7794_v0  ;;  %v7615_v28 = vadd.f32 -1.4531521, %v7555_v41  ;;  %10894 = vpow2.f32 %v8244_v57 }
 0x7a1   :  { %v8155_v18 = vmul.f32 %v8095_v8, %v15835_v27  ;;  %v15929_v25 = vpop.eup %10888  ;;  %v8159_v59 = vmul.f32 %v8099_v19, %v15864_v22  ;;  %v15935_v0 = vmul.f32 %v8504_v40, %v15721_v4  ;;  %v7910_v14 = vmul.f32 %v15850_v62, %v7850_v58 }
 0x7a2   :  { %v8509_v55 = vadd.f32 1.0, %v8449_v6  ;;  %v7914_v5 = vmul.f32 %v15874_v35, %v7854_v3  ;;  %v7675_v33 = vmul.f32 %v15911_v52, %v7615_v28  ;;  %v7559_v46 = vmul.f32 1.0614054, %v15929_v25  ;;  %v10891_v12 = vpop.eup %10890 }
 0x7a3   :  { %17125 = vst [vmem:[#allocation35_spill] sm:$0xff] %v15935_v0  ;;  %v7324_v57 = vand.u32 2147483647, %v15925_v44  ;;  %v15944_v63 = vmul.f32 0.70710677, %v15921_v30  ;;  %v8385_v6 = vsub.f32 1.0, %v8325_v48 }
 0x7a4   :  { %v15941_v27 = vmul.f32 %v8509_v55, %v15828_v9  ;;  %v7974_v8 = vadd.f32 0.2548296, %v7914_v5  ;;  %v7735_v41 = vadd.f32 1.4214138, %v7675_v33  ;;  %v15947_v22 = vmul.f32 0.5, %v15823_v43  ;;  %v17128_v0 = vld [vmem:[#allocation21_spill] sm:$0xff] }
 0x7a5   :  { %v7619_v4 = vadd.f32 -1.4531521, %v7559_v46  ;;  %v7384_v19 = vmul.f32 0.3275911, %v7324_v57  ;;  %v8500_v40 = vadd.f32 1.0, %v8440_v54  ;;  %v15955_v9 = vsel %vm7195_vm4, 1.0, %v16870_v24 }
 0x7a6   :  { %17126 = vst [vmem:[#allocation33_spill] sm:$0xff] %v15941_v27  ;;  %v7795_v3 = vmul.f32 %v15911_v52, %v7735_v41  ;;  %v8254_v28 = vmul.f32 1.442695, %v8159_v59  ;;  %v8100_v48 = vsub.f32 0.0, %v15892_v31  ;;  %v7970_v5 = vadd.f32 0.2548296, %v7910_v14 }
 0x7a7   :  { %v7679_v55 = vmul.f32 %v15929_v25, %v7619_v4  ;;  %v7444_v43 = vadd.f32 1.0, %v7384_v19  ;;  %v8034_v33 = vmul.f32 %v15874_v35, %v7974_v8  ;;  %v8246_v54 = vmul.f32 1.442695, %v8155_v18 }
 0x7a8   :  { %v15961_v46 = vand.u32 2147483647, %v15944_v63  ;;  %v8445_v59 = vmul.f32 %v8385_v6, %v15802_v49  ;;  %v15968_v27 = vadd.f32 %v17128_v0, %v17127_v17  ;;  %v7855_v4 = vadd.f32 -0.28449672, %v7795_v3 }
 0x7a9   :  { %v15963_v58 = vpop.eup %10892  ;;  %v7739_v41 = vadd.f32 1.4214138, %v7679_v55  ;;  %10896 = vrcp.f32 %v7444_v43  ;;  %v15973_v8 = vmul.f32 %v8500_v40, %v15710_v2  ;;  %vm7199_vm5 = vcmp.ge.f32.partialorder %v15848_v21, 0.0 }
 0x7aa   :  { %10898 = vpow2.f32 %v8254_v28  ;;  %v7560_v14 = vmul.f32 1.0614054, %v15963_v58  ;;  %v7385_v35 = vmul.f32 0.3275911, %v15961_v46  ;;  %v10895_v18 = vpop.eup %10894  ;;  %v8160_v6 = vmul.f32 %v8100_v48, %v15892_v31 }
 0x7ab   :  { %v7799_v49 = vmul.f32 %v15929_v25, %v7739_v41  ;;  %v8030_v19 = vmul.f32 %v15850_v62, %v7970_v5  ;;  %v8334_v55 = vmul.f32 %v10895_v18, %v8034_v33  ;;  %10900 = vpow2.f32 %v8246_v54 }
 0x7ac   :  { %v7620_v43 = vadd.f32 -1.4531521, %v7560_v14  ;;  %v7445_v3 = vadd.f32 1.0, %v7385_v35  ;;  %v8104_v17 = vsub.f32 0.0, %v7324_v57  ;;  %v15980_v39 = vmul.f32 0.70710677, %v15968_v27 }
 0x7ad   :  { %v7859_v28 = vadd.f32 -0.28449672, %v7799_v49  ;;  %v8505_v29 = vadd.f32 1.0, %v8445_v59  ;;  %v7915_v2 = vmul.f32 %v15911_v52, %v7855_v4  ;;  %vm7200_vm6 = vcmp.ge.f32.partialorder %v15885_v36, 0.0 }
 0x7ae   :  { %v7680_v40 = vmul.f32 %v15963_v58, %v7620_v43  ;;  %10902 = vrcp.f32 %v7445_v3  ;;  %v8256_v62 = vmul.f32 1.442695, %v8160_v6  ;;  %v15987_v31 = vand.u32 2147483647, %v15980_v39 }
 0x7af   :  { %v7919_v41 = vmul.f32 %v15929_v25, %v7859_v28  ;;  %v8330_v48 = vmul.f32 %v10891_v12, %v8030_v19  ;;  %v8394_v5 = vsub.f32 1.0, %v8334_v55  ;;  %v7259_v33 = vsel %vm7199_vm5, 1.0, %v16870_v24  ;;  %v17130_v12 = vld [vmem:[#allocation29_spill] sm:$0xff] }
 0x7b0   :  { %v7740_v54 = vadd.f32 1.4214138, %v7680_v40  ;;  %v15993_v4 = vmul.f32 0.5, %v15868_v15  ;;  %v8164_v14 = vmul.f32 %v8104_v17, %v7324_v57  ;;  %v7389_v35 = vmul.f32 0.3275911, %v15987_v31 }
 0x7b1   :  { %v7979_v59 = vadd.f32 0.2548296, %v7919_v41  ;;  %v15997_v36 = vmul.f32 %v8505_v29, %v15731_v16  ;;  %v7975_v18 = vadd.f32 0.2548296, %v7915_v2  ;;  %v16000_v49 = vsel %vm7200_vm6, 1.0, %v16870_v24  ;;  %v17131_v41 = vld [vmem:[#allocation19_spill] sm:$0xff] }
 0x7b2   :  { %v16004_v6 = vadd.f32 %v17128_v0, %v17130_v12  ;;  %10904 = vpow2.f32 %v8256_v62  ;;  %v16010_v15 = vmul.f32 0.5, %v15909_v47  ;;  %v7449_v57 = vadd.f32 1.0, %v7389_v35  ;;  %v17132_v62 = vld [vmem:[#allocation7_spill] sm:$0xff] }
 0x7b3   :  { %17129 = vst [vmem:[#allocation9_spill] sm:$0xff] %v15997_v36  ;;  %v16006_v21 = vpop.eup %10896  ;;  %v8039_v19 = vmul.f32 %v15929_v25, %v7979_v59  ;;  %v8390_v29 = vsub.f32 1.0, %v8330_v48  ;;  %v8454_v16 = vmul.f32 %v8394_v5, %v15896_v42  ;;  %v7800_v43 = vmul.f32 %v15963_v58, %v7740_v54 }
 0x7b4   :  { %v10899_v55 = vpop.eup %10898  ;;  %v7564_v3 = vmul.f32 1.0614054, %v16006_v21  ;;  %v8264_v17 = vmul.f32 1.442695, %v8164_v14  ;;  %10906 = vrcp.f32 %v7449_v57  ;;  %v16016_v2 = vmul.f32 0.70710677, %v16004_v6 }
 0x7b5   :  { %v8339_v28 = vmul.f32 %v10899_v55, %v8039_v19  ;;  %v8035_v25 = vmul.f32 %v15911_v52, %v7975_v18  ;;  %v8105_v47 = vsub.f32 0.0, %v15961_v46  ;;  %v16022_v48 = vadd.f32 %v17132_v62, %v17131_v41  ;;  %v10901_v42 = vpop.eup %10900 }
 0x7b6   :  { %v7624_v40 = vadd.f32 -1.4531521, %v7564_v3  ;;  %vm7204_vm7 = vcmp.ge.f32.partialorder %v15925_v44, 0.0  ;;  %v16026_v54 = vmul.f32 0.5, %v15921_v30  ;;  %v16029_v59 = vand.u32 2147483647, %v16016_v2 }
 0x7b7   :  { %v8399_v5 = vsub.f32 1.0, %v8339_v28  ;;  %v8450_v52 = vmul.f32 %v8390_v29, %v15860_v56  ;;  %v8514_v35 = vadd.f32 1.0, %v8454_v16  ;;  %v7860_v18 = vadd.f32 -0.28449672, %v7800_v43 }
 0x7b8   :  { %v16031_v14 = vpop.eup %10902  ;;  %v7684_v12 = vmul.f32 %v16006_v21, %v7624_v40  ;;  %10908 = vpow2.f32 %v8264_v17  ;;  %v7390_v55 = vmul.f32 0.3275911, %v16029_v59  ;;  %v8335_v3 = vmul.f32 %v10901_v42, %v8035_v25 }
 0x7b9   :  { %v8459_v19 = vmul.f32 %v8399_v5, %v7259_v33  ;;  %v7565_v57 = vmul.f32 1.0614054, %v16031_v14  ;;  %v8165_v28 = vmul.f32 %v8105_v47, %v15961_v46  ;;  %v16039_v41 = vmul.f32 0.70710677, %v16022_v48  ;;  %v17135_v47 = vld [vmem:[#allocation20_spill] sm:$0xff] }
 0x7ba   :  { %v7744_v30 = vadd.f32 1.4214138, %v7684_v12  ;;  %v8109_v56 = vsub.f32 0.0, %v15987_v31  ;;  %v7450_v29 = vadd.f32 1.0, %v7390_v55  ;;  %v16043_v16 = vmul.f32 %v8514_v35, %v15879_v32 }
 0x7bb   :  { %v8519_v36 = vadd.f32 1.0, %v8459_v19  ;;  %v7625_v0 = vadd.f32 -1.4531521, %v7565_v57  ;;  %v7920_v33 = vmul.f32 %v15963_v58, %v7860_v18  ;;  %v16048_v17 = vand.u32 2147483647, %v16039_v41 }
 0x7bc   :  { %17133 = vst [vmem:[#allocation29_spill] sm:$0xff] %v16043_v16  ;;  %v7804_v43 = vmul.f32 %v16006_v21, %v7744_v30  ;;  %v10905_v25 = vpop.eup %10904  ;;  %10910 = vrcp.f32 %v7450_v29  ;;  %v16056_v42 = vadd.f32 %v17132_v62, %v17135_v47  ;;  %v8510_v32 = vadd.f32 1.0, %v8450_v52  ;;  %v17137_v47 = vld [vmem:[#allocation5_spill] sm:$0xff] }
 0x7bd   :  { %v16051_v46 = vmul.f32 %v8519_v36, %v15947_v22  ;;  %v7685_v40 = vmul.f32 %v16031_v14, %v7625_v0  ;;  %vm7205_vm8 = vcmp.ge.f32.partialorder %v15944_v63, 0.0  ;;  %v7394_v35 = vmul.f32 0.3275911, %v16048_v17 }
 0x7be   :  { %v7864_v5 = vadd.f32 -0.28449672, %v7804_v43  ;;  %v16060_v18 = vpop.eup %10906  ;;  %v8395_v12 = vsub.f32 1.0, %v8335_v3  ;;  %v8169_v0 = vmul.f32 %v8109_v56, %v15987_v31  ;;  %v7980_v19 = vadd.f32 0.2548296, %v7920_v33  ;;  %v17136_v43 = vld [vmem:[#allocation30_spill] sm:$0xff] }
 0x7bf   :  { %17134 = vst [vmem:[#allocation19_spill] sm:$0xff] %v16051_v46  ;;  %v7745_v36 = vadd.f32 1.4214138, %v7685_v40  ;;  %v7569_v55 = vmul.f32 1.0614054, %v16060_v18  ;;  %v7454_v52 = vadd.f32 1.0, %v7394_v35  ;;  %v16077_v40 = vadd.f32 %v17137_v47, %v17136_v43 }
 0x7c0   :  { %v7924_v57 = vmul.f32 %v16006_v21, %v7864_v5  ;;  %v16070_v30 = vsel %vm7204_vm7, 1.0, %v16870_v24  ;;  %v8266_v29 = vmul.f32 1.442695, %v8165_v28  ;;  %v16073_v3 = vmul.f32 0.70710677, %v16056_v42 }
 0x7c1   :  { %vm7209_vm10 = vcmp.ge.f32.partialorder %v15980_v39, 0.0  ;;  %v7629_v56 = vadd.f32 -1.4531521, %v7569_v55  ;;  %10912 = vrcp.f32 %v7454_v52  ;;  %v8455_v5 = vmul.f32 %v8395_v12, %v15955_v9 }
 0x7c2   :  { %v7984_v31 = vadd.f32 0.2548296, %v7924_v57  ;;  %v10909_v33 = vpop.eup %10908  ;;  %v16084_v44 = vsel %vm7205_vm8, 1.0, %v16870_v24  ;;  %v7805_v28 = vmul.f32 %v16031_v14, %v7745_v36  ;;  %v8274_v35 = vmul.f32 1.442695, %v8169_v0 }
 0x7c3   :  { %v16088_v22 = vmul.f32 %v8510_v32, %v15854_v61  ;;  %v8040_v57 = vmul.f32 %v15963_v58, %v7980_v19  ;;  %v7689_v55 = vmul.f32 %v16060_v18, %v7629_v56  ;;  %v16094_v52 = vmul.f32 0.5, %v15968_v27 }
 0x7c4   :  { %v8044_v39 = vmul.f32 %v16006_v21, %v7984_v31  ;;  %v16097_v9 = vsel %vm7209_vm10, 1.0, %v16870_v24  ;;  %v16100_v63 = vand.u32 2147483647, %v16073_v3  ;;  %v16103_v12 = vmul.f32 0.70710677, %v16077_v40 }
 0x7c5   :  { %17138 = vst [vmem:[#allocation7_spill] sm:$0xff] %v16088_v22  ;;  %10914 = vpow2.f32 %v8266_v29  ;;  %v7749_v61 = vadd.f32 1.4214138, %v7689_v55  ;;  %v16106_v58 = vmul.f32 0.5, %v16004_v6  ;;  %v8110_v21 = vsub.f32 0.0, %v16029_v59 }
 0x7c6   :  { %v16109_v32 = vpop.eup %10910  ;;  %v8515_v27 = vadd.f32 1.0, %v8455_v5  ;;  %v7865_v36 = vadd.f32 -0.28449672, %v7805_v28  ;;  %10916 = vpow2.f32 %v8274_v35  ;;  %v7395_v0 = vmul.f32 0.3275911, %v16100_v63 }
 0x7c7   :  { %v8340_v19 = vmul.f32 %v10905_v25, %v8040_v57  ;;  %v8344_v43 = vmul.f32 %v10909_v33, %v8044_v39  ;;  %v7809_v31 = vmul.f32 %v16060_v18, %v7749_v61  ;;  %v7570_v56 = vmul.f32 1.0614054, %v16109_v32  ;;  %v17139_v39 = vld [vmem:[#allocation39_spill] sm:$0xff] }
 0x7c8   :  { %vm7210_vm11 = vcmp.ge.f32.partialorder %v16016_v2, 0.0  ;;  %v16116_v6 = vmul.f32 0.5, %v16022_v48  ;;  %v7455_v29 = vadd.f32 1.0, %v7395_v0  ;;  %v16119_v55 = vand.u32 2147483647, %v16103_v12 }
 0x7c9   :  { %v7869_v5 = vadd.f32 -0.28449672, %v7809_v31  ;;  %v7630_v28 = vadd.f32 -1.4531521, %v7570_v56  ;;  %v8170_v35 = vmul.f32 %v8110_v21, %v16029_v59  ;;  %v8114_v25 = vsub.f32 0.0, %v16048_v17 }
 0x7ca   :  { %v7925_v33 = vmul.f32 %v16031_v14, %v7865_v36  ;;  %10918 = vrcp.f32 %v7455_v29  ;;  %v7399_v57 = vmul.f32 0.3275911, %v16119_v55  ;;  %v16127_v61 = vadd.f32 %v17137_v47, %v17139_v39 }
 0x7cb   :  { %v16129_v48 = vpop.eup %10912  ;;  %v8400_v0 = vsub.f32 1.0, %v8340_v19  ;;  %v8404_v16 = vsub.f32 1.0, %v8344_v43  ;;  %v7929_v31 = vmul.f32 %v16060_v18, %v7869_v5  ;;  %v7690_v56 = vmul.f32 %v16109_v32, %v7630_v28 }
 0x7cc   :  { %v16134_v59 = vmul.f32 %v8515_v27, %v15902_v38  ;;  %vm7214_vm13 = vcmp.ge.f32.partialorder %v16039_v41, 0.0  ;;  %v7574_v21 = vmul.f32 1.0614054, %v16129_v48  ;;  %v7459_v36 = vadd.f32 1.0, %v7399_v57 }
 0x7cd   :  { %v7989_v29 = vadd.f32 0.2548296, %v7929_v31  ;;  %v7750_v46 = vadd.f32 1.4214138, %v7690_v56  ;;  %v8276_v39 = vmul.f32 1.442695, %v8170_v35  ;;  %v8174_v22 = vmul.f32 %v8114_v25, %v16048_v17 }
 0x7ce   :  { %v7985_v47 = vadd.f32 0.2548296, %v7925_v33  ;;  %v7634_v19 = vadd.f32 -1.4531521, %v7574_v21  ;;  %10920 = vrcp.f32 %v7459_v36  ;;  %v16140_v43 = vmul.f32 0.70710677, %v16127_v61 }
 0x7cf   :  { %v10915_v5 = vpop.eup %10914  ;;  %v8460_v38 = vmul.f32 %v8400_v0, %v16000_v49  ;;  %v8464_v27 = vmul.f32 %v8404_v16, %v16070_v30  ;;  %v8049_v28 = vmul.f32 %v16060_v18, %v7989_v29  ;;  %v16147_v57 = vadd.f32 %v15517_v1, %v17099_v23 }
 0x7d0   :  { %v10917_v35 = vpop.eup %10916  ;;  %v16152_v17 = vsel %vm7210_vm11, 1.0, %v16870_v24  ;;  %v7810_v25 = vmul.f32 %v16109_v32, %v7750_v46  ;;  %v7694_v33 = vmul.f32 %v16129_v48, %v7634_v19  ;;  %v16157_v49 = vand.u32 2147483647, %v16140_v43 }
 0x7d1   :  { %v8349_v16 = vmul.f32 %v10917_v35, %v8049_v28  ;;  %10922 = vpow2.f32 %v8276_v39  ;;  %v16162_v23 = vsel %vm7214_vm13, 1.0, %v16870_v24  ;;  %v16165_v1 = vmul.f32 0.5, %v16056_v42 }
 0x7d2   :  { %v8045_v2 = vmul.f32 %v16031_v14, %v7985_v47  ;;  %v7754_v18 = vadd.f32 1.4214138, %v7694_v33  ;;  %v8284_v30 = vmul.f32 1.442695, %v8174_v22  ;;  %v7400_v46 = vmul.f32 0.3275911, %v16157_v49 }
 0x7d3   :  { %v8520_v0 = vadd.f32 1.0, %v8460_v38  ;;  %v8524_v31 = vadd.f32 1.0, %v8464_v27  ;;  %v8409_v56 = vsub.f32 1.0, %v8349_v16  ;;  %v16170_v21 = vmul.f32 0.70710677, %v16147_v57  ;;  %v17140_v47 = vld [vmem:[#allocation44_spill] sm:$0xff] }
 0x7d4   :  { %v16172_v36 = vpop.eup %10918  ;;  %v7870_v41 = vadd.f32 -0.28449672, %v7810_v25  ;;  %v7814_v29 = vmul.f32 %v16129_v48, %v7754_v18  ;;  %v8119_v42 = vsub.f32 0.0, %v16119_v55  ;;  %v7460_v39 = vadd.f32 1.0, %v7400_v46 }
 0x7d5   :  { %v8469_v14 = vmul.f32 %v8409_v56, %v16097_v9  ;;  %vm7215_vm14 = vcmp.ge.f32.partialorder %v16073_v3, 0.0  ;;  %v7575_v22 = vmul.f32 1.0614054, %v16172_v36  ;;  %v16181_v19 = vadd.f32 %v17140_v47, %v15549_v13 }
 0x7d6   :  { %v8345_v38 = vmul.f32 %v10915_v5, %v8045_v2  ;;  %v7874_v27 = vadd.f32 -0.28449672, %v7814_v29  ;;  %10924 = vpow2.f32 %v8284_v30  ;;  %v8115_v28 = vsub.f32 0.0, %v16100_v63 }
 0x7d7   :  { %v8529_v35 = vadd.f32 1.0, %v8469_v14  ;;  %v7635_v25 = vadd.f32 -1.4531521, %v7575_v22  ;;  %10926 = vrcp.f32 %v7460_v39  ;;  %v16185_v33 = vand.u32 2147483647, %v16170_v21 }
 0x7d8   :  { %v16187_v9 = vpop.eup %10920  ;;  %v16190_v16 = vmul.f32 %v8524_v31, %v16010_v15  ;;  %v7930_v18 = vmul.f32 %v16109_v32, %v7870_v41  ;;  %v7934_v13 = vmul.f32 %v16129_v48, %v7874_v27  ;;  %v8179_v5 = vmul.f32 %v8119_v42, %v16119_v55 }
 0x7d9   :  { %v16196_v2 = vmul.f32 %v8529_v35, %v16094_v52  ;;  %v7695_v30 = vmul.f32 %v16172_v36, %v7635_v25  ;;  %v7579_v46 = vmul.f32 1.0614054, %v16187_v9  ;;  %v16201_v56 = vmul.f32 0.70710677, %v16181_v19 }
 0x7da   :  { %v8405_v29 = vsub.f32 1.0, %v8345_v38  ;;  %v8175_v15 = vmul.f32 %v8115_v28, %v16100_v63  ;;  %v16205_v31 = vmul.f32 0.5, %v16077_v40  ;;  %v7358_v41 = vmul.f32 0.3275911, %v16185_v33 }
 0x7db   :  { %v10923_v39 = vpop.eup %10922  ;;  %v8625_v52 = vpack.c.bf16 %v16196_v2, %v16190_v16  ;;  %v7994_v55 = vadd.f32 0.2548296, %v7934_v13  ;;  %v7755_v42 = vadd.f32 1.4214138, %v7695_v30  ;;  %v7639_v14 = vadd.f32 -1.4531521, %v7579_v46 }
 0x7dc   :  { %v16211_v22 = vmul.f32 %v8520_v0, %v15993_v4  ;;  %vm7219_vm15 = vcmp.ge.f32.partialorder %v16103_v12, 0.0  ;;  %v8294_v47 = vmul.f32 1.442695, %v8179_v5  ;;  %v7418_v38 = vadd.f32 1.0, %v7358_v41 }
 0x7dd   :  { %v7990_v63 = vadd.f32 0.2548296, %v7930_v18  ;;  %v7699_v40 = vmul.f32 %v16187_v9, %v7639_v14  ;;  %v16216_v27 = vand.u32 2147483647, %v16201_v56  ;;  %v16220_v28 = vadd.f32 %v15584_v11, %v17106_v50  ;;  %v17141_v14 = vld [vmem:[#allocation49_spill] sm:$0xff] }
 0x7de   :  { %v7815_v35 = vmul.f32 %v16172_v36, %v7755_v42  ;;  %v8286_v25 = vmul.f32 1.442695, %v8175_v15  ;;  %v8120_v4 = vsub.f32 0.0, %v16157_v49  ;;  %10928 = vrcp.f32 %v7418_v38 }
 0x7df   :  { %v8465_v0 = vmul.f32 %v8405_v29, %v16084_v44  ;;  %v8054_v13 = vmul.f32 %v16129_v48, %v7994_v55  ;;  %v16229_v18 = vsel %vm7215_vm14, 1.0, %v16870_v24  ;;  %v7759_v5 = vadd.f32 1.4214138, %v7699_v40 }
 0x7e0   :  { %v10925_v30 = vpop.eup %10924  ;;  %v16234_v50 = vsel %vm7219_vm15, 1.0, %v16870_v24  ;;  %10930 = vpow2.f32 %v8294_v47  ;;  %v16237_v11 = vmul.f32 0.5, %v16127_v61  ;;  %v7348_v44 = vmul.f32 0.3275911, %v16216_v27 }
 0x7e1   :  { %v16240_v46 = vpop.eup %10926  ;;  %v8050_v48 = vmul.f32 %v16109_v32, %v7990_v63  ;;  %v7819_v3 = vmul.f32 %v16187_v9, %v7759_v5  ;;  %vm7220_vm0 = vcmp.ge.f32.partialorder %v16140_v43, 0.0  ;;  %v16246_v29 = vmul.f32 0.70710677, %v16220_v28 }
 0x7e2   :  { %v7875_v12 = vadd.f32 -0.28449672, %v7815_v35  ;;  %10932 = vpow2.f32 %v8286_v25  ;;  %v8180_v15 = vmul.f32 %v8120_v4, %v16157_v49  ;;  %v7408_v41 = vadd.f32 1.0, %v7348_v44 }
 0x7e3   :  { %v8525_v61 = vadd.f32 1.0, %v8465_v0  ;;  %v8354_v55 = vmul.f32 %v10925_v30, %v8054_v13  ;;  %v7879_v42 = vadd.f32 -0.28449672, %v7819_v3  ;;  %v16251_v47 = vadd.f32 %v17141_v14, %v15624_v20 }
 0x7e4   :  { %v16254_v32 = vsel %vm7220_vm0, 1.0, %v16870_v24  ;;  %v7580_v43 = vmul.f32 1.0614054, %v16240_v46  ;;  %v16258_v38 = vmul.f32 0.5, %v16147_v57  ;;  %10934 = vrcp.f32 %v7408_v41 }
 0x7e5   :  { %v8350_v63 = vmul.f32 %v10923_v39, %v8050_v48  ;;  %v7939_v49 = vmul.f32 %v16187_v9, %v7879_v42  ;;  %vm7178_vm1 = vcmp.ge.f32.partialorder %v16170_v21, 0.0  ;;  %v16263_v40 = vand.u32 2147483647, %v16246_v29 }
 0x7e6   :  { %v7935_v20 = vmul.f32 %v16172_v36, %v7875_v12  ;;  %v8296_v35 = vmul.f32 1.442695, %v8180_v15  ;;  %v8078_v25 = vsub.f32 0.0, %v16185_v33  ;;  %v16268_v4 = vmul.f32 0.70710677, %v16251_v47 }
 0x7e7   :  { %v16271_v57 = vmul.f32 %v8525_v61, %v16026_v54  ;;  %v8414_v0 = vsub.f32 1.0, %v8354_v55  ;;  %v7999_v39 = vadd.f32 0.2548296, %v7939_v49  ;;  %v7363_v13 = vmul.f32 0.3275911, %v16263_v40 }
 0x7e8   :  { %v16274_v5 = vpop.eup %10928  ;;  %v7640_v21 = vadd.f32 -1.4531521, %v7580_v43  ;;  %v16277_v30 = vsel %vm7178_vm1, 1.0, %v16870_v24  ;;  %v16280_v44 = vand.u32 2147483647, %v16268_v4  ;;  %v8606_v48 = vpack.c.bf16 %v15831_v7, %v15755_v26 }
 0x7e9   :  { %v8410_v3 = vsub.f32 1.0, %v8350_v63  ;;  %v8059_v54 = vmul.f32 %v16187_v9, %v7999_v39  ;;  %v7538_v12 = vmul.f32 1.0614054, %v16274_v5  ;;  %vm7168_vm2 = vcmp.ge.f32.partialorder %v16201_v56, 0.0 }
 0x7ea   :  { %v10931_v15 = vpop.eup %10930  ;;  %v7995_v41 = vadd.f32 0.2548296, %v7935_v20  ;;  %v8138_v61 = vmul.f32 %v8078_v25, %v16185_v33  ;;  %v7423_v55 = vadd.f32 1.0, %v7363_v13  ;;  %v7353_v42 = vmul.f32 0.3275911, %v16280_v44  ;;  %8644 = vmatprep.subr.bf16.mxu1 %v8606_v48 }
 0x7eb   :  { %v8474_v14 = vmul.f32 %v8414_v0, %v16162_v23  ;;  %v8359_v43 = vmul.f32 %v10931_v15, %v8059_v54  ;;  %10936 = vpow2.f32 %v8296_v35  ;;  %v7598_v26 = vadd.f32 -1.4531521, %v7538_v12 }
 0x7ec   :  { %v17142_v7 = vpack.c.bf16 %v15669_v10, %v15666_v53  ;;  %v10933_v9 = vpop.eup %10932  ;;  %v7700_v63 = vmul.f32 %v16240_v46, %v7640_v21  ;;  %v8068_v49 = vsub.f32 0.0, %v16216_v27  ;;  %10938 = vrcp.f32 %v7423_v55 }
 0x7ed   :  { %v7413_v33 = vadd.f32 1.0, %v7353_v42  ;;  %v8419_v20 = vsub.f32 1.0, %v8359_v43  ;;  %v7658_v25 = vmul.f32 %v16274_v5, %v7598_v26  ;;  %v16297_v39 = vmul.f32 0.5, %v16181_v19 }
 0x7ee   :  { %8645 = vmatpush1.bf16.msra.mxu1 %v17142_v7  ;;  %v16302_v23 = vsel %vm7168_vm2, 1.0, %v16870_v24  ;;  %v16304_v53 = vpop.eup %10934  ;;  %v8470_v10 = vmul.f32 %v8410_v3, %v16152_v17  ;;  %v8055_v35 = vmul.f32 %v16172_v36, %v7995_v41  ;;  %v8212_v0 = vmul.f32 1.442695, %v8138_v61 }
 0x7ef   :  { %v16310_v13 = vadd.f32 %v15660_v60, %v14892_v51  ;;  %v8534_v21 = vadd.f32 1.0, %v8474_v14  ;;  %v8479_v19 = vmul.f32 %v8419_v20, %v16234_v50  ;;  %v7718_v48 = vadd.f32 1.4214138, %v7658_v25 }
 0x7f0   :  { %v16315_v56 = vadd.f32 %v14745_v34, %v15682_v45  ;;  %v7760_v54 = vadd.f32 1.4214138, %v7700_v63  ;;  %v7528_v12 = vmul.f32 1.0614054, %v16304_v53  ;;  %v8128_v17 = vmul.f32 %v8068_v49, %v16216_v27 }
 0x7f1   :  { %10940 = vrcp.f32 %v7413_v33  ;;  %v8539_v36 = vadd.f32 1.0, %v8479_v19  ;;  %v7778_v3 = vmul.f32 %v16274_v5, %v7718_v48  ;;  %v8083_v51 = vsub.f32 0.0, %v16263_v40 }
 0x7f2   :  { %v16322_v60 = vmul.f32 0.70710677, %v16310_v13  ;;  %v8530_v50 = vadd.f32 1.0, %v8470_v10  ;;  %v8355_v15 = vmul.f32 %v10933_v9, %v8055_v35  ;;  %10942 = vpow2.f32 %v8212_v0 }
 0x7f3   :  { %v7588_v41 = vadd.f32 -1.4531521, %v7528_v12  ;;  %v16325_v34 = vmul.f32 %v8534_v21, %v16116_v6  ;;  %v16328_v45 = vmul.f32 %v8539_v36, %v16205_v31  ;;  %v7838_v27 = vadd.f32 -0.28449672, %v7778_v3 }
 0x7f4   :  { %v16331_v61 = vmul.f32 0.70710677, %v16315_v56  ;;  %v7820_v55 = vmul.f32 %v16240_v46, %v7760_v54  ;;  %v8073_v14 = vsub.f32 0.0, %v16280_v44  ;;  %v7318_v43 = vand.u32 2147483647, %v16322_v60 }
 0x7f5   :  { %v7648_v42 = vmul.f32 %v16304_v53, %v7588_v41  ;;  %v16337_v26 = vpop.eup %10936  ;;  %v8630_v6 = vpack.c.bf16 %v16328_v45, %v16325_v34  ;;  %v7898_v31 = vmul.f32 %v16274_v5, %v7838_v27  ;;  %v8192_v7 = vmul.f32 1.442695, %v8128_v17 }
 0x7f6   :  { %v8143_v9 = vmul.f32 %v8083_v51, %v16263_v40  ;;  %v16343_v63 = vpop.eup %10938  ;;  %v8415_v49 = vsub.f32 1.0, %v8355_v15  ;;  %v16346_v20 = vmul.f32 0.5, %v16220_v28  ;;  %v7378_v25 = vmul.f32 0.3275911, %v7318_v43  ;;  %v17143_v51 = vld [vmem:[#allocation41_spill] sm:$0xff] }
 0x7f7   :  { %v7708_v33 = vadd.f32 1.4214138, %v7648_v42  ;;  %v16349_v10 = vmul.f32 %v8530_v50, %v16106_v58  ;;  %v7958_v35 = vadd.f32 0.2548296, %v7898_v31  ;;  %v7543_v0 = vmul.f32 1.0614054, %v16343_v63 }
 0x7f8   :  { %v16353_v21 = vand.u32 2147483647, %v16331_v61  ;;  %v7880_v19 = vadd.f32 -0.28449672, %v7820_v55  ;;  %v8133_v48 = vmul.f32 %v8073_v14, %v16280_v44  ;;  %v7438_v54 = vadd.f32 1.0, %v7378_v25 }
 0x7f9   :  { %v7768_v40 = vmul.f32 %v16304_v53, %v7708_v33  ;;  %10944 = vpow2.f32 %v8192_v7  ;;  %v7603_v12 = vadd.f32 -1.4531521, %v7543_v0  ;;  %v8222_v28 = vmul.f32 1.442695, %v8143_v9  ;;  %v17144_v0 = vld [vmem:[#allocation46_spill] sm:$0xff] }
 0x7fa   :  { %v7368_v17 = vmul.f32 0.3275911, %v16353_v21  ;;  %v8018_v58 = vmul.f32 %v16274_v5, %v7958_v35  ;;  %10946 = vrcp.f32 %v7438_v54  ;;  %v16363_v50 = vadd.f32 %v17143_v51, %v17116_v37 }
 0x7fb   :  { %v16358_v36 = vpop.eup %10940  ;;  %v7828_v3 = vadd.f32 -0.28449672, %v7768_v40  ;;  %v8475_v15 = vmul.f32 %v8415_v49, %v16229_v18  ;;  %vm7183_vm3 = vcmp.ge.f32.partialorder %v16246_v29, 0.0  ;;  %v7663_v44 = vmul.f32 %v16343_v63, %v7603_v12 }
 0x7fc   :  { %v7533_v41 = vmul.f32 1.0614054, %v16358_v36  ;;  %v10943_v27 = vpop.eup %10942  ;;  %v7940_v55 = vmul.f32 %v16240_v46, %v7880_v19  ;;  %v8202_v5 = vmul.f32 1.442695, %v8133_v48  ;;  %v7428_v14 = vadd.f32 1.0, %v7368_v17  ;;  %v17145_v19 = vld [vmem:[#allocation25_spill] sm:$0xff] }
 0x7fd   :  { %v7888_v42 = vmul.f32 %v16304_v53, %v7828_v3  ;;  %v7723_v31 = vadd.f32 1.4214138, %v7663_v44  ;;  %10948 = vpow2.f32 %v8222_v28  ;;  %v8098_v37 = vsub.f32 0.0, %v7318_v43 }
 0x7fe   :  { %v7593_v7 = vadd.f32 -1.4531521, %v7533_v41  ;;  %v8318_v9 = vmul.f32 %v10943_v27, %v8018_v58  ;;  %10950 = vrcp.f32 %v7428_v14  ;;  %v16372_v18 = vmul.f32 0.70710677, %v16363_v50 }
 0x7ff   :  { %v7948_v33 = vadd.f32 0.2548296, %v7888_v42  ;;  %v16377_v49 = vsel %vm7183_vm3, 1.0, %v16870_v24  ;;  %v7783_v25 = vmul.f32 %v16343_v63, %v7723_v31  ;;  %v16383_v40 = vadd.f32 %v17145_v19, %v17144_v0  ;;  %v17149_v0 = vld [vmem:[#allocation24_spill] sm:$0xff] }
 0x800   :  { %v7653_v35 = vmul.f32 %v16358_v36, %v7593_v7  ;;  %v8000_v48 = vadd.f32 0.2548296, %v7940_v55  ;;  %v16387_v12 = vmul.f32 0.5, %v16251_v47  ;;  %v16390_v28 = vand.u32 2147483647, %v16372_v18  ;;  %v17146_v55 = vld [vmem:[#allocation15_spill] sm:$0xff] }
 0x801   :  { %v8008_v54 = vmul.f32 %v16304_v53, %v7948_v33  ;;  %v8535_v29 = vadd.f32 1.0, %v8475_v15  ;;  %v7843_v17 = vadd.f32 -0.28449672, %v7783_v25  ;;  %vm7173_vm4 = vcmp.ge.f32.partialorder %v16268_v4, 0.0 }
 0x802   :  { %v7713_v58 = vadd.f32 1.4214138, %v7653_v35  ;;  %v8378_v3 = vsub.f32 1.0, %v8318_v9  ;;  %10952 = vpow2.f32 %v8202_v5  ;;  %v8158_v51 = vmul.f32 %v8098_v37, %v7318_v43  ;;  %v17147_v9 = vld [vmem:[#allocation23_spill] sm:$0xff] }
 0x803   :  { %v7383_v44 = vmul.f32 0.3275911, %v16390_v28  ;;  %v10945_v41 = vpop.eup %10944  ;;  %v7903_v27 = vmul.f32 %v16343_v63, %v7843_v17  ;;  %v16397_v47 = vmul.f32 0.70710677, %v16383_v40  ;;  %v8611_v15 = vpack.c.bf16 %v15973_v8, %v17146_v55 }
 0x804   :  { %v7773_v53 = vmul.f32 %v16358_v36, %v7713_v58  ;;  %v16401_v42 = vpop.eup %10946  ;;  %v8060_v4 = vmul.f32 %v16240_v46, %v8000_v48  ;;  %v8308_v14 = vmul.f32 %v10945_v41, %v8008_v54  ;;  %v7233_v43 = vsel %vm7173_vm4, 1.0, %v16870_v24  ;;  %v17148_v46 = vld [vmem:[#allocation17_spill] sm:$0xff] }
 0x805   :  { %v7443_v5 = vadd.f32 1.0, %v7383_v44  ;;  %v7963_v31 = vadd.f32 0.2548296, %v7903_v27  ;;  %v7558_v37 = vmul.f32 1.0614054, %v16401_v42  ;;  %8646 = vmatprep.subr.bf16.mxu1 %v8611_v15  ;;  %v16408_v33 = vadd.f32 %v17147_v9, %v17132_v62 }
 0x806   :  { %v7833_v7 = vadd.f32 -0.28449672, %v7773_v53  ;;  %v16411_v25 = vmul.f32 %v8535_v29, %v16165_v1  ;;  %v8438_v8 = vmul.f32 %v8378_v3, %v16277_v30  ;;  %v8252_v35 = vmul.f32 1.442695, %v8158_v51 }
 0x807   :  { %10954 = vrcp.f32 %v7443_v5  ;;  %v17150_v19 = vpack.c.bf16 %v17148_v46, %v17149_v0  ;;  %v10949_v48 = vpop.eup %10948  ;;  %v8023_v54 = vmul.f32 %v16343_v63, %v7963_v31  ;;  %v7618_v58 = vadd.f32 -1.4531521, %v7558_v37 }
 0x808   :  { %v7893_v17 = vmul.f32 %v16358_v36, %v7833_v7  ;;  %v16420_v62 = vand.u32 2147483647, %v16397_v47  ;;  %v16422_v44 = vpop.eup %10950  ;;  %v8360_v1 = vmul.f32 %v16337_v26, %v8060_v4  ;;  %v8368_v30 = vsub.f32 1.0, %v8308_v14 }
 0x809   :  { %8647 = vmatpush1.bf16.msra.mxu1 %v17150_v19  ;;  %v16426_v29 = vmul.f32 0.5, %v16310_v13  ;;  %v16429_v3 = vmul.f32 0.70710677, %v16408_v33  ;;  %v8323_v51 = vmul.f32 %v10949_v48, %v8023_v54  ;;  %v7678_v63 = vmul.f32 %v16401_v42, %v7618_v58 }
 0x80a   :  { %v7953_v41 = vadd.f32 0.2548296, %v7893_v17  ;;  %v7548_v27 = vmul.f32 1.0614054, %v16422_v44  ;;  %v8498_v53 = vadd.f32 1.0, %v8438_v8  ;;  %10956 = vpow2.f32 %v8252_v35 }
 0x80b   :  { %v8088_v55 = vsub.f32 0.0, %v16353_v21  ;;  %v7373_v15 = vmul.f32 0.3275911, %v16420_v62  ;;  %v8383_v26 = vsub.f32 1.0, %v8323_v51  ;;  %v7738_v13 = vadd.f32 1.4214138, %v7678_v63 }
 0x80c   :  { %v8013_v4 = vmul.f32 %v16358_v36, %v7953_v41  ;;  %v7608_v14 = vadd.f32 -1.4531521, %v7548_v27  ;;  %v10953_v5 = vpop.eup %10952  ;;  %v8428_v31 = vmul.f32 %v8368_v30, %v16302_v23  ;;  %v8103_v7 = vsub.f32 0.0, %v16390_v28  ;;  %v17151_v63 = vld [vmem:[#allocation45_spill] sm:$0xff]  ;;  %v17152_v27 = vld [vmem:[#allocation3_spill] sm:$0xff] }
 0x80d   :  { %v7433_v37 = vadd.f32 1.0, %v7373_v15  ;;  %v16439_v9 = vand.u32 2147483647, %v16429_v3  ;;  %v8443_v8 = vmul.f32 %v8383_v26, %v16377_v49  ;;  %v7798_v46 = vmul.f32 %v16401_v42, %v7738_v13 }
 0x80e   :  { %v8313_v35 = vmul.f32 %v10953_v5, %v8013_v4  ;;  %v7668_v0 = vmul.f32 %v16422_v44, %v7608_v14  ;;  %v16445_v36 = vmul.f32 %v8498_v53, %v16258_v38  ;;  %v8148_v19 = vmul.f32 %v8088_v55, %v16353_v21 }
 0x80f   :  { %10958 = vrcp.f32 %v7433_v37  ;;  %v7398_v23 = vmul.f32 0.3275911, %v16439_v9  ;;  %v8503_v48 = vadd.f32 1.0, %v8443_v8  ;;  %v7858_v17 = vadd.f32 -0.28449672, %v7798_v46 }
 0x810   :  { %v8373_v54 = vsub.f32 1.0, %v8313_v35  ;;  %v7728_v58 = vadd.f32 1.4214138, %v7668_v0  ;;  %v8488_v49 = vadd.f32 1.0, %v8428_v31  ;;  %v8163_v51 = vmul.f32 %v8103_v7, %v16390_v28 }
 0x811   :  { %v16449_v30 = vpop.eup %10954  ;;  %v7458_v41 = vadd.f32 1.0, %v7398_v23  ;;  %v16454_v15 = vadd.f32 %v17152_v27, %v17151_v63  ;;  %v16457_v38 = vmul.f32 %v8503_v48, %v16346_v20  ;;  %v7918_v53 = vmul.f32 %v16401_v42, %v7858_v17  ;;  %v17153_v48 = vld [vmem:[#allocation5_spill] sm:$0xff] }
 0x812   :  { %v8433_v21 = vmul.f32 %v8373_v54, %v7233_v43  ;;  %v7788_v55 = vmul.f32 %v16422_v44, %v7728_v58  ;;  %v8420_v26 = vsub.f32 1.0, %v8360_v1  ;;  %v8232_v4 = vmul.f32 1.442695, %v8148_v19  ;;  %v17154_v54 = vld [vmem:[#allocation12_spill] sm:$0xff]  ;;  %v17155_v27 = vld [vmem:[#allocation37_spill] sm:$0xff] }
 0x813   :  { %v7563_v13 = vmul.f32 1.0614054, %v16449_v30  ;;  %10960 = vrcp.f32 %v7458_v41  ;;  %v8614_v28 = vpack.c.bf16 %v16457_v38, %v16445_v36  ;;  %v7978_v5 = vadd.f32 0.2548296, %v7918_v53  ;;  %v16687_v36 = vpop.permute.xlu0 %8638 }
 0x814   :  { %v8493_v14 = vadd.f32 1.0, %v8433_v21  ;;  %v7848_v31 = vadd.f32 -0.28449672, %v7788_v55  ;;  %v10957_v7 = vpop.eup %10956  ;;  %vm7198_vm5 = vcmp.ge.f32.partialorder %v16322_v60, 0.0  ;;  %v8093_v43 = vsub.f32 0.0, %v16420_v62  ;;  %v17156_v21 = vld [vmem:[#allocation21_spill] sm:$0xff] }
 0x815   :  { %v7623_v20 = vadd.f32 -1.4531521, %v7563_v13  ;;  %v16467_v37 = vmul.f32 0.70710677, %v16454_v15  ;;  %v16470_v1 = vmul.f32 %v8488_v49, %v16297_v39  ;;  %v8038_v35 = vmul.f32 %v16401_v42, %v7978_v5 }
 0x816   :  { %v16473_v8 = vmul.f32 %v8493_v14, %v16387_v12  ;;  %v8262_v46 = vmul.f32 1.442695, %v8163_v51  ;;  %v8480_v0 = vmul.f32 %v8420_v26, %v16254_v32  ;;  %v16483_v17 = vadd.f32 %v17154_v54, %v17153_v48 }
 0x817   :  { %v7683_v19 = vmul.f32 %v16449_v30, %v7623_v20  ;;  %v16479_v23 = vand.u32 2147483647, %v16467_v37  ;;  %vm7188_vm6 = vcmp.ge.f32.partialorder %v16331_v61, 0.0  ;;  %v7908_v12 = vmul.f32 %v16422_v44, %v7848_v31 }
 0x818   :  { %v8609_v39 = vpack.c.bf16 %v16473_v8, %v16470_v1  ;;  %10962 = vpow2.f32 %v8232_v4  ;;  %v8338_v32 = vmul.f32 %v10957_v7, %v8038_v35  ;;  %v8153_v49 = vmul.f32 %v8093_v43, %v16420_v62 }
 0x819   :  { %v16489_v42 = vpop.eup %10958  ;;  %v7743_v58 = vadd.f32 1.4214138, %v7683_v19  ;;  %v7388_v51 = vmul.f32 0.3275911, %v16479_v23  ;;  %v7258_v41 = vsel %vm7198_vm5, 1.0, %v16870_v24  ;;  %10964 = vpow2.f32 %v8262_v46 }
 0x81a   :  { %v7553_v63 = vmul.f32 1.0614054, %v16489_v42  ;;  %v16499_v53 = vadd.f32 %v17156_v21, %v17155_v27  ;;  %v8540_v55 = vadd.f32 1.0, %v8480_v0  ;;  %v16503_v13 = vmul.f32 0.70710677, %v16483_v17 }
 0x81b   :  { %v7803_v26 = vmul.f32 %v16449_v30, %v7743_v58  ;;  %v7448_v4 = vadd.f32 1.0, %v7388_v51  ;;  %v16508_v62 = vsel %vm7188_vm6, 1.0, %v16870_v24  ;;  %v7968_v60 = vadd.f32 0.2548296, %v7908_v12 }
 0x81c   :  { %vm7203_vm7 = vcmp.ge.f32.partialorder %v16372_v18, 0.0  ;;  %v7613_v14 = vadd.f32 -1.4531521, %v7553_v63  ;;  %v8398_v31 = vsub.f32 1.0, %v8338_v32  ;;  %v8242_v20 = vmul.f32 1.442695, %v8153_v49 }
 0x81d   :  { %v16511_v5 = vpop.eup %10960  ;;  %v7863_v7 = vadd.f32 -0.28449672, %v7803_v26  ;;  %10966 = vrcp.f32 %v7448_v4  ;;  %v8118_v46 = vsub.f32 0.0, %v16439_v9  ;;  %v16517_v61 = vmul.f32 0.70710677, %v16499_v53 }
 0x81e   :  { %v7673_v43 = vmul.f32 %v16489_v42, %v7613_v14  ;;  %v7578_v35 = vmul.f32 1.0614054, %v16511_v5  ;;  %v16520_v0 = vmul.f32 %v8540_v55, %v16237_v11  ;;  %v16523_v19 = vmul.f32 0.5, %v16363_v50 }
 0x81f   :  { %v7923_v48 = vmul.f32 %v16449_v30, %v7863_v7  ;;  %v16527_v54 = vand.u32 2147483647, %v16503_v13  ;;  %v8028_v12 = vmul.f32 %v16422_v44, %v7968_v60  ;;  %v7263_v32 = vsel %vm7203_vm7, 1.0, %v16870_v24  ;;  %v17158_v60 = vld [vmem:[#allocation7_spill] sm:$0xff] }
 0x820   :  { %v7733_v58 = vadd.f32 1.4214138, %v7673_v43  ;;  %v7638_v49 = vadd.f32 -1.4531521, %v7578_v35  ;;  %v8458_v51 = vmul.f32 %v8398_v31, %v7258_v41  ;;  %10968 = vpow2.f32 %v8242_v20  ;;  %v17157_v41 = vld [vmem:[#allocation9_spill] sm:$0xff] }
 0x821   :  { %v7983_v63 = vadd.f32 0.2548296, %v7923_v48  ;;  %v7403_v11 = vmul.f32 0.3275911, %v16527_v54  ;;  %v8178_v55 = vmul.f32 %v8118_v46, %v16439_v9  ;;  %v16538_v44 = vand.u32 2147483647, %v16517_v61 }
 0x822   :  { %v10963_v50 = vpop.eup %10962  ;;  %v7793_v27 = vmul.f32 %v16489_v42, %v7733_v58  ;;  %v7698_v21 = vmul.f32 %v16511_v5, %v7638_v49  ;;  %v8108_v26 = vsub.f32 0.0, %v16479_v23  ;;  %v8616_v14 = vpack.c.bf16 %v17158_v60, %v17157_v41  ;;  %v17159_v49 = vld [vmem:[#allocation33_spill] sm:$0xff] }
 0x823   :  { %v8043_v18 = vmul.f32 %v16449_v30, %v7983_v63  ;;  %v7463_v4 = vadd.f32 1.0, %v7403_v11  ;;  %v10965_v31 = vpop.eup %10964  ;;  %v8328_v7 = vmul.f32 %v10963_v50, %v8028_v12  ;;  %v7393_v35 = vmul.f32 0.3275911, %v16538_v44  ;;  %v17160_v63 = vld [vmem:[#allocation35_spill] sm:$0xff] }
 0x824   :  { %v7853_v20 = vadd.f32 -0.28449672, %v7793_v27  ;;  %v7758_v43 = vadd.f32 1.4214138, %v7698_v21  ;;  %v8518_v48 = vadd.f32 1.0, %v8458_v51  ;;  %vm7193_vm8 = vcmp.ge.f32.partialorder %v16397_v47, 0.0  ;;  %8648 = vmatprep.subr.bf16.mxu1 %v8616_v14 }
 0x825   :  { %v8343_v58 = vmul.f32 %v10965_v31, %v8043_v18  ;;  %10970 = vrcp.f32 %v7463_v4  ;;  %v7453_v46 = vadd.f32 1.0, %v7393_v35  ;;  %v17161_v11 = vpack.c.bf16 %v17159_v49, %v17160_v63  ;;  %v17167_v35 = vld [vmem:[#allocation48_spill] sm:$0xff]  ;;  %v16604_v47 = vld [vmem:[%s16759_s8] sm:$0xf] }
 0x826   :  { %v7913_v9 = vmul.f32 %v16489_v42, %v7853_v20  ;;  %v7818_v30 = vmul.f32 %v16511_v5, %v7758_v43  ;;  %v8621_v12 = vpack.c.bf16 %v16211_v22, %v16134_v59  ;;  %v8292_v27 = vmul.f32 1.442695, %v8178_v55  ;;  %v17162_v22 = vld [vmem:[#allocation50_spill] sm:$0xff]  ;;  %v17163_v20 = vld [vmem:[#allocation47_spill] sm:$0xff] }
 0x827   :  { %8649 = vmatpush1.bf16.msra.mxu1 %v17161_v11  ;;  %v16553_v50 = vpop.eup %10966  ;;  %v8403_v51 = vsub.f32 1.0, %v8343_v58  ;;  %v8168_v21 = vmul.f32 %v8108_v26, %v16479_v23  ;;  %v8626_v18 = vpack.c.bf16 %v16349_v10, %v16271_v57  ;;  %v8388_v4 = vsub.f32 1.0, %v8328_v7  ;;  %v17164_v10 = vld [vmem:[#allocation19_spill] sm:$0xff]  ;;  %v17165_v26 = vld [vmem:[#allocation29_spill] sm:$0xff]  ;;  %v17168_v58 = vld [vmem:[#allocation8_spill] sm:$0xff] }
 0x828   :  { %v7973_v41 = vadd.f32 0.2548296, %v7913_v9  ;;  %v7568_v60 = vmul.f32 1.0614054, %v16553_v50  ;;  %10972 = vrcp.f32 %v7453_v46  ;;  %8650 = vmatprep.subr.bf16.mxu1 %v8621_v12  ;;  %v7878_v31 = vadd.f32 -0.28449672, %v7818_v30 }
 0x829   :  { %v8463_v14 = vmul.f32 %v8403_v51, %v7263_v32  ;;  %v8631_v59 = vpack.c.bf16 %v16520_v0, %v16411_v25  ;;  %v8608_v43 = vpack.c.bf16 %v17163_v20, %v17162_v22  ;;  %v16564_v55 = vmul.f32 %v8518_v48, %v16426_v29  ;;  %v17169_v0 = vld [vmem:[#allocation16_spill] sm:$0xff]  ;;  %v17175_v20 = vld [vmem:[#allocation43_spill] sm:$0xff] }
 0x82a   :  { %v8033_v23 = vmul.f32 %v16489_v42, %v7973_v41  ;;  %v7628_v57 = vadd.f32 -1.4531521, %v7568_v60  ;;  %v17166_v7 = vpack.c.bf16 %v17164_v10, %v17165_v26  ;;  %v8613_v32 = vpack.c.bf16 %v17168_v58, %v17167_v35  ;;  %v10969_v9 = vpop.eup %10968  ;;  %v17170_v46 = vld [vmem:[#allocation40_spill] sm:$0xff]  ;;  %v17174_v41 = vld [vmem:[#allocation10_spill] sm:$0xff] }
 0x82b   :  { %v8523_v30 = vadd.f32 1.0, %v8463_v14  ;;  %v8123_v25 = vsub.f32 0.0, %v16527_v54  ;;  %v8618_v49 = vpack.c.bf16 %v17170_v46, %v17169_v0  ;;  %v17171_v29 = vld [vmem:[#allocation28_spill] sm:$0xff]  ;;  %v8448_v42 = vmul.f32 %v8388_v4, %v16508_v62  ;;  %v17176_v10 = vld [vmem:[#allocation42_spill] sm:$0xff] }
 0x82c   :  { %8651 = vmatpush1.bf16.msra.mxu1 %v17166_v7  ;;  %v17172_v48 = vld [vmem:[#allocation36_spill] sm:$0xff]  ;;  %v8333_v11 = vmul.f32 %v10969_v9, %v8033_v23  ;;  %v7688_v12 = vmul.f32 %v16553_v50, %v7628_v57  ;;  %v7938_v14 = vmul.f32 %v16511_v5, %v7878_v31  ;;  %v8633_v26 = vpack.c.bf16 %v17176_v10, %v17175_v20 }
 0x82d   :  { %8652 = vmatprep.subr.bf16.mxu1 %v8626_v18  ;;  %v8623_v63 = vpack.c.bf16 %v17172_v48, %v17171_v29  ;;  %v17173_v51 = vld [vmem:[#allocation4_spill] sm:$0xff]  ;;  %v16582_v22 = vmul.f32 %v8523_v30, %v16523_v19  ;;  %v8113_v18 = vsub.f32 0.0, %v16538_v44  ;;  %v8272_v58 = vmul.f32 1.442695, %v8168_v21 }
 0x82e   :  { %v8628_v60 = vpack.c.bf16 %v17174_v41, %v17173_v51  ;;  %v8393_v7 = vsub.f32 1.0, %v8333_v11  ;;  %v7748_v35 = vadd.f32 1.4214138, %v7688_v12  ;;  %v7253_v19 = vsel %vm7193_vm8, 1.0, %v16870_v24 }
 0x82f   :  { %v10971_v62 = vpop.eup %10970  ;;  %v8624_v4 = vpack.c.bf16 %v16582_v22, %v16564_v55  ;;  %10974 = vpow2.f32 %v8292_v27  ;;  %v8183_v31 = vmul.f32 %v8123_v25, %v16527_v54  ;;  %v8508_v23 = vadd.f32 1.0, %v8448_v42 }
 0x830   :  { %8653 = vmatpush1.bf16.msra.mxu1 %v8625_v52  ;;  %v8453_v57 = vmul.f32 %v8393_v7, %v7253_v19  ;;  %v7808_v21 = vmul.f32 %v16553_v50, %v7748_v35  ;;  %v7583_v9 = vmul.f32 1.0614054, %v10971_v62  ;;  %v7068_v16 = vmul.f32 0.5, %v16315_v56  ;;  %v17178_v35 = vld [vmem:[#allocation18_spill] sm:$0xff] }
 0x831   :  { %8654 = vmatprep.subr.bf16.mxu1 %v8631_v59  ;;  %v7073_v2 = vmul.f32 0.5, %v16383_v40  ;;  %v7998_v52 = vadd.f32 0.2548296, %v7938_v14  ;;  %v8173_v30 = vmul.f32 %v8113_v18, %v16538_v44  ;;  %10976 = vpow2.f32 %v8272_v58 }
 0x832   :  { %v10973_v27 = vpop.eup %10972  ;;  %v8513_v54 = vadd.f32 1.0, %v8453_v57  ;;  %v7868_v59 = vadd.f32 -0.28449672, %v7808_v21  ;;  %v7643_v25 = vadd.f32 -1.4531521, %v7583_v9  ;;  %v16609_v40 = vmul.f32 %v8508_v23, %v7068_v16 }
 0x833   :  { %v8302_v56 = vmul.f32 1.442695, %v8183_v31  ;;  %v7573_v42 = vmul.f32 1.0614054, %v10973_v27  ;;  %v8282_v18 = vmul.f32 1.442695, %v8173_v30  ;;  %v8058_v34 = vmul.f32 %v16511_v5, %v7998_v52 }
 0x834   :  { %8655 = vmatpush1.bf16.msra.mxu1 %v8630_v6  ;;  %v16611_v44 = vmul.f32 %v8513_v54, %v7073_v2  ;;  %v7928_v11 = vmul.f32 %v16553_v50, %v7868_v59  ;;  %v7703_v12 = vmul.f32 %v10971_v62, %v7643_v25  ;;  %v17180_v19 = vmov 0   ;;  %v17181_v5 = vld [vmem:[#allocation14_spill] sm:$0xff]  ;;  %v17182_v52 = vld [vmem:[#allocation13_spill] sm:$0xff] }
 0x835   :  { %8685 = vmatprep.subr.bf16.mxu1 %v8608_v43  ;;  %v7633_v14 = vadd.f32 -1.4531521, %v7573_v42  ;;  %v17177_v43 = vld [vmem:[#allocation11_spill] sm:$0xff]  ;;  %10978 = vpow2.f32 %v8302_v56  ;;  %v17183_v30 = vpack.c.bf16 %v17181_v5, %v17182_v52  ;;  %vm7218_vm10 = vcmp.ge.f32.partialorder %v16429_v3, 0.0 }
 0x836   :  { %v8619_v7 = vpack.c.bf16 %v16611_v44, %v16609_v40  ;;  %v7988_v45 = vadd.f32 0.2548296, %v7928_v11  ;;  %v7763_v6 = vadd.f32 1.4214138, %v7703_v12  ;;  %v17179_v58 = vpack.c.bf16 %v17177_v43, %v17178_v35  ;;  %v17184_v11 = vld [vmem:[#allocation31_spill] sm:$0xff]  ;;  %v17185_v12 = vld [vmem:[#allocation32_spill] sm:$0xff] }
 0x837   :  { %9362 = vmatmul.mubr.msk.bf16.vlgmr.msra.gmra.mrb[92].mxu1 %vm3056_vm9, %v16604_v47  ;;  %v7693_v31 = vmul.f32 %v10973_v27, %v7633_v14  ;;  %10980 = vpow2.f32 %v8282_v18  ;;  %v17186_v14 = vpack.c.bf16 %v17184_v11, %v17185_v12  ;;  %v7278_v46 = vsel %vm7218_vm10, 1.0, %v16870_v24  ;;  %v17187_v43 = vld [vmem:[#allocation27_spill] sm:$0xff]  ;;  %v17188_v35 = vld [vmem:[#allocation34_spill] sm:$0xff] }
 0x838   :  { %8686 = vmatpush1.bf16.msra.mxu1 %v17179_v58  ;;  %8717 = vmatprep.mubr.bf16.mxu1 %v17180_v19  ;;  %v7823_v23 = vmul.f32 %v10971_v62, %v7763_v6  ;;  %v8048_v21 = vmul.f32 %v16553_v50, %v7988_v45  ;;  %vm7208_vm11 = vcmp.ge.f32.partialorder %v16467_v37, 0.0  ;;  %vm7223_vm13 = vcmp.ge.f32.partialorder %v16503_v13, 0.0 }
 0x839   :  { %8687 = vmatprep.subr.bf16.mxu1 %v8613_v32  ;;  %v10975_v57 = vpop.eup %10974  ;;  %v7753_v9 = vadd.f32 1.4214138, %v7693_v31  ;;  %v17189_v58 = vpack.c.bf16 %v17187_v43, %v17188_v35  ;;  %v7268_v48 = vsel %vm7208_vm11, 1.0, %v16870_v24  ;;  %vm7213_vm14 = vcmp.ge.f32.partialorder %v16517_v61, 0.0 }
 0x83a   :  { %v8358_v16 = vmul.f32 %v10975_v57, %v8058_v34  ;;  %v7883_v2 = vadd.f32 -0.28449672, %v7823_v23  ;;  %v17190_v57 = vld [vmem:[#allocation6_spill] sm:$0xff]  ;;  %v7098_v51 = vmul.f32 0.5, %v16408_v33  ;;  %v7103_v41 = vmul.f32 0.5, %v16483_v17 }
 0x83b   :  { %v7813_v54 = vmul.f32 %v10973_v27, %v7753_v9  ;;  %v10977_v59 = vpop.eup %10976  ;;  %v7093_v20 = vmul.f32 0.5, %v16499_v53 }
 0x83c   :  { %8688 = vmatpush1.bf16.msra.mxu1 %v17183_v30  ;;  %v7943_v25 = vmul.f32 %v10971_v62, %v7883_v2  ;;  %v8348_v32 = vmul.f32 %v10977_v59, %v8048_v21  ;;  %v8418_v50 = vsub.f32 1.0, %v8358_v16  ;;  %v17191_v21 = vld [vmem:[#allocation26_spill] sm:$0xff]  ;;  %v7273_v16 = vsel %vm7213_vm14, 1.0, %v16870_v24 }
 0x83d   :  { %8689 = vmatprep.subr.bf16.mxu1 %v8618_v49  ;;  %v7873_v56 = vadd.f32 -0.28449672, %v7813_v54  ;;  %v17192_v9 = vpack.c.bf16 %v17190_v57, %v17191_v21  ;;  %v17193_v30 = vld [vmem:[#allocation38_spill] sm:$0xff] }
 0x83e   :  { %v8003_v42 = vadd.f32 0.2548296, %v7943_v25  ;;  %v8408_v49 = vsub.f32 1.0, %v8348_v32  ;;  %v8478_v3 = vmul.f32 %v8418_v50, %v7278_v46  ;;  %v17194_v54 = vld [vmem:[#allocation22_spill] sm:$0xff]  ;;  %v7088_v25 = vmul.f32 0.5, %v16454_v15 }
 0x83f   :  { %v7933_v18 = vmul.f32 %v10973_v27, %v7873_v56  ;;  %v10979_v0 = vpop.eup %10978  ;;  %v17195_v59 = vpack.c.bf16 %v17193_v30, %v17194_v54 }
 0x840   :  { %8690 = vmatpush1.bf16.msra.mxu1 %v17186_v14  ;;  %v8063_v34 = vmul.f32 %v10971_v62, %v8003_v42  ;;  %v8468_v37 = vmul.f32 %v8408_v49, %v7268_v48  ;;  %v7283_v62 = vsel %vm7223_vm13, 1.0, %v16870_v24  ;;  %v8538_v31 = vadd.f32 1.0, %v8478_v3 }
 0x841   :  { %8691 = vmatprep.subr.bf16.mxu1 %v8623_v63  ;;  %v7993_v45 = vadd.f32 0.2548296, %v7933_v18  ;;  %v10981_v29 = vpop.eup %10980 }
 0x842   :  { %v8363_v6 = vmul.f32 %v10979_v0, %v8063_v34  ;;  %v8528_v61 = vadd.f32 1.0, %v8468_v37  ;;  %v8598_v5 = vmul.f32 %v8538_v31, %v7098_v51 }
 0x843   :  { %v8053_v19 = vmul.f32 %v10973_v27, %v7993_v45 }
 0x844   :  { %8692 = vmatpush1.bf16.msra.mxu1 %v17189_v58  ;;  %v8423_v63 = vsub.f32 1.0, %v8363_v6  ;;  %v8588_v17 = vmul.f32 %v8528_v61, %v7088_v25 }
 0x845   :  { %8693 = vmatprep.subr.bf16.mxu1 %v8628_v60  ;;  %v8353_v13 = vmul.f32 %v10981_v29, %v8053_v19 }
 0x846   :  { %v8483_v23 = vmul.f32 %v8423_v63, %v7283_v62 }
 0x847   :  { %v8413_v27 = vsub.f32 1.0, %v8353_v13 }
 0x848   :  { %8694 = vmatpush1.bf16.msra.mxu1 %v17192_v9  ;;  %v8543_v60 = vadd.f32 1.0, %v8483_v23 }
 0x849   :  { %8695 = vmatprep.subr.bf16.mxu1 %v8633_v26  ;;  %v8473_v2 = vmul.f32 %v8413_v27, %v7273_v16  ;;  %v17196_v26 = vmov 0.0  }
 0x84a   :  { %v8603_v52 = vmul.f32 %v8543_v60, %v7103_v41 }
 0x84b   :  { %v8533_v10 = vadd.f32 1.0, %v8473_v2 }
 0x84c   :  { %8696 = vmatpush1.bf16.msra.mxu1 %v17195_v59  ;;  %v8634_v33 = vpack.c.bf16 %v8603_v52, %v8598_v5 }
 0x84d   :  { %9669 = vmatprep.subr.bf16.mxu1 %v17196_v26  ;;  %v8593_v32 = vmul.f32 %v8533_v10, %v7093_v20 }
 0x84f   :  { %9363 = vmatmul.mubr.msk.bf16.vlgmr.msra.gmra.mrb[96].mxu1 %vm3056_vm9, %v16604_v47  ;;  %v8629_v56 = vpack.c.bf16 %v8593_v32, %v8588_v17 }
 0x850   :  { %9670 = vmatpush3.bf16.msra.mxu1 %v8609_v39  ;;  %9681 = vmatprep.mubr.msk.bf16.mxu1 %vm11006_vm12, %v17196_v26 }
 0x851   :  { %9671 = vmatprep.subr.bf16.mxu1 %v17196_v26 }
 0x854   :  { %9672 = vmatpush3.bf16.msra.mxu1 %v8614_v28 }
 0x855   :  { %9673 = vmatprep.subr.bf16.mxu1 %v17196_v26 }
 0x858   :  { %9674 = vmatpush3.bf16.msra.mxu1 %v8619_v7 }
 0x859   :  { %9675 = vmatprep.subr.bf16.mxu1 %v17196_v26 }
 0x85c   :  { %9676 = vmatpush3.bf16.msra.mxu1 %v8624_v4 }
 0x85d   :  { %9677 = vmatprep.subr.bf16.mxu1 %v17196_v26 }
 0x860   :  { %9678 = vmatpush3.bf16.msra.mxu1 %v8629_v56 }
 0x861   :  { %9679 = vmatprep.subr.bf16.mxu1 %v17196_v26 }
 0x864   :  { %9680 = vmatpush3.bf16.msra.mxu1 %v8634_v33 }
 0x867   :  { %9682 = vmatmul.mubr.msk.bf16.vlgmr.msra.gmra.mrb[100].mxu1 %vm3056_vm9, %v16604_v47 }
 0x90a   :  { %v8678_v15 = vpop.f32.mrb[92].mxu1 }
 0x90b   :  { %v16690_v38 = vadd.f32 %v8678_v15, %v16687_v36  ;;  %v8680_v28 = vpop.f32.mrb[93].mxu1 }
 0x90c   :  { %v16693_v1 = vadd.f32 %v8680_v28, %v16687_v36  ;;  %v8682_v8 = vpop.f32.mrb[94].mxu1 }
 0x90d   :  { %v16696_v39 = vmul.f32 0.70710677, %v16690_v38  ;;  %v8683_v53 = vpop.f32.mrb[95].mxu1 }
 0x90e   :  { %v16699_v55 = vmul.f32 0.70710677, %v16693_v1 }
 0x90f   :  { %v8786_v22 = vand.u32 2147483647, %v16696_v39  ;;  %vm8776_vm9 = vcmp.ge.f32.partialorder %v16696_v39, 0.0 }
 0x910   :  { %v8787_v4 = vand.u32 2147483647, %v16699_v55  ;;  %vm8777_vm12 = vcmp.ge.f32.partialorder %v16699_v55, 0.0  ;;  %v8781_v56 = vsel %vm8776_vm9, 1.0, %v16870_v24  ;;  %v8767_v55 = vmul.f32 0.5, %v16693_v1 }
 0x911   :  { %v8791_v47 = vmul.f32 0.3275911, %v8786_v22  ;;  %v8851_v50 = vsub.f32 0.0, %v8786_v22  ;;  %v8782_v8 = vsel %vm8777_vm12, 1.0, %v16870_v24 }
 0x912   :  { %v8792_v40 = vmul.f32 0.3275911, %v8787_v4  ;;  %v8852_v42 = vsub.f32 0.0, %v8787_v4 }
 0x913   :  { %v8796_v44 = vadd.f32 1.0, %v8791_v47  ;;  %v8856_v12 = vmul.f32 %v8851_v50, %v8786_v22 }
 0x914   :  { %v8797_v7 = vadd.f32 1.0, %v8792_v40  ;;  %v8857_v34 = vmul.f32 %v8852_v42, %v8787_v4  ;;  %v8766_v40 = vmul.f32 0.5, %v16690_v38 }
 0x915   :  { %10982 = vrcp.f32 %v8796_v44  ;;  %v8861_v45 = vmul.f32 1.442695, %v8856_v12 }
 0x916   :  { %10984 = vrcp.f32 %v8797_v7  ;;  %v8863_v58 = vmul.f32 1.442695, %v8857_v34 }
 0x917   :  { %10986 = vpow2.f32 %v8861_v45 }
 0x918   :  { %10988 = vpow2.f32 %v8863_v58 }
 0x91f   :  { %v10983_v11 = vpop.eup %10982 }
 0x920   :  { %v10985_v14 = vpop.eup %10984  ;;  %v8806_v18 = vmul.f32 1.0614054, %v10983_v11 }
 0x921   :  { %v8807_v0 = vmul.f32 1.0614054, %v10985_v14  ;;  %v10987_v59 = vpop.eup %10986 }
 0x922   :  { %v8811_v46 = vadd.f32 -1.4531521, %v8806_v18  ;;  %v8719_v49 = vpop.f32.mrb[96].mxu1  ;;  %v10989_v20 = vpop.eup %10988 }
 0x923   :  { %v8812_v3 = vadd.f32 -1.4531521, %v8807_v0  ;;  %v16704_v6 = vadd.f32 %v8719_v49, %v16687_v36  ;;  %v8721_v43 = vpop.f32.mrb[97].mxu1 }
 0x924   :  { %v8816_v35 = vmul.f32 %v10983_v11, %v8811_v46  ;;  %v16707_v19 = vadd.f32 %v8721_v43, %v16687_v36  ;;  %v8723_v29 = vpop.f32.mrb[98].mxu1 }
 0x925   :  { %v8817_v48 = vmul.f32 %v10985_v14, %v8812_v3  ;;  %v16710_v63 = vmul.f32 0.70710677, %v16704_v6  ;;  %v8724_v37 = vpop.f32.mrb[99].mxu1 }
 0x926   :  { %v8821_v62 = vadd.f32 1.4214138, %v8816_v35  ;;  %v16713_v13 = vmul.f32 0.70710677, %v16707_v19 }
 0x927   :  { %v8822_v31 = vadd.f32 1.4214138, %v8817_v48  ;;  %v8788_v23 = vand.u32 2147483647, %v16710_v63  ;;  %vm8778_vm15 = vcmp.ge.f32.partialorder %v16710_v63, 0.0  ;;  %v8769_v63 = vmul.f32 0.5, %v16707_v19 }
 0x928   :  { %v8826_v57 = vmul.f32 %v10983_v11, %v8821_v62  ;;  %v8789_v21 = vand.u32 2147483647, %v16713_v13  ;;  %vm8779_vm0 = vcmp.ge.f32.partialorder %v16713_v13, 0.0 }
 0x929   :  { %v8827_v9 = vmul.f32 %v10985_v14, %v8822_v31  ;;  %v8793_v27 = vmul.f32 0.3275911, %v8788_v23  ;;  %v8853_v33 = vsub.f32 0.0, %v8788_v23 }
 0x92a   :  { %v8831_v51 = vadd.f32 -0.28449672, %v8826_v57  ;;  %v8794_v41 = vmul.f32 0.3275911, %v8789_v21  ;;  %v8854_v32 = vsub.f32 0.0, %v8789_v21 }
 0x92b   :  { %v8832_v60 = vadd.f32 -0.28449672, %v8827_v9  ;;  %v8798_v16 = vadd.f32 1.0, %v8793_v27  ;;  %v8858_v4 = vmul.f32 %v8853_v33, %v8788_v23 }
 0x92c   :  { %v8836_v61 = vmul.f32 %v10983_v11, %v8831_v51  ;;  %v8799_v2 = vadd.f32 1.0, %v8794_v41  ;;  %v8859_v7 = vmul.f32 %v8854_v32, %v8789_v21 }
 0x92d   :  { %v8837_v5 = vmul.f32 %v10985_v14, %v8832_v60  ;;  %10990 = vrcp.f32 %v8798_v16  ;;  %v8865_v34 = vmul.f32 1.442695, %v8858_v4 }
 0x92e   :  { %v8841_v52 = vadd.f32 0.2548296, %v8836_v61  ;;  %10992 = vrcp.f32 %v8799_v2  ;;  %v8867_v45 = vmul.f32 1.442695, %v8859_v7 }
 0x92f   :  { %v8842_v30 = vadd.f32 0.2548296, %v8837_v5  ;;  %10994 = vpow2.f32 %v8865_v34 }
 0x930   :  { %v8846_v54 = vmul.f32 %v10983_v11, %v8841_v52  ;;  %10996 = vpow2.f32 %v8867_v45 }
 0x931   :  { %v8847_v25 = vmul.f32 %v10985_v14, %v8842_v30 }
 0x932   :  { %v8871_v10 = vmul.f32 %v10987_v59, %v8846_v54  ;;  %v8783_v54 = vsel %vm8778_vm15, 1.0, %v16870_v24 }
 0x933   :  { %v8872_v26 = vmul.f32 %v10989_v20, %v8847_v25  ;;  %v8784_v20 = vsel %vm8779_vm0, 1.0, %v16870_v24 }
 0x934   :  { %v8876_v17 = vsub.f32 1.0, %v8871_v10 }
 0x935   :  { %v8877_v15 = vsub.f32 1.0, %v8872_v26 }
 0x936   :  { %v8881_v28 = vmul.f32 %v8876_v17, %v8781_v56  ;;  %v8768_v17 = vmul.f32 0.5, %v16704_v6 }
 0x937   :  { %v10991_v53 = vpop.eup %10990  ;;  %v8882_v22 = vmul.f32 %v8877_v15, %v8782_v8 }
 0x938   :  { %v10993_v47 = vpop.eup %10992  ;;  %v8886_v39 = vadd.f32 1.0, %v8881_v28  ;;  %v8808_v44 = vmul.f32 1.0614054, %v10991_v53 }
 0x939   :  { %v8887_v50 = vadd.f32 1.0, %v8882_v22  ;;  %v8809_v42 = vmul.f32 1.0614054, %v10993_v47  ;;  %v10995_v60 = vpop.eup %10994 }
 0x93a   :  { %v8891_v11 = vmul.f32 %v8886_v39, %v8766_v40  ;;  %v8813_v12 = vadd.f32 -1.4531521, %v8808_v44  ;;  %v8760_v14 = vpop.f32.mrb[100].mxu1  ;;  %v10997_v61 = vpop.eup %10996 }
 0x93b   :  { %v8892_v18 = vmul.f32 %v8887_v50, %v8767_v55  ;;  %v8814_v0 = vadd.f32 -1.4531521, %v8809_v42  ;;  %v16724_v46 = vadd.f32 %v8760_v14, %v16687_v36  ;;  %v9683_v49 = vpop.f32.mrb[101].mxu1 }
 0x93c   :  { %8896 = vst [vmem:[%s16760_s10] sm:$0xff] %v8891_v11  ;;  %v8818_v38 = vmul.f32 %v10991_v53, %v8813_v12  ;;  %v8763_v3 = vpop.f32.mrb[102].mxu1 }
 0x93d   :  { %8897 = vst [vmem:[%s16760_s10 + $0x8] sm:$0xff] %v8892_v18  ;;  %v8819_v1 = vmul.f32 %v10993_v47, %v8814_v0  ;;  %v8775_v43 = vmul.f32 0.70710677, %v16724_v46  ;;  %v9684_v35 = vpop.f32.mrb[103].mxu1  ;;  %v8770_v11 = vmul.f32 0.5, %v16724_v46 }
 0x93e   :  { %v8823_v58 = vadd.f32 1.4214138, %v8818_v38 }
 0x93f   :  { %v8824_v36 = vadd.f32 1.4214138, %v8819_v1  ;;  %v8790_v29 = vand.u32 2147483647, %v8775_v43  ;;  %vm8780_vm1 = vcmp.ge.f32.partialorder %v8775_v43, 0.0 }
 0x940   :  { %v8828_v48 = vmul.f32 %v10991_v53, %v8823_v58  ;;  %v8785_v50 = vsel %vm8780_vm1, 1.0, %v16870_v24 }
 0x941   :  { %v8829_v37 = vmul.f32 %v10993_v47, %v8824_v36  ;;  %v8795_v62 = vmul.f32 0.3275911, %v8790_v29  ;;  %v8855_v52 = vsub.f32 0.0, %v8790_v29 }
 0x942   :  { %v8833_v31 = vadd.f32 -0.28449672, %v8828_v48 }
 0x943   :  { %v8834_v23 = vadd.f32 -0.28449672, %v8829_v37  ;;  %v8800_v57 = vadd.f32 1.0, %v8795_v62  ;;  %v8860_v33 = vmul.f32 %v8855_v52, %v8790_v29 }
 0x944   :  { %v8838_v21 = vmul.f32 %v10991_v53, %v8833_v31 }
 0x945   :  { %v8839_v9 = vmul.f32 %v10993_v47, %v8834_v23  ;;  %10998 = vrcp.f32 %v8800_v57 }
 0x946   :  { %v8843_v27 = vadd.f32 0.2548296, %v8838_v21 }
 0x947   :  { %v8844_v51 = vadd.f32 0.2548296, %v8839_v9 }
 0x948   :  { %v8848_v41 = vmul.f32 %v10991_v53, %v8843_v27  ;;  %v8869_v53 = vmul.f32 1.442695, %v8860_v33 }
 0x949   :  { %v8849_v16 = vmul.f32 %v10993_v47, %v8844_v51 }
 0x94a   :  { %v8873_v2 = vmul.f32 %v10995_v60, %v8848_v41  ;;  %11000 = vpow2.f32 %v8869_v53 }
 0x94b   :  { %v8874_v5 = vmul.f32 %v10997_v61, %v8849_v16 }
 0x94c   :  { %v8878_v30 = vsub.f32 1.0, %v8873_v2 }
 0x94d   :  { %v8879_v59 = vsub.f32 1.0, %v8874_v5 }
 0x94e   :  { %v8883_v25 = vmul.f32 %v8878_v30, %v8783_v54 }
 0x94f   :  { %v10999_v10 = vpop.eup %10998  ;;  %v8884_v26 = vmul.f32 %v8879_v59, %v8784_v20 }
 0x950   :  { %v8888_v32 = vadd.f32 1.0, %v8883_v25  ;;  %v8810_v56 = vmul.f32 1.0614054, %v10999_v10 }
 0x951   :  { %v8889_v15 = vadd.f32 1.0, %v8884_v26 }
 0x952   :  { %v8893_v13 = vmul.f32 %v8888_v32, %v8768_v17  ;;  %v8815_v28 = vadd.f32 -1.4531521, %v8810_v56 }
 0x953   :  { %v8894_v8 = vmul.f32 %v8889_v15, %v8769_v63 }
 0x954   :  { %8898 = vst [vmem:[%s16760_s10 + $0x10] sm:$0xff] %v8893_v13  ;;  %v8820_v22 = vmul.f32 %v10999_v10, %v8815_v28  ;;  %v11001_v44 = vpop.eup %11000 }
 0x955   :  { %8899 = vst [vmem:[%s16760_s10 + $0x18] sm:$0xff] %v8894_v8 }
 0x956   :  { %v8825_v4 = vadd.f32 1.4214138, %v8820_v22 }
 0x958   :  { %v8830_v6 = vmul.f32 %v10999_v10, %v8825_v4 }
 0x95a   :  { %v8835_v47 = vadd.f32 -0.28449672, %v8830_v6 }
 0x95c   :  { %v8840_v40 = vmul.f32 %v10999_v10, %v8835_v47 }
 0x95e   :  { %v8845_v19 = vadd.f32 0.2548296, %v8840_v40 }
 0x960   :  { %v8850_v39 = vmul.f32 %v10999_v10, %v8845_v19 }
 0x962   :  { %v8875_v7 = vmul.f32 %v11001_v44, %v8850_v39 }
 0x964   :  { %v8880_v55 = vsub.f32 1.0, %v8875_v7 }
 0x966   :  { %v8885_v42 = vmul.f32 %v8880_v55, %v8785_v50 }
 0x968   :  { %v8890_v12 = vadd.f32 1.0, %v8885_v42 }
 0x96a   :  { %v8895_v14 = vmul.f32 %v8890_v12, %v8770_v11 }
 0x96c   :  { %8900 = vst [vmem:[%s16760_s10 + $0x20] sm:$0xff] %v8895_v14 }

</bundles_post_ra>
